<compile_context>
chip_gen: v7x
topology: tpu7x:2x2x1
jax: 0.10.0
libtpu: 0.0.40
codegen_flags: <defaults>
</compile_context>

<pallas_src>
import math

import jax
import jax.numpy as jnp
from jax.experimental import pallas as pl
from jax.experimental.pallas import tpu as pltpu

F32 = jnp.float32

# ---------------- small-model config (keeps structure of the module) --------
VOCAB = 100
MAX_POS = 16
BERT_HIDDEN = 32          # self.bert.config.hidden_size
BERT_HEADS = 2
BERT_DH = BERT_HIDDEN // BERT_HEADS
BERT_FFN = 64
BERT_LAYERS = 2
LSTM_HIDDEN = 32          # hidden_dim
LSTM_LAYERS = 3           # lstm_layers
NUM_CLASSES = 3
B, T = 2, 8
BT = B * T


def _full_spec(shape):
    nd = len(shape)
    return pl.BlockSpec(shape, lambda i, _nd=nd: (0,) * _nd)


_ARBITRARY_1D = pltpu.CompilerParams(dimension_semantics=("arbitrary",))


# ===================== fused BERT encoder kernel =============================
def _bert_encoder_kernel(emb_ref, bias_ref, eg_ref, eb_ref,
                         wqkv_ref, bqkv_ref, wo_ref, bo_ref,
                         ln1g_ref, ln1b_ref, w1_ref, b1_ref,
                         w2_ref, b2_ref, ln2g_ref, ln2b_ref,
                         o_ref):
    H = BERT_HIDDEN
    DH = BERT_DH
    scale = 1.0 / math.sqrt(DH)

    def ln(x, g, b):
        mu = jnp.mean(x, axis=-1, keepdims=True)
        var = jnp.mean((x - mu) ** 2, axis=-1, keepdims=True)
        return (x - mu) * jax.lax.rsqrt(var + 1e-12) * g + b

    x = ln(emb_ref[...], eg_ref[...], eb_ref[...])          # (BT, H)
    bias = bias_ref[...]                                    # (BT, BT) additive bias
    # dropout -> identity (eval)

    for l in range(BERT_LAYERS):
        wqkv = wqkv_ref[l]                                  # (H, 3H)
        wo_l = wo_ref[l]                                    # (H, H)
        # Fused QKV projection: one (BT, H) x (H, 3H) matmul.
        qkv = (jnp.dot(x, wqkv, preferred_element_type=jnp.float32)
               + bqkv_ref[l])                               # (BT, 3H)

        attn = jnp.zeros((BT, H), F32)
        # Head split via static lane slices; output projection decomposed per
        # head so no concat/transpose is ever materialized in the kernel.
        for h in range(BERT_HEADS):
            q = qkv[:, h * DH:(h + 1) * DH]                 # (BT, DH)
            k = qkv[:, H + h * DH:H + (h + 1) * DH]         # (BT, DH)
            v = qkv[:, 2 * H + h * DH:2 * H + (h + 1) * DH]
            # s[i, j] = <q_i, k_j>; cross-batch / padded keys masked via bias.
            s = jax.lax.dot_general(
                q, k, (((1,), (1,)), ((), ())),
                preferred_element_type=jnp.float32) * scale + bias
            s = s - jnp.max(s, axis=-1, keepdims=True)
            e = jnp.exp(s)
            p = e * pl.reciprocal(jnp.sum(e, axis=-1, keepdims=True),
                                  approx=True)
            ctx = jnp.dot(p, v, preferred_element_type=jnp.float32)  # (BT, DH)
            attn = attn + jnp.dot(ctx, wo_l[h * DH:(h + 1) * DH, :],
                                  preferred_element_type=jnp.float32)
        attn = attn + bo_ref[l]
        x = ln(attn + x, ln1g_ref[l], ln1b_ref[l])

        # TODO(synk): tanh-approx GELU (BERT default is exact erf GELU).
        ff = jax.nn.gelu(
            jnp.dot(x, w1_ref[l], preferred_element_type=jnp.float32) + b1_ref[l],
            approximate=True)
        ff = jnp.dot(ff, w2_ref[l], preferred_element_type=jnp.float32) + b2_ref[l]
        x = ln(ff + x, ln2g_ref[l], ln2b_ref[l])

    o_ref[...] = x.astype(o_ref.dtype)


def bert_encoder(emb2d, attn_bias, p):
    args = (emb2d, attn_bias,
            p["emb_ln_g"], p["emb_ln_b"],
            p["wqkv"], p["bqkv"], p["wo"], p["bo"],
            p["ln1_g"], p["ln1_b"], p["w1"], p["b1"],
            p["w2"], p["b2"], p["ln2_g"], p["ln2_b"])
    return pl.pallas_call(
        _bert_encoder_kernel,
        grid=(1,),
        out_shape=jax.ShapeDtypeStruct((BT, BERT_HIDDEN), F32),
        in_specs=[_full_spec(a.shape) for a in args],
        out_specs=_full_spec((BT, BERT_HIDDEN)),
        compiler_params=_ARBITRARY_1D,
    )(*args)


# ============== fused 3-layer biLSTM + classifier kernel =====================
def _bilstm_classifier_kernel(x_ref, wih0_ref, wih12_ref, whh_ref, b_ref,
                              wc_ref, bc_ref, o_ref,
                              outf_ref, outb_ref):
    # x_ref: time-major flattened (T*B, H); rows [t*B:(t+1)*B] = timestep t.
    H = LSTM_HIDDEN

    def run_dir(gates_all, whh, out_ref, reverse):
        # Statically unrolled recurrence; gates_all (T*B, 4H) already holds
        # x @ W_ih + b (kept in vregs), only h @ W_hh is inside the loop.
        h = jnp.zeros((B, H), F32)
        c = jnp.zeros((B, H), F32)
        order = range(T - 1, -1, -1) if reverse else range(T)
        for t in order:
            g = (gates_all[t * B:(t + 1) * B, :]
                 + jnp.dot(h, whh, preferred_element_type=jnp.float32))
            i_g = jax.nn.sigmoid(g[:, 0 * H:1 * H])
            f_g = jax.nn.sigmoid(g[:, 1 * H:2 * H])
            g_g = jnp.tanh(g[:, 2 * H:3 * H])
            o_g = jax.nn.sigmoid(g[:, 3 * H:4 * H])
            c = f_g * c + i_g * g_g
            h = o_g * jnp.tanh(c)
            out_ref[pl.ds(t * B, B), :] = h

    for l in range(LSTM_LAYERS):
        # Hoisted input projection for all timesteps, both directions.
        if l == 0:
            xin = x_ref[...]                                     # (T*B, H)
            gx_f = jnp.dot(xin, wih0_ref[0], preferred_element_type=jnp.float32)
            gx_b = jnp.dot(xin, wih0_ref[1], preferred_element_type=jnp.float32)
        else:
            xf = outf_ref[...]                                   # (T*B, H)
            xb = outb_ref[...]                                   # (T*B, H)
            w12 = wih12_ref[l - 1]                               # (2, 2H, 4H)
            wf, wb = w12[0], w12[1]
            # [xf | xb] @ W == xf @ W[:H] + xb @ W[H:]  (no in-kernel concat)
            gx_f = (jnp.dot(xf, wf[0:H, :], preferred_element_type=jnp.float32)
                    + jnp.dot(xb, wf[H:2 * H, :], preferred_element_type=jnp.float32))
            gx_b = (jnp.dot(xf, wb[0:H, :], preferred_element_type=jnp.float32)
                    + jnp.dot(xb, wb[H:2 * H, :], preferred_element_type=jnp.float32))
        b_l = b_ref[l]                                           # (2, 1, 4H)
        whh_l = whh_ref[l]                                       # (2, H, 4H)
        run_dir(gx_f + b_l[0], whh_l[0], outf_ref, reverse=False)
        run_dir(gx_b + b_l[1], whh_l[1], outb_ref, reverse=True)
        # inter-layer LSTM dropout -> identity (eval)

    # lstm_output[:, -1, :] == [h_fwd(T-1) | h_bwd(T-1)]; classifier fused.
    last_f = outf_ref[pl.ds((T - 1) * B, B), :]                  # (B, H)
    last_b = outb_ref[pl.ds((T - 1) * B, B), :]                  # (B, H)
    wc = wc_ref[...]                                             # (2H, C)
    logits = (jnp.dot(last_f, wc[0:H, :], preferred_element_type=jnp.float32)
              + jnp.dot(last_b, wc[H:2 * H, :], preferred_element_type=jnp.float32)
              + bc_ref[...])
    o_ref[...] = logits.astype(o_ref.dtype)


def bilstm_classifier(seq_tm2d, p):
    args = (seq_tm2d, p["lstm_w_ih0"], p["lstm_w_ih12"], p["lstm_w_hh"],
            p["lstm_b"], p["wc"], p["bc"])
    return pl.pallas_call(
        _bilstm_classifier_kernel,
        grid=(1,),
        out_shape=jax.ShapeDtypeStruct((B, NUM_CLASSES), F32),
        in_specs=[_full_spec(a.shape) for a in args],
        out_specs=_full_spec((B, NUM_CLASSES)),
        scratch_shapes=[pltpu.VMEM((T * B, LSTM_HIDDEN), F32),   # fwd hidden per t
                        pltpu.VMEM((T * B, LSTM_HIDDEN), F32)],  # bwd hidden per t
        compiler_params=_ARBITRARY_1D,
    )(*args)


# ----------------------------- parameter init -------------------------------
def init_params(key):
    keys = iter(jax.random.split(key, 64))

    def nrm(shape, scale=0.02):
        return (scale * jax.random.normal(next(keys), shape)).astype(F32)

    L, H = BERT_LAYERS, BERT_HIDDEN
    p = {
        "tok_emb": nrm((VOCAB, H)),
        "pos_emb": nrm((MAX_POS, H)),
        "type_emb": nrm((2, H)),
        "emb_ln_g": jnp.ones((1, H), F32),
        "emb_ln_b": jnp.zeros((1, H), F32),
        # fused QKV projection: [wq | wk | wv] along the output dim
        "wqkv": nrm((L, H, 3 * H)),
        "bqkv": jnp.zeros((L, 1, 3 * H), F32),
        "wo": nrm((L, H, H)),
        "bo": jnp.zeros((L, 1, H), F32),
        "ln1_g": jnp.ones((L, 1, H), F32),
        "ln1_b": jnp.zeros((L, 1, H), F32),
        "w1": nrm((L, H, BERT_FFN)),
        "b1": jnp.zeros((L, 1, BERT_FFN), F32),
        "w2": nrm((L, BERT_FFN, H)),
        "b2": jnp.zeros((L, 1, H), F32),
        "ln2_g": jnp.ones((L, 1, H), F32),
        "ln2_b": jnp.zeros((L, 1, H), F32),
        # biLSTM stack (dir 0 = fwd, dir 1 = bwd); gate order i, f, g, o
        "lstm_w_ih0": nrm((2, H, 4 * LSTM_HIDDEN), 0.05),
        "lstm_w_ih12": nrm((LSTM_LAYERS - 1, 2, 2 * LSTM_HIDDEN, 4 * LSTM_HIDDEN), 0.05),
        "lstm_w_hh": nrm((LSTM_LAYERS, 2, LSTM_HIDDEN, 4 * LSTM_HIDDEN), 0.05),
        "lstm_b": jnp.zeros((LSTM_LAYERS, 2, 1, 4 * LSTM_HIDDEN), F32),
        "wc": nrm((2 * LSTM_HIDDEN, NUM_CLASSES)),
        "bc": jnp.zeros((1, NUM_CLASSES), F32),
    }
    return p


# ------------------------------ forward pass --------------------------------
def bert_lstm_forward(params, input_ids, attention_mask):
    bsz, seq = input_ids.shape

    # --- BERT embeddings (gather stays as cheap JAX glue) ---
    emb = (params["tok_emb"][input_ids]
           + params["pos_emb"][jnp.arange(seq)][None, :, :]
           + params["type_emb"][0][None, None, :])                  # (B, T, H)
    emb2d = emb.reshape(bsz * seq, BERT_HIDDEN)

    # Flattened (B*T, B*T) additive attention bias: 0 where query/key are in
    # the same batch row AND the key is not padding, -1e9 otherwise.
    rows = jnp.arange(bsz * seq) // seq
    same_batch = rows[:, None] == rows[None, :]
    key_keep = attention_mask.reshape(-1) > 0
    attn_bias = jnp.where(same_batch & key_keep[None, :], 0.0, -1e9).astype(F32)

    # --- fused BERT encoder (single pallas_call) ---
    seq_out = bert_encoder(emb2d, attn_bias, params)                 # (B*T, H)
    # self.dropout(sequence_output) -> identity (eval)

    # --- fused 3-layer biLSTM + classifier (single pallas_call) ---
    seq_tm2d = (seq_out.reshape(bsz, seq, BERT_HIDDEN)
                .transpose(1, 0, 2)
                .reshape(seq * bsz, BERT_HIDDEN))                    # time-major (T*B, H)
    logits = bilstm_classifier(seq_tm2d, params)                     # (B, 3)
    return logits


# ---------------------------------- main -------------------------------------
if __name__ == "__main__":
    key = jax.random.PRNGKey(0)
    pkey, dkey = jax.random.split(key)
    params = init_params(pkey)

    input_ids = jax.random.randint(dkey, (B, T), 0, VOCAB, dtype=jnp.int32)
    attention_mask = jnp.array([[1, 1, 1, 1, 1, 1, 1, 1],
                                [1, 1, 1, 1, 1, 1, 0, 0]], dtype=jnp.int32)

    logits = jax.jit(bert_lstm_forward)(params, input_ids, attention_mask)
    logits = jax.block_until_ready(logits)
    assert logits.shape == (B, NUM_CLASSES)
    assert bool(jnp.all(jnp.isfinite(logits)))
    print("KERNEL_OK")
</pallas_src>

<mosaic_0001>
module attributes {stable_mosaic.version = 11 : i64} {
  func.func @_bert_encoder_kernel(%arg0: i32, %arg1: memref<16x32xf32, #tpu.memory_space<vmem>>, %arg2: memref<16x16xf32, #tpu.memory_space<vmem>>, %arg3: memref<1x32xf32, #tpu.memory_space<vmem>>, %arg4: memref<1x32xf32, #tpu.memory_space<vmem>>, %arg5: memref<2x32x96xf32, #tpu.memory_space<vmem>>, %arg6: memref<2x1x96xf32, #tpu.memory_space<vmem>>, %arg7: memref<2x32x32xf32, #tpu.memory_space<vmem>>, %arg8: memref<2x1x32xf32, #tpu.memory_space<vmem>>, %arg9: memref<2x1x32xf32, #tpu.memory_space<vmem>>, %arg10: memref<2x1x32xf32, #tpu.memory_space<vmem>>, %arg11: memref<2x32x64xf32, #tpu.memory_space<vmem>>, %arg12: memref<2x1x64xf32, #tpu.memory_space<vmem>>, %arg13: memref<2x64x32xf32, #tpu.memory_space<vmem>>, %arg14: memref<2x1x32xf32, #tpu.memory_space<vmem>>, %arg15: memref<2x1x32xf32, #tpu.memory_space<vmem>>, %arg16: memref<2x1x32xf32, #tpu.memory_space<vmem>>, %arg17: memref<16x32xf32, #tpu.memory_space<vmem>>) attributes {dimension_semantics = [#tpu.dimension_semantics<arbitrary>], iteration_bounds = array<i64: 1>, scalar_prefetch = 0 : i64, scratch_operands = 0 : i64, tpu.core_type = #tpu.core_type<tc>, window_params = [{pipeline_mode = #tpu.pipeline_mode<synchronous>, transform_indices = @transform_0, window_bounds = array<i64: 16, 32>}, {pipeline_mode = #tpu.pipeline_mode<synchronous>, transform_indices = @transform_1, window_bounds = array<i64: 16, 16>}, {pipeline_mode = #tpu.pipeline_mode<synchronous>, transform_indices = @transform_2, window_bounds = array<i64: 1, 32>}, {pipeline_mode = #tpu.pipeline_mode<synchronous>, transform_indices = @transform_3, window_bounds = array<i64: 1, 32>}, {pipeline_mode = #tpu.pipeline_mode<synchronous>, transform_indices = @transform_4, window_bounds = array<i64: 2, 32, 96>}, {pipeline_mode = #tpu.pipeline_mode<synchronous>, transform_indices = @transform_5, window_bounds = array<i64: 2, 1, 96>}, {pipeline_mode = #tpu.pipeline_mode<synchronous>, transform_indices = @transform_6, window_bounds = array<i64: 2, 32, 32>}, {pipeline_mode = #tpu.pipeline_mode<synchronous>, transform_indices = @transform_7, window_bounds = array<i64: 2, 1, 32>}, {pipeline_mode = #tpu.pipeline_mode<synchronous>, transform_indices = @transform_8, window_bounds = array<i64: 2, 1, 32>}, {pipeline_mode = #tpu.pipeline_mode<synchronous>, transform_indices = @transform_9, window_bounds = array<i64: 2, 1, 32>}, {pipeline_mode = #tpu.pipeline_mode<synchronous>, transform_indices = @transform_10, window_bounds = array<i64: 2, 32, 64>}, {pipeline_mode = #tpu.pipeline_mode<synchronous>, transform_indices = @transform_11, window_bounds = array<i64: 2, 1, 64>}, {pipeline_mode = #tpu.pipeline_mode<synchronous>, transform_indices = @transform_12, window_bounds = array<i64: 2, 64, 32>}, {pipeline_mode = #tpu.pipeline_mode<synchronous>, transform_indices = @transform_13, window_bounds = array<i64: 2, 1, 32>}, {pipeline_mode = #tpu.pipeline_mode<synchronous>, transform_indices = @transform_14, window_bounds = array<i64: 2, 1, 32>}, {pipeline_mode = #tpu.pipeline_mode<synchronous>, transform_indices = @transform_15, window_bounds = array<i64: 2, 1, 32>}, {pipeline_mode = #tpu.pipeline_mode<synchronous>, transform_indices = @transform_16, window_bounds = array<i64: 16, 32>}]} {
    %c0 = arith.constant 0 : index
    %c0_0 = arith.constant 0 : index
    %0 = vector.load %arg1[%c0, %c0_0] : memref<16x32xf32, #tpu.memory_space<vmem>>, vector<16x32xf32>
    %c0_1 = arith.constant 0 : index
    %c0_2 = arith.constant 0 : index
    %1 = vector.load %arg3[%c0_1, %c0_2] : memref<1x32xf32, #tpu.memory_space<vmem>>, vector<1x32xf32>
    %c0_3 = arith.constant 0 : index
    %c0_4 = arith.constant 0 : index
    %2 = vector.load %arg4[%c0_3, %c0_4] : memref<1x32xf32, #tpu.memory_space<vmem>>, vector<1x32xf32>
    %cst = arith.constant dense<0.000000e+00> : vector<16xf32>
    %3 = vector.multi_reduction <add>, %0, %cst [1] : vector<16x32xf32> to vector<16xf32>
    %4 = vector.shape_cast %3 : vector<16xf32> to vector<16x1xf32>
    %cst_5 = arith.constant 3.200000e+01 : f32
    %5 = vector.broadcast %cst_5 : f32 to vector<16x1xf32>
    %6 = arith.divf %4, %5 : vector<16x1xf32>
    %7 = vector.broadcast %6 : vector<16x1xf32> to vector<16x32xf32>
    %8 = arith.subf %0, %7 : vector<16x32xf32>
    %9 = arith.mulf %8, %8 : vector<16x32xf32>
    %cst_6 = arith.constant dense<0.000000e+00> : vector<16xf32>
    %10 = vector.multi_reduction <add>, %9, %cst_6 [1] : vector<16x32xf32> to vector<16xf32>
    %11 = vector.shape_cast %10 : vector<16xf32> to vector<16x1xf32>
    %cst_7 = arith.constant 3.200000e+01 : f32
    %12 = vector.broadcast %cst_7 : f32 to vector<16x1xf32>
    %13 = arith.divf %11, %12 : vector<16x1xf32>
    %14 = vector.broadcast %6 : vector<16x1xf32> to vector<16x32xf32>
    %15 = arith.subf %0, %14 : vector<16x32xf32>
    %cst_8 = arith.constant 9.99999996E-13 : f32
    %16 = vector.broadcast %cst_8 : f32 to vector<16x1xf32>
    %17 = arith.addf %13, %16 : vector<16x1xf32>
    %18 = math.rsqrt %17 : vector<16x1xf32>
    %19 = vector.broadcast %18 : vector<16x1xf32> to vector<16x32xf32>
    %20 = arith.mulf %15, %19 : vector<16x32xf32>
    %21 = vector.broadcast %1 : vector<1x32xf32> to vector<16x32xf32>
    %22 = arith.mulf %20, %21 : vector<16x32xf32>
    %23 = vector.broadcast %2 : vector<1x32xf32> to vector<16x32xf32>
    %24 = arith.addf %22, %23 : vector<16x32xf32>
    %c0_9 = arith.constant 0 : index
    %c0_10 = arith.constant 0 : index
    %25 = vector.load %arg2[%c0_9, %c0_10] : memref<16x16xf32, #tpu.memory_space<vmem>>, vector<16x16xf32>
    %c0_11 = arith.constant 0 : index
    %c0_12 = arith.constant 0 : index
    %c0_13 = arith.constant 0 : index
    %26 = vector.load %arg5[%c0_11, %c0_12, %c0_13] : memref<2x32x96xf32, #tpu.memory_space<vmem>>, vector<1x32x96xf32>
    %27 = vector.shape_cast %26 : vector<1x32x96xf32> to vector<32x96xf32>
    %c0_14 = arith.constant 0 : index
    %c0_15 = arith.constant 0 : index
    %c0_16 = arith.constant 0 : index
    %28 = vector.load %arg7[%c0_14, %c0_15, %c0_16] : memref<2x32x32xf32, #tpu.memory_space<vmem>>, vector<1x32x32xf32>
    %29 = vector.shape_cast %28 : vector<1x32x32xf32> to vector<32x32xf32>
    %cst_17 = arith.constant dense<0.000000e+00> : vector<16x96xf32>
    %30 = tpu.matmul %24, %27, %cst_17 {dimension_numbers = #tpu.dot_dimension_numbers<[1], [0], [0], [1], [0, 0, 1, 1], [], []>} : vector<16x32xf32>, vector<32x96xf32>, vector<16x96xf32> -> vector<16x96xf32>
    %c0_18 = arith.constant 0 : index
    %c0_19 = arith.constant 0 : index
    %c0_20 = arith.constant 0 : index
    %31 = vector.load %arg6[%c0_18, %c0_19, %c0_20] : memref<2x1x96xf32, #tpu.memory_space<vmem>>, vector<1x1x96xf32>
    %32 = vector.shape_cast %31 : vector<1x1x96xf32> to vector<1x96xf32>
    %33 = vector.broadcast %32 : vector<1x96xf32> to vector<16x96xf32>
    %34 = arith.addf %30, %33 : vector<16x96xf32>
    %cst_21 = arith.constant 0.000000e+00 : f32
    %35 = vector.broadcast %cst_21 : f32 to vector<16x32xf32>
    %36 = vector.extract_strided_slice %34 {offsets = [0, 0], sizes = [16, 16], strides = [1, 1]} : vector<16x96xf32> to vector<16x16xf32>
    %37 = vector.extract_strided_slice %34 {offsets = [0, 32], sizes = [16, 16], strides = [1, 1]} : vector<16x96xf32> to vector<16x16xf32>
    %38 = vector.extract_strided_slice %34 {offsets = [0, 64], sizes = [16, 16], strides = [1, 1]} : vector<16x96xf32> to vector<16x16xf32>
    %cst_22 = arith.constant dense<0.000000e+00> : vector<16x16xf32>
    %39 = tpu.matmul %36, %37, %cst_22 {dimension_numbers = #tpu.dot_dimension_numbers<[1], [1], [0], [0], [0, 0, 1, 0], [], []>} : vector<16x16xf32>, vector<16x16xf32>, vector<16x16xf32> -> vector<16x16xf32>
    %cst_23 = arith.constant 2.500000e-01 : f32
    %40 = vector.broadcast %cst_23 : f32 to vector<16x16xf32>
    %41 = arith.mulf %39, %40 : vector<16x16xf32>
    %42 = arith.addf %41, %25 : vector<16x16xf32>
    %cst_24 = arith.constant dense<0xFF800000> : vector<16xf32>
    %43 = vector.multi_reduction <maximumf>, %42, %cst_24 [1] : vector<16x16xf32> to vector<16xf32>
    %44 = vector.shape_cast %43 : vector<16xf32> to vector<16x1xf32>
    %45 = vector.broadcast %44 : vector<16x1xf32> to vector<16x16xf32>
    %46 = arith.subf %42, %45 : vector<16x16xf32>
    %47 = math.exp %46 : vector<16x16xf32>
    %cst_25 = arith.constant dense<0.000000e+00> : vector<16xf32>
    %48 = vector.multi_reduction <add>, %47, %cst_25 [1] : vector<16x16xf32> to vector<16xf32>
    %49 = vector.shape_cast %48 : vector<16xf32> to vector<16x1xf32>
    %50 = tpu.reciprocal %49 {approx = true} : vector<16x1xf32> -> vector<16x1xf32>
    %51 = vector.broadcast %50 : vector<16x1xf32> to vector<16x16xf32>
    %52 = arith.mulf %47, %51 : vector<16x16xf32>
    %cst_26 = arith.constant dense<0.000000e+00> : vector<16x16xf32>
    %53 = tpu.matmul %52, %38, %cst_26 {dimension_numbers = #tpu.dot_dimension_numbers<[1], [0], [0], [1], [0, 0, 1, 1], [], []>} : vector<16x16xf32>, vector<16x16xf32>, vector<16x16xf32> -> vector<16x16xf32>
    %54 = vector.extract_strided_slice %29 {offsets = [0, 0], sizes = [16, 32], strides = [1, 1]} : vector<32x32xf32> to vector<16x32xf32>
    %cst_27 = arith.constant dense<0.000000e+00> : vector<16x32xf32>
    %55 = tpu.matmul %53, %54, %cst_27 {dimension_numbers = #tpu.dot_dimension_numbers<[1], [0], [0], [1], [0, 0, 1, 1], [], []>} : vector<16x16xf32>, vector<16x32xf32>, vector<16x32xf32> -> vector<16x32xf32>
    %56 = arith.addf %35, %55 : vector<16x32xf32>
    %57 = vector.extract_strided_slice %34 {offsets = [0, 16], sizes = [16, 16], strides = [1, 1]} : vector<16x96xf32> to vector<16x16xf32>
    %58 = vector.extract_strided_slice %34 {offsets = [0, 48], sizes = [16, 16], strides = [1, 1]} : vector<16x96xf32> to vector<16x16xf32>
    %59 = vector.extract_strided_slice %34 {offsets = [0, 80], sizes = [16, 16], strides = [1, 1]} : vector<16x96xf32> to vector<16x16xf32>
    %cst_28 = arith.constant dense<0.000000e+00> : vector<16x16xf32>
    %60 = tpu.matmul %57, %58, %cst_28 {dimension_numbers = #tpu.dot_dimension_numbers<[1], [1], [0], [0], [0, 0, 1, 0], [], []>} : vector<16x16xf32>, vector<16x16xf32>, vector<16x16xf32> -> vector<16x16xf32>
    %cst_29 = arith.constant 2.500000e-01 : f32
    %61 = vector.broadcast %cst_29 : f32 to vector<16x16xf32>
    %62 = arith.mulf %60, %61 : vector<16x16xf32>
    %63 = arith.addf %62, %25 : vector<16x16xf32>
    %cst_30 = arith.constant dense<0xFF800000> : vector<16xf32>
    %64 = vector.multi_reduction <maximumf>, %63, %cst_30 [1] : vector<16x16xf32> to vector<16xf32>
    %65 = vector.shape_cast %64 : vector<16xf32> to vector<16x1xf32>
    %66 = vector.broadcast %65 : vector<16x1xf32> to vector<16x16xf32>
    %67 = arith.subf %63, %66 : vector<16x16xf32>
    %68 = math.exp %67 : vector<16x16xf32>
    %cst_31 = arith.constant dense<0.000000e+00> : vector<16xf32>
    %69 = vector.multi_reduction <add>, %68, %cst_31 [1] : vector<16x16xf32> to vector<16xf32>
    %70 = vector.shape_cast %69 : vector<16xf32> to vector<16x1xf32>
    %71 = tpu.reciprocal %70 {approx = true} : vector<16x1xf32> -> vector<16x1xf32>
    %72 = vector.broadcast %71 : vector<16x1xf32> to vector<16x16xf32>
    %73 = arith.mulf %68, %72 : vector<16x16xf32>
    %cst_32 = arith.constant dense<0.000000e+00> : vector<16x16xf32>
    %74 = tpu.matmul %73, %59, %cst_32 {dimension_numbers = #tpu.dot_dimension_numbers<[1], [0], [0], [1], [0, 0, 1, 1], [], []>} : vector<16x16xf32>, vector<16x16xf32>, vector<16x16xf32> -> vector<16x16xf32>
    %75 = vector.extract_strided_slice %29 {offsets = [16, 0], sizes = [16, 32], strides = [1, 1]} : vector<32x32xf32> to vector<16x32xf32>
    %cst_33 = arith.constant dense<0.000000e+00> : vector<16x32xf32>
    %76 = tpu.matmul %74, %75, %cst_33 {dimension_numbers = #tpu.dot_dimension_numbers<[1], [0], [0], [1], [0, 0, 1, 1], [], []>} : vector<16x16xf32>, vector<16x32xf32>, vector<16x32xf32> -> vector<16x32xf32>
    %77 = arith.addf %56, %76 : vector<16x32xf32>
    %c0_34 = arith.constant 0 : index
    %c0_35 = arith.constant 0 : index
    %c0_36 = arith.constant 0 : index
    %78 = vector.load %arg8[%c0_34, %c0_35, %c0_36] : memref<2x1x32xf32, #tpu.memory_space<vmem>>, vector<1x1x32xf32>
    %79 = vector.shape_cast %78 : vector<1x1x32xf32> to vector<1x32xf32>
    %80 = vector.broadcast %79 : vector<1x32xf32> to vector<16x32xf32>
    %81 = arith.addf %77, %80 : vector<16x32xf32>
    %82 = arith.addf %81, %24 : vector<16x32xf32>
    %c0_37 = arith.constant 0 : index
    %c0_38 = arith.constant 0 : index
    %c0_39 = arith.constant 0 : index
    %83 = vector.load %arg9[%c0_37, %c0_38, %c0_39] : memref<2x1x32xf32, #tpu.memory_space<vmem>>, vector<1x1x32xf32>
    %84 = vector.shape_cast %83 : vector<1x1x32xf32> to vector<1x32xf32>
    %c0_40 = arith.constant 0 : index
    %c0_41 = arith.constant 0 : index
    %c0_42 = arith.constant 0 : index
    %85 = vector.load %arg10[%c0_40, %c0_41, %c0_42] : memref<2x1x32xf32, #tpu.memory_space<vmem>>, vector<1x1x32xf32>
    %86 = vector.shape_cast %85 : vector<1x1x32xf32> to vector<1x32xf32>
    %cst_43 = arith.constant dense<0.000000e+00> : vector<16xf32>
    %87 = vector.multi_reduction <add>, %82, %cst_43 [1] : vector<16x32xf32> to vector<16xf32>
    %88 = vector.shape_cast %87 : vector<16xf32> to vector<16x1xf32>
    %cst_44 = arith.constant 3.200000e+01 : f32
    %89 = vector.broadcast %cst_44 : f32 to vector<16x1xf32>
    %90 = arith.divf %88, %89 : vector<16x1xf32>
    %91 = vector.broadcast %90 : vector<16x1xf32> to vector<16x32xf32>
    %92 = arith.subf %82, %91 : vector<16x32xf32>
    %93 = arith.mulf %92, %92 : vector<16x32xf32>
    %cst_45 = arith.constant dense<0.000000e+00> : vector<16xf32>
    %94 = vector.multi_reduction <add>, %93, %cst_45 [1] : vector<16x32xf32> to vector<16xf32>
    %95 = vector.shape_cast %94 : vector<16xf32> to vector<16x1xf32>
    %cst_46 = arith.constant 3.200000e+01 : f32
    %96 = vector.broadcast %cst_46 : f32 to vector<16x1xf32>
    %97 = arith.divf %95, %96 : vector<16x1xf32>
    %98 = vector.broadcast %90 : vector<16x1xf32> to vector<16x32xf32>
    %99 = arith.subf %82, %98 : vector<16x32xf32>
    %cst_47 = arith.constant 9.99999996E-13 : f32
    %100 = vector.broadcast %cst_47 : f32 to vector<16x1xf32>
    %101 = arith.addf %97, %100 : vector<16x1xf32>
    %102 = math.rsqrt %101 : vector<16x1xf32>
    %103 = vector.broadcast %102 : vector<16x1xf32> to vector<16x32xf32>
    %104 = arith.mulf %99, %103 : vector<16x32xf32>
    %105 = vector.broadcast %84 : vector<1x32xf32> to vector<16x32xf32>
    %106 = arith.mulf %104, %105 : vector<16x32xf32>
    %107 = vector.broadcast %86 : vector<1x32xf32> to vector<16x32xf32>
    %108 = arith.addf %106, %107 : vector<16x32xf32>
    %c0_48 = arith.constant 0 : index
    %c0_49 = arith.constant 0 : index
    %c0_50 = arith.constant 0 : index
    %109 = vector.load %arg11[%c0_48, %c0_49, %c0_50] : memref<2x32x64xf32, #tpu.memory_space<vmem>>, vector<1x32x64xf32>
    %110 = vector.shape_cast %109 : vector<1x32x64xf32> to vector<32x64xf32>
    %cst_51 = arith.constant dense<0.000000e+00> : vector<16x64xf32>
    %111 = tpu.matmul %108, %110, %cst_51 {dimension_numbers = #tpu.dot_dimension_numbers<[1], [0], [0], [1], [0, 0, 1, 1], [], []>} : vector<16x32xf32>, vector<32x64xf32>, vector<16x64xf32> -> vector<16x64xf32>
    %c0_52 = arith.constant 0 : index
    %c0_53 = arith.constant 0 : index
    %c0_54 = arith.constant 0 : index
    %112 = vector.load %arg12[%c0_52, %c0_53, %c0_54] : memref<2x1x64xf32, #tpu.memory_space<vmem>>, vector<1x1x64xf32>
    %113 = vector.shape_cast %112 : vector<1x1x64xf32> to vector<1x64xf32>
    %114 = vector.broadcast %113 : vector<1x64xf32> to vector<16x64xf32>
    %115 = arith.addf %111, %114 : vector<16x64xf32>
    %116 = arith.mulf %115, %115 : vector<16x64xf32>
    %117 = arith.mulf %115, %116 : vector<16x64xf32>
    %cst_55 = arith.constant 4.471500e-02 : f32
    %118 = vector.broadcast %cst_55 : f32 to vector<16x64xf32>
    %119 = arith.mulf %118, %117 : vector<16x64xf32>
    %120 = arith.addf %115, %119 : vector<16x64xf32>
    %cst_56 = arith.constant 0.797884583 : f32
    %121 = vector.broadcast %cst_56 : f32 to vector<16x64xf32>
    %122 = arith.mulf %121, %120 : vector<16x64xf32>
    %123 = math.tanh %122 : vector<16x64xf32>
    %cst_57 = arith.constant 1.000000e+00 : f32
    %124 = vector.broadcast %cst_57 : f32 to vector<16x64xf32>
    %125 = arith.addf %124, %123 : vector<16x64xf32>
    %cst_58 = arith.constant 5.000000e-01 : f32
    %126 = vector.broadcast %cst_58 : f32 to vector<16x64xf32>
    %127 = arith.mulf %126, %125 : vector<16x64xf32>
    %128 = arith.mulf %115, %127 : vector<16x64xf32>
    %c0_59 = arith.constant 0 : index
    %c0_60 = arith.constant 0 : index
    %c0_61 = arith.constant 0 : index
    %129 = vector.load %arg13[%c0_59, %c0_60, %c0_61] : memref<2x64x32xf32, #tpu.memory_space<vmem>>, vector<1x64x32xf32>
    %130 = vector.shape_cast %129 : vector<1x64x32xf32> to vector<64x32xf32>
    %cst_62 = arith.constant dense<0.000000e+00> : vector<16x32xf32>
    %131 = tpu.matmul %128, %130, %cst_62 {dimension_numbers = #tpu.dot_dimension_numbers<[1], [0], [0], [1], [0, 0, 1, 1], [], []>} : vector<16x64xf32>, vector<64x32xf32>, vector<16x32xf32> -> vector<16x32xf32>
    %c0_63 = arith.constant 0 : index
    %c0_64 = arith.constant 0 : index
    %c0_65 = arith.constant 0 : index
    %132 = vector.load %arg14[%c0_63, %c0_64, %c0_65] : memref<2x1x32xf32, #tpu.memory_space<vmem>>, vector<1x1x32xf32>
    %133 = vector.shape_cast %132 : vector<1x1x32xf32> to vector<1x32xf32>
    %134 = vector.broadcast %133 : vector<1x32xf32> to vector<16x32xf32>
    %135 = arith.addf %131, %134 : vector<16x32xf32>
    %136 = arith.addf %135, %108 : vector<16x32xf32>
    %c0_66 = arith.constant 0 : index
    %c0_67 = arith.constant 0 : index
    %c0_68 = arith.constant 0 : index
    %137 = vector.load %arg15[%c0_66, %c0_67, %c0_68] : memref<2x1x32xf32, #tpu.memory_space<vmem>>, vector<1x1x32xf32>
    %138 = vector.shape_cast %137 : vector<1x1x32xf32> to vector<1x32xf32>
    %c0_69 = arith.constant 0 : index
    %c0_70 = arith.constant 0 : index
    %c0_71 = arith.constant 0 : index
    %139 = vector.load %arg16[%c0_69, %c0_70, %c0_71] : memref<2x1x32xf32, #tpu.memory_space<vmem>>, vector<1x1x32xf32>
    %140 = vector.shape_cast %139 : vector<1x1x32xf32> to vector<1x32xf32>
    %cst_72 = arith.constant dense<0.000000e+00> : vector<16xf32>
    %141 = vector.multi_reduction <add>, %136, %cst_72 [1] : vector<16x32xf32> to vector<16xf32>
    %142 = vector.shape_cast %141 : vector<16xf32> to vector<16x1xf32>
    %cst_73 = arith.constant 3.200000e+01 : f32
    %143 = vector.broadcast %cst_73 : f32 to vector<16x1xf32>
    %144 = arith.divf %142, %143 : vector<16x1xf32>
    %145 = vector.broadcast %144 : vector<16x1xf32> to vector<16x32xf32>
    %146 = arith.subf %136, %145 : vector<16x32xf32>
    %147 = arith.mulf %146, %146 : vector<16x32xf32>
    %cst_74 = arith.constant dense<0.000000e+00> : vector<16xf32>
    %148 = vector.multi_reduction <add>, %147, %cst_74 [1] : vector<16x32xf32> to vector<16xf32>
    %149 = vector.shape_cast %148 : vector<16xf32> to vector<16x1xf32>
    %cst_75 = arith.constant 3.200000e+01 : f32
    %150 = vector.broadcast %cst_75 : f32 to vector<16x1xf32>
    %151 = arith.divf %149, %150 : vector<16x1xf32>
    %152 = vector.broadcast %144 : vector<16x1xf32> to vector<16x32xf32>
    %153 = arith.subf %136, %152 : vector<16x32xf32>
    %cst_76 = arith.constant 9.99999996E-13 : f32
    %154 = vector.broadcast %cst_76 : f32 to vector<16x1xf32>
    %155 = arith.addf %151, %154 : vector<16x1xf32>
    %156 = math.rsqrt %155 : vector<16x1xf32>
    %157 = vector.broadcast %156 : vector<16x1xf32> to vector<16x32xf32>
    %158 = arith.mulf %153, %157 : vector<16x32xf32>
    %159 = vector.broadcast %138 : vector<1x32xf32> to vector<16x32xf32>
    %160 = arith.mulf %158, %159 : vector<16x32xf32>
    %161 = vector.broadcast %140 : vector<1x32xf32> to vector<16x32xf32>
    %162 = arith.addf %160, %161 : vector<16x32xf32>
    %c1 = arith.constant 1 : index
    %c0_77 = arith.constant 0 : index
    %c0_78 = arith.constant 0 : index
    %163 = vector.load %arg5[%c1, %c0_77, %c0_78] : memref<2x32x96xf32, #tpu.memory_space<vmem>>, vector<1x32x96xf32>
    %164 = vector.shape_cast %163 : vector<1x32x96xf32> to vector<32x96xf32>
    %c1_79 = arith.constant 1 : index
    %c0_80 = arith.constant 0 : index
    %c0_81 = arith.constant 0 : index
    %165 = vector.load %arg7[%c1_79, %c0_80, %c0_81] : memref<2x32x32xf32, #tpu.memory_space<vmem>>, vector<1x32x32xf32>
    %166 = vector.shape_cast %165 : vector<1x32x32xf32> to vector<32x32xf32>
    %cst_82 = arith.constant dense<0.000000e+00> : vector<16x96xf32>
    %167 = tpu.matmul %162, %164, %cst_82 {dimension_numbers = #tpu.dot_dimension_numbers<[1], [0], [0], [1], [0, 0, 1, 1], [], []>} : vector<16x32xf32>, vector<32x96xf32>, vector<16x96xf32> -> vector<16x96xf32>
    %c1_83 = arith.constant 1 : index
    %c0_84 = arith.constant 0 : index
    %c0_85 = arith.constant 0 : index
    %168 = vector.load %arg6[%c1_83, %c0_84, %c0_85] : memref<2x1x96xf32, #tpu.memory_space<vmem>>, vector<1x1x96xf32>
    %169 = vector.shape_cast %168 : vector<1x1x96xf32> to vector<1x96xf32>
    %170 = vector.broadcast %169 : vector<1x96xf32> to vector<16x96xf32>
    %171 = arith.addf %167, %170 : vector<16x96xf32>
    %cst_86 = arith.constant 0.000000e+00 : f32
    %172 = vector.broadcast %cst_86 : f32 to vector<16x32xf32>
    %173 = vector.extract_strided_slice %171 {offsets = [0, 0], sizes = [16, 16], strides = [1, 1]} : vector<16x96xf32> to vector<16x16xf32>
    %174 = vector.extract_strided_slice %171 {offsets = [0, 32], sizes = [16, 16], strides = [1, 1]} : vector<16x96xf32> to vector<16x16xf32>
    %175 = vector.extract_strided_slice %171 {offsets = [0, 64], sizes = [16, 16], strides = [1, 1]} : vector<16x96xf32> to vector<16x16xf32>
    %cst_87 = arith.constant dense<0.000000e+00> : vector<16x16xf32>
    %176 = tpu.matmul %173, %174, %cst_87 {dimension_numbers = #tpu.dot_dimension_numbers<[1], [1], [0], [0], [0, 0, 1, 0], [], []>} : vector<16x16xf32>, vector<16x16xf32>, vector<16x16xf32> -> vector<16x16xf32>
    %cst_88 = arith.constant 2.500000e-01 : f32
    %177 = vector.broadcast %cst_88 : f32 to vector<16x16xf32>
    %178 = arith.mulf %176, %177 : vector<16x16xf32>
    %179 = arith.addf %178, %25 : vector<16x16xf32>
    %cst_89 = arith.constant dense<0xFF800000> : vector<16xf32>
    %180 = vector.multi_reduction <maximumf>, %179, %cst_89 [1] : vector<16x16xf32> to vector<16xf32>
    %181 = vector.shape_cast %180 : vector<16xf32> to vector<16x1xf32>
    %182 = vector.broadcast %181 : vector<16x1xf32> to vector<16x16xf32>
    %183 = arith.subf %179, %182 : vector<16x16xf32>
    %184 = math.exp %183 : vector<16x16xf32>
    %cst_90 = arith.constant dense<0.000000e+00> : vector<16xf32>
    %185 = vector.multi_reduction <add>, %184, %cst_90 [1] : vector<16x16xf32> to vector<16xf32>
    %186 = vector.shape_cast %185 : vector<16xf32> to vector<16x1xf32>
    %187 = tpu.reciprocal %186 {approx = true} : vector<16x1xf32> -> vector<16x1xf32>
    %188 = vector.broadcast %187 : vector<16x1xf32> to vector<16x16xf32>
    %189 = arith.mulf %184, %188 : vector<16x16xf32>
    %cst_91 = arith.constant dense<0.000000e+00> : vector<16x16xf32>
    %190 = tpu.matmul %189, %175, %cst_91 {dimension_numbers = #tpu.dot_dimension_numbers<[1], [0], [0], [1], [0, 0, 1, 1], [], []>} : vector<16x16xf32>, vector<16x16xf32>, vector<16x16xf32> -> vector<16x16xf32>
    %191 = vector.extract_strided_slice %166 {offsets = [0, 0], sizes = [16, 32], strides = [1, 1]} : vector<32x32xf32> to vector<16x32xf32>
    %cst_92 = arith.constant dense<0.000000e+00> : vector<16x32xf32>
    %192 = tpu.matmul %190, %191, %cst_92 {dimension_numbers = #tpu.dot_dimension_numbers<[1], [0], [0], [1], [0, 0, 1, 1], [], []>} : vector<16x16xf32>, vector<16x32xf32>, vector<16x32xf32> -> vector<16x32xf32>
    %193 = arith.addf %172, %192 : vector<16x32xf32>
    %194 = vector.extract_strided_slice %171 {offsets = [0, 16], sizes = [16, 16], strides = [1, 1]} : vector<16x96xf32> to vector<16x16xf32>
    %195 = vector.extract_strided_slice %171 {offsets = [0, 48], sizes = [16, 16], strides = [1, 1]} : vector<16x96xf32> to vector<16x16xf32>
    %196 = vector.extract_strided_slice %171 {offsets = [0, 80], sizes = [16, 16], strides = [1, 1]} : vector<16x96xf32> to vector<16x16xf32>
    %cst_93 = arith.constant dense<0.000000e+00> : vector<16x16xf32>
    %197 = tpu.matmul %194, %195, %cst_93 {dimension_numbers = #tpu.dot_dimension_numbers<[1], [1], [0], [0], [0, 0, 1, 0], [], []>} : vector<16x16xf32>, vector<16x16xf32>, vector<16x16xf32> -> vector<16x16xf32>
    %cst_94 = arith.constant 2.500000e-01 : f32
    %198 = vector.broadcast %cst_94 : f32 to vector<16x16xf32>
    %199 = arith.mulf %197, %198 : vector<16x16xf32>
    %200 = arith.addf %199, %25 : vector<16x16xf32>
    %cst_95 = arith.constant dense<0xFF800000> : vector<16xf32>
    %201 = vector.multi_reduction <maximumf>, %200, %cst_95 [1] : vector<16x16xf32> to vector<16xf32>
    %202 = vector.shape_cast %201 : vector<16xf32> to vector<16x1xf32>
    %203 = vector.broadcast %202 : vector<16x1xf32> to vector<16x16xf32>
    %204 = arith.subf %200, %203 : vector<16x16xf32>
    %205 = math.exp %204 : vector<16x16xf32>
    %cst_96 = arith.constant dense<0.000000e+00> : vector<16xf32>
    %206 = vector.multi_reduction <add>, %205, %cst_96 [1] : vector<16x16xf32> to vector<16xf32>
    %207 = vector.shape_cast %206 : vector<16xf32> to vector<16x1xf32>
    %208 = tpu.reciprocal %207 {approx = true} : vector<16x1xf32> -> vector<16x1xf32>
    %209 = vector.broadcast %208 : vector<16x1xf32> to vector<16x16xf32>
    %210 = arith.mulf %205, %209 : vector<16x16xf32>
    %cst_97 = arith.constant dense<0.000000e+00> : vector<16x16xf32>
    %211 = tpu.matmul %210, %196, %cst_97 {dimension_numbers = #tpu.dot_dimension_numbers<[1], [0], [0], [1], [0, 0, 1, 1], [], []>} : vector<16x16xf32>, vector<16x16xf32>, vector<16x16xf32> -> vector<16x16xf32>
    %212 = vector.extract_strided_slice %166 {offsets = [16, 0], sizes = [16, 32], strides = [1, 1]} : vector<32x32xf32> to vector<16x32xf32>
    %cst_98 = arith.constant dense<0.000000e+00> : vector<16x32xf32>
    %213 = tpu.matmul %211, %212, %cst_98 {dimension_numbers = #tpu.dot_dimension_numbers<[1], [0], [0], [1], [0, 0, 1, 1], [], []>} : vector<16x16xf32>, vector<16x32xf32>, vector<16x32xf32> -> vector<16x32xf32>
    %214 = arith.addf %193, %213 : vector<16x32xf32>
    %c1_99 = arith.constant 1 : index
    %c0_100 = arith.constant 0 : index
    %c0_101 = arith.constant 0 : index
    %215 = vector.load %arg8[%c1_99, %c0_100, %c0_101] : memref<2x1x32xf32, #tpu.memory_space<vmem>>, vector<1x1x32xf32>
    %216 = vector.shape_cast %215 : vector<1x1x32xf32> to vector<1x32xf32>
    %217 = vector.broadcast %216 : vector<1x32xf32> to vector<16x32xf32>
    %218 = arith.addf %214, %217 : vector<16x32xf32>
    %219 = arith.addf %218, %162 : vector<16x32xf32>
    %c1_102 = arith.constant 1 : index
    %c0_103 = arith.constant 0 : index
    %c0_104 = arith.constant 0 : index
    %220 = vector.load %arg9[%c1_102, %c0_103, %c0_104] : memref<2x1x32xf32, #tpu.memory_space<vmem>>, vector<1x1x32xf32>
    %221 = vector.shape_cast %220 : vector<1x1x32xf32> to vector<1x32xf32>
    %c1_105 = arith.constant 1 : index
    %c0_106 = arith.constant 0 : index
    %c0_107 = arith.constant 0 : index
    %222 = vector.load %arg10[%c1_105, %c0_106, %c0_107] : memref<2x1x32xf32, #tpu.memory_space<vmem>>, vector<1x1x32xf32>
    %223 = vector.shape_cast %222 : vector<1x1x32xf32> to vector<1x32xf32>
    %cst_108 = arith.constant dense<0.000000e+00> : vector<16xf32>
    %224 = vector.multi_reduction <add>, %219, %cst_108 [1] : vector<16x32xf32> to vector<16xf32>
    %225 = vector.shape_cast %224 : vector<16xf32> to vector<16x1xf32>
    %cst_109 = arith.constant 3.200000e+01 : f32
    %226 = vector.broadcast %cst_109 : f32 to vector<16x1xf32>
    %227 = arith.divf %225, %226 : vector<16x1xf32>
    %228 = vector.broadcast %227 : vector<16x1xf32> to vector<16x32xf32>
    %229 = arith.subf %219, %228 : vector<16x32xf32>
    %230 = arith.mulf %229, %229 : vector<16x32xf32>
    %cst_110 = arith.constant dense<0.000000e+00> : vector<16xf32>
    %231 = vector.multi_reduction <add>, %230, %cst_110 [1] : vector<16x32xf32> to vector<16xf32>
    %232 = vector.shape_cast %231 : vector<16xf32> to vector<16x1xf32>
    %cst_111 = arith.constant 3.200000e+01 : f32
    %233 = vector.broadcast %cst_111 : f32 to vector<16x1xf32>
    %234 = arith.divf %232, %233 : vector<16x1xf32>
    %235 = vector.broadcast %227 : vector<16x1xf32> to vector<16x32xf32>
    %236 = arith.subf %219, %235 : vector<16x32xf32>
    %cst_112 = arith.constant 9.99999996E-13 : f32
    %237 = vector.broadcast %cst_112 : f32 to vector<16x1xf32>
    %238 = arith.addf %234, %237 : vector<16x1xf32>
    %239 = math.rsqrt %238 : vector<16x1xf32>
    %240 = vector.broadcast %239 : vector<16x1xf32> to vector<16x32xf32>
    %241 = arith.mulf %236, %240 : vector<16x32xf32>
    %242 = vector.broadcast %221 : vector<1x32xf32> to vector<16x32xf32>
    %243 = arith.mulf %241, %242 : vector<16x32xf32>
    %244 = vector.broadcast %223 : vector<1x32xf32> to vector<16x32xf32>
    %245 = arith.addf %243, %244 : vector<16x32xf32>
    %c1_113 = arith.constant 1 : index
    %c0_114 = arith.constant 0 : index
    %c0_115 = arith.constant 0 : index
    %246 = vector.load %arg11[%c1_113, %c0_114, %c0_115] : memref<2x32x64xf32, #tpu.memory_space<vmem>>, vector<1x32x64xf32>
    %247 = vector.shape_cast %246 : vector<1x32x64xf32> to vector<32x64xf32>
    %cst_116 = arith.constant dense<0.000000e+00> : vector<16x64xf32>
    %248 = tpu.matmul %245, %247, %cst_116 {dimension_numbers = #tpu.dot_dimension_numbers<[1], [0], [0], [1], [0, 0, 1, 1], [], []>} : vector<16x32xf32>, vector<32x64xf32>, vector<16x64xf32> -> vector<16x64xf32>
    %c1_117 = arith.constant 1 : index
    %c0_118 = arith.constant 0 : index
    %c0_119 = arith.constant 0 : index
    %249 = vector.load %arg12[%c1_117, %c0_118, %c0_119] : memref<2x1x64xf32, #tpu.memory_space<vmem>>, vector<1x1x64xf32>
    %250 = vector.shape_cast %249 : vector<1x1x64xf32> to vector<1x64xf32>
    %251 = vector.broadcast %250 : vector<1x64xf32> to vector<16x64xf32>
    %252 = arith.addf %248, %251 : vector<16x64xf32>
    %253 = arith.mulf %252, %252 : vector<16x64xf32>
    %254 = arith.mulf %252, %253 : vector<16x64xf32>
    %cst_120 = arith.constant 4.471500e-02 : f32
    %255 = vector.broadcast %cst_120 : f32 to vector<16x64xf32>
    %256 = arith.mulf %255, %254 : vector<16x64xf32>
    %257 = arith.addf %252, %256 : vector<16x64xf32>
    %cst_121 = arith.constant 0.797884583 : f32
    %258 = vector.broadcast %cst_121 : f32 to vector<16x64xf32>
    %259 = arith.mulf %258, %257 : vector<16x64xf32>
    %260 = math.tanh %259 : vector<16x64xf32>
    %cst_122 = arith.constant 1.000000e+00 : f32
    %261 = vector.broadcast %cst_122 : f32 to vector<16x64xf32>
    %262 = arith.addf %261, %260 : vector<16x64xf32>
    %cst_123 = arith.constant 5.000000e-01 : f32
    %263 = vector.broadcast %cst_123 : f32 to vector<16x64xf32>
    %264 = arith.mulf %263, %262 : vector<16x64xf32>
    %265 = arith.mulf %252, %264 : vector<16x64xf32>
    %c1_124 = arith.constant 1 : index
    %c0_125 = arith.constant 0 : index
    %c0_126 = arith.constant 0 : index
    %266 = vector.load %arg13[%c1_124, %c0_125, %c0_126] : memref<2x64x32xf32, #tpu.memory_space<vmem>>, vector<1x64x32xf32>
    %267 = vector.shape_cast %266 : vector<1x64x32xf32> to vector<64x32xf32>
    %cst_127 = arith.constant dense<0.000000e+00> : vector<16x32xf32>
    %268 = tpu.matmul %265, %267, %cst_127 {dimension_numbers = #tpu.dot_dimension_numbers<[1], [0], [0], [1], [0, 0, 1, 1], [], []>} : vector<16x64xf32>, vector<64x32xf32>, vector<16x32xf32> -> vector<16x32xf32>
    %c1_128 = arith.constant 1 : index
    %c0_129 = arith.constant 0 : index
    %c0_130 = arith.constant 0 : index
    %269 = vector.load %arg14[%c1_128, %c0_129, %c0_130] : memref<2x1x32xf32, #tpu.memory_space<vmem>>, vector<1x1x32xf32>
    %270 = vector.shape_cast %269 : vector<1x1x32xf32> to vector<1x32xf32>
    %271 = vector.broadcast %270 : vector<1x32xf32> to vector<16x32xf32>
    %272 = arith.addf %268, %271 : vector<16x32xf32>
    %273 = arith.addf %272, %245 : vector<16x32xf32>
    %c1_131 = arith.constant 1 : index
    %c0_132 = arith.constant 0 : index
    %c0_133 = arith.constant 0 : index
    %274 = vector.load %arg15[%c1_131, %c0_132, %c0_133] : memref<2x1x32xf32, #tpu.memory_space<vmem>>, vector<1x1x32xf32>
    %275 = vector.shape_cast %274 : vector<1x1x32xf32> to vector<1x32xf32>
    %c1_134 = arith.constant 1 : index
    %c0_135 = arith.constant 0 : index
    %c0_136 = arith.constant 0 : index
    %276 = vector.load %arg16[%c1_134, %c0_135, %c0_136] : memref<2x1x32xf32, #tpu.memory_space<vmem>>, vector<1x1x32xf32>
    %277 = vector.shape_cast %276 : vector<1x1x32xf32> to vector<1x32xf32>
    %cst_137 = arith.constant dense<0.000000e+00> : vector<16xf32>
    %278 = vector.multi_reduction <add>, %273, %cst_137 [1] : vector<16x32xf32> to vector<16xf32>
    %279 = vector.shape_cast %278 : vector<16xf32> to vector<16x1xf32>
    %cst_138 = arith.constant 3.200000e+01 : f32
    %280 = vector.broadcast %cst_138 : f32 to vector<16x1xf32>
    %281 = arith.divf %279, %280 : vector<16x1xf32>
    %282 = vector.broadcast %281 : vector<16x1xf32> to vector<16x32xf32>
    %283 = arith.subf %273, %282 : vector<16x32xf32>
    %284 = arith.mulf %283, %283 : vector<16x32xf32>
    %cst_139 = arith.constant dense<0.000000e+00> : vector<16xf32>
    %285 = vector.multi_reduction <add>, %284, %cst_139 [1] : vector<16x32xf32> to vector<16xf32>
    %286 = vector.shape_cast %285 : vector<16xf32> to vector<16x1xf32>
    %cst_140 = arith.constant 3.200000e+01 : f32
    %287 = vector.broadcast %cst_140 : f32 to vector<16x1xf32>
    %288 = arith.divf %286, %287 : vector<16x1xf32>
    %289 = vector.broadcast %281 : vector<16x1xf32> to vector<16x32xf32>
    %290 = arith.subf %273, %289 : vector<16x32xf32>
    %cst_141 = arith.constant 9.99999996E-13 : f32
    %291 = vector.broadcast %cst_141 : f32 to vector<16x1xf32>
    %292 = arith.addf %288, %291 : vector<16x1xf32>
    %293 = math.rsqrt %292 : vector<16x1xf32>
    %294 = vector.broadcast %293 : vector<16x1xf32> to vector<16x32xf32>
    %295 = arith.mulf %290, %294 : vector<16x32xf32>
    %296 = vector.broadcast %275 : vector<1x32xf32> to vector<16x32xf32>
    %297 = arith.mulf %295, %296 : vector<16x32xf32>
    %298 = vector.broadcast %277 : vector<1x32xf32> to vector<16x32xf32>
    %299 = arith.addf %297, %298 : vector<16x32xf32>
    %c0_142 = arith.constant 0 : index
    %c0_143 = arith.constant 0 : index
    %300 = vector.load %arg17[%c0_142, %c0_143] : memref<16x32xf32, #tpu.memory_space<vmem>>, vector<16x32xf32>
    tpu.vector_store %arg17[%c0_142, %c0_143], %299 {strides = array<i32>} : memref<16x32xf32, #tpu.memory_space<vmem>>, vector<16x32xf32>,
    return
  }
  func.func @transform_0(%arg0: i32) -> (i32, i32) {
    %c0_i32 = arith.constant 0 : i32
    %c0_i32_0 = arith.constant 0 : i32
    %c0_i32_1 = arith.constant 0 : i32
    return %c0_i32, %c0_i32_0 : i32, i32
  }
  func.func @transform_1(%arg0: i32) -> (i32, i32) {
    %c0_i32 = arith.constant 0 : i32
    %c0_i32_0 = arith.constant 0 : i32
    %c0_i32_1 = arith.constant 0 : i32
    return %c0_i32, %c0_i32_0 : i32, i32
  }
  func.func @transform_2(%arg0: i32) -> (i32, i32) {
    %c0_i32 = arith.constant 0 : i32
    %c0_i32_0 = arith.constant 0 : i32
    %c0_i32_1 = arith.constant 0 : i32
    return %c0_i32, %c0_i32_0 : i32, i32
  }
  func.func @transform_3(%arg0: i32) -> (i32, i32) {
    %c0_i32 = arith.constant 0 : i32
    %c0_i32_0 = arith.constant 0 : i32
    %c0_i32_1 = arith.constant 0 : i32
    return %c0_i32, %c0_i32_0 : i32, i32
  }
  func.func @transform_4(%arg0: i32) -> (i32, i32, i32) {
    %c0_i32 = arith.constant 0 : i32
    %c0_i32_0 = arith.constant 0 : i32
    %c0_i32_1 = arith.constant 0 : i32
    %c0_i32_2 = arith.constant 0 : i32
    return %c0_i32, %c0_i32_0, %c0_i32_1 : i32, i32, i32
  }
  func.func @transform_5(%arg0: i32) -> (i32, i32, i32) {
    %c0_i32 = arith.constant 0 : i32
    %c0_i32_0 = arith.constant 0 : i32
    %c0_i32_1 = arith.constant 0 : i32
    %c0_i32_2 = arith.constant 0 : i32
    return %c0_i32, %c0_i32_0, %c0_i32_1 : i32, i32, i32
  }
  func.func @transform_6(%arg0: i32) -> (i32, i32, i32) {
    %c0_i32 = arith.constant 0 : i32
    %c0_i32_0 = arith.constant 0 : i32
    %c0_i32_1 = arith.constant 0 : i32
    %c0_i32_2 = arith.constant 0 : i32
    return %c0_i32, %c0_i32_0, %c0_i32_1 : i32, i32, i32
  }
  func.func @transform_7(%arg0: i32) -> (i32, i32, i32) {
    %c0_i32 = arith.constant 0 : i32
    %c0_i32_0 = arith.constant 0 : i32
    %c0_i32_1 = arith.constant 0 : i32
    %c0_i32_2 = arith.constant 0 : i32
    return %c0_i32, %c0_i32_0, %c0_i32_1 : i32, i32, i32
  }
  func.func @transform_8(%arg0: i32) -> (i32, i32, i32) {
    %c0_i32 = arith.constant 0 : i32
    %c0_i32_0 = arith.constant 0 : i32
    %c0_i32_1 = arith.constant 0 : i32
    %c0_i32_2 = arith.constant 0 : i32
    return %c0_i32, %c0_i32_0, %c0_i32_1 : i32, i32, i32
  }
  func.func @transform_9(%arg0: i32) -> (i32, i32, i32) {
    %c0_i32 = arith.constant 0 : i32
    %c0_i32_0 = arith.constant 0 : i32
    %c0_i32_1 = arith.constant 0 : i32
    %c0_i32_2 = arith.constant 0 : i32
    return %c0_i32, %c0_i32_0, %c0_i32_1 : i32, i32, i32
  }
  func.func @transform_10(%arg0: i32) -> (i32, i32, i32) {
    %c0_i32 = arith.constant 0 : i32
    %c0_i32_0 = arith.constant 0 : i32
    %c0_i32_1 = arith.constant 0 : i32
    %c0_i32_2 = arith.constant 0 : i32
    return %c0_i32, %c0_i32_0, %c0_i32_1 : i32, i32, i32
  }
  func.func @transform_11(%arg0: i32) -> (i32, i32, i32) {
    %c0_i32 = arith.constant 0 : i32
    %c0_i32_0 = arith.constant 0 : i32
    %c0_i32_1 = arith.constant 0 : i32
    %c0_i32_2 = arith.constant 0 : i32
    return %c0_i32, %c0_i32_0, %c0_i32_1 : i32, i32, i32
  }
  func.func @transform_12(%arg0: i32) -> (i32, i32, i32) {
    %c0_i32 = arith.constant 0 : i32
    %c0_i32_0 = arith.constant 0 : i32
    %c0_i32_1 = arith.constant 0 : i32
    %c0_i32_2 = arith.constant 0 : i32
    return %c0_i32, %c0_i32_0, %c0_i32_1 : i32, i32, i32
  }
  func.func @transform_13(%arg0: i32) -> (i32, i32, i32) {
    %c0_i32 = arith.constant 0 : i32
    %c0_i32_0 = arith.constant 0 : i32
    %c0_i32_1 = arith.constant 0 : i32
    %c0_i32_2 = arith.constant 0 : i32
    return %c0_i32, %c0_i32_0, %c0_i32_1 : i32, i32, i32
  }
  func.func @transform_14(%arg0: i32) -> (i32, i32, i32) {
    %c0_i32 = arith.constant 0 : i32
    %c0_i32_0 = arith.constant 0 : i32
    %c0_i32_1 = arith.constant 0 : i32
    %c0_i32_2 = arith.constant 0 : i32
    return %c0_i32, %c0_i32_0, %c0_i32_1 : i32, i32, i32
  }
  func.func @transform_15(%arg0: i32) -> (i32, i32, i32) {
    %c0_i32 = arith.constant 0 : i32
    %c0_i32_0 = arith.constant 0 : i32
    %c0_i32_1 = arith.constant 0 : i32
    %c0_i32_2 = arith.constant 0 : i32
    return %c0_i32, %c0_i32_0, %c0_i32_1 : i32, i32, i32
  }
  func.func @transform_16(%arg0: i32) -> (i32, i32) {
    %c0_i32 = arith.constant 0 : i32
    %c0_i32_0 = arith.constant 0 : i32
    %c0_i32_1 = arith.constant 0 : i32
    return %c0_i32, %c0_i32_0 : i32, i32
  }
}

module attributes {stable_mosaic.version = 11 : i64} {
  func.func @_bilstm_classifier_kernel(%arg0: i32, %arg1: memref<16x32xf32, #tpu.memory_space<vmem>>, %arg2: memref<2x32x128xf32, #tpu.memory_space<vmem>>, %arg3: memref<2x2x64x128xf32, #tpu.memory_space<vmem>>, %arg4: memref<3x2x32x128xf32, #tpu.memory_space<vmem>>, %arg5: memref<3x2x1x128xf32, #tpu.memory_space<vmem>>, %arg6: memref<64x3xf32, #tpu.memory_space<vmem>>, %arg7: memref<1x3xf32, #tpu.memory_space<vmem>>, %arg8: memref<2x3xf32, #tpu.memory_space<vmem>>, %arg9: memref<16x32xf32, #tpu.memory_space<vmem>>, %arg10: memref<16x32xf32, #tpu.memory_space<vmem>>) attributes {dimension_semantics = [#tpu.dimension_semantics<arbitrary>], iteration_bounds = array<i64: 1>, scalar_prefetch = 0 : i64, scratch_operands = 2 : i64, tpu.core_type = #tpu.core_type<tc>, window_params = [{pipeline_mode = #tpu.pipeline_mode<synchronous>, transform_indices = @transform_0, window_bounds = array<i64: 16, 32>}, {pipeline_mode = #tpu.pipeline_mode<synchronous>, transform_indices = @transform_1, window_bounds = array<i64: 2, 32, 128>}, {pipeline_mode = #tpu.pipeline_mode<synchronous>, transform_indices = @transform_2, window_bounds = array<i64: 2, 2, 64, 128>}, {pipeline_mode = #tpu.pipeline_mode<synchronous>, transform_indices = @transform_3, window_bounds = array<i64: 3, 2, 32, 128>}, {pipeline_mode = #tpu.pipeline_mode<synchronous>, transform_indices = @transform_4, window_bounds = array<i64: 3, 2, 1, 128>}, {pipeline_mode = #tpu.pipeline_mode<synchronous>, transform_indices = @transform_5, window_bounds = array<i64: 64, 3>}, {pipeline_mode = #tpu.pipeline_mode<synchronous>, transform_indices = @transform_6, window_bounds = array<i64: 1, 3>}, {pipeline_mode = #tpu.pipeline_mode<synchronous>, transform_indices = @transform_7, window_bounds = array<i64: 2, 3>}]} {
    %c0 = arith.constant 0 : index
    %c0_0 = arith.constant 0 : index
    %0 = vector.load %arg1[%c0, %c0_0] : memref<16x32xf32, #tpu.memory_space<vmem>>, vector<16x32xf32>
    %c0_1 = arith.constant 0 : index
    %c0_2 = arith.constant 0 : index
    %c0_3 = arith.constant 0 : index
    %1 = vector.load %arg2[%c0_1, %c0_2, %c0_3] : memref<2x32x128xf32, #tpu.memory_space<vmem>>, vector<1x32x128xf32>
    %2 = vector.shape_cast %1 : vector<1x32x128xf32> to vector<32x128xf32>
    %cst = arith.constant dense<0.000000e+00> : vector<16x128xf32>
    %3 = tpu.matmul %0, %2, %cst {dimension_numbers = #tpu.dot_dimension_numbers<[1], [0], [0], [1], [0, 0, 1, 1], [], []>} : vector<16x32xf32>, vector<32x128xf32>, vector<16x128xf32> -> vector<16x128xf32>
    %c1 = arith.constant 1 : index
    %c0_4 = arith.constant 0 : index
    %c0_5 = arith.constant 0 : index
    %4 = vector.load %arg2[%c1, %c0_4, %c0_5] : memref<2x32x128xf32, #tpu.memory_space<vmem>>, vector<1x32x128xf32>
    %5 = vector.shape_cast %4 : vector<1x32x128xf32> to vector<32x128xf32>
    %cst_6 = arith.constant dense<0.000000e+00> : vector<16x128xf32>
    %6 = tpu.matmul %0, %5, %cst_6 {dimension_numbers = #tpu.dot_dimension_numbers<[1], [0], [0], [1], [0, 0, 1, 1], [], []>} : vector<16x32xf32>, vector<32x128xf32>, vector<16x128xf32> -> vector<16x128xf32>
    %c0_7 = arith.constant 0 : index
    %c0_8 = arith.constant 0 : index
    %c0_9 = arith.constant 0 : index
    %c0_10 = arith.constant 0 : index
    %7 = vector.load %arg5[%c0_7, %c0_8, %c0_9, %c0_10] : memref<3x2x1x128xf32, #tpu.memory_space<vmem>>, vector<1x2x1x128xf32>
    %8 = vector.shape_cast %7 : vector<1x2x1x128xf32> to vector<2x1x128xf32>
    %c0_11 = arith.constant 0 : index
    %c0_12 = arith.constant 0 : index
    %c0_13 = arith.constant 0 : index
    %c0_14 = arith.constant 0 : index
    %9 = vector.load %arg4[%c0_11, %c0_12, %c0_13, %c0_14] : memref<3x2x32x128xf32, #tpu.memory_space<vmem>>, vector<1x2x32x128xf32>
    %10 = vector.shape_cast %9 : vector<1x2x32x128xf32> to vector<2x32x128xf32>
    %11 = vector.extract_strided_slice %8 {offsets = [0, 0, 0], sizes = [1, 1, 128], strides = [1, 1, 1]} : vector<2x1x128xf32> to vector<1x1x128xf32>
    %12 = vector.shape_cast %11 : vector<1x1x128xf32> to vector<1x128xf32>
    %13 = vector.broadcast %12 : vector<1x128xf32> to vector<16x128xf32>
    %14 = arith.addf %3, %13 : vector<16x128xf32>
    %15 = vector.extract_strided_slice %10 {offsets = [0, 0, 0], sizes = [1, 32, 128], strides = [1, 1, 1]} : vector<2x32x128xf32> to vector<1x32x128xf32>
    %16 = vector.shape_cast %15 : vector<1x32x128xf32> to vector<32x128xf32>
    %cst_15 = arith.constant 0.000000e+00 : f32
    %17 = vector.broadcast %cst_15 : f32 to vector<2x32xf32>
    %cst_16 = arith.constant 0.000000e+00 : f32
    %18 = vector.broadcast %cst_16 : f32 to vector<2x32xf32>
    %19 = vector.extract_strided_slice %14 {offsets = [0, 0], sizes = [2, 128], strides = [1, 1]} : vector<16x128xf32> to vector<2x128xf32>
    %cst_17 = arith.constant dense<0.000000e+00> : vector<2x128xf32>
    %20 = tpu.matmul %17, %16, %cst_17 {dimension_numbers = #tpu.dot_dimension_numbers<[1], [0], [0], [1], [0, 0, 1, 1], [], []>} : vector<2x32xf32>, vector<32x128xf32>, vector<2x128xf32> -> vector<2x128xf32>
    %21 = arith.addf %19, %20 : vector<2x128xf32>
    %22 = vector.extract_strided_slice %21 {offsets = [0, 0], sizes = [2, 32], strides = [1, 1]} : vector<2x128xf32> to vector<2x32xf32>
    %23 = arith.negf %22 : vector<2x32xf32>
    %24 = math.exp %23 : vector<2x32xf32>
    %cst_18 = arith.constant 1.000000e+00 : f32
    %25 = vector.broadcast %cst_18 : f32 to vector<2x32xf32>
    %26 = arith.addf %25, %24 : vector<2x32xf32>
    %27 = arith.divf %25, %26 : vector<2x32xf32>
    %28 = vector.extract_strided_slice %21 {offsets = [0, 32], sizes = [2, 32], strides = [1, 1]} : vector<2x128xf32> to vector<2x32xf32>
    %29 = arith.negf %28 : vector<2x32xf32>
    %30 = math.exp %29 : vector<2x32xf32>
    %cst_19 = arith.constant 1.000000e+00 : f32
    %31 = vector.broadcast %cst_19 : f32 to vector<2x32xf32>
    %32 = arith.addf %31, %30 : vector<2x32xf32>
    %33 = arith.divf %31, %32 : vector<2x32xf32>
    %34 = vector.extract_strided_slice %21 {offsets = [0, 64], sizes = [2, 32], strides = [1, 1]} : vector<2x128xf32> to vector<2x32xf32>
    %35 = math.tanh %34 : vector<2x32xf32>
    %36 = vector.extract_strided_slice %21 {offsets = [0, 96], sizes = [2, 32], strides = [1, 1]} : vector<2x128xf32> to vector<2x32xf32>
    %37 = arith.negf %36 : vector<2x32xf32>
    %38 = math.exp %37 : vector<2x32xf32>
    %cst_20 = arith.constant 1.000000e+00 : f32
    %39 = vector.broadcast %cst_20 : f32 to vector<2x32xf32>
    %40 = arith.addf %39, %38 : vector<2x32xf32>
    %41 = arith.divf %39, %40 : vector<2x32xf32>
    %42 = arith.mulf %33, %18 : vector<2x32xf32>
    %43 = arith.mulf %27, %35 : vector<2x32xf32>
    %44 = arith.addf %42, %43 : vector<2x32xf32>
    %45 = math.tanh %44 : vector<2x32xf32>
    %46 = arith.mulf %41, %45 : vector<2x32xf32>
    %c0_21 = arith.constant 0 : index
    %c0_22 = arith.constant 0 : index
    %47 = vector.load %arg9[%c0_21, %c0_22] : memref<16x32xf32, #tpu.memory_space<vmem>>, vector<2x32xf32>
    tpu.vector_store %arg9[%c0_21, %c0_22], %46 {strides = array<i32>} : memref<16x32xf32, #tpu.memory_space<vmem>>, vector<2x32xf32>,
    %48 = vector.extract_strided_slice %14 {offsets = [2, 0], sizes = [2, 128], strides = [1, 1]} : vector<16x128xf32> to vector<2x128xf32>
    %cst_23 = arith.constant dense<0.000000e+00> : vector<2x128xf32>
    %49 = tpu.matmul %46, %16, %cst_23 {dimension_numbers = #tpu.dot_dimension_numbers<[1], [0], [0], [1], [0, 0, 1, 1], [], []>} : vector<2x32xf32>, vector<32x128xf32>, vector<2x128xf32> -> vector<2x128xf32>
    %50 = arith.addf %48, %49 : vector<2x128xf32>
    %51 = vector.extract_strided_slice %50 {offsets = [0, 0], sizes = [2, 32], strides = [1, 1]} : vector<2x128xf32> to vector<2x32xf32>
    %52 = arith.negf %51 : vector<2x32xf32>
    %53 = math.exp %52 : vector<2x32xf32>
    %cst_24 = arith.constant 1.000000e+00 : f32
    %54 = vector.broadcast %cst_24 : f32 to vector<2x32xf32>
    %55 = arith.addf %54, %53 : vector<2x32xf32>
    %56 = arith.divf %54, %55 : vector<2x32xf32>
    %57 = vector.extract_strided_slice %50 {offsets = [0, 32], sizes = [2, 32], strides = [1, 1]} : vector<2x128xf32> to vector<2x32xf32>
    %58 = arith.negf %57 : vector<2x32xf32>
    %59 = math.exp %58 : vector<2x32xf32>
    %cst_25 = arith.constant 1.000000e+00 : f32
    %60 = vector.broadcast %cst_25 : f32 to vector<2x32xf32>
    %61 = arith.addf %60, %59 : vector<2x32xf32>
    %62 = arith.divf %60, %61 : vector<2x32xf32>
    %63 = vector.extract_strided_slice %50 {offsets = [0, 64], sizes = [2, 32], strides = [1, 1]} : vector<2x128xf32> to vector<2x32xf32>
    %64 = math.tanh %63 : vector<2x32xf32>
    %65 = vector.extract_strided_slice %50 {offsets = [0, 96], sizes = [2, 32], strides = [1, 1]} : vector<2x128xf32> to vector<2x32xf32>
    %66 = arith.negf %65 : vector<2x32xf32>
    %67 = math.exp %66 : vector<2x32xf32>
    %cst_26 = arith.constant 1.000000e+00 : f32
    %68 = vector.broadcast %cst_26 : f32 to vector<2x32xf32>
    %69 = arith.addf %68, %67 : vector<2x32xf32>
    %70 = arith.divf %68, %69 : vector<2x32xf32>
    %71 = arith.mulf %62, %44 : vector<2x32xf32>
    %72 = arith.mulf %56, %64 : vector<2x32xf32>
    %73 = arith.addf %71, %72 : vector<2x32xf32>
    %74 = math.tanh %73 : vector<2x32xf32>
    %75 = arith.mulf %70, %74 : vector<2x32xf32>
    %c2 = arith.constant 2 : index
    %c0_27 = arith.constant 0 : index
    %76 = vector.load %arg9[%c2, %c0_27] : memref<16x32xf32, #tpu.memory_space<vmem>>, vector<2x32xf32>
    tpu.vector_store %arg9[%c2, %c0_27], %75 {strides = array<i32>} : memref<16x32xf32, #tpu.memory_space<vmem>>, vector<2x32xf32>,
    %77 = vector.extract_strided_slice %14 {offsets = [4, 0], sizes = [2, 128], strides = [1, 1]} : vector<16x128xf32> to vector<2x128xf32>
    %cst_28 = arith.constant dense<0.000000e+00> : vector<2x128xf32>
    %78 = tpu.matmul %75, %16, %cst_28 {dimension_numbers = #tpu.dot_dimension_numbers<[1], [0], [0], [1], [0, 0, 1, 1], [], []>} : vector<2x32xf32>, vector<32x128xf32>, vector<2x128xf32> -> vector<2x128xf32>
    %79 = arith.addf %77, %78 : vector<2x128xf32>
    %80 = vector.extract_strided_slice %79 {offsets = [0, 0], sizes = [2, 32], strides = [1, 1]} : vector<2x128xf32> to vector<2x32xf32>
    %81 = arith.negf %80 : vector<2x32xf32>
    %82 = math.exp %81 : vector<2x32xf32>
    %cst_29 = arith.constant 1.000000e+00 : f32
    %83 = vector.broadcast %cst_29 : f32 to vector<2x32xf32>
    %84 = arith.addf %83, %82 : vector<2x32xf32>
    %85 = arith.divf %83, %84 : vector<2x32xf32>
    %86 = vector.extract_strided_slice %79 {offsets = [0, 32], sizes = [2, 32], strides = [1, 1]} : vector<2x128xf32> to vector<2x32xf32>
    %87 = arith.negf %86 : vector<2x32xf32>
    %88 = math.exp %87 : vector<2x32xf32>
    %cst_30 = arith.constant 1.000000e+00 : f32
    %89 = vector.broadcast %cst_30 : f32 to vector<2x32xf32>
    %90 = arith.addf %89, %88 : vector<2x32xf32>
    %91 = arith.divf %89, %90 : vector<2x32xf32>
    %92 = vector.extract_strided_slice %79 {offsets = [0, 64], sizes = [2, 32], strides = [1, 1]} : vector<2x128xf32> to vector<2x32xf32>
    %93 = math.tanh %92 : vector<2x32xf32>
    %94 = vector.extract_strided_slice %79 {offsets = [0, 96], sizes = [2, 32], strides = [1, 1]} : vector<2x128xf32> to vector<2x32xf32>
    %95 = arith.negf %94 : vector<2x32xf32>
    %96 = math.exp %95 : vector<2x32xf32>
    %cst_31 = arith.constant 1.000000e+00 : f32
    %97 = vector.broadcast %cst_31 : f32 to vector<2x32xf32>
    %98 = arith.addf %97, %96 : vector<2x32xf32>
    %99 = arith.divf %97, %98 : vector<2x32xf32>
    %100 = arith.mulf %91, %73 : vector<2x32xf32>
    %101 = arith.mulf %85, %93 : vector<2x32xf32>
    %102 = arith.addf %100, %101 : vector<2x32xf32>
    %103 = math.tanh %102 : vector<2x32xf32>
    %104 = arith.mulf %99, %103 : vector<2x32xf32>
    %c4 = arith.constant 4 : index
    %c0_32 = arith.constant 0 : index
    %105 = vector.load %arg9[%c4, %c0_32] : memref<16x32xf32, #tpu.memory_space<vmem>>, vector<2x32xf32>
    tpu.vector_store %arg9[%c4, %c0_32], %104 {strides = array<i32>} : memref<16x32xf32, #tpu.memory_space<vmem>>, vector<2x32xf32>,
    %106 = vector.extract_strided_slice %14 {offsets = [6, 0], sizes = [2, 128], strides = [1, 1]} : vector<16x128xf32> to vector<2x128xf32>
    %cst_33 = arith.constant dense<0.000000e+00> : vector<2x128xf32>
    %107 = tpu.matmul %104, %16, %cst_33 {dimension_numbers = #tpu.dot_dimension_numbers<[1], [0], [0], [1], [0, 0, 1, 1], [], []>} : vector<2x32xf32>, vector<32x128xf32>, vector<2x128xf32> -> vector<2x128xf32>
    %108 = arith.addf %106, %107 : vector<2x128xf32>
    %109 = vector.extract_strided_slice %108 {offsets = [0, 0], sizes = [2, 32], strides = [1, 1]} : vector<2x128xf32> to vector<2x32xf32>
    %110 = arith.negf %109 : vector<2x32xf32>
    %111 = math.exp %110 : vector<2x32xf32>
    %cst_34 = arith.constant 1.000000e+00 : f32
    %112 = vector.broadcast %cst_34 : f32 to vector<2x32xf32>
    %113 = arith.addf %112, %111 : vector<2x32xf32>
    %114 = arith.divf %112, %113 : vector<2x32xf32>
    %115 = vector.extract_strided_slice %108 {offsets = [0, 32], sizes = [2, 32], strides = [1, 1]} : vector<2x128xf32> to vector<2x32xf32>
    %116 = arith.negf %115 : vector<2x32xf32>
    %117 = math.exp %116 : vector<2x32xf32>
    %cst_35 = arith.constant 1.000000e+00 : f32
    %118 = vector.broadcast %cst_35 : f32 to vector<2x32xf32>
    %119 = arith.addf %118, %117 : vector<2x32xf32>
    %120 = arith.divf %118, %119 : vector<2x32xf32>
    %121 = vector.extract_strided_slice %108 {offsets = [0, 64], sizes = [2, 32], strides = [1, 1]} : vector<2x128xf32> to vector<2x32xf32>
    %122 = math.tanh %121 : vector<2x32xf32>
    %123 = vector.extract_strided_slice %108 {offsets = [0, 96], sizes = [2, 32], strides = [1, 1]} : vector<2x128xf32> to vector<2x32xf32>
    %124 = arith.negf %123 : vector<2x32xf32>
    %125 = math.exp %124 : vector<2x32xf32>
    %cst_36 = arith.constant 1.000000e+00 : f32
    %126 = vector.broadcast %cst_36 : f32 to vector<2x32xf32>
    %127 = arith.addf %126, %125 : vector<2x32xf32>
    %128 = arith.divf %126, %127 : vector<2x32xf32>
    %129 = arith.mulf %120, %102 : vector<2x32xf32>
    %130 = arith.mulf %114, %122 : vector<2x32xf32>
    %131 = arith.addf %129, %130 : vector<2x32xf32>
    %132 = math.tanh %131 : vector<2x32xf32>
    %133 = arith.mulf %128, %132 : vector<2x32xf32>
    %c6 = arith.constant 6 : index
    %c0_37 = arith.constant 0 : index
    %134 = vector.load %arg9[%c6, %c0_37] : memref<16x32xf32, #tpu.memory_space<vmem>>, vector<2x32xf32>
    tpu.vector_store %arg9[%c6, %c0_37], %133 {strides = array<i32>} : memref<16x32xf32, #tpu.memory_space<vmem>>, vector<2x32xf32>,
    %135 = vector.extract_strided_slice %14 {offsets = [8, 0], sizes = [2, 128], strides = [1, 1]} : vector<16x128xf32> to vector<2x128xf32>
    %cst_38 = arith.constant dense<0.000000e+00> : vector<2x128xf32>
    %136 = tpu.matmul %133, %16, %cst_38 {dimension_numbers = #tpu.dot_dimension_numbers<[1], [0], [0], [1], [0, 0, 1, 1], [], []>} : vector<2x32xf32>, vector<32x128xf32>, vector<2x128xf32> -> vector<2x128xf32>
    %137 = arith.addf %135, %136 : vector<2x128xf32>
    %138 = vector.extract_strided_slice %137 {offsets = [0, 0], sizes = [2, 32], strides = [1, 1]} : vector<2x128xf32> to vector<2x32xf32>
    %139 = arith.negf %138 : vector<2x32xf32>
    %140 = math.exp %139 : vector<2x32xf32>
    %cst_39 = arith.constant 1.000000e+00 : f32
    %141 = vector.broadcast %cst_39 : f32 to vector<2x32xf32>
    %142 = arith.addf %141, %140 : vector<2x32xf32>
    %143 = arith.divf %141, %142 : vector<2x32xf32>
    %144 = vector.extract_strided_slice %137 {offsets = [0, 32], sizes = [2, 32], strides = [1, 1]} : vector<2x128xf32> to vector<2x32xf32>
    %145 = arith.negf %144 : vector<2x32xf32>
    %146 = math.exp %145 : vector<2x32xf32>
    %cst_40 = arith.constant 1.000000e+00 : f32
    %147 = vector.broadcast %cst_40 : f32 to vector<2x32xf32>
    %148 = arith.addf %147, %146 : vector<2x32xf32>
    %149 = arith.divf %147, %148 : vector<2x32xf32>
    %150 = vector.extract_strided_slice %137 {offsets = [0, 64], sizes = [2, 32], strides = [1, 1]} : vector<2x128xf32> to vector<2x32xf32>
    %151 = math.tanh %150 : vector<2x32xf32>
    %152 = vector.extract_strided_slice %137 {offsets = [0, 96], sizes = [2, 32], strides = [1, 1]} : vector<2x128xf32> to vector<2x32xf32>
    %153 = arith.negf %152 : vector<2x32xf32>
    %154 = math.exp %153 : vector<2x32xf32>
    %cst_41 = arith.constant 1.000000e+00 : f32
    %155 = vector.broadcast %cst_41 : f32 to vector<2x32xf32>
    %156 = arith.addf %155, %154 : vector<2x32xf32>
    %157 = arith.divf %155, %156 : vector<2x32xf32>
    %158 = arith.mulf %149, %131 : vector<2x32xf32>
    %159 = arith.mulf %143, %151 : vector<2x32xf32>
    %160 = arith.addf %158, %159 : vector<2x32xf32>
    %161 = math.tanh %160 : vector<2x32xf32>
    %162 = arith.mulf %157, %161 : vector<2x32xf32>
    %c8 = arith.constant 8 : index
    %c0_42 = arith.constant 0 : index
    %163 = vector.load %arg9[%c8, %c0_42] : memref<16x32xf32, #tpu.memory_space<vmem>>, vector<2x32xf32>
    tpu.vector_store %arg9[%c8, %c0_42], %162 {strides = array<i32>} : memref<16x32xf32, #tpu.memory_space<vmem>>, vector<2x32xf32>,
    %164 = vector.extract_strided_slice %14 {offsets = [10, 0], sizes = [2, 128], strides = [1, 1]} : vector<16x128xf32> to vector<2x128xf32>
    %cst_43 = arith.constant dense<0.000000e+00> : vector<2x128xf32>
    %165 = tpu.matmul %162, %16, %cst_43 {dimension_numbers = #tpu.dot_dimension_numbers<[1], [0], [0], [1], [0, 0, 1, 1], [], []>} : vector<2x32xf32>, vector<32x128xf32>, vector<2x128xf32> -> vector<2x128xf32>
    %166 = arith.addf %164, %165 : vector<2x128xf32>
    %167 = vector.extract_strided_slice %166 {offsets = [0, 0], sizes = [2, 32], strides = [1, 1]} : vector<2x128xf32> to vector<2x32xf32>
    %168 = arith.negf %167 : vector<2x32xf32>
    %169 = math.exp %168 : vector<2x32xf32>
    %cst_44 = arith.constant 1.000000e+00 : f32
    %170 = vector.broadcast %cst_44 : f32 to vector<2x32xf32>
    %171 = arith.addf %170, %169 : vector<2x32xf32>
    %172 = arith.divf %170, %171 : vector<2x32xf32>
    %173 = vector.extract_strided_slice %166 {offsets = [0, 32], sizes = [2, 32], strides = [1, 1]} : vector<2x128xf32> to vector<2x32xf32>
    %174 = arith.negf %173 : vector<2x32xf32>
    %175 = math.exp %174 : vector<2x32xf32>
    %cst_45 = arith.constant 1.000000e+00 : f32
    %176 = vector.broadcast %cst_45 : f32 to vector<2x32xf32>
    %177 = arith.addf %176, %175 : vector<2x32xf32>
    %178 = arith.divf %176, %177 : vector<2x32xf32>
    %179 = vector.extract_strided_slice %166 {offsets = [0, 64], sizes = [2, 32], strides = [1, 1]} : vector<2x128xf32> to vector<2x32xf32>
    %180 = math.tanh %179 : vector<2x32xf32>
    %181 = vector.extract_strided_slice %166 {offsets = [0, 96], sizes = [2, 32], strides = [1, 1]} : vector<2x128xf32> to vector<2x32xf32>
    %182 = arith.negf %181 : vector<2x32xf32>
    %183 = math.exp %182 : vector<2x32xf32>
    %cst_46 = arith.constant 1.000000e+00 : f32
    %184 = vector.broadcast %cst_46 : f32 to vector<2x32xf32>
    %185 = arith.addf %184, %183 : vector<2x32xf32>
    %186 = arith.divf %184, %185 : vector<2x32xf32>
    %187 = arith.mulf %178, %160 : vector<2x32xf32>
    %188 = arith.mulf %172, %180 : vector<2x32xf32>
    %189 = arith.addf %187, %188 : vector<2x32xf32>
    %190 = math.tanh %189 : vector<2x32xf32>
    %191 = arith.mulf %186, %190 : vector<2x32xf32>
    %c10 = arith.constant 10 : index
    %c0_47 = arith.constant 0 : index
    %192 = vector.load %arg9[%c10, %c0_47] : memref<16x32xf32, #tpu.memory_space<vmem>>, vector<2x32xf32>
    tpu.vector_store %arg9[%c10, %c0_47], %191 {strides = array<i32>} : memref<16x32xf32, #tpu.memory_space<vmem>>, vector<2x32xf32>,
    %193 = vector.extract_strided_slice %14 {offsets = [12, 0], sizes = [2, 128], strides = [1, 1]} : vector<16x128xf32> to vector<2x128xf32>
    %cst_48 = arith.constant dense<0.000000e+00> : vector<2x128xf32>
    %194 = tpu.matmul %191, %16, %cst_48 {dimension_numbers = #tpu.dot_dimension_numbers<[1], [0], [0], [1], [0, 0, 1, 1], [], []>} : vector<2x32xf32>, vector<32x128xf32>, vector<2x128xf32> -> vector<2x128xf32>
    %195 = arith.addf %193, %194 : vector<2x128xf32>
    %196 = vector.extract_strided_slice %195 {offsets = [0, 0], sizes = [2, 32], strides = [1, 1]} : vector<2x128xf32> to vector<2x32xf32>
    %197 = arith.negf %196 : vector<2x32xf32>
    %198 = math.exp %197 : vector<2x32xf32>
    %cst_49 = arith.constant 1.000000e+00 : f32
    %199 = vector.broadcast %cst_49 : f32 to vector<2x32xf32>
    %200 = arith.addf %199, %198 : vector<2x32xf32>
    %201 = arith.divf %199, %200 : vector<2x32xf32>
    %202 = vector.extract_strided_slice %195 {offsets = [0, 32], sizes = [2, 32], strides = [1, 1]} : vector<2x128xf32> to vector<2x32xf32>
    %203 = arith.negf %202 : vector<2x32xf32>
    %204 = math.exp %203 : vector<2x32xf32>
    %cst_50 = arith.constant 1.000000e+00 : f32
    %205 = vector.broadcast %cst_50 : f32 to vector<2x32xf32>
    %206 = arith.addf %205, %204 : vector<2x32xf32>
    %207 = arith.divf %205, %206 : vector<2x32xf32>
    %208 = vector.extract_strided_slice %195 {offsets = [0, 64], sizes = [2, 32], strides = [1, 1]} : vector<2x128xf32> to vector<2x32xf32>
    %209 = math.tanh %208 : vector<2x32xf32>
    %210 = vector.extract_strided_slice %195 {offsets = [0, 96], sizes = [2, 32], strides = [1, 1]} : vector<2x128xf32> to vector<2x32xf32>
    %211 = arith.negf %210 : vector<2x32xf32>
    %212 = math.exp %211 : vector<2x32xf32>
    %cst_51 = arith.constant 1.000000e+00 : f32
    %213 = vector.broadcast %cst_51 : f32 to vector<2x32xf32>
    %214 = arith.addf %213, %212 : vector<2x32xf32>
    %215 = arith.divf %213, %214 : vector<2x32xf32>
    %216 = arith.mulf %207, %189 : vector<2x32xf32>
    %217 = arith.mulf %201, %209 : vector<2x32xf32>
    %218 = arith.addf %216, %217 : vector<2x32xf32>
    %219 = math.tanh %218 : vector<2x32xf32>
    %220 = arith.mulf %215, %219 : vector<2x32xf32>
    %c12 = arith.constant 12 : index
    %c0_52 = arith.constant 0 : index
    %221 = vector.load %arg9[%c12, %c0_52] : memref<16x32xf32, #tpu.memory_space<vmem>>, vector<2x32xf32>
    tpu.vector_store %arg9[%c12, %c0_52], %220 {strides = array<i32>} : memref<16x32xf32, #tpu.memory_space<vmem>>, vector<2x32xf32>,
    %222 = vector.extract_strided_slice %14 {offsets = [14, 0], sizes = [2, 128], strides = [1, 1]} : vector<16x128xf32> to vector<2x128xf32>
    %cst_53 = arith.constant dense<0.000000e+00> : vector<2x128xf32>
    %223 = tpu.matmul %220, %16, %cst_53 {dimension_numbers = #tpu.dot_dimension_numbers<[1], [0], [0], [1], [0, 0, 1, 1], [], []>} : vector<2x32xf32>, vector<32x128xf32>, vector<2x128xf32> -> vector<2x128xf32>
    %224 = arith.addf %222, %223 : vector<2x128xf32>
    %225 = vector.extract_strided_slice %224 {offsets = [0, 0], sizes = [2, 32], strides = [1, 1]} : vector<2x128xf32> to vector<2x32xf32>
    %226 = arith.negf %225 : vector<2x32xf32>
    %227 = math.exp %226 : vector<2x32xf32>
    %cst_54 = arith.constant 1.000000e+00 : f32
    %228 = vector.broadcast %cst_54 : f32 to vector<2x32xf32>
    %229 = arith.addf %228, %227 : vector<2x32xf32>
    %230 = arith.divf %228, %229 : vector<2x32xf32>
    %231 = vector.extract_strided_slice %224 {offsets = [0, 32], sizes = [2, 32], strides = [1, 1]} : vector<2x128xf32> to vector<2x32xf32>
    %232 = arith.negf %231 : vector<2x32xf32>
    %233 = math.exp %232 : vector<2x32xf32>
    %cst_55 = arith.constant 1.000000e+00 : f32
    %234 = vector.broadcast %cst_55 : f32 to vector<2x32xf32>
    %235 = arith.addf %234, %233 : vector<2x32xf32>
    %236 = arith.divf %234, %235 : vector<2x32xf32>
    %237 = vector.extract_strided_slice %224 {offsets = [0, 64], sizes = [2, 32], strides = [1, 1]} : vector<2x128xf32> to vector<2x32xf32>
    %238 = math.tanh %237 : vector<2x32xf32>
    %239 = vector.extract_strided_slice %224 {offsets = [0, 96], sizes = [2, 32], strides = [1, 1]} : vector<2x128xf32> to vector<2x32xf32>
    %240 = arith.negf %239 : vector<2x32xf32>
    %241 = math.exp %240 : vector<2x32xf32>
    %cst_56 = arith.constant 1.000000e+00 : f32
    %242 = vector.broadcast %cst_56 : f32 to vector<2x32xf32>
    %243 = arith.addf %242, %241 : vector<2x32xf32>
    %244 = arith.divf %242, %243 : vector<2x32xf32>
    %245 = arith.mulf %236, %218 : vector<2x32xf32>
    %246 = arith.mulf %230, %238 : vector<2x32xf32>
    %247 = arith.addf %245, %246 : vector<2x32xf32>
    %248 = math.tanh %247 : vector<2x32xf32>
    %249 = arith.mulf %244, %248 : vector<2x32xf32>
    %c14 = arith.constant 14 : index
    %c0_57 = arith.constant 0 : index
    %250 = vector.load %arg9[%c14, %c0_57] : memref<16x32xf32, #tpu.memory_space<vmem>>, vector<2x32xf32>
    tpu.vector_store %arg9[%c14, %c0_57], %249 {strides = array<i32>} : memref<16x32xf32, #tpu.memory_space<vmem>>, vector<2x32xf32>,
    %251 = vector.extract_strided_slice %8 {offsets = [1, 0, 0], sizes = [1, 1, 128], strides = [1, 1, 1]} : vector<2x1x128xf32> to vector<1x1x128xf32>
    %252 = vector.shape_cast %251 : vector<1x1x128xf32> to vector<1x128xf32>
    %253 = vector.broadcast %252 : vector<1x128xf32> to vector<16x128xf32>
    %254 = arith.addf %6, %253 : vector<16x128xf32>
    %255 = vector.extract_strided_slice %10 {offsets = [1, 0, 0], sizes = [1, 32, 128], strides = [1, 1, 1]} : vector<2x32x128xf32> to vector<1x32x128xf32>
    %256 = vector.shape_cast %255 : vector<1x32x128xf32> to vector<32x128xf32>
    %cst_58 = arith.constant 0.000000e+00 : f32
    %257 = vector.broadcast %cst_58 : f32 to vector<2x32xf32>
    %cst_59 = arith.constant 0.000000e+00 : f32
    %258 = vector.broadcast %cst_59 : f32 to vector<2x32xf32>
    %259 = vector.extract_strided_slice %254 {offsets = [14, 0], sizes = [2, 128], strides = [1, 1]} : vector<16x128xf32> to vector<2x128xf32>
    %cst_60 = arith.constant dense<0.000000e+00> : vector<2x128xf32>
    %260 = tpu.matmul %257, %256, %cst_60 {dimension_numbers = #tpu.dot_dimension_numbers<[1], [0], [0], [1], [0, 0, 1, 1], [], []>} : vector<2x32xf32>, vector<32x128xf32>, vector<2x128xf32> -> vector<2x128xf32>
    %261 = arith.addf %259, %260 : vector<2x128xf32>
    %262 = vector.extract_strided_slice %261 {offsets = [0, 0], sizes = [2, 32], strides = [1, 1]} : vector<2x128xf32> to vector<2x32xf32>
    %263 = arith.negf %262 : vector<2x32xf32>
    %264 = math.exp %263 : vector<2x32xf32>
    %cst_61 = arith.constant 1.000000e+00 : f32
    %265 = vector.broadcast %cst_61 : f32 to vector<2x32xf32>
    %266 = arith.addf %265, %264 : vector<2x32xf32>
    %267 = arith.divf %265, %266 : vector<2x32xf32>
    %268 = vector.extract_strided_slice %261 {offsets = [0, 32], sizes = [2, 32], strides = [1, 1]} : vector<2x128xf32> to vector<2x32xf32>
    %269 = arith.negf %268 : vector<2x32xf32>
    %270 = math.exp %269 : vector<2x32xf32>
    %cst_62 = arith.constant 1.000000e+00 : f32
    %271 = vector.broadcast %cst_62 : f32 to vector<2x32xf32>
    %272 = arith.addf %271, %270 : vector<2x32xf32>
    %273 = arith.divf %271, %272 : vector<2x32xf32>
    %274 = vector.extract_strided_slice %261 {offsets = [0, 64], sizes = [2, 32], strides = [1, 1]} : vector<2x128xf32> to vector<2x32xf32>
    %275 = math.tanh %274 : vector<2x32xf32>
    %276 = vector.extract_strided_slice %261 {offsets = [0, 96], sizes = [2, 32], strides = [1, 1]} : vector<2x128xf32> to vector<2x32xf32>
    %277 = arith.negf %276 : vector<2x32xf32>
    %278 = math.exp %277 : vector<2x32xf32>
    %cst_63 = arith.constant 1.000000e+00 : f32
    %279 = vector.broadcast %cst_63 : f32 to vector<2x32xf32>
    %280 = arith.addf %279, %278 : vector<2x32xf32>
    %281 = arith.divf %279, %280 : vector<2x32xf32>
    %282 = arith.mulf %273, %258 : vector<2x32xf32>
    %283 = arith.mulf %267, %275 : vector<2x32xf32>
    %284 = arith.addf %282, %283 : vector<2x32xf32>
    %285 = math.tanh %284 : vector<2x32xf32>
    %286 = arith.mulf %281, %285 : vector<2x32xf32>
    %c14_64 = arith.constant 14 : index
    %c0_65 = arith.constant 0 : index
    %287 = vector.load %arg10[%c14_64, %c0_65] : memref<16x32xf32, #tpu.memory_space<vmem>>, vector<2x32xf32>
    tpu.vector_store %arg10[%c14_64, %c0_65], %286 {strides = array<i32>} : memref<16x32xf32, #tpu.memory_space<vmem>>, vector<2x32xf32>,
    %288 = vector.extract_strided_slice %254 {offsets = [12, 0], sizes = [2, 128], strides = [1, 1]} : vector<16x128xf32> to vector<2x128xf32>
    %cst_66 = arith.constant dense<0.000000e+00> : vector<2x128xf32>
    %289 = tpu.matmul %286, %256, %cst_66 {dimension_numbers = #tpu.dot_dimension_numbers<[1], [0], [0], [1], [0, 0, 1, 1], [], []>} : vector<2x32xf32>, vector<32x128xf32>, vector<2x128xf32> -> vector<2x128xf32>
    %290 = arith.addf %288, %289 : vector<2x128xf32>
    %291 = vector.extract_strided_slice %290 {offsets = [0, 0], sizes = [2, 32], strides = [1, 1]} : vector<2x128xf32> to vector<2x32xf32>
    %292 = arith.negf %291 : vector<2x32xf32>
    %293 = math.exp %292 : vector<2x32xf32>
    %cst_67 = arith.constant 1.000000e+00 : f32
    %294 = vector.broadcast %cst_67 : f32 to vector<2x32xf32>
    %295 = arith.addf %294, %293 : vector<2x32xf32>
    %296 = arith.divf %294, %295 : vector<2x32xf32>
    %297 = vector.extract_strided_slice %290 {offsets = [0, 32], sizes = [2, 32], strides = [1, 1]} : vector<2x128xf32> to vector<2x32xf32>
    %298 = arith.negf %297 : vector<2x32xf32>
    %299 = math.exp %298 : vector<2x32xf32>
    %cst_68 = arith.constant 1.000000e+00 : f32
    %300 = vector.broadcast %cst_68 : f32 to vector<2x32xf32>
    %301 = arith.addf %300, %299 : vector<2x32xf32>
    %302 = arith.divf %300, %301 : vector<2x32xf32>
    %303 = vector.extract_strided_slice %290 {offsets = [0, 64], sizes = [2, 32], strides = [1, 1]} : vector<2x128xf32> to vector<2x32xf32>
    %304 = math.tanh %303 : vector<2x32xf32>
    %305 = vector.extract_strided_slice %290 {offsets = [0, 96], sizes = [2, 32], strides = [1, 1]} : vector<2x128xf32> to vector<2x32xf32>
    %306 = arith.negf %305 : vector<2x32xf32>
    %307 = math.exp %306 : vector<2x32xf32>
    %cst_69 = arith.constant 1.000000e+00 : f32
    %308 = vector.broadcast %cst_69 : f32 to vector<2x32xf32>
    %309 = arith.addf %308, %307 : vector<2x32xf32>
    %310 = arith.divf %308, %309 : vector<2x32xf32>
    %311 = arith.mulf %302, %284 : vector<2x32xf32>
    %312 = arith.mulf %296, %304 : vector<2x32xf32>
    %313 = arith.addf %311, %312 : vector<2x32xf32>
    %314 = math.tanh %313 : vector<2x32xf32>
    %315 = arith.mulf %310, %314 : vector<2x32xf32>
    %c12_70 = arith.constant 12 : index
    %c0_71 = arith.constant 0 : index
    %316 = vector.load %arg10[%c12_70, %c0_71] : memref<16x32xf32, #tpu.memory_space<vmem>>, vector<2x32xf32>
    tpu.vector_store %arg10[%c12_70, %c0_71], %315 {strides = array<i32>} : memref<16x32xf32, #tpu.memory_space<vmem>>, vector<2x32xf32>,
    %317 = vector.extract_strided_slice %254 {offsets = [10, 0], sizes = [2, 128], strides = [1, 1]} : vector<16x128xf32> to vector<2x128xf32>
    %cst_72 = arith.constant dense<0.000000e+00> : vector<2x128xf32>
    %318 = tpu.matmul %315, %256, %cst_72 {dimension_numbers = #tpu.dot_dimension_numbers<[1], [0], [0], [1], [0, 0, 1, 1], [], []>} : vector<2x32xf32>, vector<32x128xf32>, vector<2x128xf32> -> vector<2x128xf32>
    %319 = arith.addf %317, %318 : vector<2x128xf32>
    %320 = vector.extract_strided_slice %319 {offsets = [0, 0], sizes = [2, 32], strides = [1, 1]} : vector<2x128xf32> to vector<2x32xf32>
    %321 = arith.negf %320 : vector<2x32xf32>
    %322 = math.exp %321 : vector<2x32xf32>
    %cst_73 = arith.constant 1.000000e+00 : f32
    %323 = vector.broadcast %cst_73 : f32 to vector<2x32xf32>
    %324 = arith.addf %323, %322 : vector<2x32xf32>
    %325 = arith.divf %323, %324 : vector<2x32xf32>
    %326 = vector.extract_strided_slice %319 {offsets = [0, 32], sizes = [2, 32], strides = [1, 1]} : vector<2x128xf32> to vector<2x32xf32>
    %327 = arith.negf %326 : vector<2x32xf32>
    %328 = math.exp %327 : vector<2x32xf32>
    %cst_74 = arith.constant 1.000000e+00 : f32
    %329 = vector.broadcast %cst_74 : f32 to vector<2x32xf32>
    %330 = arith.addf %329, %328 : vector<2x32xf32>
    %331 = arith.divf %329, %330 : vector<2x32xf32>
    %332 = vector.extract_strided_slice %319 {offsets = [0, 64], sizes = [2, 32], strides = [1, 1]} : vector<2x128xf32> to vector<2x32xf32>
    %333 = math.tanh %332 : vector<2x32xf32>
    %334 = vector.extract_strided_slice %319 {offsets = [0, 96], sizes = [2, 32], strides = [1, 1]} : vector<2x128xf32> to vector<2x32xf32>
    %335 = arith.negf %334 : vector<2x32xf32>
    %336 = math.exp %335 : vector<2x32xf32>
    %cst_75 = arith.constant 1.000000e+00 : f32
    %337 = vector.broadcast %cst_75 : f32 to vector<2x32xf32>
    %338 = arith.addf %337, %336 : vector<2x32xf32>
    %339 = arith.divf %337, %338 : vector<2x32xf32>
    %340 = arith.mulf %331, %313 : vector<2x32xf32>
    %341 = arith.mulf %325, %333 : vector<2x32xf32>
    %342 = arith.addf %340, %341 : vector<2x32xf32>
    %343 = math.tanh %342 : vector<2x32xf32>
    %344 = arith.mulf %339, %343 : vector<2x32xf32>
    %c10_76 = arith.constant 10 : index
    %c0_77 = arith.constant 0 : index
    %345 = vector.load %arg10[%c10_76, %c0_77] : memref<16x32xf32, #tpu.memory_space<vmem>>, vector<2x32xf32>
    tpu.vector_store %arg10[%c10_76, %c0_77], %344 {strides = array<i32>} : memref<16x32xf32, #tpu.memory_space<vmem>>, vector<2x32xf32>,
    %346 = vector.extract_strided_slice %254 {offsets = [8, 0], sizes = [2, 128], strides = [1, 1]} : vector<16x128xf32> to vector<2x128xf32>
    %cst_78 = arith.constant dense<0.000000e+00> : vector<2x128xf32>
    %347 = tpu.matmul %344, %256, %cst_78 {dimension_numbers = #tpu.dot_dimension_numbers<[1], [0], [0], [1], [0, 0, 1, 1], [], []>} : vector<2x32xf32>, vector<32x128xf32>, vector<2x128xf32> -> vector<2x128xf32>
    %348 = arith.addf %346, %347 : vector<2x128xf32>
    %349 = vector.extract_strided_slice %348 {offsets = [0, 0], sizes = [2, 32], strides = [1, 1]} : vector<2x128xf32> to vector<2x32xf32>
    %350 = arith.negf %349 : vector<2x32xf32>
    %351 = math.exp %350 : vector<2x32xf32>
    %cst_79 = arith.constant 1.000000e+00 : f32
    %352 = vector.broadcast %cst_79 : f32 to vector<2x32xf32>
    %353 = arith.addf %352, %351 : vector<2x32xf32>
    %354 = arith.divf %352, %353 : vector<2x32xf32>
    %355 = vector.extract_strided_slice %348 {offsets = [0, 32], sizes = [2, 32], strides = [1, 1]} : vector<2x128xf32> to vector<2x32xf32>
    %356 = arith.negf %355 : vector<2x32xf32>
    %357 = math.exp %356 : vector<2x32xf32>
    %cst_80 = arith.constant 1.000000e+00 : f32
    %358 = vector.broadcast %cst_80 : f32 to vector<2x32xf32>
    %359 = arith.addf %358, %357 : vector<2x32xf32>
    %360 = arith.divf %358, %359 : vector<2x32xf32>
    %361 = vector.extract_strided_slice %348 {offsets = [0, 64], sizes = [2, 32], strides = [1, 1]} : vector<2x128xf32> to vector<2x32xf32>
    %362 = math.tanh %361 : vector<2x32xf32>
    %363 = vector.extract_strided_slice %348 {offsets = [0, 96], sizes = [2, 32], strides = [1, 1]} : vector<2x128xf32> to vector<2x32xf32>
    %364 = arith.negf %363 : vector<2x32xf32>
    %365 = math.exp %364 : vector<2x32xf32>
    %cst_81 = arith.constant 1.000000e+00 : f32
    %366 = vector.broadcast %cst_81 : f32 to vector<2x32xf32>
    %367 = arith.addf %366, %365 : vector<2x32xf32>
    %368 = arith.divf %366, %367 : vector<2x32xf32>
    %369 = arith.mulf %360, %342 : vector<2x32xf32>
    %370 = arith.mulf %354, %362 : vector<2x32xf32>
    %371 = arith.addf %369, %370 : vector<2x32xf32>
    %372 = math.tanh %371 : vector<2x32xf32>
    %373 = arith.mulf %368, %372 : vector<2x32xf32>
    %c8_82 = arith.constant 8 : index
    %c0_83 = arith.constant 0 : index
    %374 = vector.load %arg10[%c8_82, %c0_83] : memref<16x32xf32, #tpu.memory_space<vmem>>, vector<2x32xf32>
    tpu.vector_store %arg10[%c8_82, %c0_83], %373 {strides = array<i32>} : memref<16x32xf32, #tpu.memory_space<vmem>>, vector<2x32xf32>,
    %375 = vector.extract_strided_slice %254 {offsets = [6, 0], sizes = [2, 128], strides = [1, 1]} : vector<16x128xf32> to vector<2x128xf32>
    %cst_84 = arith.constant dense<0.000000e+00> : vector<2x128xf32>
    %376 = tpu.matmul %373, %256, %cst_84 {dimension_numbers = #tpu.dot_dimension_numbers<[1], [0], [0], [1], [0, 0, 1, 1], [], []>} : vector<2x32xf32>, vector<32x128xf32>, vector<2x128xf32> -> vector<2x128xf32>
    %377 = arith.addf %375, %376 : vector<2x128xf32>
    %378 = vector.extract_strided_slice %377 {offsets = [0, 0], sizes = [2, 32], strides = [1, 1]} : vector<2x128xf32> to vector<2x32xf32>
    %379 = arith.negf %378 : vector<2x32xf32>
    %380 = math.exp %379 : vector<2x32xf32>
    %cst_85 = arith.constant 1.000000e+00 : f32
    %381 = vector.broadcast %cst_85 : f32 to vector<2x32xf32>
    %382 = arith.addf %381, %380 : vector<2x32xf32>
    %383 = arith.divf %381, %382 : vector<2x32xf32>
    %384 = vector.extract_strided_slice %377 {offsets = [0, 32], sizes = [2, 32], strides = [1, 1]} : vector<2x128xf32> to vector<2x32xf32>
    %385 = arith.negf %384 : vector<2x32xf32>
    %386 = math.exp %385 : vector<2x32xf32>
    %cst_86 = arith.constant 1.000000e+00 : f32
    %387 = vector.broadcast %cst_86 : f32 to vector<2x32xf32>
    %388 = arith.addf %387, %386 : vector<2x32xf32>
    %389 = arith.divf %387, %388 : vector<2x32xf32>
    %390 = vector.extract_strided_slice %377 {offsets = [0, 64], sizes = [2, 32], strides = [1, 1]} : vector<2x128xf32> to vector<2x32xf32>
    %391 = math.tanh %390 : vector<2x32xf32>
    %392 = vector.extract_strided_slice %377 {offsets = [0, 96], sizes = [2, 32], strides = [1, 1]} : vector<2x128xf32> to vector<2x32xf32>
    %393 = arith.negf %392 : vector<2x32xf32>
    %394 = math.exp %393 : vector<2x32xf32>
    %cst_87 = arith.constant 1.000000e+00 : f32
    %395 = vector.broadcast %cst_87 : f32 to vector<2x32xf32>
    %396 = arith.addf %395, %394 : vector<2x32xf32>
    %397 = arith.divf %395, %396 : vector<2x32xf32>
    %398 = arith.mulf %389, %371 : vector<2x32xf32>
    %399 = arith.mulf %383, %391 : vector<2x32xf32>
    %400 = arith.addf %398, %399 : vector<2x32xf32>
    %401 = math.tanh %400 : vector<2x32xf32>
    %402 = arith.mulf %397, %401 : vector<2x32xf32>
    %c6_88 = arith.constant 6 : index
    %c0_89 = arith.constant 0 : index
    %403 = vector.load %arg10[%c6_88, %c0_89] : memref<16x32xf32, #tpu.memory_space<vmem>>, vector<2x32xf32>
    tpu.vector_store %arg10[%c6_88, %c0_89], %402 {strides = array<i32>} : memref<16x32xf32, #tpu.memory_space<vmem>>, vector<2x32xf32>,
    %404 = vector.extract_strided_slice %254 {offsets = [4, 0], sizes = [2, 128], strides = [1, 1]} : vector<16x128xf32> to vector<2x128xf32>
    %cst_90 = arith.constant dense<0.000000e+00> : vector<2x128xf32>
    %405 = tpu.matmul %402, %256, %cst_90 {dimension_numbers = #tpu.dot_dimension_numbers<[1], [0], [0], [1], [0, 0, 1, 1], [], []>} : vector<2x32xf32>, vector<32x128xf32>, vector<2x128xf32> -> vector<2x128xf32>
    %406 = arith.addf %404, %405 : vector<2x128xf32>
    %407 = vector.extract_strided_slice %406 {offsets = [0, 0], sizes = [2, 32], strides = [1, 1]} : vector<2x128xf32> to vector<2x32xf32>
    %408 = arith.negf %407 : vector<2x32xf32>
    %409 = math.exp %408 : vector<2x32xf32>
    %cst_91 = arith.constant 1.000000e+00 : f32
    %410 = vector.broadcast %cst_91 : f32 to vector<2x32xf32>
    %411 = arith.addf %410, %409 : vector<2x32xf32>
    %412 = arith.divf %410, %411 : vector<2x32xf32>
    %413 = vector.extract_strided_slice %406 {offsets = [0, 32], sizes = [2, 32], strides = [1, 1]} : vector<2x128xf32> to vector<2x32xf32>
    %414 = arith.negf %413 : vector<2x32xf32>
    %415 = math.exp %414 : vector<2x32xf32>
    %cst_92 = arith.constant 1.000000e+00 : f32
    %416 = vector.broadcast %cst_92 : f32 to vector<2x32xf32>
    %417 = arith.addf %416, %415 : vector<2x32xf32>
    %418 = arith.divf %416, %417 : vector<2x32xf32>
    %419 = vector.extract_strided_slice %406 {offsets = [0, 64], sizes = [2, 32], strides = [1, 1]} : vector<2x128xf32> to vector<2x32xf32>
    %420 = math.tanh %419 : vector<2x32xf32>
    %421 = vector.extract_strided_slice %406 {offsets = [0, 96], sizes = [2, 32], strides = [1, 1]} : vector<2x128xf32> to vector<2x32xf32>
    %422 = arith.negf %421 : vector<2x32xf32>
    %423 = math.exp %422 : vector<2x32xf32>
    %cst_93 = arith.constant 1.000000e+00 : f32
    %424 = vector.broadcast %cst_93 : f32 to vector<2x32xf32>
    %425 = arith.addf %424, %423 : vector<2x32xf32>
    %426 = arith.divf %424, %425 : vector<2x32xf32>
    %427 = arith.mulf %418, %400 : vector<2x32xf32>
    %428 = arith.mulf %412, %420 : vector<2x32xf32>
    %429 = arith.addf %427, %428 : vector<2x32xf32>
    %430 = math.tanh %429 : vector<2x32xf32>
    %431 = arith.mulf %426, %430 : vector<2x32xf32>
    %c4_94 = arith.constant 4 : index
    %c0_95 = arith.constant 0 : index
    %432 = vector.load %arg10[%c4_94, %c0_95] : memref<16x32xf32, #tpu.memory_space<vmem>>, vector<2x32xf32>
    tpu.vector_store %arg10[%c4_94, %c0_95], %431 {strides = array<i32>} : memref<16x32xf32, #tpu.memory_space<vmem>>, vector<2x32xf32>,
    %433 = vector.extract_strided_slice %254 {offsets = [2, 0], sizes = [2, 128], strides = [1, 1]} : vector<16x128xf32> to vector<2x128xf32>
    %cst_96 = arith.constant dense<0.000000e+00> : vector<2x128xf32>
    %434 = tpu.matmul %431, %256, %cst_96 {dimension_numbers = #tpu.dot_dimension_numbers<[1], [0], [0], [1], [0, 0, 1, 1], [], []>} : vector<2x32xf32>, vector<32x128xf32>, vector<2x128xf32> -> vector<2x128xf32>
    %435 = arith.addf %433, %434 : vector<2x128xf32>
    %436 = vector.extract_strided_slice %435 {offsets = [0, 0], sizes = [2, 32], strides = [1, 1]} : vector<2x128xf32> to vector<2x32xf32>
    %437 = arith.negf %436 : vector<2x32xf32>
    %438 = math.exp %437 : vector<2x32xf32>
    %cst_97 = arith.constant 1.000000e+00 : f32
    %439 = vector.broadcast %cst_97 : f32 to vector<2x32xf32>
    %440 = arith.addf %439, %438 : vector<2x32xf32>
    %441 = arith.divf %439, %440 : vector<2x32xf32>
    %442 = vector.extract_strided_slice %435 {offsets = [0, 32], sizes = [2, 32], strides = [1, 1]} : vector<2x128xf32> to vector<2x32xf32>
    %443 = arith.negf %442 : vector<2x32xf32>
    %444 = math.exp %443 : vector<2x32xf32>
    %cst_98 = arith.constant 1.000000e+00 : f32
    %445 = vector.broadcast %cst_98 : f32 to vector<2x32xf32>
    %446 = arith.addf %445, %444 : vector<2x32xf32>
    %447 = arith.divf %445, %446 : vector<2x32xf32>
    %448 = vector.extract_strided_slice %435 {offsets = [0, 64], sizes = [2, 32], strides = [1, 1]} : vector<2x128xf32> to vector<2x32xf32>
    %449 = math.tanh %448 : vector<2x32xf32>
    %450 = vector.extract_strided_slice %435 {offsets = [0, 96], sizes = [2, 32], strides = [1, 1]} : vector<2x128xf32> to vector<2x32xf32>
    %451 = arith.negf %450 : vector<2x32xf32>
    %452 = math.exp %451 : vector<2x32xf32>
    %cst_99 = arith.constant 1.000000e+00 : f32
    %453 = vector.broadcast %cst_99 : f32 to vector<2x32xf32>
    %454 = arith.addf %453, %452 : vector<2x32xf32>
    %455 = arith.divf %453, %454 : vector<2x32xf32>
    %456 = arith.mulf %447, %429 : vector<2x32xf32>
    %457 = arith.mulf %441, %449 : vector<2x32xf32>
    %458 = arith.addf %456, %457 : vector<2x32xf32>
    %459 = math.tanh %458 : vector<2x32xf32>
    %460 = arith.mulf %455, %459 : vector<2x32xf32>
    %c2_100 = arith.constant 2 : index
    %c0_101 = arith.constant 0 : index
    %461 = vector.load %arg10[%c2_100, %c0_101] : memref<16x32xf32, #tpu.memory_space<vmem>>, vector<2x32xf32>
    tpu.vector_store %arg10[%c2_100, %c0_101], %460 {strides = array<i32>} : memref<16x32xf32, #tpu.memory_space<vmem>>, vector<2x32xf32>,
    %462 = vector.extract_strided_slice %254 {offsets = [0, 0], sizes = [2, 128], strides = [1, 1]} : vector<16x128xf32> to vector<2x128xf32>
    %cst_102 = arith.constant dense<0.000000e+00> : vector<2x128xf32>
    %463 = tpu.matmul %460, %256, %cst_102 {dimension_numbers = #tpu.dot_dimension_numbers<[1], [0], [0], [1], [0, 0, 1, 1], [], []>} : vector<2x32xf32>, vector<32x128xf32>, vector<2x128xf32> -> vector<2x128xf32>
    %464 = arith.addf %462, %463 : vector<2x128xf32>
    %465 = vector.extract_strided_slice %464 {offsets = [0, 0], sizes = [2, 32], strides = [1, 1]} : vector<2x128xf32> to vector<2x32xf32>
    %466 = arith.negf %465 : vector<2x32xf32>
    %467 = math.exp %466 : vector<2x32xf32>
    %cst_103 = arith.constant 1.000000e+00 : f32
    %468 = vector.broadcast %cst_103 : f32 to vector<2x32xf32>
    %469 = arith.addf %468, %467 : vector<2x32xf32>
    %470 = arith.divf %468, %469 : vector<2x32xf32>
    %471 = vector.extract_strided_slice %464 {offsets = [0, 32], sizes = [2, 32], strides = [1, 1]} : vector<2x128xf32> to vector<2x32xf32>
    %472 = arith.negf %471 : vector<2x32xf32>
    %473 = math.exp %472 : vector<2x32xf32>
    %cst_104 = arith.constant 1.000000e+00 : f32
    %474 = vector.broadcast %cst_104 : f32 to vector<2x32xf32>
    %475 = arith.addf %474, %473 : vector<2x32xf32>
    %476 = arith.divf %474, %475 : vector<2x32xf32>
    %477 = vector.extract_strided_slice %464 {offsets = [0, 64], sizes = [2, 32], strides = [1, 1]} : vector<2x128xf32> to vector<2x32xf32>
    %478 = math.tanh %477 : vector<2x32xf32>
    %479 = vector.extract_strided_slice %464 {offsets = [0, 96], sizes = [2, 32], strides = [1, 1]} : vector<2x128xf32> to vector<2x32xf32>
    %480 = arith.negf %479 : vector<2x32xf32>
    %481 = math.exp %480 : vector<2x32xf32>
    %cst_105 = arith.constant 1.000000e+00 : f32
    %482 = vector.broadcast %cst_105 : f32 to vector<2x32xf32>
    %483 = arith.addf %482, %481 : vector<2x32xf32>
    %484 = arith.divf %482, %483 : vector<2x32xf32>
    %485 = arith.mulf %476, %458 : vector<2x32xf32>
    %486 = arith.mulf %470, %478 : vector<2x32xf32>
    %487 = arith.addf %485, %486 : vector<2x32xf32>
    %488 = math.tanh %487 : vector<2x32xf32>
    %489 = arith.mulf %484, %488 : vector<2x32xf32>
    %c0_106 = arith.constant 0 : index
    %c0_107 = arith.constant 0 : index
    %490 = vector.load %arg10[%c0_106, %c0_107] : memref<16x32xf32, #tpu.memory_space<vmem>>, vector<2x32xf32>
    tpu.vector_store %arg10[%c0_106, %c0_107], %489 {strides = array<i32>} : memref<16x32xf32, #tpu.memory_space<vmem>>, vector<2x32xf32>,
    %c0_108 = arith.constant 0 : index
    %c0_109 = arith.constant 0 : index
    %491 = vector.load %arg9[%c0_108, %c0_109] : memref<16x32xf32, #tpu.memory_space<vmem>>, vector<16x32xf32>
    %c0_110 = arith.constant 0 : index
    %c0_111 = arith.constant 0 : index
    %492 = vector.load %arg10[%c0_110, %c0_111] : memref<16x32xf32, #tpu.memory_space<vmem>>, vector<16x32xf32>
    %c0_112 = arith.constant 0 : index
    %c0_113 = arith.constant 0 : index
    %c0_114 = arith.constant 0 : index
    %c0_115 = arith.constant 0 : index
    %493 = vector.load %arg3[%c0_112, %c0_113, %c0_114, %c0_115] : memref<2x2x64x128xf32, #tpu.memory_space<vmem>>, vector<1x2x64x128xf32>
    %494 = vector.shape_cast %493 : vector<1x2x64x128xf32> to vector<2x64x128xf32>
    %495 = vector.extract_strided_slice %494 {offsets = [0, 0, 0], sizes = [1, 64, 128], strides = [1, 1, 1]} : vector<2x64x128xf32> to vector<1x64x128xf32>
    %496 = vector.shape_cast %495 : vector<1x64x128xf32> to vector<64x128xf32>
    %497 = vector.extract_strided_slice %494 {offsets = [1, 0, 0], sizes = [1, 64, 128], strides = [1, 1, 1]} : vector<2x64x128xf32> to vector<1x64x128xf32>
    %498 = vector.shape_cast %497 : vector<1x64x128xf32> to vector<64x128xf32>
    %499 = vector.extract_strided_slice %496 {offsets = [0, 0], sizes = [32, 128], strides = [1, 1]} : vector<64x128xf32> to vector<32x128xf32>
    %cst_116 = arith.constant dense<0.000000e+00> : vector<16x128xf32>
    %500 = tpu.matmul %491, %499, %cst_116 {dimension_numbers = #tpu.dot_dimension_numbers<[1], [0], [0], [1], [0, 0, 1, 1], [], []>} : vector<16x32xf32>, vector<32x128xf32>, vector<16x128xf32> -> vector<16x128xf32>
    %501 = vector.extract_strided_slice %496 {offsets = [32, 0], sizes = [32, 128], strides = [1, 1]} : vector<64x128xf32> to vector<32x128xf32>
    %cst_117 = arith.constant dense<0.000000e+00> : vector<16x128xf32>
    %502 = tpu.matmul %492, %501, %cst_117 {dimension_numbers = #tpu.dot_dimension_numbers<[1], [0], [0], [1], [0, 0, 1, 1], [], []>} : vector<16x32xf32>, vector<32x128xf32>, vector<16x128xf32> -> vector<16x128xf32>
    %503 = arith.addf %500, %502 : vector<16x128xf32>
    %504 = vector.extract_strided_slice %498 {offsets = [0, 0], sizes = [32, 128], strides = [1, 1]} : vector<64x128xf32> to vector<32x128xf32>
    %cst_118 = arith.constant dense<0.000000e+00> : vector<16x128xf32>
    %505 = tpu.matmul %491, %504, %cst_118 {dimension_numbers = #tpu.dot_dimension_numbers<[1], [0], [0], [1], [0, 0, 1, 1], [], []>} : vector<16x32xf32>, vector<32x128xf32>, vector<16x128xf32> -> vector<16x128xf32>
    %506 = vector.extract_strided_slice %498 {offsets = [32, 0], sizes = [32, 128], strides = [1, 1]} : vector<64x128xf32> to vector<32x128xf32>
    %cst_119 = arith.constant dense<0.000000e+00> : vector<16x128xf32>
    %507 = tpu.matmul %492, %506, %cst_119 {dimension_numbers = #tpu.dot_dimension_numbers<[1], [0], [0], [1], [0, 0, 1, 1], [], []>} : vector<16x32xf32>, vector<32x128xf32>, vector<16x128xf32> -> vector<16x128xf32>
    %508 = arith.addf %505, %507 : vector<16x128xf32>
    %c1_120 = arith.constant 1 : index
    %c0_121 = arith.constant 0 : index
    %c0_122 = arith.constant 0 : index
    %c0_123 = arith.constant 0 : index
    %509 = vector.load %arg5[%c1_120, %c0_121, %c0_122, %c0_123] : memref<3x2x1x128xf32, #tpu.memory_space<vmem>>, vector<1x2x1x128xf32>
    %510 = vector.shape_cast %509 : vector<1x2x1x128xf32> to vector<2x1x128xf32>
    %c1_124 = arith.constant 1 : index
    %c0_125 = arith.constant 0 : index
    %c0_126 = arith.constant 0 : index
    %c0_127 = arith.constant 0 : index
    %511 = vector.load %arg4[%c1_124, %c0_125, %c0_126, %c0_127] : memref<3x2x32x128xf32, #tpu.memory_space<vmem>>, vector<1x2x32x128xf32>
    %512 = vector.shape_cast %511 : vector<1x2x32x128xf32> to vector<2x32x128xf32>
    %513 = vector.extract_strided_slice %510 {offsets = [0, 0, 0], sizes = [1, 1, 128], strides = [1, 1, 1]} : vector<2x1x128xf32> to vector<1x1x128xf32>
    %514 = vector.shape_cast %513 : vector<1x1x128xf32> to vector<1x128xf32>
    %515 = vector.broadcast %514 : vector<1x128xf32> to vector<16x128xf32>
    %516 = arith.addf %503, %515 : vector<16x128xf32>
    %517 = vector.extract_strided_slice %512 {offsets = [0, 0, 0], sizes = [1, 32, 128], strides = [1, 1, 1]} : vector<2x32x128xf32> to vector<1x32x128xf32>
    %518 = vector.shape_cast %517 : vector<1x32x128xf32> to vector<32x128xf32>
    %cst_128 = arith.constant 0.000000e+00 : f32
    %519 = vector.broadcast %cst_128 : f32 to vector<2x32xf32>
    %cst_129 = arith.constant 0.000000e+00 : f32
    %520 = vector.broadcast %cst_129 : f32 to vector<2x32xf32>
    %521 = vector.extract_strided_slice %516 {offsets = [0, 0], sizes = [2, 128], strides = [1, 1]} : vector<16x128xf32> to vector<2x128xf32>
    %cst_130 = arith.constant dense<0.000000e+00> : vector<2x128xf32>
    %522 = tpu.matmul %519, %518, %cst_130 {dimension_numbers = #tpu.dot_dimension_numbers<[1], [0], [0], [1], [0, 0, 1, 1], [], []>} : vector<2x32xf32>, vector<32x128xf32>, vector<2x128xf32> -> vector<2x128xf32>
    %523 = arith.addf %521, %522 : vector<2x128xf32>
    %524 = vector.extract_strided_slice %523 {offsets = [0, 0], sizes = [2, 32], strides = [1, 1]} : vector<2x128xf32> to vector<2x32xf32>
    %525 = arith.negf %524 : vector<2x32xf32>
    %526 = math.exp %525 : vector<2x32xf32>
    %cst_131 = arith.constant 1.000000e+00 : f32
    %527 = vector.broadcast %cst_131 : f32 to vector<2x32xf32>
    %528 = arith.addf %527, %526 : vector<2x32xf32>
    %529 = arith.divf %527, %528 : vector<2x32xf32>
    %530 = vector.extract_strided_slice %523 {offsets = [0, 32], sizes = [2, 32], strides = [1, 1]} : vector<2x128xf32> to vector<2x32xf32>
    %531 = arith.negf %530 : vector<2x32xf32>
    %532 = math.exp %531 : vector<2x32xf32>
    %cst_132 = arith.constant 1.000000e+00 : f32
    %533 = vector.broadcast %cst_132 : f32 to vector<2x32xf32>
    %534 = arith.addf %533, %532 : vector<2x32xf32>
    %535 = arith.divf %533, %534 : vector<2x32xf32>
    %536 = vector.extract_strided_slice %523 {offsets = [0, 64], sizes = [2, 32], strides = [1, 1]} : vector<2x128xf32> to vector<2x32xf32>
    %537 = math.tanh %536 : vector<2x32xf32>
    %538 = vector.extract_strided_slice %523 {offsets = [0, 96], sizes = [2, 32], strides = [1, 1]} : vector<2x128xf32> to vector<2x32xf32>
    %539 = arith.negf %538 : vector<2x32xf32>
    %540 = math.exp %539 : vector<2x32xf32>
    %cst_133 = arith.constant 1.000000e+00 : f32
    %541 = vector.broadcast %cst_133 : f32 to vector<2x32xf32>
    %542 = arith.addf %541, %540 : vector<2x32xf32>
    %543 = arith.divf %541, %542 : vector<2x32xf32>
    %544 = arith.mulf %535, %520 : vector<2x32xf32>
    %545 = arith.mulf %529, %537 : vector<2x32xf32>
    %546 = arith.addf %544, %545 : vector<2x32xf32>
    %547 = math.tanh %546 : vector<2x32xf32>
    %548 = arith.mulf %543, %547 : vector<2x32xf32>
    %c0_134 = arith.constant 0 : index
    %c0_135 = arith.constant 0 : index
    %549 = vector.load %arg9[%c0_134, %c0_135] : memref<16x32xf32, #tpu.memory_space<vmem>>, vector<2x32xf32>
    tpu.vector_store %arg9[%c0_134, %c0_135], %548 {strides = array<i32>} : memref<16x32xf32, #tpu.memory_space<vmem>>, vector<2x32xf32>,
    %550 = vector.extract_strided_slice %516 {offsets = [2, 0], sizes = [2, 128], strides = [1, 1]} : vector<16x128xf32> to vector<2x128xf32>
    %cst_136 = arith.constant dense<0.000000e+00> : vector<2x128xf32>
    %551 = tpu.matmul %548, %518, %cst_136 {dimension_numbers = #tpu.dot_dimension_numbers<[1], [0], [0], [1], [0, 0, 1, 1], [], []>} : vector<2x32xf32>, vector<32x128xf32>, vector<2x128xf32> -> vector<2x128xf32>
    %552 = arith.addf %550, %551 : vector<2x128xf32>
    %553 = vector.extract_strided_slice %552 {offsets = [0, 0], sizes = [2, 32], strides = [1, 1]} : vector<2x128xf32> to vector<2x32xf32>
    %554 = arith.negf %553 : vector<2x32xf32>
    %555 = math.exp %554 : vector<2x32xf32>
    %cst_137 = arith.constant 1.000000e+00 : f32
    %556 = vector.broadcast %cst_137 : f32 to vector<2x32xf32>
    %557 = arith.addf %556, %555 : vector<2x32xf32>
    %558 = arith.divf %556, %557 : vector<2x32xf32>
    %559 = vector.extract_strided_slice %552 {offsets = [0, 32], sizes = [2, 32], strides = [1, 1]} : vector<2x128xf32> to vector<2x32xf32>
    %560 = arith.negf %559 : vector<2x32xf32>
    %561 = math.exp %560 : vector<2x32xf32>
    %cst_138 = arith.constant 1.000000e+00 : f32
    %562 = vector.broadcast %cst_138 : f32 to vector<2x32xf32>
    %563 = arith.addf %562, %561 : vector<2x32xf32>
    %564 = arith.divf %562, %563 : vector<2x32xf32>
    %565 = vector.extract_strided_slice %552 {offsets = [0, 64], sizes = [2, 32], strides = [1, 1]} : vector<2x128xf32> to vector<2x32xf32>
    %566 = math.tanh %565 : vector<2x32xf32>
    %567 = vector.extract_strided_slice %552 {offsets = [0, 96], sizes = [2, 32], strides = [1, 1]} : vector<2x128xf32> to vector<2x32xf32>
    %568 = arith.negf %567 : vector<2x32xf32>
    %569 = math.exp %568 : vector<2x32xf32>
    %cst_139 = arith.constant 1.000000e+00 : f32
    %570 = vector.broadcast %cst_139 : f32 to vector<2x32xf32>
    %571 = arith.addf %570, %569 : vector<2x32xf32>
    %572 = arith.divf %570, %571 : vector<2x32xf32>
    %573 = arith.mulf %564, %546 : vector<2x32xf32>
    %574 = arith.mulf %558, %566 : vector<2x32xf32>
    %575 = arith.addf %573, %574 : vector<2x32xf32>
    %576 = math.tanh %575 : vector<2x32xf32>
    %577 = arith.mulf %572, %576 : vector<2x32xf32>
    %c2_140 = arith.constant 2 : index
    %c0_141 = arith.constant 0 : index
    %578 = vector.load %arg9[%c2_140, %c0_141] : memref<16x32xf32, #tpu.memory_space<vmem>>, vector<2x32xf32>
    tpu.vector_store %arg9[%c2_140, %c0_141], %577 {strides = array<i32>} : memref<16x32xf32, #tpu.memory_space<vmem>>, vector<2x32xf32>,
    %579 = vector.extract_strided_slice %516 {offsets = [4, 0], sizes = [2, 128], strides = [1, 1]} : vector<16x128xf32> to vector<2x128xf32>
    %cst_142 = arith.constant dense<0.000000e+00> : vector<2x128xf32>
    %580 = tpu.matmul %577, %518, %cst_142 {dimension_numbers = #tpu.dot_dimension_numbers<[1], [0], [0], [1], [0, 0, 1, 1], [], []>} : vector<2x32xf32>, vector<32x128xf32>, vector<2x128xf32> -> vector<2x128xf32>
    %581 = arith.addf %579, %580 : vector<2x128xf32>
    %582 = vector.extract_strided_slice %581 {offsets = [0, 0], sizes = [2, 32], strides = [1, 1]} : vector<2x128xf32> to vector<2x32xf32>
    %583 = arith.negf %582 : vector<2x32xf32>
    %584 = math.exp %583 : vector<2x32xf32>
    %cst_143 = arith.constant 1.000000e+00 : f32
    %585 = vector.broadcast %cst_143 : f32 to vector<2x32xf32>
    %586 = arith.addf %585, %584 : vector<2x32xf32>
    %587 = arith.divf %585, %586 : vector<2x32xf32>
    %588 = vector.extract_strided_slice %581 {offsets = [0, 32], sizes = [2, 32], strides = [1, 1]} : vector<2x128xf32> to vector<2x32xf32>
    %589 = arith.negf %588 : vector<2x32xf32>
    %590 = math.exp %589 : vector<2x32xf32>
    %cst_144 = arith.constant 1.000000e+00 : f32
    %591 = vector.broadcast %cst_144 : f32 to vector<2x32xf32>
    %592 = arith.addf %591, %590 : vector<2x32xf32>
    %593 = arith.divf %591, %592 : vector<2x32xf32>
    %594 = vector.extract_strided_slice %581 {offsets = [0, 64], sizes = [2, 32], strides = [1, 1]} : vector<2x128xf32> to vector<2x32xf32>
    %595 = math.tanh %594 : vector<2x32xf32>
    %596 = vector.extract_strided_slice %581 {offsets = [0, 96], sizes = [2, 32], strides = [1, 1]} : vector<2x128xf32> to vector<2x32xf32>
    %597 = arith.negf %596 : vector<2x32xf32>
    %598 = math.exp %597 : vector<2x32xf32>
    %cst_145 = arith.constant 1.000000e+00 : f32
    %599 = vector.broadcast %cst_145 : f32 to vector<2x32xf32>
    %600 = arith.addf %599, %598 : vector<2x32xf32>
    %601 = arith.divf %599, %600 : vector<2x32xf32>
    %602 = arith.mulf %593, %575 : vector<2x32xf32>
    %603 = arith.mulf %587, %595 : vector<2x32xf32>
    %604 = arith.addf %602, %603 : vector<2x32xf32>
    %605 = math.tanh %604 : vector<2x32xf32>
    %606 = arith.mulf %601, %605 : vector<2x32xf32>
    %c4_146 = arith.constant 4 : index
    %c0_147 = arith.constant 0 : index
    %607 = vector.load %arg9[%c4_146, %c0_147] : memref<16x32xf32, #tpu.memory_space<vmem>>, vector<2x32xf32>
    tpu.vector_store %arg9[%c4_146, %c0_147], %606 {strides = array<i32>} : memref<16x32xf32, #tpu.memory_space<vmem>>, vector<2x32xf32>,
    %608 = vector.extract_strided_slice %516 {offsets = [6, 0], sizes = [2, 128], strides = [1, 1]} : vector<16x128xf32> to vector<2x128xf32>
    %cst_148 = arith.constant dense<0.000000e+00> : vector<2x128xf32>
    %609 = tpu.matmul %606, %518, %cst_148 {dimension_numbers = #tpu.dot_dimension_numbers<[1], [0], [0], [1], [0, 0, 1, 1], [], []>} : vector<2x32xf32>, vector<32x128xf32>, vector<2x128xf32> -> vector<2x128xf32>
    %610 = arith.addf %608, %609 : vector<2x128xf32>
    %611 = vector.extract_strided_slice %610 {offsets = [0, 0], sizes = [2, 32], strides = [1, 1]} : vector<2x128xf32> to vector<2x32xf32>
    %612 = arith.negf %611 : vector<2x32xf32>
    %613 = math.exp %612 : vector<2x32xf32>
    %cst_149 = arith.constant 1.000000e+00 : f32
    %614 = vector.broadcast %cst_149 : f32 to vector<2x32xf32>
    %615 = arith.addf %614, %613 : vector<2x32xf32>
    %616 = arith.divf %614, %615 : vector<2x32xf32>
    %617 = vector.extract_strided_slice %610 {offsets = [0, 32], sizes = [2, 32], strides = [1, 1]} : vector<2x128xf32> to vector<2x32xf32>
    %618 = arith.negf %617 : vector<2x32xf32>
    %619 = math.exp %618 : vector<2x32xf32>
    %cst_150 = arith.constant 1.000000e+00 : f32
    %620 = vector.broadcast %cst_150 : f32 to vector<2x32xf32>
    %621 = arith.addf %620, %619 : vector<2x32xf32>
    %622 = arith.divf %620, %621 : vector<2x32xf32>
    %623 = vector.extract_strided_slice %610 {offsets = [0, 64], sizes = [2, 32], strides = [1, 1]} : vector<2x128xf32> to vector<2x32xf32>
    %624 = math.tanh %623 : vector<2x32xf32>
    %625 = vector.extract_strided_slice %610 {offsets = [0, 96], sizes = [2, 32], strides = [1, 1]} : vector<2x128xf32> to vector<2x32xf32>
    %626 = arith.negf %625 : vector<2x32xf32>
    %627 = math.exp %626 : vector<2x32xf32>
    %cst_151 = arith.constant 1.000000e+00 : f32
    %628 = vector.broadcast %cst_151 : f32 to vector<2x32xf32>
    %629 = arith.addf %628, %627 : vector<2x32xf32>
    %630 = arith.divf %628, %629 : vector<2x32xf32>
    %631 = arith.mulf %622, %604 : vector<2x32xf32>
    %632 = arith.mulf %616, %624 : vector<2x32xf32>
    %633 = arith.addf %631, %632 : vector<2x32xf32>
    %634 = math.tanh %633 : vector<2x32xf32>
    %635 = arith.mulf %630, %634 : vector<2x32xf32>
    %c6_152 = arith.constant 6 : index
    %c0_153 = arith.constant 0 : index
    %636 = vector.load %arg9[%c6_152, %c0_153] : memref<16x32xf32, #tpu.memory_space<vmem>>, vector<2x32xf32>
    tpu.vector_store %arg9[%c6_152, %c0_153], %635 {strides = array<i32>} : memref<16x32xf32, #tpu.memory_space<vmem>>, vector<2x32xf32>,
    %637 = vector.extract_strided_slice %516 {offsets = [8, 0], sizes = [2, 128], strides = [1, 1]} : vector<16x128xf32> to vector<2x128xf32>
    %cst_154 = arith.constant dense<0.000000e+00> : vector<2x128xf32>
    %638 = tpu.matmul %635, %518, %cst_154 {dimension_numbers = #tpu.dot_dimension_numbers<[1], [0], [0], [1], [0, 0, 1, 1], [], []>} : vector<2x32xf32>, vector<32x128xf32>, vector<2x128xf32> -> vector<2x128xf32>
    %639 = arith.addf %637, %638 : vector<2x128xf32>
    %640 = vector.extract_strided_slice %639 {offsets = [0, 0], sizes = [2, 32], strides = [1, 1]} : vector<2x128xf32> to vector<2x32xf32>
    %641 = arith.negf %640 : vector<2x32xf32>
    %642 = math.exp %641 : vector<2x32xf32>
    %cst_155 = arith.constant 1.000000e+00 : f32
    %643 = vector.broadcast %cst_155 : f32 to vector<2x32xf32>
    %644 = arith.addf %643, %642 : vector<2x32xf32>
    %645 = arith.divf %643, %644 : vector<2x32xf32>
    %646 = vector.extract_strided_slice %639 {offsets = [0, 32], sizes = [2, 32], strides = [1, 1]} : vector<2x128xf32> to vector<2x32xf32>
    %647 = arith.negf %646 : vector<2x32xf32>
    %648 = math.exp %647 : vector<2x32xf32>
    %cst_156 = arith.constant 1.000000e+00 : f32
    %649 = vector.broadcast %cst_156 : f32 to vector<2x32xf32>
    %650 = arith.addf %649, %648 : vector<2x32xf32>
    %651 = arith.divf %649, %650 : vector<2x32xf32>
    %652 = vector.extract_strided_slice %639 {offsets = [0, 64], sizes = [2, 32], strides = [1, 1]} : vector<2x128xf32> to vector<2x32xf32>
    %653 = math.tanh %652 : vector<2x32xf32>
    %654 = vector.extract_strided_slice %639 {offsets = [0, 96], sizes = [2, 32], strides = [1, 1]} : vector<2x128xf32> to vector<2x32xf32>
    %655 = arith.negf %654 : vector<2x32xf32>
    %656 = math.exp %655 : vector<2x32xf32>
    %cst_157 = arith.constant 1.000000e+00 : f32
    %657 = vector.broadcast %cst_157 : f32 to vector<2x32xf32>
    %658 = arith.addf %657, %656 : vector<2x32xf32>
    %659 = arith.divf %657, %658 : vector<2x32xf32>
    %660 = arith.mulf %651, %633 : vector<2x32xf32>
    %661 = arith.mulf %645, %653 : vector<2x32xf32>
    %662 = arith.addf %660, %661 : vector<2x32xf32>
    %663 = math.tanh %662 : vector<2x32xf32>
    %664 = arith.mulf %659, %663 : vector<2x32xf32>
    %c8_158 = arith.constant 8 : index
    %c0_159 = arith.constant 0 : index
    %665 = vector.load %arg9[%c8_158, %c0_159] : memref<16x32xf32, #tpu.memory_space<vmem>>, vector<2x32xf32>
    tpu.vector_store %arg9[%c8_158, %c0_159], %664 {strides = array<i32>} : memref<16x32xf32, #tpu.memory_space<vmem>>, vector<2x32xf32>,
    %666 = vector.extract_strided_slice %516 {offsets = [10, 0], sizes = [2, 128], strides = [1, 1]} : vector<16x128xf32> to vector<2x128xf32>
    %cst_160 = arith.constant dense<0.000000e+00> : vector<2x128xf32>
    %667 = tpu.matmul %664, %518, %cst_160 {dimension_numbers = #tpu.dot_dimension_numbers<[1], [0], [0], [1], [0, 0, 1, 1], [], []>} : vector<2x32xf32>, vector<32x128xf32>, vector<2x128xf32> -> vector<2x128xf32>
    %668 = arith.addf %666, %667 : vector<2x128xf32>
    %669 = vector.extract_strided_slice %668 {offsets = [0, 0], sizes = [2, 32], strides = [1, 1]} : vector<2x128xf32> to vector<2x32xf32>
    %670 = arith.negf %669 : vector<2x32xf32>
    %671 = math.exp %670 : vector<2x32xf32>
    %cst_161 = arith.constant 1.000000e+00 : f32
    %672 = vector.broadcast %cst_161 : f32 to vector<2x32xf32>
    %673 = arith.addf %672, %671 : vector<2x32xf32>
    %674 = arith.divf %672, %673 : vector<2x32xf32>
    %675 = vector.extract_strided_slice %668 {offsets = [0, 32], sizes = [2, 32], strides = [1, 1]} : vector<2x128xf32> to vector<2x32xf32>
    %676 = arith.negf %675 : vector<2x32xf32>
    %677 = math.exp %676 : vector<2x32xf32>
    %cst_162 = arith.constant 1.000000e+00 : f32
    %678 = vector.broadcast %cst_162 : f32 to vector<2x32xf32>
    %679 = arith.addf %678, %677 : vector<2x32xf32>
    %680 = arith.divf %678, %679 : vector<2x32xf32>
    %681 = vector.extract_strided_slice %668 {offsets = [0, 64], sizes = [2, 32], strides = [1, 1]} : vector<2x128xf32> to vector<2x32xf32>
    %682 = math.tanh %681 : vector<2x32xf32>
    %683 = vector.extract_strided_slice %668 {offsets = [0, 96], sizes = [2, 32], strides = [1, 1]} : vector<2x128xf32> to vector<2x32xf32>
    %684 = arith.negf %683 : vector<2x32xf32>
    %685 = math.exp %684 : vector<2x32xf32>
    %cst_163 = arith.constant 1.000000e+00 : f32
    %686 = vector.broadcast %cst_163 : f32 to vector<2x32xf32>
    %687 = arith.addf %686, %685 : vector<2x32xf32>
    %688 = arith.divf %686, %687 : vector<2x32xf32>
    %689 = arith.mulf %680, %662 : vector<2x32xf32>
    %690 = arith.mulf %674, %682 : vector<2x32xf32>
    %691 = arith.addf %689, %690 : vector<2x32xf32>
    %692 = math.tanh %691 : vector<2x32xf32>
    %693 = arith.mulf %688, %692 : vector<2x32xf32>
    %c10_164 = arith.constant 10 : index
    %c0_165 = arith.constant 0 : index
    %694 = vector.load %arg9[%c10_164, %c0_165] : memref<16x32xf32, #tpu.memory_space<vmem>>, vector<2x32xf32>
    tpu.vector_store %arg9[%c10_164, %c0_165], %693 {strides = array<i32>} : memref<16x32xf32, #tpu.memory_space<vmem>>, vector<2x32xf32>,
    %695 = vector.extract_strided_slice %516 {offsets = [12, 0], sizes = [2, 128], strides = [1, 1]} : vector<16x128xf32> to vector<2x128xf32>
    %cst_166 = arith.constant dense<0.000000e+00> : vector<2x128xf32>
    %696 = tpu.matmul %693, %518, %cst_166 {dimension_numbers = #tpu.dot_dimension_numbers<[1], [0], [0], [1], [0, 0, 1, 1], [], []>} : vector<2x32xf32>, vector<32x128xf32>, vector<2x128xf32> -> vector<2x128xf32>
    %697 = arith.addf %695, %696 : vector<2x128xf32>
    %698 = vector.extract_strided_slice %697 {offsets = [0, 0], sizes = [2, 32], strides = [1, 1]} : vector<2x128xf32> to vector<2x32xf32>
    %699 = arith.negf %698 : vector<2x32xf32>
    %700 = math.exp %699 : vector<2x32xf32>
    %cst_167 = arith.constant 1.000000e+00 : f32
    %701 = vector.broadcast %cst_167 : f32 to vector<2x32xf32>
    %702 = arith.addf %701, %700 : vector<2x32xf32>
    %703 = arith.divf %701, %702 : vector<2x32xf32>
    %704 = vector.extract_strided_slice %697 {offsets = [0, 32], sizes = [2, 32], strides = [1, 1]} : vector<2x128xf32> to vector<2x32xf32>
    %705 = arith.negf %704 : vector<2x32xf32>
    %706 = math.exp %705 : vector<2x32xf32>
    %cst_168 = arith.constant 1.000000e+00 : f32
    %707 = vector.broadcast %cst_168 : f32 to vector<2x32xf32>
    %708 = arith.addf %707, %706 : vector<2x32xf32>
    %709 = arith.divf %707, %708 : vector<2x32xf32>
    %710 = vector.extract_strided_slice %697 {offsets = [0, 64], sizes = [2, 32], strides = [1, 1]} : vector<2x128xf32> to vector<2x32xf32>
    %711 = math.tanh %710 : vector<2x32xf32>
    %712 = vector.extract_strided_slice %697 {offsets = [0, 96], sizes = [2, 32], strides = [1, 1]} : vector<2x128xf32> to vector<2x32xf32>
    %713 = arith.negf %712 : vector<2x32xf32>
    %714 = math.exp %713 : vector<2x32xf32>
    %cst_169 = arith.constant 1.000000e+00 : f32
    %715 = vector.broadcast %cst_169 : f32 to vector<2x32xf32>
    %716 = arith.addf %715, %714 : vector<2x32xf32>
    %717 = arith.divf %715, %716 : vector<2x32xf32>
    %718 = arith.mulf %709, %691 : vector<2x32xf32>
    %719 = arith.mulf %703, %711 : vector<2x32xf32>
    %720 = arith.addf %718, %719 : vector<2x32xf32>
    %721 = math.tanh %720 : vector<2x32xf32>
    %722 = arith.mulf %717, %721 : vector<2x32xf32>
    %c12_170 = arith.constant 12 : index
    %c0_171 = arith.constant 0 : index
    %723 = vector.load %arg9[%c12_170, %c0_171] : memref<16x32xf32, #tpu.memory_space<vmem>>, vector<2x32xf32>
    tpu.vector_store %arg9[%c12_170, %c0_171], %722 {strides = array<i32>} : memref<16x32xf32, #tpu.memory_space<vmem>>, vector<2x32xf32>,
    %724 = vector.extract_strided_slice %516 {offsets = [14, 0], sizes = [2, 128], strides = [1, 1]} : vector<16x128xf32> to vector<2x128xf32>
    %cst_172 = arith.constant dense<0.000000e+00> : vector<2x128xf32>
    %725 = tpu.matmul %722, %518, %cst_172 {dimension_numbers = #tpu.dot_dimension_numbers<[1], [0], [0], [1], [0, 0, 1, 1], [], []>} : vector<2x32xf32>, vector<32x128xf32>, vector<2x128xf32> -> vector<2x128xf32>
    %726 = arith.addf %724, %725 : vector<2x128xf32>
    %727 = vector.extract_strided_slice %726 {offsets = [0, 0], sizes = [2, 32], strides = [1, 1]} : vector<2x128xf32> to vector<2x32xf32>
    %728 = arith.negf %727 : vector<2x32xf32>
    %729 = math.exp %728 : vector<2x32xf32>
    %cst_173 = arith.constant 1.000000e+00 : f32
    %730 = vector.broadcast %cst_173 : f32 to vector<2x32xf32>
    %731 = arith.addf %730, %729 : vector<2x32xf32>
    %732 = arith.divf %730, %731 : vector<2x32xf32>
    %733 = vector.extract_strided_slice %726 {offsets = [0, 32], sizes = [2, 32], strides = [1, 1]} : vector<2x128xf32> to vector<2x32xf32>
    %734 = arith.negf %733 : vector<2x32xf32>
    %735 = math.exp %734 : vector<2x32xf32>
    %cst_174 = arith.constant 1.000000e+00 : f32
    %736 = vector.broadcast %cst_174 : f32 to vector<2x32xf32>
    %737 = arith.addf %736, %735 : vector<2x32xf32>
    %738 = arith.divf %736, %737 : vector<2x32xf32>
    %739 = vector.extract_strided_slice %726 {offsets = [0, 64], sizes = [2, 32], strides = [1, 1]} : vector<2x128xf32> to vector<2x32xf32>
    %740 = math.tanh %739 : vector<2x32xf32>
    %741 = vector.extract_strided_slice %726 {offsets = [0, 96], sizes = [2, 32], strides = [1, 1]} : vector<2x128xf32> to vector<2x32xf32>
    %742 = arith.negf %741 : vector<2x32xf32>
    %743 = math.exp %742 : vector<2x32xf32>
    %cst_175 = arith.constant 1.000000e+00 : f32
    %744 = vector.broadcast %cst_175 : f32 to vector<2x32xf32>
    %745 = arith.addf %744, %743 : vector<2x32xf32>
    %746 = arith.divf %744, %745 : vector<2x32xf32>
    %747 = arith.mulf %738, %720 : vector<2x32xf32>
    %748 = arith.mulf %732, %740 : vector<2x32xf32>
    %749 = arith.addf %747, %748 : vector<2x32xf32>
    %750 = math.tanh %749 : vector<2x32xf32>
    %751 = arith.mulf %746, %750 : vector<2x32xf32>
    %c14_176 = arith.constant 14 : index
    %c0_177 = arith.constant 0 : index
    %752 = vector.load %arg9[%c14_176, %c0_177] : memref<16x32xf32, #tpu.memory_space<vmem>>, vector<2x32xf32>
    tpu.vector_store %arg9[%c14_176, %c0_177], %751 {strides = array<i32>} : memref<16x32xf32, #tpu.memory_space<vmem>>, vector<2x32xf32>,
    %753 = vector.extract_strided_slice %510 {offsets = [1, 0, 0], sizes = [1, 1, 128], strides = [1, 1, 1]} : vector<2x1x128xf32> to vector<1x1x128xf32>
    %754 = vector.shape_cast %753 : vector<1x1x128xf32> to vector<1x128xf32>
    %755 = vector.broadcast %754 : vector<1x128xf32> to vector<16x128xf32>
    %756 = arith.addf %508, %755 : vector<16x128xf32>
    %757 = vector.extract_strided_slice %512 {offsets = [1, 0, 0], sizes = [1, 32, 128], strides = [1, 1, 1]} : vector<2x32x128xf32> to vector<1x32x128xf32>
    %758 = vector.shape_cast %757 : vector<1x32x128xf32> to vector<32x128xf32>
    %cst_178 = arith.constant 0.000000e+00 : f32
    %759 = vector.broadcast %cst_178 : f32 to vector<2x32xf32>
    %cst_179 = arith.constant 0.000000e+00 : f32
    %760 = vector.broadcast %cst_179 : f32 to vector<2x32xf32>
    %761 = vector.extract_strided_slice %756 {offsets = [14, 0], sizes = [2, 128], strides = [1, 1]} : vector<16x128xf32> to vector<2x128xf32>
    %cst_180 = arith.constant dense<0.000000e+00> : vector<2x128xf32>
    %762 = tpu.matmul %759, %758, %cst_180 {dimension_numbers = #tpu.dot_dimension_numbers<[1], [0], [0], [1], [0, 0, 1, 1], [], []>} : vector<2x32xf32>, vector<32x128xf32>, vector<2x128xf32> -> vector<2x128xf32>
    %763 = arith.addf %761, %762 : vector<2x128xf32>
    %764 = vector.extract_strided_slice %763 {offsets = [0, 0], sizes = [2, 32], strides = [1, 1]} : vector<2x128xf32> to vector<2x32xf32>
    %765 = arith.negf %764 : vector<2x32xf32>
    %766 = math.exp %765 : vector<2x32xf32>
    %cst_181 = arith.constant 1.000000e+00 : f32
    %767 = vector.broadcast %cst_181 : f32 to vector<2x32xf32>
    %768 = arith.addf %767, %766 : vector<2x32xf32>
    %769 = arith.divf %767, %768 : vector<2x32xf32>
    %770 = vector.extract_strided_slice %763 {offsets = [0, 32], sizes = [2, 32], strides = [1, 1]} : vector<2x128xf32> to vector<2x32xf32>
    %771 = arith.negf %770 : vector<2x32xf32>
    %772 = math.exp %771 : vector<2x32xf32>
    %cst_182 = arith.constant 1.000000e+00 : f32
    %773 = vector.broadcast %cst_182 : f32 to vector<2x32xf32>
    %774 = arith.addf %773, %772 : vector<2x32xf32>
    %775 = arith.divf %773, %774 : vector<2x32xf32>
    %776 = vector.extract_strided_slice %763 {offsets = [0, 64], sizes = [2, 32], strides = [1, 1]} : vector<2x128xf32> to vector<2x32xf32>
    %777 = math.tanh %776 : vector<2x32xf32>
    %778 = vector.extract_strided_slice %763 {offsets = [0, 96], sizes = [2, 32], strides = [1, 1]} : vector<2x128xf32> to vector<2x32xf32>
    %779 = arith.negf %778 : vector<2x32xf32>
    %780 = math.exp %779 : vector<2x32xf32>
    %cst_183 = arith.constant 1.000000e+00 : f32
    %781 = vector.broadcast %cst_183 : f32 to vector<2x32xf32>
    %782 = arith.addf %781, %780 : vector<2x32xf32>
    %783 = arith.divf %781, %782 : vector<2x32xf32>
    %784 = arith.mulf %775, %760 : vector<2x32xf32>
    %785 = arith.mulf %769, %777 : vector<2x32xf32>
    %786 = arith.addf %784, %785 : vector<2x32xf32>
    %787 = math.tanh %786 : vector<2x32xf32>
    %788 = arith.mulf %783, %787 : vector<2x32xf32>
    %c14_184 = arith.constant 14 : index
    %c0_185 = arith.constant 0 : index
    %789 = vector.load %arg10[%c14_184, %c0_185] : memref<16x32xf32, #tpu.memory_space<vmem>>, vector<2x32xf32>
    tpu.vector_store %arg10[%c14_184, %c0_185], %788 {strides = array<i32>} : memref<16x32xf32, #tpu.memory_space<vmem>>, vector<2x32xf32>,
    %790 = vector.extract_strided_slice %756 {offsets = [12, 0], sizes = [2, 128], strides = [1, 1]} : vector<16x128xf32> to vector<2x128xf32>
    %cst_186 = arith.constant dense<0.000000e+00> : vector<2x128xf32>
    %791 = tpu.matmul %788, %758, %cst_186 {dimension_numbers = #tpu.dot_dimension_numbers<[1], [0], [0], [1], [0, 0, 1, 1], [], []>} : vector<2x32xf32>, vector<32x128xf32>, vector<2x128xf32> -> vector<2x128xf32>
    %792 = arith.addf %790, %791 : vector<2x128xf32>
    %793 = vector.extract_strided_slice %792 {offsets = [0, 0], sizes = [2, 32], strides = [1, 1]} : vector<2x128xf32> to vector<2x32xf32>
    %794 = arith.negf %793 : vector<2x32xf32>
    %795 = math.exp %794 : vector<2x32xf32>
    %cst_187 = arith.constant 1.000000e+00 : f32
    %796 = vector.broadcast %cst_187 : f32 to vector<2x32xf32>
    %797 = arith.addf %796, %795 : vector<2x32xf32>
    %798 = arith.divf %796, %797 : vector<2x32xf32>
    %799 = vector.extract_strided_slice %792 {offsets = [0, 32], sizes = [2, 32], strides = [1, 1]} : vector<2x128xf32> to vector<2x32xf32>
    %800 = arith.negf %799 : vector<2x32xf32>
    %801 = math.exp %800 : vector<2x32xf32>
    %cst_188 = arith.constant 1.000000e+00 : f32
    %802 = vector.broadcast %cst_188 : f32 to vector<2x32xf32>
    %803 = arith.addf %802, %801 : vector<2x32xf32>
    %804 = arith.divf %802, %803 : vector<2x32xf32>
    %805 = vector.extract_strided_slice %792 {offsets = [0, 64], sizes = [2, 32], strides = [1, 1]} : vector<2x128xf32> to vector<2x32xf32>
    %806 = math.tanh %805 : vector<2x32xf32>
    %807 = vector.extract_strided_slice %792 {offsets = [0, 96], sizes = [2, 32], strides = [1, 1]} : vector<2x128xf32> to vector<2x32xf32>
    %808 = arith.negf %807 : vector<2x32xf32>
    %809 = math.exp %808 : vector<2x32xf32>
    %cst_189 = arith.constant 1.000000e+00 : f32
    %810 = vector.broadcast %cst_189 : f32 to vector<2x32xf32>
    %811 = arith.addf %810, %809 : vector<2x32xf32>
    %812 = arith.divf %810, %811 : vector<2x32xf32>
    %813 = arith.mulf %804, %786 : vector<2x32xf32>
    %814 = arith.mulf %798, %806 : vector<2x32xf32>
    %815 = arith.addf %813, %814 : vector<2x32xf32>
    %816 = math.tanh %815 : vector<2x32xf32>
    %817 = arith.mulf %812, %816 : vector<2x32xf32>
    %c12_190 = arith.constant 12 : index
    %c0_191 = arith.constant 0 : index
    %818 = vector.load %arg10[%c12_190, %c0_191] : memref<16x32xf32, #tpu.memory_space<vmem>>, vector<2x32xf32>
    tpu.vector_store %arg10[%c12_190, %c0_191], %817 {strides = array<i32>} : memref<16x32xf32, #tpu.memory_space<vmem>>, vector<2x32xf32>,
    %819 = vector.extract_strided_slice %756 {offsets = [10, 0], sizes = [2, 128], strides = [1, 1]} : vector<16x128xf32> to vector<2x128xf32>
    %cst_192 = arith.constant dense<0.000000e+00> : vector<2x128xf32>
    %820 = tpu.matmul %817, %758, %cst_192 {dimension_numbers = #tpu.dot_dimension_numbers<[1], [0], [0], [1], [0, 0, 1, 1], [], []>} : vector<2x32xf32>, vector<32x128xf32>, vector<2x128xf32> -> vector<2x128xf32>
    %821 = arith.addf %819, %820 : vector<2x128xf32>
    %822 = vector.extract_strided_slice %821 {offsets = [0, 0], sizes = [2, 32], strides = [1, 1]} : vector<2x128xf32> to vector<2x32xf32>
    %823 = arith.negf %822 : vector<2x32xf32>
    %824 = math.exp %823 : vector<2x32xf32>
    %cst_193 = arith.constant 1.000000e+00 : f32
    %825 = vector.broadcast %cst_193 : f32 to vector<2x32xf32>
    %826 = arith.addf %825, %824 : vector<2x32xf32>
    %827 = arith.divf %825, %826 : vector<2x32xf32>
    %828 = vector.extract_strided_slice %821 {offsets = [0, 32], sizes = [2, 32], strides = [1, 1]} : vector<2x128xf32> to vector<2x32xf32>
    %829 = arith.negf %828 : vector<2x32xf32>
    %830 = math.exp %829 : vector<2x32xf32>
    %cst_194 = arith.constant 1.000000e+00 : f32
    %831 = vector.broadcast %cst_194 : f32 to vector<2x32xf32>
    %832 = arith.addf %831, %830 : vector<2x32xf32>
    %833 = arith.divf %831, %832 : vector<2x32xf32>
    %834 = vector.extract_strided_slice %821 {offsets = [0, 64], sizes = [2, 32], strides = [1, 1]} : vector<2x128xf32> to vector<2x32xf32>
    %835 = math.tanh %834 : vector<2x32xf32>
    %836 = vector.extract_strided_slice %821 {offsets = [0, 96], sizes = [2, 32], strides = [1, 1]} : vector<2x128xf32> to vector<2x32xf32>
    %837 = arith.negf %836 : vector<2x32xf32>
    %838 = math.exp %837 : vector<2x32xf32>
    %cst_195 = arith.constant 1.000000e+00 : f32
    %839 = vector.broadcast %cst_195 : f32 to vector<2x32xf32>
    %840 = arith.addf %839, %838 : vector<2x32xf32>
    %841 = arith.divf %839, %840 : vector<2x32xf32>
    %842 = arith.mulf %833, %815 : vector<2x32xf32>
    %843 = arith.mulf %827, %835 : vector<2x32xf32>
    %844 = arith.addf %842, %843 : vector<2x32xf32>
    %845 = math.tanh %844 : vector<2x32xf32>
    %846 = arith.mulf %841, %845 : vector<2x32xf32>
    %c10_196 = arith.constant 10 : index
    %c0_197 = arith.constant 0 : index
    %847 = vector.load %arg10[%c10_196, %c0_197] : memref<16x32xf32, #tpu.memory_space<vmem>>, vector<2x32xf32>
    tpu.vector_store %arg10[%c10_196, %c0_197], %846 {strides = array<i32>} : memref<16x32xf32, #tpu.memory_space<vmem>>, vector<2x32xf32>,
    %848 = vector.extract_strided_slice %756 {offsets = [8, 0], sizes = [2, 128], strides = [1, 1]} : vector<16x128xf32> to vector<2x128xf32>
    %cst_198 = arith.constant dense<0.000000e+00> : vector<2x128xf32>
    %849 = tpu.matmul %846, %758, %cst_198 {dimension_numbers = #tpu.dot_dimension_numbers<[1], [0], [0], [1], [0, 0, 1, 1], [], []>} : vector<2x32xf32>, vector<32x128xf32>, vector<2x128xf32> -> vector<2x128xf32>
    %850 = arith.addf %848, %849 : vector<2x128xf32>
    %851 = vector.extract_strided_slice %850 {offsets = [0, 0], sizes = [2, 32], strides = [1, 1]} : vector<2x128xf32> to vector<2x32xf32>
    %852 = arith.negf %851 : vector<2x32xf32>
    %853 = math.exp %852 : vector<2x32xf32>
    %cst_199 = arith.constant 1.000000e+00 : f32
    %854 = vector.broadcast %cst_199 : f32 to vector<2x32xf32>
    %855 = arith.addf %854, %853 : vector<2x32xf32>
    %856 = arith.divf %854, %855 : vector<2x32xf32>
    %857 = vector.extract_strided_slice %850 {offsets = [0, 32], sizes = [2, 32], strides = [1, 1]} : vector<2x128xf32> to vector<2x32xf32>
    %858 = arith.negf %857 : vector<2x32xf32>
    %859 = math.exp %858 : vector<2x32xf32>
    %cst_200 = arith.constant 1.000000e+00 : f32
    %860 = vector.broadcast %cst_200 : f32 to vector<2x32xf32>
    %861 = arith.addf %860, %859 : vector<2x32xf32>
    %862 = arith.divf %860, %861 : vector<2x32xf32>
    %863 = vector.extract_strided_slice %850 {offsets = [0, 64], sizes = [2, 32], strides = [1, 1]} : vector<2x128xf32> to vector<2x32xf32>
    %864 = math.tanh %863 : vector<2x32xf32>
    %865 = vector.extract_strided_slice %850 {offsets = [0, 96], sizes = [2, 32], strides = [1, 1]} : vector<2x128xf32> to vector<2x32xf32>
    %866 = arith.negf %865 : vector<2x32xf32>
    %867 = math.exp %866 : vector<2x32xf32>
    %cst_201 = arith.constant 1.000000e+00 : f32
    %868 = vector.broadcast %cst_201 : f32 to vector<2x32xf32>
    %869 = arith.addf %868, %867 : vector<2x32xf32>
    %870 = arith.divf %868, %869 : vector<2x32xf32>
    %871 = arith.mulf %862, %844 : vector<2x32xf32>
    %872 = arith.mulf %856, %864 : vector<2x32xf32>
    %873 = arith.addf %871, %872 : vector<2x32xf32>
    %874 = math.tanh %873 : vector<2x32xf32>
    %875 = arith.mulf %870, %874 : vector<2x32xf32>
    %c8_202 = arith.constant 8 : index
    %c0_203 = arith.constant 0 : index
    %876 = vector.load %arg10[%c8_202, %c0_203] : memref<16x32xf32, #tpu.memory_space<vmem>>, vector<2x32xf32>
    tpu.vector_store %arg10[%c8_202, %c0_203], %875 {strides = array<i32>} : memref<16x32xf32, #tpu.memory_space<vmem>>, vector<2x32xf32>,
    %877 = vector.extract_strided_slice %756 {offsets = [6, 0], sizes = [2, 128], strides = [1, 1]} : vector<16x128xf32> to vector<2x128xf32>
    %cst_204 = arith.constant dense<0.000000e+00> : vector<2x128xf32>
    %878 = tpu.matmul %875, %758, %cst_204 {dimension_numbers = #tpu.dot_dimension_numbers<[1], [0], [0], [1], [0, 0, 1, 1], [], []>} : vector<2x32xf32>, vector<32x128xf32>, vector<2x128xf32> -> vector<2x128xf32>
    %879 = arith.addf %877, %878 : vector<2x128xf32>
    %880 = vector.extract_strided_slice %879 {offsets = [0, 0], sizes = [2, 32], strides = [1, 1]} : vector<2x128xf32> to vector<2x32xf32>
    %881 = arith.negf %880 : vector<2x32xf32>
    %882 = math.exp %881 : vector<2x32xf32>
    %cst_205 = arith.constant 1.000000e+00 : f32
    %883 = vector.broadcast %cst_205 : f32 to vector<2x32xf32>
    %884 = arith.addf %883, %882 : vector<2x32xf32>
    %885 = arith.divf %883, %884 : vector<2x32xf32>
    %886 = vector.extract_strided_slice %879 {offsets = [0, 32], sizes = [2, 32], strides = [1, 1]} : vector<2x128xf32> to vector<2x32xf32>
    %887 = arith.negf %886 : vector<2x32xf32>
    %888 = math.exp %887 : vector<2x32xf32>
    %cst_206 = arith.constant 1.000000e+00 : f32
    %889 = vector.broadcast %cst_206 : f32 to vector<2x32xf32>
    %890 = arith.addf %889, %888 : vector<2x32xf32>
    %891 = arith.divf %889, %890 : vector<2x32xf32>
    %892 = vector.extract_strided_slice %879 {offsets = [0, 64], sizes = [2, 32], strides = [1, 1]} : vector<2x128xf32> to vector<2x32xf32>
    %893 = math.tanh %892 : vector<2x32xf32>
    %894 = vector.extract_strided_slice %879 {offsets = [0, 96], sizes = [2, 32], strides = [1, 1]} : vector<2x128xf32> to vector<2x32xf32>
    %895 = arith.negf %894 : vector<2x32xf32>
    %896 = math.exp %895 : vector<2x32xf32>
    %cst_207 = arith.constant 1.000000e+00 : f32
    %897 = vector.broadcast %cst_207 : f32 to vector<2x32xf32>
    %898 = arith.addf %897, %896 : vector<2x32xf32>
    %899 = arith.divf %897, %898 : vector<2x32xf32>
    %900 = arith.mulf %891, %873 : vector<2x32xf32>
    %901 = arith.mulf %885, %893 : vector<2x32xf32>
    %902 = arith.addf %900, %901 : vector<2x32xf32>
    %903 = math.tanh %902 : vector<2x32xf32>
    %904 = arith.mulf %899, %903 : vector<2x32xf32>
    %c6_208 = arith.constant 6 : index
    %c0_209 = arith.constant 0 : index
    %905 = vector.load %arg10[%c6_208, %c0_209] : memref<16x32xf32, #tpu.memory_space<vmem>>, vector<2x32xf32>
    tpu.vector_store %arg10[%c6_208, %c0_209], %904 {strides = array<i32>} : memref<16x32xf32, #tpu.memory_space<vmem>>, vector<2x32xf32>,
    %906 = vector.extract_strided_slice %756 {offsets = [4, 0], sizes = [2, 128], strides = [1, 1]} : vector<16x128xf32> to vector<2x128xf32>
    %cst_210 = arith.constant dense<0.000000e+00> : vector<2x128xf32>
    %907 = tpu.matmul %904, %758, %cst_210 {dimension_numbers = #tpu.dot_dimension_numbers<[1], [0], [0], [1], [0, 0, 1, 1], [], []>} : vector<2x32xf32>, vector<32x128xf32>, vector<2x128xf32> -> vector<2x128xf32>
    %908 = arith.addf %906, %907 : vector<2x128xf32>
    %909 = vector.extract_strided_slice %908 {offsets = [0, 0], sizes = [2, 32], strides = [1, 1]} : vector<2x128xf32> to vector<2x32xf32>
    %910 = arith.negf %909 : vector<2x32xf32>
    %911 = math.exp %910 : vector<2x32xf32>
    %cst_211 = arith.constant 1.000000e+00 : f32
    %912 = vector.broadcast %cst_211 : f32 to vector<2x32xf32>
    %913 = arith.addf %912, %911 : vector<2x32xf32>
    %914 = arith.divf %912, %913 : vector<2x32xf32>
    %915 = vector.extract_strided_slice %908 {offsets = [0, 32], sizes = [2, 32], strides = [1, 1]} : vector<2x128xf32> to vector<2x32xf32>
    %916 = arith.negf %915 : vector<2x32xf32>
    %917 = math.exp %916 : vector<2x32xf32>
    %cst_212 = arith.constant 1.000000e+00 : f32
    %918 = vector.broadcast %cst_212 : f32 to vector<2x32xf32>
    %919 = arith.addf %918, %917 : vector<2x32xf32>
    %920 = arith.divf %918, %919 : vector<2x32xf32>
    %921 = vector.extract_strided_slice %908 {offsets = [0, 64], sizes = [2, 32], strides = [1, 1]} : vector<2x128xf32> to vector<2x32xf32>
    %922 = math.tanh %921 : vector<2x32xf32>
    %923 = vector.extract_strided_slice %908 {offsets = [0, 96], sizes = [2, 32], strides = [1, 1]} : vector<2x128xf32> to vector<2x32xf32>
    %924 = arith.negf %923 : vector<2x32xf32>
    %925 = math.exp %924 : vector<2x32xf32>
    %cst_213 = arith.constant 1.000000e+00 : f32
    %926 = vector.broadcast %cst_213 : f32 to vector<2x32xf32>
    %927 = arith.addf %926, %925 : vector<2x32xf32>
    %928 = arith.divf %926, %927 : vector<2x32xf32>
    %929 = arith.mulf %920, %902 : vector<2x32xf32>
    %930 = arith.mulf %914, %922 : vector<2x32xf32>
    %931 = arith.addf %929, %930 : vector<2x32xf32>
    %932 = math.tanh %931 : vector<2x32xf32>
    %933 = arith.mulf %928, %932 : vector<2x32xf32>
    %c4_214 = arith.constant 4 : index
    %c0_215 = arith.constant 0 : index
    %934 = vector.load %arg10[%c4_214, %c0_215] : memref<16x32xf32, #tpu.memory_space<vmem>>, vector<2x32xf32>
    tpu.vector_store %arg10[%c4_214, %c0_215], %933 {strides = array<i32>} : memref<16x32xf32, #tpu.memory_space<vmem>>, vector<2x32xf32>,
    %935 = vector.extract_strided_slice %756 {offsets = [2, 0], sizes = [2, 128], strides = [1, 1]} : vector<16x128xf32> to vector<2x128xf32>
    %cst_216 = arith.constant dense<0.000000e+00> : vector<2x128xf32>
    %936 = tpu.matmul %933, %758, %cst_216 {dimension_numbers = #tpu.dot_dimension_numbers<[1], [0], [0], [1], [0, 0, 1, 1], [], []>} : vector<2x32xf32>, vector<32x128xf32>, vector<2x128xf32> -> vector<2x128xf32>
    %937 = arith.addf %935, %936 : vector<2x128xf32>
    %938 = vector.extract_strided_slice %937 {offsets = [0, 0], sizes = [2, 32], strides = [1, 1]} : vector<2x128xf32> to vector<2x32xf32>
    %939 = arith.negf %938 : vector<2x32xf32>
    %940 = math.exp %939 : vector<2x32xf32>
    %cst_217 = arith.constant 1.000000e+00 : f32
    %941 = vector.broadcast %cst_217 : f32 to vector<2x32xf32>
    %942 = arith.addf %941, %940 : vector<2x32xf32>
    %943 = arith.divf %941, %942 : vector<2x32xf32>
    %944 = vector.extract_strided_slice %937 {offsets = [0, 32], sizes = [2, 32], strides = [1, 1]} : vector<2x128xf32> to vector<2x32xf32>
    %945 = arith.negf %944 : vector<2x32xf32>
    %946 = math.exp %945 : vector<2x32xf32>
    %cst_218 = arith.constant 1.000000e+00 : f32
    %947 = vector.broadcast %cst_218 : f32 to vector<2x32xf32>
    %948 = arith.addf %947, %946 : vector<2x32xf32>
    %949 = arith.divf %947, %948 : vector<2x32xf32>
    %950 = vector.extract_strided_slice %937 {offsets = [0, 64], sizes = [2, 32], strides = [1, 1]} : vector<2x128xf32> to vector<2x32xf32>
    %951 = math.tanh %950 : vector<2x32xf32>
    %952 = vector.extract_strided_slice %937 {offsets = [0, 96], sizes = [2, 32], strides = [1, 1]} : vector<2x128xf32> to vector<2x32xf32>
    %953 = arith.negf %952 : vector<2x32xf32>
    %954 = math.exp %953 : vector<2x32xf32>
    %cst_219 = arith.constant 1.000000e+00 : f32
    %955 = vector.broadcast %cst_219 : f32 to vector<2x32xf32>
    %956 = arith.addf %955, %954 : vector<2x32xf32>
    %957 = arith.divf %955, %956 : vector<2x32xf32>
    %958 = arith.mulf %949, %931 : vector<2x32xf32>
    %959 = arith.mulf %943, %951 : vector<2x32xf32>
    %960 = arith.addf %958, %959 : vector<2x32xf32>
    %961 = math.tanh %960 : vector<2x32xf32>
    %962 = arith.mulf %957, %961 : vector<2x32xf32>
    %c2_220 = arith.constant 2 : index
    %c0_221 = arith.constant 0 : index
    %963 = vector.load %arg10[%c2_220, %c0_221] : memref<16x32xf32, #tpu.memory_space<vmem>>, vector<2x32xf32>
    tpu.vector_store %arg10[%c2_220, %c0_221], %962 {strides = array<i32>} : memref<16x32xf32, #tpu.memory_space<vmem>>, vector<2x32xf32>,
    %964 = vector.extract_strided_slice %756 {offsets = [0, 0], sizes = [2, 128], strides = [1, 1]} : vector<16x128xf32> to vector<2x128xf32>
    %cst_222 = arith.constant dense<0.000000e+00> : vector<2x128xf32>
    %965 = tpu.matmul %962, %758, %cst_222 {dimension_numbers = #tpu.dot_dimension_numbers<[1], [0], [0], [1], [0, 0, 1, 1], [], []>} : vector<2x32xf32>, vector<32x128xf32>, vector<2x128xf32> -> vector<2x128xf32>
    %966 = arith.addf %964, %965 : vector<2x128xf32>
    %967 = vector.extract_strided_slice %966 {offsets = [0, 0], sizes = [2, 32], strides = [1, 1]} : vector<2x128xf32> to vector<2x32xf32>
    %968 = arith.negf %967 : vector<2x32xf32>
    %969 = math.exp %968 : vector<2x32xf32>
    %cst_223 = arith.constant 1.000000e+00 : f32
    %970 = vector.broadcast %cst_223 : f32 to vector<2x32xf32>
    %971 = arith.addf %970, %969 : vector<2x32xf32>
    %972 = arith.divf %970, %971 : vector<2x32xf32>
    %973 = vector.extract_strided_slice %966 {offsets = [0, 32], sizes = [2, 32], strides = [1, 1]} : vector<2x128xf32> to vector<2x32xf32>
    %974 = arith.negf %973 : vector<2x32xf32>
    %975 = math.exp %974 : vector<2x32xf32>
    %cst_224 = arith.constant 1.000000e+00 : f32
    %976 = vector.broadcast %cst_224 : f32 to vector<2x32xf32>
    %977 = arith.addf %976, %975 : vector<2x32xf32>
    %978 = arith.divf %976, %977 : vector<2x32xf32>
    %979 = vector.extract_strided_slice %966 {offsets = [0, 64], sizes = [2, 32], strides = [1, 1]} : vector<2x128xf32> to vector<2x32xf32>
    %980 = math.tanh %979 : vector<2x32xf32>
    %981 = vector.extract_strided_slice %966 {offsets = [0, 96], sizes = [2, 32], strides = [1, 1]} : vector<2x128xf32> to vector<2x32xf32>
    %982 = arith.negf %981 : vector<2x32xf32>
    %983 = math.exp %982 : vector<2x32xf32>
    %cst_225 = arith.constant 1.000000e+00 : f32
    %984 = vector.broadcast %cst_225 : f32 to vector<2x32xf32>
    %985 = arith.addf %984, %983 : vector<2x32xf32>
    %986 = arith.divf %984, %985 : vector<2x32xf32>
    %987 = arith.mulf %978, %960 : vector<2x32xf32>
    %988 = arith.mulf %972, %980 : vector<2x32xf32>
    %989 = arith.addf %987, %988 : vector<2x32xf32>
    %990 = math.tanh %989 : vector<2x32xf32>
    %991 = arith.mulf %986, %990 : vector<2x32xf32>
    %c0_226 = arith.constant 0 : index
    %c0_227 = arith.constant 0 : index
    %992 = vector.load %arg10[%c0_226, %c0_227] : memref<16x32xf32, #tpu.memory_space<vmem>>, vector<2x32xf32>
    tpu.vector_store %arg10[%c0_226, %c0_227], %991 {strides = array<i32>} : memref<16x32xf32, #tpu.memory_space<vmem>>, vector<2x32xf32>,
    %c0_228 = arith.constant 0 : index
    %c0_229 = arith.constant 0 : index
    %993 = vector.load %arg9[%c0_228, %c0_229] : memref<16x32xf32, #tpu.memory_space<vmem>>, vector<16x32xf32>
    %c0_230 = arith.constant 0 : index
    %c0_231 = arith.constant 0 : index
    %994 = vector.load %arg10[%c0_230, %c0_231] : memref<16x32xf32, #tpu.memory_space<vmem>>, vector<16x32xf32>
    %c1_232 = arith.constant 1 : index
    %c0_233 = arith.constant 0 : index
    %c0_234 = arith.constant 0 : index
    %c0_235 = arith.constant 0 : index
    %995 = vector.load %arg3[%c1_232, %c0_233, %c0_234, %c0_235] : memref<2x2x64x128xf32, #tpu.memory_space<vmem>>, vector<1x2x64x128xf32>
    %996 = vector.shape_cast %995 : vector<1x2x64x128xf32> to vector<2x64x128xf32>
    %997 = vector.extract_strided_slice %996 {offsets = [0, 0, 0], sizes = [1, 64, 128], strides = [1, 1, 1]} : vector<2x64x128xf32> to vector<1x64x128xf32>
    %998 = vector.shape_cast %997 : vector<1x64x128xf32> to vector<64x128xf32>
    %999 = vector.extract_strided_slice %996 {offsets = [1, 0, 0], sizes = [1, 64, 128], strides = [1, 1, 1]} : vector<2x64x128xf32> to vector<1x64x128xf32>
    %1000 = vector.shape_cast %999 : vector<1x64x128xf32> to vector<64x128xf32>
    %1001 = vector.extract_strided_slice %998 {offsets = [0, 0], sizes = [32, 128], strides = [1, 1]} : vector<64x128xf32> to vector<32x128xf32>
    %cst_236 = arith.constant dense<0.000000e+00> : vector<16x128xf32>
    %1002 = tpu.matmul %993, %1001, %cst_236 {dimension_numbers = #tpu.dot_dimension_numbers<[1], [0], [0], [1], [0, 0, 1, 1], [], []>} : vector<16x32xf32>, vector<32x128xf32>, vector<16x128xf32> -> vector<16x128xf32>
    %1003 = vector.extract_strided_slice %998 {offsets = [32, 0], sizes = [32, 128], strides = [1, 1]} : vector<64x128xf32> to vector<32x128xf32>
    %cst_237 = arith.constant dense<0.000000e+00> : vector<16x128xf32>
    %1004 = tpu.matmul %994, %1003, %cst_237 {dimension_numbers = #tpu.dot_dimension_numbers<[1], [0], [0], [1], [0, 0, 1, 1], [], []>} : vector<16x32xf32>, vector<32x128xf32>, vector<16x128xf32> -> vector<16x128xf32>
    %1005 = arith.addf %1002, %1004 : vector<16x128xf32>
    %1006 = vector.extract_strided_slice %1000 {offsets = [0, 0], sizes = [32, 128], strides = [1, 1]} : vector<64x128xf32> to vector<32x128xf32>
    %cst_238 = arith.constant dense<0.000000e+00> : vector<16x128xf32>
    %1007 = tpu.matmul %993, %1006, %cst_238 {dimension_numbers = #tpu.dot_dimension_numbers<[1], [0], [0], [1], [0, 0, 1, 1], [], []>} : vector<16x32xf32>, vector<32x128xf32>, vector<16x128xf32> -> vector<16x128xf32>
    %1008 = vector.extract_strided_slice %1000 {offsets = [32, 0], sizes = [32, 128], strides = [1, 1]} : vector<64x128xf32> to vector<32x128xf32>
    %cst_239 = arith.constant dense<0.000000e+00> : vector<16x128xf32>
    %1009 = tpu.matmul %994, %1008, %cst_239 {dimension_numbers = #tpu.dot_dimension_numbers<[1], [0], [0], [1], [0, 0, 1, 1], [], []>} : vector<16x32xf32>, vector<32x128xf32>, vector<16x128xf32> -> vector<16x128xf32>
    %1010 = arith.addf %1007, %1009 : vector<16x128xf32>
    %c2_240 = arith.constant 2 : index
    %c0_241 = arith.constant 0 : index
    %c0_242 = arith.constant 0 : index
    %c0_243 = arith.constant 0 : index
    %1011 = vector.load %arg5[%c2_240, %c0_241, %c0_242, %c0_243] : memref<3x2x1x128xf32, #tpu.memory_space<vmem>>, vector<1x2x1x128xf32>
    %1012 = vector.shape_cast %1011 : vector<1x2x1x128xf32> to vector<2x1x128xf32>
    %c2_244 = arith.constant 2 : index
    %c0_245 = arith.constant 0 : index
    %c0_246 = arith.constant 0 : index
    %c0_247 = arith.constant 0 : index
    %1013 = vector.load %arg4[%c2_244, %c0_245, %c0_246, %c0_247] : memref<3x2x32x128xf32, #tpu.memory_space<vmem>>, vector<1x2x32x128xf32>
    %1014 = vector.shape_cast %1013 : vector<1x2x32x128xf32> to vector<2x32x128xf32>
    %1015 = vector.extract_strided_slice %1012 {offsets = [0, 0, 0], sizes = [1, 1, 128], strides = [1, 1, 1]} : vector<2x1x128xf32> to vector<1x1x128xf32>
    %1016 = vector.shape_cast %1015 : vector<1x1x128xf32> to vector<1x128xf32>
    %1017 = vector.broadcast %1016 : vector<1x128xf32> to vector<16x128xf32>
    %1018 = arith.addf %1005, %1017 : vector<16x128xf32>
    %1019 = vector.extract_strided_slice %1014 {offsets = [0, 0, 0], sizes = [1, 32, 128], strides = [1, 1, 1]} : vector<2x32x128xf32> to vector<1x32x128xf32>
    %1020 = vector.shape_cast %1019 : vector<1x32x128xf32> to vector<32x128xf32>
    %cst_248 = arith.constant 0.000000e+00 : f32
    %1021 = vector.broadcast %cst_248 : f32 to vector<2x32xf32>
    %cst_249 = arith.constant 0.000000e+00 : f32
    %1022 = vector.broadcast %cst_249 : f32 to vector<2x32xf32>
    %1023 = vector.extract_strided_slice %1018 {offsets = [0, 0], sizes = [2, 128], strides = [1, 1]} : vector<16x128xf32> to vector<2x128xf32>
    %cst_250 = arith.constant dense<0.000000e+00> : vector<2x128xf32>
    %1024 = tpu.matmul %1021, %1020, %cst_250 {dimension_numbers = #tpu.dot_dimension_numbers<[1], [0], [0], [1], [0, 0, 1, 1], [], []>} : vector<2x32xf32>, vector<32x128xf32>, vector<2x128xf32> -> vector<2x128xf32>
    %1025 = arith.addf %1023, %1024 : vector<2x128xf32>
    %1026 = vector.extract_strided_slice %1025 {offsets = [0, 0], sizes = [2, 32], strides = [1, 1]} : vector<2x128xf32> to vector<2x32xf32>
    %1027 = arith.negf %1026 : vector<2x32xf32>
    %1028 = math.exp %1027 : vector<2x32xf32>
    %cst_251 = arith.constant 1.000000e+00 : f32
    %1029 = vector.broadcast %cst_251 : f32 to vector<2x32xf32>
    %1030 = arith.addf %1029, %1028 : vector<2x32xf32>
    %1031 = arith.divf %1029, %1030 : vector<2x32xf32>
    %1032 = vector.extract_strided_slice %1025 {offsets = [0, 32], sizes = [2, 32], strides = [1, 1]} : vector<2x128xf32> to vector<2x32xf32>
    %1033 = arith.negf %1032 : vector<2x32xf32>
    %1034 = math.exp %1033 : vector<2x32xf32>
    %cst_252 = arith.constant 1.000000e+00 : f32
    %1035 = vector.broadcast %cst_252 : f32 to vector<2x32xf32>
    %1036 = arith.addf %1035, %1034 : vector<2x32xf32>
    %1037 = arith.divf %1035, %1036 : vector<2x32xf32>
    %1038 = vector.extract_strided_slice %1025 {offsets = [0, 64], sizes = [2, 32], strides = [1, 1]} : vector<2x128xf32> to vector<2x32xf32>
    %1039 = math.tanh %1038 : vector<2x32xf32>
    %1040 = vector.extract_strided_slice %1025 {offsets = [0, 96], sizes = [2, 32], strides = [1, 1]} : vector<2x128xf32> to vector<2x32xf32>
    %1041 = arith.negf %1040 : vector<2x32xf32>
    %1042 = math.exp %1041 : vector<2x32xf32>
    %cst_253 = arith.constant 1.000000e+00 : f32
    %1043 = vector.broadcast %cst_253 : f32 to vector<2x32xf32>
    %1044 = arith.addf %1043, %1042 : vector<2x32xf32>
    %1045 = arith.divf %1043, %1044 : vector<2x32xf32>
    %1046 = arith.mulf %1037, %1022 : vector<2x32xf32>
    %1047 = arith.mulf %1031, %1039 : vector<2x32xf32>
    %1048 = arith.addf %1046, %1047 : vector<2x32xf32>
    %1049 = math.tanh %1048 : vector<2x32xf32>
    %1050 = arith.mulf %1045, %1049 : vector<2x32xf32>
    %c0_254 = arith.constant 0 : index
    %c0_255 = arith.constant 0 : index
    %1051 = vector.load %arg9[%c0_254, %c0_255] : memref<16x32xf32, #tpu.memory_space<vmem>>, vector<2x32xf32>
    tpu.vector_store %arg9[%c0_254, %c0_255], %1050 {strides = array<i32>} : memref<16x32xf32, #tpu.memory_space<vmem>>, vector<2x32xf32>,
    %1052 = vector.extract_strided_slice %1018 {offsets = [2, 0], sizes = [2, 128], strides = [1, 1]} : vector<16x128xf32> to vector<2x128xf32>
    %cst_256 = arith.constant dense<0.000000e+00> : vector<2x128xf32>
    %1053 = tpu.matmul %1050, %1020, %cst_256 {dimension_numbers = #tpu.dot_dimension_numbers<[1], [0], [0], [1], [0, 0, 1, 1], [], []>} : vector<2x32xf32>, vector<32x128xf32>, vector<2x128xf32> -> vector<2x128xf32>
    %1054 = arith.addf %1052, %1053 : vector<2x128xf32>
    %1055 = vector.extract_strided_slice %1054 {offsets = [0, 0], sizes = [2, 32], strides = [1, 1]} : vector<2x128xf32> to vector<2x32xf32>
    %1056 = arith.negf %1055 : vector<2x32xf32>
    %1057 = math.exp %1056 : vector<2x32xf32>
    %cst_257 = arith.constant 1.000000e+00 : f32
    %1058 = vector.broadcast %cst_257 : f32 to vector<2x32xf32>
    %1059 = arith.addf %1058, %1057 : vector<2x32xf32>
    %1060 = arith.divf %1058, %1059 : vector<2x32xf32>
    %1061 = vector.extract_strided_slice %1054 {offsets = [0, 32], sizes = [2, 32], strides = [1, 1]} : vector<2x128xf32> to vector<2x32xf32>
    %1062 = arith.negf %1061 : vector<2x32xf32>
    %1063 = math.exp %1062 : vector<2x32xf32>
    %cst_258 = arith.constant 1.000000e+00 : f32
    %1064 = vector.broadcast %cst_258 : f32 to vector<2x32xf32>
    %1065 = arith.addf %1064, %1063 : vector<2x32xf32>
    %1066 = arith.divf %1064, %1065 : vector<2x32xf32>
    %1067 = vector.extract_strided_slice %1054 {offsets = [0, 64], sizes = [2, 32], strides = [1, 1]} : vector<2x128xf32> to vector<2x32xf32>
    %1068 = math.tanh %1067 : vector<2x32xf32>
    %1069 = vector.extract_strided_slice %1054 {offsets = [0, 96], sizes = [2, 32], strides = [1, 1]} : vector<2x128xf32> to vector<2x32xf32>
    %1070 = arith.negf %1069 : vector<2x32xf32>
    %1071 = math.exp %1070 : vector<2x32xf32>
    %cst_259 = arith.constant 1.000000e+00 : f32
    %1072 = vector.broadcast %cst_259 : f32 to vector<2x32xf32>
    %1073 = arith.addf %1072, %1071 : vector<2x32xf32>
    %1074 = arith.divf %1072, %1073 : vector<2x32xf32>
    %1075 = arith.mulf %1066, %1048 : vector<2x32xf32>
    %1076 = arith.mulf %1060, %1068 : vector<2x32xf32>
    %1077 = arith.addf %1075, %1076 : vector<2x32xf32>
    %1078 = math.tanh %1077 : vector<2x32xf32>
    %1079 = arith.mulf %1074, %1078 : vector<2x32xf32>
    %c2_260 = arith.constant 2 : index
    %c0_261 = arith.constant 0 : index
    %1080 = vector.load %arg9[%c2_260, %c0_261] : memref<16x32xf32, #tpu.memory_space<vmem>>, vector<2x32xf32>
    tpu.vector_store %arg9[%c2_260, %c0_261], %1079 {strides = array<i32>} : memref<16x32xf32, #tpu.memory_space<vmem>>, vector<2x32xf32>,
    %1081 = vector.extract_strided_slice %1018 {offsets = [4, 0], sizes = [2, 128], strides = [1, 1]} : vector<16x128xf32> to vector<2x128xf32>
    %cst_262 = arith.constant dense<0.000000e+00> : vector<2x128xf32>
    %1082 = tpu.matmul %1079, %1020, %cst_262 {dimension_numbers = #tpu.dot_dimension_numbers<[1], [0], [0], [1], [0, 0, 1, 1], [], []>} : vector<2x32xf32>, vector<32x128xf32>, vector<2x128xf32> -> vector<2x128xf32>
    %1083 = arith.addf %1081, %1082 : vector<2x128xf32>
    %1084 = vector.extract_strided_slice %1083 {offsets = [0, 0], sizes = [2, 32], strides = [1, 1]} : vector<2x128xf32> to vector<2x32xf32>
    %1085 = arith.negf %1084 : vector<2x32xf32>
    %1086 = math.exp %1085 : vector<2x32xf32>
    %cst_263 = arith.constant 1.000000e+00 : f32
    %1087 = vector.broadcast %cst_263 : f32 to vector<2x32xf32>
    %1088 = arith.addf %1087, %1086 : vector<2x32xf32>
    %1089 = arith.divf %1087, %1088 : vector<2x32xf32>
    %1090 = vector.extract_strided_slice %1083 {offsets = [0, 32], sizes = [2, 32], strides = [1, 1]} : vector<2x128xf32> to vector<2x32xf32>
    %1091 = arith.negf %1090 : vector<2x32xf32>
    %1092 = math.exp %1091 : vector<2x32xf32>
    %cst_264 = arith.constant 1.000000e+00 : f32
    %1093 = vector.broadcast %cst_264 : f32 to vector<2x32xf32>
    %1094 = arith.addf %1093, %1092 : vector<2x32xf32>
    %1095 = arith.divf %1093, %1094 : vector<2x32xf32>
    %1096 = vector.extract_strided_slice %1083 {offsets = [0, 64], sizes = [2, 32], strides = [1, 1]} : vector<2x128xf32> to vector<2x32xf32>
    %1097 = math.tanh %1096 : vector<2x32xf32>
    %1098 = vector.extract_strided_slice %1083 {offsets = [0, 96], sizes = [2, 32], strides = [1, 1]} : vector<2x128xf32> to vector<2x32xf32>
    %1099 = arith.negf %1098 : vector<2x32xf32>
    %1100 = math.exp %1099 : vector<2x32xf32>
    %cst_265 = arith.constant 1.000000e+00 : f32
    %1101 = vector.broadcast %cst_265 : f32 to vector<2x32xf32>
    %1102 = arith.addf %1101, %1100 : vector<2x32xf32>
    %1103 = arith.divf %1101, %1102 : vector<2x32xf32>
    %1104 = arith.mulf %1095, %1077 : vector<2x32xf32>
    %1105 = arith.mulf %1089, %1097 : vector<2x32xf32>
    %1106 = arith.addf %1104, %1105 : vector<2x32xf32>
    %1107 = math.tanh %1106 : vector<2x32xf32>
    %1108 = arith.mulf %1103, %1107 : vector<2x32xf32>
    %c4_266 = arith.constant 4 : index
    %c0_267 = arith.constant 0 : index
    %1109 = vector.load %arg9[%c4_266, %c0_267] : memref<16x32xf32, #tpu.memory_space<vmem>>, vector<2x32xf32>
    tpu.vector_store %arg9[%c4_266, %c0_267], %1108 {strides = array<i32>} : memref<16x32xf32, #tpu.memory_space<vmem>>, vector<2x32xf32>,
    %1110 = vector.extract_strided_slice %1018 {offsets = [6, 0], sizes = [2, 128], strides = [1, 1]} : vector<16x128xf32> to vector<2x128xf32>
    %cst_268 = arith.constant dense<0.000000e+00> : vector<2x128xf32>
    %1111 = tpu.matmul %1108, %1020, %cst_268 {dimension_numbers = #tpu.dot_dimension_numbers<[1], [0], [0], [1], [0, 0, 1, 1], [], []>} : vector<2x32xf32>, vector<32x128xf32>, vector<2x128xf32> -> vector<2x128xf32>
    %1112 = arith.addf %1110, %1111 : vector<2x128xf32>
    %1113 = vector.extract_strided_slice %1112 {offsets = [0, 0], sizes = [2, 32], strides = [1, 1]} : vector<2x128xf32> to vector<2x32xf32>
    %1114 = arith.negf %1113 : vector<2x32xf32>
    %1115 = math.exp %1114 : vector<2x32xf32>
    %cst_269 = arith.constant 1.000000e+00 : f32
    %1116 = vector.broadcast %cst_269 : f32 to vector<2x32xf32>
    %1117 = arith.addf %1116, %1115 : vector<2x32xf32>
    %1118 = arith.divf %1116, %1117 : vector<2x32xf32>
    %1119 = vector.extract_strided_slice %1112 {offsets = [0, 32], sizes = [2, 32], strides = [1, 1]} : vector<2x128xf32> to vector<2x32xf32>
    %1120 = arith.negf %1119 : vector<2x32xf32>
    %1121 = math.exp %1120 : vector<2x32xf32>
    %cst_270 = arith.constant 1.000000e+00 : f32
    %1122 = vector.broadcast %cst_270 : f32 to vector<2x32xf32>
    %1123 = arith.addf %1122, %1121 : vector<2x32xf32>
    %1124 = arith.divf %1122, %1123 : vector<2x32xf32>
    %1125 = vector.extract_strided_slice %1112 {offsets = [0, 64], sizes = [2, 32], strides = [1, 1]} : vector<2x128xf32> to vector<2x32xf32>
    %1126 = math.tanh %1125 : vector<2x32xf32>
    %1127 = vector.extract_strided_slice %1112 {offsets = [0, 96], sizes = [2, 32], strides = [1, 1]} : vector<2x128xf32> to vector<2x32xf32>
    %1128 = arith.negf %1127 : vector<2x32xf32>
    %1129 = math.exp %1128 : vector<2x32xf32>
    %cst_271 = arith.constant 1.000000e+00 : f32
    %1130 = vector.broadcast %cst_271 : f32 to vector<2x32xf32>
    %1131 = arith.addf %1130, %1129 : vector<2x32xf32>
    %1132 = arith.divf %1130, %1131 : vector<2x32xf32>
    %1133 = arith.mulf %1124, %1106 : vector<2x32xf32>
    %1134 = arith.mulf %1118, %1126 : vector<2x32xf32>
    %1135 = arith.addf %1133, %1134 : vector<2x32xf32>
    %1136 = math.tanh %1135 : vector<2x32xf32>
    %1137 = arith.mulf %1132, %1136 : vector<2x32xf32>
    %c6_272 = arith.constant 6 : index
    %c0_273 = arith.constant 0 : index
    %1138 = vector.load %arg9[%c6_272, %c0_273] : memref<16x32xf32, #tpu.memory_space<vmem>>, vector<2x32xf32>
    tpu.vector_store %arg9[%c6_272, %c0_273], %1137 {strides = array<i32>} : memref<16x32xf32, #tpu.memory_space<vmem>>, vector<2x32xf32>,
    %1139 = vector.extract_strided_slice %1018 {offsets = [8, 0], sizes = [2, 128], strides = [1, 1]} : vector<16x128xf32> to vector<2x128xf32>
    %cst_274 = arith.constant dense<0.000000e+00> : vector<2x128xf32>
    %1140 = tpu.matmul %1137, %1020, %cst_274 {dimension_numbers = #tpu.dot_dimension_numbers<[1], [0], [0], [1], [0, 0, 1, 1], [], []>} : vector<2x32xf32>, vector<32x128xf32>, vector<2x128xf32> -> vector<2x128xf32>
    %1141 = arith.addf %1139, %1140 : vector<2x128xf32>
    %1142 = vector.extract_strided_slice %1141 {offsets = [0, 0], sizes = [2, 32], strides = [1, 1]} : vector<2x128xf32> to vector<2x32xf32>
    %1143 = arith.negf %1142 : vector<2x32xf32>
    %1144 = math.exp %1143 : vector<2x32xf32>
    %cst_275 = arith.constant 1.000000e+00 : f32
    %1145 = vector.broadcast %cst_275 : f32 to vector<2x32xf32>
    %1146 = arith.addf %1145, %1144 : vector<2x32xf32>
    %1147 = arith.divf %1145, %1146 : vector<2x32xf32>
    %1148 = vector.extract_strided_slice %1141 {offsets = [0, 32], sizes = [2, 32], strides = [1, 1]} : vector<2x128xf32> to vector<2x32xf32>
    %1149 = arith.negf %1148 : vector<2x32xf32>
    %1150 = math.exp %1149 : vector<2x32xf32>
    %cst_276 = arith.constant 1.000000e+00 : f32
    %1151 = vector.broadcast %cst_276 : f32 to vector<2x32xf32>
    %1152 = arith.addf %1151, %1150 : vector<2x32xf32>
    %1153 = arith.divf %1151, %1152 : vector<2x32xf32>
    %1154 = vector.extract_strided_slice %1141 {offsets = [0, 64], sizes = [2, 32], strides = [1, 1]} : vector<2x128xf32> to vector<2x32xf32>
    %1155 = math.tanh %1154 : vector<2x32xf32>
    %1156 = vector.extract_strided_slice %1141 {offsets = [0, 96], sizes = [2, 32], strides = [1, 1]} : vector<2x128xf32> to vector<2x32xf32>
    %1157 = arith.negf %1156 : vector<2x32xf32>
    %1158 = math.exp %1157 : vector<2x32xf32>
    %cst_277 = arith.constant 1.000000e+00 : f32
    %1159 = vector.broadcast %cst_277 : f32 to vector<2x32xf32>
    %1160 = arith.addf %1159, %1158 : vector<2x32xf32>
    %1161 = arith.divf %1159, %1160 : vector<2x32xf32>
    %1162 = arith.mulf %1153, %1135 : vector<2x32xf32>
    %1163 = arith.mulf %1147, %1155 : vector<2x32xf32>
    %1164 = arith.addf %1162, %1163 : vector<2x32xf32>
    %1165 = math.tanh %1164 : vector<2x32xf32>
    %1166 = arith.mulf %1161, %1165 : vector<2x32xf32>
    %c8_278 = arith.constant 8 : index
    %c0_279 = arith.constant 0 : index
    %1167 = vector.load %arg9[%c8_278, %c0_279] : memref<16x32xf32, #tpu.memory_space<vmem>>, vector<2x32xf32>
    tpu.vector_store %arg9[%c8_278, %c0_279], %1166 {strides = array<i32>} : memref<16x32xf32, #tpu.memory_space<vmem>>, vector<2x32xf32>,
    %1168 = vector.extract_strided_slice %1018 {offsets = [10, 0], sizes = [2, 128], strides = [1, 1]} : vector<16x128xf32> to vector<2x128xf32>
    %cst_280 = arith.constant dense<0.000000e+00> : vector<2x128xf32>
    %1169 = tpu.matmul %1166, %1020, %cst_280 {dimension_numbers = #tpu.dot_dimension_numbers<[1], [0], [0], [1], [0, 0, 1, 1], [], []>} : vector<2x32xf32>, vector<32x128xf32>, vector<2x128xf32> -> vector<2x128xf32>
    %1170 = arith.addf %1168, %1169 : vector<2x128xf32>
    %1171 = vector.extract_strided_slice %1170 {offsets = [0, 0], sizes = [2, 32], strides = [1, 1]} : vector<2x128xf32> to vector<2x32xf32>
    %1172 = arith.negf %1171 : vector<2x32xf32>
    %1173 = math.exp %1172 : vector<2x32xf32>
    %cst_281 = arith.constant 1.000000e+00 : f32
    %1174 = vector.broadcast %cst_281 : f32 to vector<2x32xf32>
    %1175 = arith.addf %1174, %1173 : vector<2x32xf32>
    %1176 = arith.divf %1174, %1175 : vector<2x32xf32>
    %1177 = vector.extract_strided_slice %1170 {offsets = [0, 32], sizes = [2, 32], strides = [1, 1]} : vector<2x128xf32> to vector<2x32xf32>
    %1178 = arith.negf %1177 : vector<2x32xf32>
    %1179 = math.exp %1178 : vector<2x32xf32>
    %cst_282 = arith.constant 1.000000e+00 : f32
    %1180 = vector.broadcast %cst_282 : f32 to vector<2x32xf32>
    %1181 = arith.addf %1180, %1179 : vector<2x32xf32>
    %1182 = arith.divf %1180, %1181 : vector<2x32xf32>
    %1183 = vector.extract_strided_slice %1170 {offsets = [0, 64], sizes = [2, 32], strides = [1, 1]} : vector<2x128xf32> to vector<2x32xf32>
    %1184 = math.tanh %1183 : vector<2x32xf32>
    %1185 = vector.extract_strided_slice %1170 {offsets = [0, 96], sizes = [2, 32], strides = [1, 1]} : vector<2x128xf32> to vector<2x32xf32>
    %1186 = arith.negf %1185 : vector<2x32xf32>
    %1187 = math.exp %1186 : vector<2x32xf32>
    %cst_283 = arith.constant 1.000000e+00 : f32
    %1188 = vector.broadcast %cst_283 : f32 to vector<2x32xf32>
    %1189 = arith.addf %1188, %1187 : vector<2x32xf32>
    %1190 = arith.divf %1188, %1189 : vector<2x32xf32>
    %1191 = arith.mulf %1182, %1164 : vector<2x32xf32>
    %1192 = arith.mulf %1176, %1184 : vector<2x32xf32>
    %1193 = arith.addf %1191, %1192 : vector<2x32xf32>
    %1194 = math.tanh %1193 : vector<2x32xf32>
    %1195 = arith.mulf %1190, %1194 : vector<2x32xf32>
    %c10_284 = arith.constant 10 : index
    %c0_285 = arith.constant 0 : index
    %1196 = vector.load %arg9[%c10_284, %c0_285] : memref<16x32xf32, #tpu.memory_space<vmem>>, vector<2x32xf32>
    tpu.vector_store %arg9[%c10_284, %c0_285], %1195 {strides = array<i32>} : memref<16x32xf32, #tpu.memory_space<vmem>>, vector<2x32xf32>,
    %1197 = vector.extract_strided_slice %1018 {offsets = [12, 0], sizes = [2, 128], strides = [1, 1]} : vector<16x128xf32> to vector<2x128xf32>
    %cst_286 = arith.constant dense<0.000000e+00> : vector<2x128xf32>
    %1198 = tpu.matmul %1195, %1020, %cst_286 {dimension_numbers = #tpu.dot_dimension_numbers<[1], [0], [0], [1], [0, 0, 1, 1], [], []>} : vector<2x32xf32>, vector<32x128xf32>, vector<2x128xf32> -> vector<2x128xf32>
    %1199 = arith.addf %1197, %1198 : vector<2x128xf32>
    %1200 = vector.extract_strided_slice %1199 {offsets = [0, 0], sizes = [2, 32], strides = [1, 1]} : vector<2x128xf32> to vector<2x32xf32>
    %1201 = arith.negf %1200 : vector<2x32xf32>
    %1202 = math.exp %1201 : vector<2x32xf32>
    %cst_287 = arith.constant 1.000000e+00 : f32
    %1203 = vector.broadcast %cst_287 : f32 to vector<2x32xf32>
    %1204 = arith.addf %1203, %1202 : vector<2x32xf32>
    %1205 = arith.divf %1203, %1204 : vector<2x32xf32>
    %1206 = vector.extract_strided_slice %1199 {offsets = [0, 32], sizes = [2, 32], strides = [1, 1]} : vector<2x128xf32> to vector<2x32xf32>
    %1207 = arith.negf %1206 : vector<2x32xf32>
    %1208 = math.exp %1207 : vector<2x32xf32>
    %cst_288 = arith.constant 1.000000e+00 : f32
    %1209 = vector.broadcast %cst_288 : f32 to vector<2x32xf32>
    %1210 = arith.addf %1209, %1208 : vector<2x32xf32>
    %1211 = arith.divf %1209, %1210 : vector<2x32xf32>
    %1212 = vector.extract_strided_slice %1199 {offsets = [0, 64], sizes = [2, 32], strides = [1, 1]} : vector<2x128xf32> to vector<2x32xf32>
    %1213 = math.tanh %1212 : vector<2x32xf32>
    %1214 = vector.extract_strided_slice %1199 {offsets = [0, 96], sizes = [2, 32], strides = [1, 1]} : vector<2x128xf32> to vector<2x32xf32>
    %1215 = arith.negf %1214 : vector<2x32xf32>
    %1216 = math.exp %1215 : vector<2x32xf32>
    %cst_289 = arith.constant 1.000000e+00 : f32
    %1217 = vector.broadcast %cst_289 : f32 to vector<2x32xf32>
    %1218 = arith.addf %1217, %1216 : vector<2x32xf32>
    %1219 = arith.divf %1217, %1218 : vector<2x32xf32>
    %1220 = arith.mulf %1211, %1193 : vector<2x32xf32>
    %1221 = arith.mulf %1205, %1213 : vector<2x32xf32>
    %1222 = arith.addf %1220, %1221 : vector<2x32xf32>
    %1223 = math.tanh %1222 : vector<2x32xf32>
    %1224 = arith.mulf %1219, %1223 : vector<2x32xf32>
    %c12_290 = arith.constant 12 : index
    %c0_291 = arith.constant 0 : index
    %1225 = vector.load %arg9[%c12_290, %c0_291] : memref<16x32xf32, #tpu.memory_space<vmem>>, vector<2x32xf32>
    tpu.vector_store %arg9[%c12_290, %c0_291], %1224 {strides = array<i32>} : memref<16x32xf32, #tpu.memory_space<vmem>>, vector<2x32xf32>,
    %1226 = vector.extract_strided_slice %1018 {offsets = [14, 0], sizes = [2, 128], strides = [1, 1]} : vector<16x128xf32> to vector<2x128xf32>
    %cst_292 = arith.constant dense<0.000000e+00> : vector<2x128xf32>
    %1227 = tpu.matmul %1224, %1020, %cst_292 {dimension_numbers = #tpu.dot_dimension_numbers<[1], [0], [0], [1], [0, 0, 1, 1], [], []>} : vector<2x32xf32>, vector<32x128xf32>, vector<2x128xf32> -> vector<2x128xf32>
    %1228 = arith.addf %1226, %1227 : vector<2x128xf32>
    %1229 = vector.extract_strided_slice %1228 {offsets = [0, 0], sizes = [2, 32], strides = [1, 1]} : vector<2x128xf32> to vector<2x32xf32>
    %1230 = arith.negf %1229 : vector<2x32xf32>
    %1231 = math.exp %1230 : vector<2x32xf32>
    %cst_293 = arith.constant 1.000000e+00 : f32
    %1232 = vector.broadcast %cst_293 : f32 to vector<2x32xf32>
    %1233 = arith.addf %1232, %1231 : vector<2x32xf32>
    %1234 = arith.divf %1232, %1233 : vector<2x32xf32>
    %1235 = vector.extract_strided_slice %1228 {offsets = [0, 32], sizes = [2, 32], strides = [1, 1]} : vector<2x128xf32> to vector<2x32xf32>
    %1236 = arith.negf %1235 : vector<2x32xf32>
    %1237 = math.exp %1236 : vector<2x32xf32>
    %cst_294 = arith.constant 1.000000e+00 : f32
    %1238 = vector.broadcast %cst_294 : f32 to vector<2x32xf32>
    %1239 = arith.addf %1238, %1237 : vector<2x32xf32>
    %1240 = arith.divf %1238, %1239 : vector<2x32xf32>
    %1241 = vector.extract_strided_slice %1228 {offsets = [0, 64], sizes = [2, 32], strides = [1, 1]} : vector<2x128xf32> to vector<2x32xf32>
    %1242 = math.tanh %1241 : vector<2x32xf32>
    %1243 = vector.extract_strided_slice %1228 {offsets = [0, 96], sizes = [2, 32], strides = [1, 1]} : vector<2x128xf32> to vector<2x32xf32>
    %1244 = arith.negf %1243 : vector<2x32xf32>
    %1245 = math.exp %1244 : vector<2x32xf32>
    %cst_295 = arith.constant 1.000000e+00 : f32
    %1246 = vector.broadcast %cst_295 : f32 to vector<2x32xf32>
    %1247 = arith.addf %1246, %1245 : vector<2x32xf32>
    %1248 = arith.divf %1246, %1247 : vector<2x32xf32>
    %1249 = arith.mulf %1240, %1222 : vector<2x32xf32>
    %1250 = arith.mulf %1234, %1242 : vector<2x32xf32>
    %1251 = arith.addf %1249, %1250 : vector<2x32xf32>
    %1252 = math.tanh %1251 : vector<2x32xf32>
    %1253 = arith.mulf %1248, %1252 : vector<2x32xf32>
    %c14_296 = arith.constant 14 : index
    %c0_297 = arith.constant 0 : index
    %1254 = vector.load %arg9[%c14_296, %c0_297] : memref<16x32xf32, #tpu.memory_space<vmem>>, vector<2x32xf32>
    tpu.vector_store %arg9[%c14_296, %c0_297], %1253 {strides = array<i32>} : memref<16x32xf32, #tpu.memory_space<vmem>>, vector<2x32xf32>,
    %1255 = vector.extract_strided_slice %1012 {offsets = [1, 0, 0], sizes = [1, 1, 128], strides = [1, 1, 1]} : vector<2x1x128xf32> to vector<1x1x128xf32>
    %1256 = vector.shape_cast %1255 : vector<1x1x128xf32> to vector<1x128xf32>
    %1257 = vector.broadcast %1256 : vector<1x128xf32> to vector<16x128xf32>
    %1258 = arith.addf %1010, %1257 : vector<16x128xf32>
    %1259 = vector.extract_strided_slice %1014 {offsets = [1, 0, 0], sizes = [1, 32, 128], strides = [1, 1, 1]} : vector<2x32x128xf32> to vector<1x32x128xf32>
    %1260 = vector.shape_cast %1259 : vector<1x32x128xf32> to vector<32x128xf32>
    %cst_298 = arith.constant 0.000000e+00 : f32
    %1261 = vector.broadcast %cst_298 : f32 to vector<2x32xf32>
    %cst_299 = arith.constant 0.000000e+00 : f32
    %1262 = vector.broadcast %cst_299 : f32 to vector<2x32xf32>
    %1263 = vector.extract_strided_slice %1258 {offsets = [14, 0], sizes = [2, 128], strides = [1, 1]} : vector<16x128xf32> to vector<2x128xf32>
    %cst_300 = arith.constant dense<0.000000e+00> : vector<2x128xf32>
    %1264 = tpu.matmul %1261, %1260, %cst_300 {dimension_numbers = #tpu.dot_dimension_numbers<[1], [0], [0], [1], [0, 0, 1, 1], [], []>} : vector<2x32xf32>, vector<32x128xf32>, vector<2x128xf32> -> vector<2x128xf32>
    %1265 = arith.addf %1263, %1264 : vector<2x128xf32>
    %1266 = vector.extract_strided_slice %1265 {offsets = [0, 0], sizes = [2, 32], strides = [1, 1]} : vector<2x128xf32> to vector<2x32xf32>
    %1267 = arith.negf %1266 : vector<2x32xf32>
    %1268 = math.exp %1267 : vector<2x32xf32>
    %cst_301 = arith.constant 1.000000e+00 : f32
    %1269 = vector.broadcast %cst_301 : f32 to vector<2x32xf32>
    %1270 = arith.addf %1269, %1268 : vector<2x32xf32>
    %1271 = arith.divf %1269, %1270 : vector<2x32xf32>
    %1272 = vector.extract_strided_slice %1265 {offsets = [0, 32], sizes = [2, 32], strides = [1, 1]} : vector<2x128xf32> to vector<2x32xf32>
    %1273 = arith.negf %1272 : vector<2x32xf32>
    %1274 = math.exp %1273 : vector<2x32xf32>
    %cst_302 = arith.constant 1.000000e+00 : f32
    %1275 = vector.broadcast %cst_302 : f32 to vector<2x32xf32>
    %1276 = arith.addf %1275, %1274 : vector<2x32xf32>
    %1277 = arith.divf %1275, %1276 : vector<2x32xf32>
    %1278 = vector.extract_strided_slice %1265 {offsets = [0, 64], sizes = [2, 32], strides = [1, 1]} : vector<2x128xf32> to vector<2x32xf32>
    %1279 = math.tanh %1278 : vector<2x32xf32>
    %1280 = vector.extract_strided_slice %1265 {offsets = [0, 96], sizes = [2, 32], strides = [1, 1]} : vector<2x128xf32> to vector<2x32xf32>
    %1281 = arith.negf %1280 : vector<2x32xf32>
    %1282 = math.exp %1281 : vector<2x32xf32>
    %cst_303 = arith.constant 1.000000e+00 : f32
    %1283 = vector.broadcast %cst_303 : f32 to vector<2x32xf32>
    %1284 = arith.addf %1283, %1282 : vector<2x32xf32>
    %1285 = arith.divf %1283, %1284 : vector<2x32xf32>
    %1286 = arith.mulf %1277, %1262 : vector<2x32xf32>
    %1287 = arith.mulf %1271, %1279 : vector<2x32xf32>
    %1288 = arith.addf %1286, %1287 : vector<2x32xf32>
    %1289 = math.tanh %1288 : vector<2x32xf32>
    %1290 = arith.mulf %1285, %1289 : vector<2x32xf32>
    %c14_304 = arith.constant 14 : index
    %c0_305 = arith.constant 0 : index
    %1291 = vector.load %arg10[%c14_304, %c0_305] : memref<16x32xf32, #tpu.memory_space<vmem>>, vector<2x32xf32>
    tpu.vector_store %arg10[%c14_304, %c0_305], %1290 {strides = array<i32>} : memref<16x32xf32, #tpu.memory_space<vmem>>, vector<2x32xf32>,
    %1292 = vector.extract_strided_slice %1258 {offsets = [12, 0], sizes = [2, 128], strides = [1, 1]} : vector<16x128xf32> to vector<2x128xf32>
    %cst_306 = arith.constant dense<0.000000e+00> : vector<2x128xf32>
    %1293 = tpu.matmul %1290, %1260, %cst_306 {dimension_numbers = #tpu.dot_dimension_numbers<[1], [0], [0], [1], [0, 0, 1, 1], [], []>} : vector<2x32xf32>, vector<32x128xf32>, vector<2x128xf32> -> vector<2x128xf32>
    %1294 = arith.addf %1292, %1293 : vector<2x128xf32>
    %1295 = vector.extract_strided_slice %1294 {offsets = [0, 0], sizes = [2, 32], strides = [1, 1]} : vector<2x128xf32> to vector<2x32xf32>
    %1296 = arith.negf %1295 : vector<2x32xf32>
    %1297 = math.exp %1296 : vector<2x32xf32>
    %cst_307 = arith.constant 1.000000e+00 : f32
    %1298 = vector.broadcast %cst_307 : f32 to vector<2x32xf32>
    %1299 = arith.addf %1298, %1297 : vector<2x32xf32>
    %1300 = arith.divf %1298, %1299 : vector<2x32xf32>
    %1301 = vector.extract_strided_slice %1294 {offsets = [0, 32], sizes = [2, 32], strides = [1, 1]} : vector<2x128xf32> to vector<2x32xf32>
    %1302 = arith.negf %1301 : vector<2x32xf32>
    %1303 = math.exp %1302 : vector<2x32xf32>
    %cst_308 = arith.constant 1.000000e+00 : f32
    %1304 = vector.broadcast %cst_308 : f32 to vector<2x32xf32>
    %1305 = arith.addf %1304, %1303 : vector<2x32xf32>
    %1306 = arith.divf %1304, %1305 : vector<2x32xf32>
    %1307 = vector.extract_strided_slice %1294 {offsets = [0, 64], sizes = [2, 32], strides = [1, 1]} : vector<2x128xf32> to vector<2x32xf32>
    %1308 = math.tanh %1307 : vector<2x32xf32>
    %1309 = vector.extract_strided_slice %1294 {offsets = [0, 96], sizes = [2, 32], strides = [1, 1]} : vector<2x128xf32> to vector<2x32xf32>
    %1310 = arith.negf %1309 : vector<2x32xf32>
    %1311 = math.exp %1310 : vector<2x32xf32>
    %cst_309 = arith.constant 1.000000e+00 : f32
    %1312 = vector.broadcast %cst_309 : f32 to vector<2x32xf32>
    %1313 = arith.addf %1312, %1311 : vector<2x32xf32>
    %1314 = arith.divf %1312, %1313 : vector<2x32xf32>
    %1315 = arith.mulf %1306, %1288 : vector<2x32xf32>
    %1316 = arith.mulf %1300, %1308 : vector<2x32xf32>
    %1317 = arith.addf %1315, %1316 : vector<2x32xf32>
    %1318 = math.tanh %1317 : vector<2x32xf32>
    %1319 = arith.mulf %1314, %1318 : vector<2x32xf32>
    %c12_310 = arith.constant 12 : index
    %c0_311 = arith.constant 0 : index
    %1320 = vector.load %arg10[%c12_310, %c0_311] : memref<16x32xf32, #tpu.memory_space<vmem>>, vector<2x32xf32>
    tpu.vector_store %arg10[%c12_310, %c0_311], %1319 {strides = array<i32>} : memref<16x32xf32, #tpu.memory_space<vmem>>, vector<2x32xf32>,
    %1321 = vector.extract_strided_slice %1258 {offsets = [10, 0], sizes = [2, 128], strides = [1, 1]} : vector<16x128xf32> to vector<2x128xf32>
    %cst_312 = arith.constant dense<0.000000e+00> : vector<2x128xf32>
    %1322 = tpu.matmul %1319, %1260, %cst_312 {dimension_numbers = #tpu.dot_dimension_numbers<[1], [0], [0], [1], [0, 0, 1, 1], [], []>} : vector<2x32xf32>, vector<32x128xf32>, vector<2x128xf32> -> vector<2x128xf32>
    %1323 = arith.addf %1321, %1322 : vector<2x128xf32>
    %1324 = vector.extract_strided_slice %1323 {offsets = [0, 0], sizes = [2, 32], strides = [1, 1]} : vector<2x128xf32> to vector<2x32xf32>
    %1325 = arith.negf %1324 : vector<2x32xf32>
    %1326 = math.exp %1325 : vector<2x32xf32>
    %cst_313 = arith.constant 1.000000e+00 : f32
    %1327 = vector.broadcast %cst_313 : f32 to vector<2x32xf32>
    %1328 = arith.addf %1327, %1326 : vector<2x32xf32>
    %1329 = arith.divf %1327, %1328 : vector<2x32xf32>
    %1330 = vector.extract_strided_slice %1323 {offsets = [0, 32], sizes = [2, 32], strides = [1, 1]} : vector<2x128xf32> to vector<2x32xf32>
    %1331 = arith.negf %1330 : vector<2x32xf32>
    %1332 = math.exp %1331 : vector<2x32xf32>
    %cst_314 = arith.constant 1.000000e+00 : f32
    %1333 = vector.broadcast %cst_314 : f32 to vector<2x32xf32>
    %1334 = arith.addf %1333, %1332 : vector<2x32xf32>
    %1335 = arith.divf %1333, %1334 : vector<2x32xf32>
    %1336 = vector.extract_strided_slice %1323 {offsets = [0, 64], sizes = [2, 32], strides = [1, 1]} : vector<2x128xf32> to vector<2x32xf32>
    %1337 = math.tanh %1336 : vector<2x32xf32>
    %1338 = vector.extract_strided_slice %1323 {offsets = [0, 96], sizes = [2, 32], strides = [1, 1]} : vector<2x128xf32> to vector<2x32xf32>
    %1339 = arith.negf %1338 : vector<2x32xf32>
    %1340 = math.exp %1339 : vector<2x32xf32>
    %cst_315 = arith.constant 1.000000e+00 : f32
    %1341 = vector.broadcast %cst_315 : f32 to vector<2x32xf32>
    %1342 = arith.addf %1341, %1340 : vector<2x32xf32>
    %1343 = arith.divf %1341, %1342 : vector<2x32xf32>
    %1344 = arith.mulf %1335, %1317 : vector<2x32xf32>
    %1345 = arith.mulf %1329, %1337 : vector<2x32xf32>
    %1346 = arith.addf %1344, %1345 : vector<2x32xf32>
    %1347 = math.tanh %1346 : vector<2x32xf32>
    %1348 = arith.mulf %1343, %1347 : vector<2x32xf32>
    %c10_316 = arith.constant 10 : index
    %c0_317 = arith.constant 0 : index
    %1349 = vector.load %arg10[%c10_316, %c0_317] : memref<16x32xf32, #tpu.memory_space<vmem>>, vector<2x32xf32>
    tpu.vector_store %arg10[%c10_316, %c0_317], %1348 {strides = array<i32>} : memref<16x32xf32, #tpu.memory_space<vmem>>, vector<2x32xf32>,
    %1350 = vector.extract_strided_slice %1258 {offsets = [8, 0], sizes = [2, 128], strides = [1, 1]} : vector<16x128xf32> to vector<2x128xf32>
    %cst_318 = arith.constant dense<0.000000e+00> : vector<2x128xf32>
    %1351 = tpu.matmul %1348, %1260, %cst_318 {dimension_numbers = #tpu.dot_dimension_numbers<[1], [0], [0], [1], [0, 0, 1, 1], [], []>} : vector<2x32xf32>, vector<32x128xf32>, vector<2x128xf32> -> vector<2x128xf32>
    %1352 = arith.addf %1350, %1351 : vector<2x128xf32>
    %1353 = vector.extract_strided_slice %1352 {offsets = [0, 0], sizes = [2, 32], strides = [1, 1]} : vector<2x128xf32> to vector<2x32xf32>
    %1354 = arith.negf %1353 : vector<2x32xf32>
    %1355 = math.exp %1354 : vector<2x32xf32>
    %cst_319 = arith.constant 1.000000e+00 : f32
    %1356 = vector.broadcast %cst_319 : f32 to vector<2x32xf32>
    %1357 = arith.addf %1356, %1355 : vector<2x32xf32>
    %1358 = arith.divf %1356, %1357 : vector<2x32xf32>
    %1359 = vector.extract_strided_slice %1352 {offsets = [0, 32], sizes = [2, 32], strides = [1, 1]} : vector<2x128xf32> to vector<2x32xf32>
    %1360 = arith.negf %1359 : vector<2x32xf32>
    %1361 = math.exp %1360 : vector<2x32xf32>
    %cst_320 = arith.constant 1.000000e+00 : f32
    %1362 = vector.broadcast %cst_320 : f32 to vector<2x32xf32>
    %1363 = arith.addf %1362, %1361 : vector<2x32xf32>
    %1364 = arith.divf %1362, %1363 : vector<2x32xf32>
    %1365 = vector.extract_strided_slice %1352 {offsets = [0, 64], sizes = [2, 32], strides = [1, 1]} : vector<2x128xf32> to vector<2x32xf32>
    %1366 = math.tanh %1365 : vector<2x32xf32>
    %1367 = vector.extract_strided_slice %1352 {offsets = [0, 96], sizes = [2, 32], strides = [1, 1]} : vector<2x128xf32> to vector<2x32xf32>
    %1368 = arith.negf %1367 : vector<2x32xf32>
    %1369 = math.exp %1368 : vector<2x32xf32>
    %cst_321 = arith.constant 1.000000e+00 : f32
    %1370 = vector.broadcast %cst_321 : f32 to vector<2x32xf32>
    %1371 = arith.addf %1370, %1369 : vector<2x32xf32>
    %1372 = arith.divf %1370, %1371 : vector<2x32xf32>
    %1373 = arith.mulf %1364, %1346 : vector<2x32xf32>
    %1374 = arith.mulf %1358, %1366 : vector<2x32xf32>
    %1375 = arith.addf %1373, %1374 : vector<2x32xf32>
    %1376 = math.tanh %1375 : vector<2x32xf32>
    %1377 = arith.mulf %1372, %1376 : vector<2x32xf32>
    %c8_322 = arith.constant 8 : index
    %c0_323 = arith.constant 0 : index
    %1378 = vector.load %arg10[%c8_322, %c0_323] : memref<16x32xf32, #tpu.memory_space<vmem>>, vector<2x32xf32>
    tpu.vector_store %arg10[%c8_322, %c0_323], %1377 {strides = array<i32>} : memref<16x32xf32, #tpu.memory_space<vmem>>, vector<2x32xf32>,
    %1379 = vector.extract_strided_slice %1258 {offsets = [6, 0], sizes = [2, 128], strides = [1, 1]} : vector<16x128xf32> to vector<2x128xf32>
    %cst_324 = arith.constant dense<0.000000e+00> : vector<2x128xf32>
    %1380 = tpu.matmul %1377, %1260, %cst_324 {dimension_numbers = #tpu.dot_dimension_numbers<[1], [0], [0], [1], [0, 0, 1, 1], [], []>} : vector<2x32xf32>, vector<32x128xf32>, vector<2x128xf32> -> vector<2x128xf32>
    %1381 = arith.addf %1379, %1380 : vector<2x128xf32>
    %1382 = vector.extract_strided_slice %1381 {offsets = [0, 0], sizes = [2, 32], strides = [1, 1]} : vector<2x128xf32> to vector<2x32xf32>
    %1383 = arith.negf %1382 : vector<2x32xf32>
    %1384 = math.exp %1383 : vector<2x32xf32>
    %cst_325 = arith.constant 1.000000e+00 : f32
    %1385 = vector.broadcast %cst_325 : f32 to vector<2x32xf32>
    %1386 = arith.addf %1385, %1384 : vector<2x32xf32>
    %1387 = arith.divf %1385, %1386 : vector<2x32xf32>
    %1388 = vector.extract_strided_slice %1381 {offsets = [0, 32], sizes = [2, 32], strides = [1, 1]} : vector<2x128xf32> to vector<2x32xf32>
    %1389 = arith.negf %1388 : vector<2x32xf32>
    %1390 = math.exp %1389 : vector<2x32xf32>
    %cst_326 = arith.constant 1.000000e+00 : f32
    %1391 = vector.broadcast %cst_326 : f32 to vector<2x32xf32>
    %1392 = arith.addf %1391, %1390 : vector<2x32xf32>
    %1393 = arith.divf %1391, %1392 : vector<2x32xf32>
    %1394 = vector.extract_strided_slice %1381 {offsets = [0, 64], sizes = [2, 32], strides = [1, 1]} : vector<2x128xf32> to vector<2x32xf32>
    %1395 = math.tanh %1394 : vector<2x32xf32>
    %1396 = vector.extract_strided_slice %1381 {offsets = [0, 96], sizes = [2, 32], strides = [1, 1]} : vector<2x128xf32> to vector<2x32xf32>
    %1397 = arith.negf %1396 : vector<2x32xf32>
    %1398 = math.exp %1397 : vector<2x32xf32>
    %cst_327 = arith.constant 1.000000e+00 : f32
    %1399 = vector.broadcast %cst_327 : f32 to vector<2x32xf32>
    %1400 = arith.addf %1399, %1398 : vector<2x32xf32>
    %1401 = arith.divf %1399, %1400 : vector<2x32xf32>
    %1402 = arith.mulf %1393, %1375 : vector<2x32xf32>
    %1403 = arith.mulf %1387, %1395 : vector<2x32xf32>
    %1404 = arith.addf %1402, %1403 : vector<2x32xf32>
    %1405 = math.tanh %1404 : vector<2x32xf32>
    %1406 = arith.mulf %1401, %1405 : vector<2x32xf32>
    %c6_328 = arith.constant 6 : index
    %c0_329 = arith.constant 0 : index
    %1407 = vector.load %arg10[%c6_328, %c0_329] : memref<16x32xf32, #tpu.memory_space<vmem>>, vector<2x32xf32>
    tpu.vector_store %arg10[%c6_328, %c0_329], %1406 {strides = array<i32>} : memref<16x32xf32, #tpu.memory_space<vmem>>, vector<2x32xf32>,
    %1408 = vector.extract_strided_slice %1258 {offsets = [4, 0], sizes = [2, 128], strides = [1, 1]} : vector<16x128xf32> to vector<2x128xf32>
    %cst_330 = arith.constant dense<0.000000e+00> : vector<2x128xf32>
    %1409 = tpu.matmul %1406, %1260, %cst_330 {dimension_numbers = #tpu.dot_dimension_numbers<[1], [0], [0], [1], [0, 0, 1, 1], [], []>} : vector<2x32xf32>, vector<32x128xf32>, vector<2x128xf32> -> vector<2x128xf32>
    %1410 = arith.addf %1408, %1409 : vector<2x128xf32>
    %1411 = vector.extract_strided_slice %1410 {offsets = [0, 0], sizes = [2, 32], strides = [1, 1]} : vector<2x128xf32> to vector<2x32xf32>
    %1412 = arith.negf %1411 : vector<2x32xf32>
    %1413 = math.exp %1412 : vector<2x32xf32>
    %cst_331 = arith.constant 1.000000e+00 : f32
    %1414 = vector.broadcast %cst_331 : f32 to vector<2x32xf32>
    %1415 = arith.addf %1414, %1413 : vector<2x32xf32>
    %1416 = arith.divf %1414, %1415 : vector<2x32xf32>
    %1417 = vector.extract_strided_slice %1410 {offsets = [0, 32], sizes = [2, 32], strides = [1, 1]} : vector<2x128xf32> to vector<2x32xf32>
    %1418 = arith.negf %1417 : vector<2x32xf32>
    %1419 = math.exp %1418 : vector<2x32xf32>
    %cst_332 = arith.constant 1.000000e+00 : f32
    %1420 = vector.broadcast %cst_332 : f32 to vector<2x32xf32>
    %1421 = arith.addf %1420, %1419 : vector<2x32xf32>
    %1422 = arith.divf %1420, %1421 : vector<2x32xf32>
    %1423 = vector.extract_strided_slice %1410 {offsets = [0, 64], sizes = [2, 32], strides = [1, 1]} : vector<2x128xf32> to vector<2x32xf32>
    %1424 = math.tanh %1423 : vector<2x32xf32>
    %1425 = vector.extract_strided_slice %1410 {offsets = [0, 96], sizes = [2, 32], strides = [1, 1]} : vector<2x128xf32> to vector<2x32xf32>
    %1426 = arith.negf %1425 : vector<2x32xf32>
    %1427 = math.exp %1426 : vector<2x32xf32>
    %cst_333 = arith.constant 1.000000e+00 : f32
    %1428 = vector.broadcast %cst_333 : f32 to vector<2x32xf32>
    %1429 = arith.addf %1428, %1427 : vector<2x32xf32>
    %1430 = arith.divf %1428, %1429 : vector<2x32xf32>
    %1431 = arith.mulf %1422, %1404 : vector<2x32xf32>
    %1432 = arith.mulf %1416, %1424 : vector<2x32xf32>
    %1433 = arith.addf %1431, %1432 : vector<2x32xf32>
    %1434 = math.tanh %1433 : vector<2x32xf32>
    %1435 = arith.mulf %1430, %1434 : vector<2x32xf32>
    %c4_334 = arith.constant 4 : index
    %c0_335 = arith.constant 0 : index
    %1436 = vector.load %arg10[%c4_334, %c0_335] : memref<16x32xf32, #tpu.memory_space<vmem>>, vector<2x32xf32>
    tpu.vector_store %arg10[%c4_334, %c0_335], %1435 {strides = array<i32>} : memref<16x32xf32, #tpu.memory_space<vmem>>, vector<2x32xf32>,
    %1437 = vector.extract_strided_slice %1258 {offsets = [2, 0], sizes = [2, 128], strides = [1, 1]} : vector<16x128xf32> to vector<2x128xf32>
    %cst_336 = arith.constant dense<0.000000e+00> : vector<2x128xf32>
    %1438 = tpu.matmul %1435, %1260, %cst_336 {dimension_numbers = #tpu.dot_dimension_numbers<[1], [0], [0], [1], [0, 0, 1, 1], [], []>} : vector<2x32xf32>, vector<32x128xf32>, vector<2x128xf32> -> vector<2x128xf32>
    %1439 = arith.addf %1437, %1438 : vector<2x128xf32>
    %1440 = vector.extract_strided_slice %1439 {offsets = [0, 0], sizes = [2, 32], strides = [1, 1]} : vector<2x128xf32> to vector<2x32xf32>
    %1441 = arith.negf %1440 : vector<2x32xf32>
    %1442 = math.exp %1441 : vector<2x32xf32>
    %cst_337 = arith.constant 1.000000e+00 : f32
    %1443 = vector.broadcast %cst_337 : f32 to vector<2x32xf32>
    %1444 = arith.addf %1443, %1442 : vector<2x32xf32>
    %1445 = arith.divf %1443, %1444 : vector<2x32xf32>
    %1446 = vector.extract_strided_slice %1439 {offsets = [0, 32], sizes = [2, 32], strides = [1, 1]} : vector<2x128xf32> to vector<2x32xf32>
    %1447 = arith.negf %1446 : vector<2x32xf32>
    %1448 = math.exp %1447 : vector<2x32xf32>
    %cst_338 = arith.constant 1.000000e+00 : f32
    %1449 = vector.broadcast %cst_338 : f32 to vector<2x32xf32>
    %1450 = arith.addf %1449, %1448 : vector<2x32xf32>
    %1451 = arith.divf %1449, %1450 : vector<2x32xf32>
    %1452 = vector.extract_strided_slice %1439 {offsets = [0, 64], sizes = [2, 32], strides = [1, 1]} : vector<2x128xf32> to vector<2x32xf32>
    %1453 = math.tanh %1452 : vector<2x32xf32>
    %1454 = vector.extract_strided_slice %1439 {offsets = [0, 96], sizes = [2, 32], strides = [1, 1]} : vector<2x128xf32> to vector<2x32xf32>
    %1455 = arith.negf %1454 : vector<2x32xf32>
    %1456 = math.exp %1455 : vector<2x32xf32>
    %cst_339 = arith.constant 1.000000e+00 : f32
    %1457 = vector.broadcast %cst_339 : f32 to vector<2x32xf32>
    %1458 = arith.addf %1457, %1456 : vector<2x32xf32>
    %1459 = arith.divf %1457, %1458 : vector<2x32xf32>
    %1460 = arith.mulf %1451, %1433 : vector<2x32xf32>
    %1461 = arith.mulf %1445, %1453 : vector<2x32xf32>
    %1462 = arith.addf %1460, %1461 : vector<2x32xf32>
    %1463 = math.tanh %1462 : vector<2x32xf32>
    %1464 = arith.mulf %1459, %1463 : vector<2x32xf32>
    %c2_340 = arith.constant 2 : index
    %c0_341 = arith.constant 0 : index
    %1465 = vector.load %arg10[%c2_340, %c0_341] : memref<16x32xf32, #tpu.memory_space<vmem>>, vector<2x32xf32>
    tpu.vector_store %arg10[%c2_340, %c0_341], %1464 {strides = array<i32>} : memref<16x32xf32, #tpu.memory_space<vmem>>, vector<2x32xf32>,
    %1466 = vector.extract_strided_slice %1258 {offsets = [0, 0], sizes = [2, 128], strides = [1, 1]} : vector<16x128xf32> to vector<2x128xf32>
    %cst_342 = arith.constant dense<0.000000e+00> : vector<2x128xf32>
    %1467 = tpu.matmul %1464, %1260, %cst_342 {dimension_numbers = #tpu.dot_dimension_numbers<[1], [0], [0], [1], [0, 0, 1, 1], [], []>} : vector<2x32xf32>, vector<32x128xf32>, vector<2x128xf32> -> vector<2x128xf32>
    %1468 = arith.addf %1466, %1467 : vector<2x128xf32>
    %1469 = vector.extract_strided_slice %1468 {offsets = [0, 0], sizes = [2, 32], strides = [1, 1]} : vector<2x128xf32> to vector<2x32xf32>
    %1470 = arith.negf %1469 : vector<2x32xf32>
    %1471 = math.exp %1470 : vector<2x32xf32>
    %cst_343 = arith.constant 1.000000e+00 : f32
    %1472 = vector.broadcast %cst_343 : f32 to vector<2x32xf32>
    %1473 = arith.addf %1472, %1471 : vector<2x32xf32>
    %1474 = arith.divf %1472, %1473 : vector<2x32xf32>
    %1475 = vector.extract_strided_slice %1468 {offsets = [0, 32], sizes = [2, 32], strides = [1, 1]} : vector<2x128xf32> to vector<2x32xf32>
    %1476 = arith.negf %1475 : vector<2x32xf32>
    %1477 = math.exp %1476 : vector<2x32xf32>
    %cst_344 = arith.constant 1.000000e+00 : f32
    %1478 = vector.broadcast %cst_344 : f32 to vector<2x32xf32>
    %1479 = arith.addf %1478, %1477 : vector<2x32xf32>
    %1480 = arith.divf %1478, %1479 : vector<2x32xf32>
    %1481 = vector.extract_strided_slice %1468 {offsets = [0, 64], sizes = [2, 32], strides = [1, 1]} : vector<2x128xf32> to vector<2x32xf32>
    %1482 = math.tanh %1481 : vector<2x32xf32>
    %1483 = vector.extract_strided_slice %1468 {offsets = [0, 96], sizes = [2, 32], strides = [1, 1]} : vector<2x128xf32> to vector<2x32xf32>
    %1484 = arith.negf %1483 : vector<2x32xf32>
    %1485 = math.exp %1484 : vector<2x32xf32>
    %cst_345 = arith.constant 1.000000e+00 : f32
    %1486 = vector.broadcast %cst_345 : f32 to vector<2x32xf32>
    %1487 = arith.addf %1486, %1485 : vector<2x32xf32>
    %1488 = arith.divf %1486, %1487 : vector<2x32xf32>
    %1489 = arith.mulf %1480, %1462 : vector<2x32xf32>
    %1490 = arith.mulf %1474, %1482 : vector<2x32xf32>
    %1491 = arith.addf %1489, %1490 : vector<2x32xf32>
    %1492 = math.tanh %1491 : vector<2x32xf32>
    %1493 = arith.mulf %1488, %1492 : vector<2x32xf32>
    %c0_346 = arith.constant 0 : index
    %c0_347 = arith.constant 0 : index
    %1494 = vector.load %arg10[%c0_346, %c0_347] : memref<16x32xf32, #tpu.memory_space<vmem>>, vector<2x32xf32>
    tpu.vector_store %arg10[%c0_346, %c0_347], %1493 {strides = array<i32>} : memref<16x32xf32, #tpu.memory_space<vmem>>, vector<2x32xf32>,
    %c14_348 = arith.constant 14 : index
    %c0_349 = arith.constant 0 : index
    %1495 = vector.load %arg9[%c14_348, %c0_349] : memref<16x32xf32, #tpu.memory_space<vmem>>, vector<2x32xf32>
    %c14_350 = arith.constant 14 : index
    %c0_351 = arith.constant 0 : index
    %1496 = vector.load %arg10[%c14_350, %c0_351] : memref<16x32xf32, #tpu.memory_space<vmem>>, vector<2x32xf32>
    %c0_352 = arith.constant 0 : index
    %c0_353 = arith.constant 0 : index
    %1497 = vector.load %arg6[%c0_352, %c0_353] : memref<64x3xf32, #tpu.memory_space<vmem>>, vector<64x3xf32>
    %1498 = vector.extract_strided_slice %1497 {offsets = [0, 0], sizes = [32, 3], strides = [1, 1]} : vector<64x3xf32> to vector<32x3xf32>
    %cst_354 = arith.constant dense<0.000000e+00> : vector<2x3xf32>
    %1499 = tpu.matmul %1495, %1498, %cst_354 {dimension_numbers = #tpu.dot_dimension_numbers<[1], [0], [0], [1], [0, 0, 1, 1], [], []>} : vector<2x32xf32>, vector<32x3xf32>, vector<2x3xf32> -> vector<2x3xf32>
    %1500 = vector.extract_strided_slice %1497 {offsets = [32, 0], sizes = [32, 3], strides = [1, 1]} : vector<64x3xf32> to vector<32x3xf32>
    %cst_355 = arith.constant dense<0.000000e+00> : vector<2x3xf32>
    %1501 = tpu.matmul %1496, %1500, %cst_355 {dimension_numbers = #tpu.dot_dimension_numbers<[1], [0], [0], [1], [0, 0, 1, 1], [], []>} : vector<2x32xf32>, vector<32x3xf32>, vector<2x3xf32> -> vector<2x3xf32>
    %1502 = arith.addf %1499, %1501 : vector<2x3xf32>
    %c0_356 = arith.constant 0 : index
    %c0_357 = arith.constant 0 : index
    %1503 = vector.load %arg7[%c0_356, %c0_357] : memref<1x3xf32, #tpu.memory_space<vmem>>, vector<1x3xf32>
    %1504 = vector.broadcast %1503 : vector<1x3xf32> to vector<2x3xf32>
    %1505 = arith.addf %1502, %1504 : vector<2x3xf32>
    %c0_358 = arith.constant 0 : index
    %c0_359 = arith.constant 0 : index
    %1506 = vector.load %arg8[%c0_358, %c0_359] : memref<2x3xf32, #tpu.memory_space<vmem>>, vector<2x3xf32>
    tpu.vector_store %arg8[%c0_358, %c0_359], %1505 {strides = array<i32>} : memref<2x3xf32, #tpu.memory_space<vmem>>, vector<2x3xf32>,
    return
  }
  func.func @transform_0(%arg0: i32) -> (i32, i32) {
    %c0_i32 = arith.constant 0 : i32
    %c0_i32_0 = arith.constant 0 : i32
    %c0_i32_1 = arith.constant 0 : i32
    return %c0_i32, %c0_i32_0 : i32, i32
  }
  func.func @transform_1(%arg0: i32) -> (i32, i32, i32) {
    %c0_i32 = arith.constant 0 : i32
    %c0_i32_0 = arith.constant 0 : i32
    %c0_i32_1 = arith.constant 0 : i32
    %c0_i32_2 = arith.constant 0 : i32
    return %c0_i32, %c0_i32_0, %c0_i32_1 : i32, i32, i32
  }
  func.func @transform_2(%arg0: i32) -> (i32, i32, i32, i32) {
    %c0_i32 = arith.constant 0 : i32
    %c0_i32_0 = arith.constant 0 : i32
    %c0_i32_1 = arith.constant 0 : i32
    %c0_i32_2 = arith.constant 0 : i32
    %c0_i32_3 = arith.constant 0 : i32
    return %c0_i32, %c0_i32_0, %c0_i32_1, %c0_i32_2 : i32, i32, i32, i32
  }
  func.func @transform_3(%arg0: i32) -> (i32, i32, i32, i32) {
    %c0_i32 = arith.constant 0 : i32
    %c0_i32_0 = arith.constant 0 : i32
    %c0_i32_1 = arith.constant 0 : i32
    %c0_i32_2 = arith.constant 0 : i32
    %c0_i32_3 = arith.constant 0 : i32
    return %c0_i32, %c0_i32_0, %c0_i32_1, %c0_i32_2 : i32, i32, i32, i32
  }
  func.func @transform_4(%arg0: i32) -> (i32, i32, i32, i32) {
    %c0_i32 = arith.constant 0 : i32
    %c0_i32_0 = arith.constant 0 : i32
    %c0_i32_1 = arith.constant 0 : i32
    %c0_i32_2 = arith.constant 0 : i32
    %c0_i32_3 = arith.constant 0 : i32
    return %c0_i32, %c0_i32_0, %c0_i32_1, %c0_i32_2 : i32, i32, i32, i32
  }
  func.func @transform_5(%arg0: i32) -> (i32, i32) {
    %c0_i32 = arith.constant 0 : i32
    %c0_i32_0 = arith.constant 0 : i32
    %c0_i32_1 = arith.constant 0 : i32
    return %c0_i32, %c0_i32_0 : i32, i32
  }
  func.func @transform_6(%arg0: i32) -> (i32, i32) {
    %c0_i32 = arith.constant 0 : i32
    %c0_i32_0 = arith.constant 0 : i32
    %c0_i32_1 = arith.constant 0 : i32
    return %c0_i32, %c0_i32_0 : i32, i32
  }
  func.func @transform_7(%arg0: i32) -> (i32, i32) {
    %c0_i32 = arith.constant 0 : i32
    %c0_i32_0 = arith.constant 0 : i32
    %c0_i32_1 = arith.constant 0 : i32
    return %c0_i32, %c0_i32_0 : i32, i32
  }
}

</mosaic_0001>

<bundles_post_ra>
// kernel: bert_lstm_forward.2
= control target key start
LH: loop header
LB: loop body
LE: loop exit
PB: predicated region body
PF: predicated region fallthrough
CT: control target
= control target key end

     0   :  { %vm57_vm0 = vcmask 261120   ;;  %vm205_vm1 = vcmask 130048   ;;  %s2643_s24 = smov 96   ;;  %s2644_s25 = smov 112   ;;  %vm948_vm3 = vcmask 523264   ;;  %s3072_s0 = inlined_call_operand.vmem [shape: f32[16,32], index: 0, kind: input, shape index: {}]   ;;  %s3073_s4 = inlined_call_operand.vmem [shape: f32[2,32,96], index: 4, kind: input, shape index: {}]   ;;  %s3074_s2 = inlined_call_operand.vmem [shape: f32[1,32], index: 2, kind: input, shape index: {}]   ;;  %s3075_s3 = inlined_call_operand.vmem [shape: f32[1,32], index: 3, kind: input, shape index: {}]   ;;  %s3076_s5 = inlined_call_operand.vmem [shape: f32[2,1,96], index: 5, kind: input, shape index: {}]   ;;  %s3077_s1 = inlined_call_operand.vmem [shape: f32[16,16], index: 1, kind: input, shape index: {}]   ;;  %s3078_s6 = inlined_call_operand.vmem [shape: f32[2,32,32], index: 6, kind: input, shape index: {}]   ;;  %s3079_s7 = inlined_call_operand.vmem [shape: f32[2,1,32], index: 7, kind: input, shape index: {}]   ;;  %s3080_s10 = inlined_call_operand.vmem [shape: f32[2,32,64], index: 10, kind: input, shape index: {}]   ;;  %s3081_s8 = inlined_call_operand.vmem [shape: f32[2,1,32], index: 8, kind: input, shape index: {}]   ;;  %s3082_s9 = inlined_call_operand.vmem [shape: f32[2,1,32], index: 9, kind: input, shape index: {}]   ;;  %s3083_s12 = inlined_call_operand.vmem [shape: f32[2,64,32], index: 12, kind: input, shape index: {}]   ;;  %s3084_s11 = inlined_call_operand.vmem [shape: f32[2,1,64], index: 11, kind: input, shape index: {}]   ;;  %s3085_s13 = inlined_call_operand.vmem [shape: f32[2,1,32], index: 13, kind: input, shape index: {}]   ;;  %s3086_s14 = inlined_call_operand.vmem [shape: f32[2,1,32], index: 14, kind: input, shape index: {}]   ;;  %s3087_s15 = inlined_call_operand.vmem [shape: f32[2,1,32], index: 15, kind: input, shape index: {}]   ;;  %s3088_s16 = inlined_call_operand.vmem [shape: f32[16,32], index: 16, kind: output, shape index: {}]  }
   0x1   :  { %3090 = sst [smem:[#allocation2_spill]] %s3072_s0  ;;  %v103_v14 = vld [vmem:[%s3073_s4] sm:$0xff]  ;;  %v104_v15 = vld [vmem:[%s3073_s4 + $0x8] sm:$0xff]  ;;  %v105_v16 = vld [vmem:[%s3073_s4 + $0x10] sm:$0xff]  ;;  %s2646_s30 = smov 64  }
   0x2   :  { %s3091_s23 = sld [smem:[#allocation2_spill]]  ;;  %v2413_v17 = vpack.c.bf16 %v104_v15, %v103_v14  ;;  %v106_v18 = vld [vmem:[%s3073_s4 + $0x18] sm:$0xff]  ;;  %v2065_v27 = vld [vmem:[%s3074_s2] ss:$0 sm:$0xff]  ;;  %vm2782_vm2 = vmpackc.low %vm205_vm1, %vm205_vm1 }
   0x3   :  { %v2417_v19 = vpack.c.bf16 %v106_v18, %v105_v16  ;;  %v2066_v29 = vld [vmem:[%s3075_s3] ss:$0 sm:$0xff]  ;;  %s2642_s3 = smov 80   ;;  %v2800_v54 = vld [vmem:[%s3077_s1 + $0x8] sm:$0xff] }
   0x4   :  { %2414 = vmatprep.subr.bf16.mxu1 %v2413_v17  ;;  %v2067_v36 = vld [vmem:[%s3076_s5] ss:$0 sm:$0xff] }
   0x5   :  { %2416 = vmatpush3.bf16.msra.mxu1 %v2413_v17  ;;  %v2805_v57 = vld [vmem:[%s3077_s1] sm:$0xff]  ;;  %s2645_s1 = smov 48  }
   0x6   :  { %2418 = vmatprep.subr.bf16.mxu1 %v2417_v19 }
   0x8   :  { %v53_v0 = vld [vmem:[%s3091_s23] sm:$0xff]  ;;  %v54_v1 = vld [vmem:[%s3091_s23 + $0x8] sm:$0xff] }
   0x9   :  { %v58_v2 = vsel %vm57_vm0, %v53_v0, 0.0  ;;  %v61_v3 = vsel %vm57_vm0, %v54_v1, 0.0  ;;  %2420 = vmatpush3.bf16.msra.mxu1 %v2417_v19 }
   0xa   :  { %59 = vadd.xlane.f32.xlu0 %v58_v2 }
   0xe   :  { %62 = vadd.xlane.f32.xlu0 %v61_v3 }
  0x97   :  { %v60_v4 = vpop.xlane.xlu0 %59 }
  0x98   :  { %v65_v5 = vmul.f32 0.03125, %v60_v4 }
  0x9a   :  { %v67_v6 = vsub.f32 %v53_v0, %v65_v5 }
  0x9b   :  { %v63_v7 = vpop.xlane.xlu0 %62 }
  0x9c   :  { %v66_v8 = vmul.f32 0.03125, %v63_v7  ;;  %v69_v9 = vmul.f32 %v67_v6, %v67_v6 }
  0x9e   :  { %v68_v10 = vsub.f32 %v54_v1, %v66_v8  ;;  %v71_v11 = vsel %vm57_vm0, %v69_v9, 0.0 }
  0x9f   :  { %72 = vadd.xlane.f32.xlu1 %v71_v11 }
  0xa0   :  { %v70_v12 = vmul.f32 %v68_v10, %v68_v10 }
  0xa2   :  { %v74_v13 = vsel %vm57_vm0, %v70_v12, 0.0 }
  0xa3   :  { %75 = vadd.xlane.f32.xlu1 %v74_v13 }
 0x12c   :  { %v73_v20 = vpop.xlane.xlu1 %72 }
 0x12d   :  { %v77_v21 = vmul.f32 0.03125, %v73_v20 }
 0x12f   :  { %v79_v22 = vadd.f32 1e-12, %v77_v21 }
 0x130   :  { %v76_v23 = vpop.xlane.xlu1 %75 }
 0x131   :  { %2582 = vrsqrt.f32 %v79_v22  ;;  %v78_v24 = vmul.f32 0.03125, %v76_v23 }
 0x133   :  { %v80_v25 = vadd.f32 1e-12, %v78_v24 }
 0x135   :  { %2584 = vrsqrt.f32 %v80_v25 }
 0x13b   :  { %v2583_v26 = vpop.eup %2582 }
 0x13c   :  { %v83_v28 = vmul.f32 %v2583_v26, %v67_v6 }
 0x13e   :  { %v91_v30 = vmul.f32 %v2065_v27, %v83_v28 }
 0x13f   :  { %v2585_v31 = vpop.eup %2584 }
 0x140   :  { %v84_v32 = vmul.f32 %v2585_v31, %v68_v10  ;;  %v2760_v33 = vadd.f32 %v2066_v29, %v91_v30 }
 0x142   :  { %v92_v34 = vmul.f32 %v2065_v27, %v84_v32  ;;  %2255 = vmatprep.mubr.msk.f32.mxu1 %vm57_vm0, %v2760_v33 }
 0x144   :  { %v2764_v35 = vadd.f32 %v2066_v29, %v92_v34 }
 0x146   :  { %2256 = vmatmul.mubr.msk.f32.vlgmr.msra.gmra.mrb[0].mxu1 %vm57_vm0, %v2764_v35 }
 0x219   :  { %v2257_v37 = vpop.f32.mrb[0].mxu1 }
 0x21a   :  { %v196_v38 = vadd.f32 %v2257_v37, %v2067_v36  ;;  %v190_v39 = vpop.f32.mrb[1].mxu1 }
 0x21b   :  { %v191_v40 = vadd.f32 %v2067_v36, %v190_v39 }
 0x21d   :  { %2262 = vmatprep.mubr.msk.f32.mxu1 %vm205_vm1, %v191_v40  ;;  %v2772_v41 = vpack.i.bf16 %v196_v38, %v191_v40 }
 0x21f   :  { %2548 = vrot.lane.b32.xlu1 %v2772_v41, %s2642_s3  ;;  %2543 = vrot.lane.b32.xlu0 %v2772_v41, %s2643_s24 }
 0x223   :  { %402 = vrot.lane.b32.xlu1 %v191_v40, %s2644_s25 }
 0x227   :  { %404 = vrot.lane.b32.xlu1 %v196_v38, %s2644_s25 }
 0x291   :  { %v2549_v42 = vpop.permute.xlu1 %2548  ;;  %v2544_v43 = vpop.permute.xlu0 %2543 }
 0x292   :  { %v2551_v44 = vunpack.i.h.bf16 %v2549_v42  ;;  %v2550_v45 = vunpack.i.l.bf16 %v2549_v42  ;;  %v2546_v46 = vunpack.i.h.bf16 %v2544_v43  ;;  %v2545_v47 = vunpack.i.l.bf16 %v2544_v43 }
 0x294   :  { %v2421_v49 = vpack.c.bf16 %v2546_v46, %v2545_v47  ;;  %v2431_v50 = vpack.c.bf16 %v2551_v44, %v2550_v45 }
 0x295   :  { %v403_v51 = vpop.permute.xlu1 %402 }
 0x296   :  { %2423 = vmatprep.subr.msk.bf16.mxu1 %vm2782_vm2, %v2421_v49 }
 0x297   :  { %2426 = vmatpush3.bf16.xpose.msk.msra.mxu1 %vm2782_vm2, %v2421_v49 }
 0x298   :  { %2433 = vmatprep.subr.msk.bf16.mxu1 %vm2782_vm2, %v2431_v50 }
 0x299   :  { %v405_v52 = vpop.permute.xlu1 %404 }
 0x29e   :  { %2263 = vmatmul.mubr.msk.f32.vlgmr.msra.gmra.mrb[2].mxu1 %vm205_vm1, %v196_v38 }
 0x29f   :  { %2436 = vmatpush3.bf16.xpose.msk.msra.mxu1 %vm2782_vm2, %v2431_v50  ;;  %2276 = vmatprep.mubr.msk.f32.mxu1 %vm205_vm1, %v403_v51  ;;  %v109_v50 = vld [vmem:[%s3078_s6 + $0x10] sm:$0xff]  ;;  %v110_v51 = vld [vmem:[%s3078_s6 + $0x18] sm:$0xff] }
 0x2a6   :  { %2277 = vmatmul.mubr.msk.f32.vlgmr.msra.gmra.mrb[4].mxu1 %vm205_vm1, %v405_v52  ;;  %v2441_v52 = vpack.c.bf16 %v110_v51, %v109_v50  ;;  %v940_v50 = vld [vmem:[%s3083_s12 + $0x38] sm:$0xff] }
 0x371   :  { %v2264_v53 = vpop.f32.mrb[2].mxu1 }
 0x372   :  { %v290_v55 = vmul.f32 0.25, %v2264_v53  ;;  %v280_v56 = vpop.f32.mrb[3].mxu1  ;;  %v107_v53 = vld [vmem:[%s3078_s6] sm:$0xff] }
 0x373   :  { %v289_v58 = vmul.f32 0.25, %v280_v56 }
 0x374   :  { %v292_v59 = vadd.f32 %v290_v55, %v2800_v54  ;;  %v108_v55 = vld [vmem:[%s3078_s6 + $0x8] sm:$0xff] }
 0x375   :  { %v291_v60 = vadd.f32 %v289_v58, %v2805_v57  ;;  %v2445_v56 = vpack.c.bf16 %v108_v55, %v107_v53 }
 0x376   :  { %v296_v61 = vsel %vm205_vm1, %v292_v59, -inf }
 0x377   :  { %297 = vmax.xlane.f32.xlu1 %v296_v61  ;;  %v293_v62 = vsel %vm205_vm1, %v291_v60, -inf }
 0x378   :  { %294 = vmax.xlane.f32.xlu0 %v293_v62  ;;  %v2086_v62 = vld [vmem:[%s3079_s7] ss:$0 sm:$0xff] }
 0x379   :  { %v2278_v63 = vpop.f32.mrb[4].mxu1 }
 0x37a   :  { %v484_v0 = vpop.f32.mrb[5].mxu1  ;;  %v494_v1 = vmul.f32 0.25, %v2278_v63 }
 0x37b   :  { %v493_v2 = vmul.f32 0.25, %v484_v0 }
 0x37c   :  { %v496_v5 = vadd.f32 %v494_v1, %v2800_v54 }
 0x37d   :  { %v495_v3 = vadd.f32 %v493_v2, %v2805_v57 }
 0x37e   :  { %v500_v6 = vsel %vm205_vm1, %v496_v5, -inf }
 0x37f   :  { %v497_v4 = vsel %vm205_vm1, %v495_v3, -inf }
 0x380   :  { %498 = vmax.xlane.f32.xlu0 %v497_v4 }
 0x384   :  { %501 = vmax.xlane.f32.xlu0 %v500_v6 }
 0x404   :  { %v298_v7 = vpop.xlane.xlu1 %297 }
 0x405   :  { %v300_v8 = vsub.f32 %v292_v59, %v298_v7  ;;  %v295_v9 = vpop.xlane.xlu0 %294 }
 0x406   :  { %v299_v10 = vsub.f32 %v291_v60, %v295_v9 }
 0x407   :  { %v303_v11 = vmul.f32 1.442695, %v300_v8 }
 0x408   :  { %v301_v12 = vmul.f32 1.442695, %v299_v10 }
 0x409   :  { %2586 = vpow2.f32 %v303_v11 }
 0x40a   :  { %2588 = vpow2.f32 %v301_v12 }
 0x40d   :  { %v499_v13 = vpop.xlane.xlu0 %498 }
 0x40e   :  { %v503_v14 = vsub.f32 %v495_v3, %v499_v13 }
 0x410   :  { %v505_v15 = vmul.f32 1.442695, %v503_v14 }
 0x411   :  { %v502_v16 = vpop.xlane.xlu0 %501 }
 0x412   :  { %2590 = vpow2.f32 %v505_v15  ;;  %v504_v17 = vsub.f32 %v496_v5, %v502_v16  ;;  %v824_v16 = vld [vmem:[%s3080_s10 + $0x8] sm:$0xff] }
 0x413   :  { %v2587_v18 = vpop.eup %2586 }
 0x414   :  { %v2589_v19 = vpop.eup %2588  ;;  %v507_v20 = vmul.f32 1.442695, %v504_v17  ;;  %v308_v21 = vsel %vm205_vm1, %v2587_v18, 0.0 }
 0x415   :  { %309 = vadd.xlane.f32.xlu1 %v308_v21  ;;  %v305_v22 = vsel %vm205_vm1, %v2589_v19, 0.0 }
 0x416   :  { %2592 = vpow2.f32 %v507_v20  ;;  %306 = vadd.xlane.f32.xlu0 %v305_v22 }
 0x41c   :  { %v2591_v23 = vpop.eup %2590 }
 0x41d   :  { %v509_v24 = vsel %vm205_vm1, %v2591_v23, 0.0 }
 0x41e   :  { %510 = vadd.xlane.f32.xlu0 %v509_v24 }
 0x420   :  { %v2593_v25 = vpop.eup %2592 }
 0x421   :  { %v512_v26 = vsel %vm205_vm1, %v2593_v25, 0.0 }
 0x422   :  { %513 = vadd.xlane.f32.xlu1 %v512_v26 }
 0x433   :  { %2558 = vrot.lane.b32.xlu1 %v2772_v41, %s2645_s1 }
 0x434   :  { %2553 = vrot.lane.b32.xlu0 %v2772_v41, %s2646_s30 }
 0x4a2   :  { %v310_v28 = vpop.xlane.xlu1 %309 }
 0x4a3   :  { %v307_v27 = vpop.xlane.xlu0 %306 }
 0x4a4   :  { %2594 = vrcp.f32 %v307_v27 }
 0x4a5   :  { %2596 = vrcp.f32 %v310_v28  ;;  %v2087_v28 = vld [vmem:[%s3081_s8] ss:$0 sm:$0xff] }
 0x4ab   :  { %v511_v29 = vpop.xlane.xlu0 %510 }
 0x4ac   :  { %2598 = vrcp.f32 %v511_v29 }
 0x4ae   :  { %v2595_v30 = vpop.eup %2594 }
 0x4af   :  { %v514_v31 = vpop.xlane.xlu1 %513  ;;  %v2554_v32 = vpop.permute.xlu0 %2553  ;;  %v313_v34 = vmul.f32 %v2595_v30, %v2589_v19  ;;  %v826_v19 = vld [vmem:[%s3080_s10 + $0x18] sm:$0xff] }
 0x4b0   :  { %2600 = vrcp.f32 %v514_v31  ;;  %v2556_v36 = vunpack.i.h.bf16 %v2554_v32  ;;  %v2555_v37 = vunpack.i.l.bf16 %v2554_v32  ;;  %v2597_v39 = vpop.eup %2596  ;;  %v2088_v32 = vld [vmem:[%s3082_s9] ss:$0 sm:$0xff] }
 0x4b1   :  { %2269 = vmatprep.mubr.msk.f32.mxu0 %vm205_vm1, %v313_v34  ;;  %v314_v45 = vmul.f32 %v2597_v39, %v2587_v18  ;;  %v825_v18 = vld [vmem:[%s3080_s10 + $0x10] sm:$0xff]  ;;  %v933_v39 = vld [vmem:[%s3083_s12] sm:$0xff] }
 0x4b2   :  { %v2427_v38 = vpack.c.bf16 %v2556_v36, %v2555_v37  ;;  %v2453_v20 = vpack.c.bf16 %v826_v19, %v825_v18 }
 0x4b3   :  { %v2559_v40 = vpop.permute.xlu1 %2558 }
 0x4b4   :  { %v2561_v42 = vunpack.i.h.bf16 %v2559_v40  ;;  %v2560_v41 = vunpack.i.l.bf16 %v2559_v40  ;;  %2428 = vmatprep.subr.bf16.mxu0 %v2427_v38  ;;  %v934_v40 = vld [vmem:[%s3083_s12 + $0x8] sm:$0xff] }
 0x4b5   :  { %2430 = vmatpush3.bf16.msra.mxu0 %v2427_v38 }
 0x4b6   :  { %v2599_v43 = vpop.eup %2598  ;;  %v2437_v44 = vpack.c.bf16 %v2561_v42, %v2560_v41  ;;  %v2457_v42 = vpack.c.bf16 %v934_v40, %v933_v39  ;;  %v935_v41 = vld [vmem:[%s3083_s12 + $0x10] sm:$0xff] }
 0x4b7   :  { %v517_v46 = vmul.f32 %v2599_v43, %v2591_v23  ;;  %v936_v43 = vld [vmem:[%s3083_s12 + $0x18] sm:$0xff] }
 0x4b8   :  { %2270 = vmatmul.mubr.msk.f32.vlgmr.msra.gmra.mrb[0].mxu0 %vm205_vm1, %v314_v45  ;;  %2438 = vmatprep.subr.bf16.mxu0 %v2437_v44  ;;  %v937_v45 = vld [vmem:[%s3083_s12 + $0x20] sm:$0xff] }
 0x4b9   :  { %2440 = vmatpush3.bf16.msra.mxu0 %v2437_v44  ;;  %2283 = vmatprep.mubr.msk.f32.mxu0 %vm205_vm1, %v517_v46  ;;  %v2461_v44 = vpack.c.bf16 %v936_v43, %v935_v41  ;;  %v938_v46 = vld [vmem:[%s3083_s12 + $0x28] sm:$0xff] }
 0x4ba   :  { %v2601_v47 = vpop.eup %2600  ;;  %2442 = vmatprep.subr.bf16.mxu0 %v2441_v52 }
 0x4bb   :  { %v518_v49 = vmul.f32 %v2601_v47, %v2593_v25  ;;  %v2465_v47 = vpack.c.bf16 %v938_v46, %v937_v45  ;;  %v2095_v45 = vld [vmem:[%s3086_s14] ss:$0 sm:$0xff] }
 0x4bd   :  { %2284 = vmatmul.mubr.msk.f32.vlgmr.msra.gmra.mrb[2].mxu0 %vm205_vm1, %v518_v49  ;;  %v939_v49 = vld [vmem:[%s3083_s12 + $0x30] sm:$0xff] }
 0x4be   :  { %2444 = vmatpush3.bf16.msra.mxu0 %v2441_v52  ;;  %v2469_v51 = vpack.c.bf16 %v940_v50, %v939_v49  ;;  %v2089_v52 = vld [vmem:[%s3084_s11] ss:$0 sm:$0xff] }
 0x4bf   :  { %2446 = vmatprep.subr.bf16.mxu0 %v2445_v56  ;;  %v2096_v50 = vld [vmem:[%s3087_s15] ss:$0 sm:$0xff] }
 0x58b   :  { %v2271_v58 = vpop.f32.mrb[0].mxu0 }
 0x58c   :  { %v393_v59 = vpop.f32.mrb[1].mxu0 }
 0x590   :  { %v2285_v60 = vpop.f32.mrb[2].mxu0 }
 0x591   :  { %v597_v61 = vpop.f32.mrb[3].mxu0 }
 0x592   :  { %2290 = vmatprep.mubr.msk.f32.mxu0 %vm205_vm1, %v597_v61 }
 0x593   :  { %2291 = vmatmul.mubr.msk.f32.vlgmr.msra.gmra.mrb[4].mxu0 %vm205_vm1, %v2285_v60 }
 0x594   :  { %2448 = vmatpush3.bf16.msra.mxu0 %v2445_v56  ;;  %2297 = vmatprep.mubr.msk.f32.mxu0 %vm205_vm1, %v393_v59 }
 0x595   :  { %2458 = vmatprep.subr.bf16.mxu0 %v2457_v42 }
 0x59b   :  { %2298 = vmatmul.mubr.msk.f32.vlgmr.msra.gmra.mrb[4].mxu0 %vm205_vm1, %v2271_v58 }
 0x59c   :  { %2460 = vmatpush3.bf16.msra.mxu0 %v2457_v42 }
 0x59d   :  { %2462 = vmatprep.subr.bf16.mxu0 %v2461_v44 }
 0x5a0   :  { %2464 = vmatpush3.bf16.msra.mxu0 %v2461_v44 }
 0x5a1   :  { %2466 = vmatprep.subr.bf16.mxu0 %v2465_v47 }
 0x5a4   :  { %2468 = vmatpush3.bf16.msra.mxu0 %v2465_v47 }
 0x5a5   :  { %2470 = vmatprep.subr.bf16.mxu0 %v2469_v51 }
 0x5a8   :  { %2472 = vmatpush3.bf16.msra.mxu0 %v2469_v51 }
 0x66e   :  { %v2299_v63 = vpop.f32.mrb[4].mxu0 }
 0x66f   :  { %v776_v0 = vadd.f32 %v2299_v63, %v2086_v62  ;;  %v759_v1 = vpop.f32.mrb[5].mxu0 }
 0x670   :  { %v775_v2 = vadd.f32 %v2086_v62, %v759_v1 }
 0x671   :  { %v778_v3 = vadd.f32 %v776_v0, %v2764_v35 }
 0x672   :  { %v777_v4 = vadd.f32 %v775_v2, %v2760_v33  ;;  %v823_v33 = vld [vmem:[%s3080_s10] sm:$0xff] }
 0x673   :  { %v784_v5 = vsel %vm57_vm0, %v778_v3, 0.0  ;;  %v2449_v17 = vpack.c.bf16 %v824_v16, %v823_v33 }
 0x674   :  { %785 = vadd.xlane.f32.xlu0 %v784_v5  ;;  %v781_v6 = vsel %vm57_vm0, %v777_v4, 0.0 }
 0x675   :  { %782 = vadd.xlane.f32.xlu1 %v781_v6  ;;  %2450 = vmatprep.subr.bf16.mxu1 %v2449_v17 }
 0x676   :  { %2452 = vmatpush3.bf16.msra.mxu1 %v2449_v17 }
 0x677   :  { %2454 = vmatprep.subr.bf16.mxu1 %v2453_v20 }
 0x67a   :  { %2456 = vmatpush3.bf16.msra.mxu1 %v2453_v20 }
 0x701   :  { %v786_v7 = vpop.xlane.xlu0 %785 }
 0x702   :  { %v788_v8 = vmul.f32 0.03125, %v786_v7  ;;  %v783_v9 = vpop.xlane.xlu1 %782 }
 0x703   :  { %v787_v10 = vmul.f32 0.03125, %v783_v9 }
 0x704   :  { %v790_v11 = vsub.f32 %v778_v3, %v788_v8 }
 0x705   :  { %v789_v12 = vsub.f32 %v777_v4, %v787_v10 }
 0x706   :  { %v792_v13 = vmul.f32 %v790_v11, %v790_v11 }
 0x707   :  { %v791_v14 = vmul.f32 %v789_v12, %v789_v12 }
 0x708   :  { %v796_v15 = vsel %vm57_vm0, %v792_v13, 0.0  ;;  %v2092_v13 = vld [vmem:[%s3085_s13] ss:$0 sm:$0xff] }
 0x709   :  { %797 = vadd.xlane.f32.xlu1 %v796_v15  ;;  %v793_v35 = vsel %vm57_vm0, %v791_v14, 0.0 }
 0x70a   :  { %794 = vadd.xlane.f32.xlu0 %v793_v35 }
 0x796   :  { %v798_v21 = vpop.xlane.xlu1 %797 }
 0x797   :  { %v800_v22 = vmul.f32 0.03125, %v798_v21  ;;  %v795_v23 = vpop.xlane.xlu0 %794 }
 0x798   :  { %v799_v24 = vmul.f32 0.03125, %v795_v23 }
 0x799   :  { %v802_v25 = vadd.f32 1e-12, %v800_v22 }
 0x79a   :  { %v801_v26 = vadd.f32 1e-12, %v799_v24 }
 0x79b   :  { %2602 = vrsqrt.f32 %v802_v25 }
 0x79c   :  { %2604 = vrsqrt.f32 %v801_v26 }
 0x7a5   :  { %v2603_v27 = vpop.eup %2602 }
 0x7a6   :  { %v2605_v29 = vpop.eup %2604  ;;  %v806_v30 = vmul.f32 %v2603_v27, %v790_v11 }
 0x7a7   :  { %v805_v31 = vmul.f32 %v2605_v29, %v789_v12 }
 0x7a8   :  { %v814_v34 = vmul.f32 %v2087_v28, %v806_v30  ;;  %v2097_v30 = vld [vmem:[%s3073_s4 + $0x20] sm:$0xff] }
 0x7a9   :  { %v813_v36 = vmul.f32 %v2087_v28, %v805_v31  ;;  %v2098_v31 = vld [vmem:[%s3073_s4 + $0x28] sm:$0xff] }
 0x7aa   :  { %v822_v38 = vadd.f32 %v2088_v32, %v814_v34  ;;  %v2099_v34 = vld [vmem:[%s3073_s4 + $0x30] sm:$0xff] }
 0x7ab   :  { %v821_v37 = vadd.f32 %v2088_v32, %v813_v36  ;;  %v2473_v32 = vpack.c.bf16 %v2098_v31, %v2097_v30  ;;  %v2100_v36 = vld [vmem:[%s3073_s4 + $0x38] sm:$0xff] }
 0x7ad   :  { %2308 = vmatprep.mubr.msk.f32.mxu1 %vm57_vm0, %v821_v37  ;;  %2474 = vmatprep.subr.bf16.mxu1 %v2473_v32 }
 0x7ae   :  { %2309 = vmatmul.mubr.msk.f32.vlgmr.msra.gmra.mrb[6].mxu1 %vm57_vm0, %v822_v38 }
 0x7af   :  { %2476 = vmatpush3.bf16.msra.mxu1 %v2473_v32 }
 0x881   :  { %v2310_v53 = vpop.f32.mrb[6].mxu1 }
 0x882   :  { %v912_v55 = vadd.f32 %v2310_v53, %v2089_v52  ;;  %v906_v56 = vpop.f32.mrb[7].mxu1 }
 0x883   :  { %v907_v58 = vadd.f32 %v2089_v52, %v906_v56  ;;  %v2106_v56 = vld [vmem:[%s3076_s5 + $0x1] ss:$0 sm:$0xff] }
 0x884   :  { %v916_v59 = vmul.f32 %v912_v55, %v912_v55 }
 0x885   :  { %v915_v60 = vmul.f32 %v907_v58, %v907_v58 }
 0x886   :  { %v918_v61 = vmul.f32 %v916_v59, %v912_v55 }
 0x887   :  { %v917_v62 = vmul.f32 %v915_v60, %v907_v58 }
 0x888   :  { %v920_v63 = vmul.f32 0.044715, %v918_v61 }
 0x889   :  { %v919_v0 = vmul.f32 0.044715, %v917_v62 }
 0x88a   :  { %v922_v1 = vadd.f32 %v920_v63, %v912_v55 }
 0x88b   :  { %v921_v2 = vadd.f32 %v919_v0, %v907_v58 }
 0x88c   :  { %v924_v3 = vmul.f32 0.7978846, %v922_v1 }
 0x88d   :  { %v923_v4 = vmul.f32 0.7978846, %v921_v2 }
 0x88e   :  { %2606 = vtanh.f32 %v924_v3 }
 0x88f   :  { %2608 = vtanh.f32 %v923_v4 }
 0x898   :  { %v2607_v5 = vpop.eup %2606 }
 0x899   :  { %v2609_v6 = vpop.eup %2608  ;;  %v928_v7 = vadd.f32 1.0, %v2607_v5 }
 0x89a   :  { %v927_v8 = vadd.f32 1.0, %v2609_v6 }
 0x89b   :  { %v930_v9 = vmul.f32 0.5, %v928_v7 }
 0x89c   :  { %v929_v10 = vmul.f32 0.5, %v927_v8 }
 0x89d   :  { %v932_v12 = vmul.f32 %v930_v9, %v912_v55 }
 0x89e   :  { %v931_v11 = vmul.f32 %v929_v10, %v907_v58 }
 0x8a0   :  { %2327 = vmatprep.mubr.msk.f32.mxu0 %vm948_vm3, %v931_v11 }
 0x8a1   :  { %2328 = vmatmul.mubr.msk.f32.vlgmr.msra.gmra.mrb[6].mxu0 %vm948_vm3, %v932_v12 }
 0x974   :  { %v2329_v14 = vpop.f32.mrb[6].mxu0 }
 0x975   :  { %v1027_v15 = vadd.f32 %v2329_v14, %v2092_v13  ;;  %v1021_v35 = vpop.f32.mrb[7].mxu0 }
 0x976   :  { %v1022_v33 = vadd.f32 %v2092_v13, %v1021_v35 }
 0x977   :  { %v1031_v16 = vadd.f32 %v1027_v15, %v822_v38 }
 0x978   :  { %v1030_v17 = vadd.f32 %v1022_v33, %v821_v37  ;;  %v2477_v37 = vpack.c.bf16 %v2100_v36, %v2099_v34 }
 0x979   :  { %v1037_v18 = vsel %vm57_vm0, %v1031_v16, 0.0 }
 0x97a   :  { %1038 = vadd.xlane.f32.xlu1 %v1037_v18  ;;  %v1034_v19 = vsel %vm57_vm0, %v1030_v17, 0.0  ;;  %2478 = vmatprep.subr.bf16.mxu1 %v2477_v37 }
 0x97b   :  { %1035 = vadd.xlane.f32.xlu0 %v1034_v19  ;;  %2480 = vmatpush3.bf16.msra.mxu1 %v2477_v37 }
 0xa07   :  { %v1039_v20 = vpop.xlane.xlu1 %1038 }
 0xa08   :  { %v1041_v21 = vmul.f32 0.03125, %v1039_v20  ;;  %v1036_v22 = vpop.xlane.xlu0 %1035 }
 0xa09   :  { %v1040_v23 = vmul.f32 0.03125, %v1036_v22 }
 0xa0a   :  { %v1043_v24 = vsub.f32 %v1031_v16, %v1041_v21 }
 0xa0b   :  { %v1042_v25 = vsub.f32 %v1030_v17, %v1040_v23 }
 0xa0c   :  { %v1045_v26 = vmul.f32 %v1043_v24, %v1043_v24 }
 0xa0d   :  { %v1044_v27 = vmul.f32 %v1042_v25, %v1042_v25 }
 0xa0e   :  { %v1049_v28 = vsel %vm57_vm0, %v1045_v26, 0.0 }
 0xa0f   :  { %1050 = vadd.xlane.f32.xlu1 %v1049_v28  ;;  %v1046_v29 = vsel %vm57_vm0, %v1044_v27, 0.0 }
 0xa10   :  { %1047 = vadd.xlane.f32.xlu0 %v1046_v29 }
 0xa9c   :  { %v1051_v38 = vpop.xlane.xlu1 %1050 }
 0xa9d   :  { %v1053_v39 = vmul.f32 0.03125, %v1051_v38  ;;  %v1048_v40 = vpop.xlane.xlu0 %1047 }
 0xa9e   :  { %v1052_v42 = vmul.f32 0.03125, %v1048_v40 }
 0xa9f   :  { %v1055_v41 = vadd.f32 1e-12, %v1053_v39 }
 0xaa0   :  { %v1054_v43 = vadd.f32 1e-12, %v1052_v42 }
 0xaa1   :  { %2610 = vrsqrt.f32 %v1055_v41 }
 0xaa2   :  { %2612 = vrsqrt.f32 %v1054_v43 }
 0xaab   :  { %v2611_v44 = vpop.eup %2610 }
 0xaac   :  { %v2613_v46 = vpop.eup %2612  ;;  %v1059_v47 = vmul.f32 %v2611_v44, %v1043_v24 }
 0xaad   :  { %v1058_v49 = vmul.f32 %v2613_v46, %v1042_v25 }
 0xaae   :  { %v1067_v51 = vmul.f32 %v2095_v45, %v1059_v47 }
 0xaaf   :  { %v1066_v52 = vmul.f32 %v2095_v45, %v1058_v49 }
 0xab0   :  { %v2928_v55 = vadd.f32 %v2096_v50, %v1067_v51 }
 0xab1   :  { %v2926_v53 = vadd.f32 %v2096_v50, %v1066_v52 }
 0xab3   :  { %2338 = vmatprep.mubr.msk.f32.mxu1 %vm57_vm0, %v2926_v53 }
 0xab4   :  { %2339 = vmatmul.mubr.msk.f32.vlgmr.msra.gmra.mrb[8].mxu1 %vm57_vm0, %v2928_v55 }
 0xb87   :  { %v2340_v58 = vpop.f32.mrb[8].mxu1 }
 0xb88   :  { %v1172_v59 = vadd.f32 %v2340_v58, %v2106_v56  ;;  %v1166_v60 = vpop.f32.mrb[9].mxu1 }
 0xb89   :  { %v1167_v61 = vadd.f32 %v2106_v56, %v1166_v60 }
 0xb8b   :  { %2345 = vmatprep.mubr.msk.f32.mxu1 %vm205_vm1, %v1167_v61  ;;  %v2938_v62 = vpack.i.bf16 %v1172_v59, %v1167_v61 }
 0xb8d   :  { %2568 = vrot.lane.b32.xlu1 %v2938_v62, %s2642_s3  ;;  %2563 = vrot.lane.b32.xlu0 %v2938_v62, %s2643_s24 }
 0xb91   :  { %1377 = vrot.lane.b32.xlu1 %v1167_v61, %s2644_s25 }
 0xb95   :  { %1379 = vrot.lane.b32.xlu1 %v1172_v59, %s2644_s25 }
 0xbff   :  { %v2569_v63 = vpop.permute.xlu1 %2568  ;;  %v2564_v0 = vpop.permute.xlu0 %2563 }
 0xc00   :  { %v2571_v1 = vunpack.i.h.bf16 %v2569_v63  ;;  %v2570_v2 = vunpack.i.l.bf16 %v2569_v63  ;;  %v2566_v3 = vunpack.i.h.bf16 %v2564_v0  ;;  %v2565_v4 = vunpack.i.l.bf16 %v2564_v0 }
 0xc02   :  { %v2481_v5 = vpack.c.bf16 %v2566_v3, %v2565_v4  ;;  %v2491_v6 = vpack.c.bf16 %v2571_v1, %v2570_v2  ;;  %v2103_v3 = vld [vmem:[%s3078_s6 + $0x30] sm:$0xff]  ;;  %v2104_v4 = vld [vmem:[%s3078_s6 + $0x38] sm:$0xff] }
 0xc03   :  { %v1378_v7 = vpop.permute.xlu1 %1377 }
 0xc04   :  { %2483 = vmatprep.subr.msk.bf16.mxu1 %vm2782_vm2, %v2481_v5 }
 0xc05   :  { %2486 = vmatpush3.bf16.xpose.msk.msra.mxu1 %vm2782_vm2, %v2481_v5  ;;  %v2501_v5 = vpack.c.bf16 %v2104_v4, %v2103_v3 }
 0xc06   :  { %2493 = vmatprep.subr.msk.bf16.mxu1 %vm2782_vm2, %v2491_v6 }
 0xc07   :  { %v1380_v8 = vpop.permute.xlu1 %1379 }
 0xc0c   :  { %2346 = vmatmul.mubr.msk.f32.vlgmr.msra.gmra.mrb[10].mxu1 %vm205_vm1, %v1172_v59 }
 0xc0d   :  { %2496 = vmatpush3.bf16.xpose.msk.msra.mxu1 %vm2782_vm2, %v2491_v6  ;;  %2359 = vmatprep.mubr.msk.f32.mxu1 %vm205_vm1, %v1378_v7  ;;  %v2101_v6 = vld [vmem:[%s3078_s6 + $0x20] sm:$0xff]  ;;  %v2102_v7 = vld [vmem:[%s3078_s6 + $0x28] sm:$0xff] }
 0xc14   :  { %2360 = vmatmul.mubr.msk.f32.vlgmr.msra.gmra.mrb[12].mxu1 %vm205_vm1, %v1380_v8  ;;  %v2505_v8 = vpack.c.bf16 %v2102_v7, %v2101_v6 }
 0xcdf   :  { %v2347_v9 = vpop.f32.mrb[10].mxu1 }
 0xce0   :  { %v1265_v10 = vmul.f32 0.25, %v2347_v9  ;;  %v1255_v11 = vpop.f32.mrb[11].mxu1 }
 0xce1   :  { %v1264_v12 = vmul.f32 0.25, %v1255_v11 }
 0xce2   :  { %v1267_v13 = vadd.f32 %v1265_v10, %v2800_v54 }
 0xce3   :  { %v1266_v14 = vadd.f32 %v1264_v12, %v2805_v57 }
 0xce4   :  { %v1271_v15 = vsel %vm205_vm1, %v1267_v13, -inf }
 0xce5   :  { %1272 = vmax.xlane.f32.xlu1 %v1271_v15  ;;  %v1268_v35 = vsel %vm205_vm1, %v1266_v14, -inf }
 0xce6   :  { %1269 = vmax.xlane.f32.xlu0 %v1268_v35 }
 0xce7   :  { %v2361_v48 = vpop.f32.mrb[12].mxu1 }
 0xce8   :  { %v1459_v33 = vpop.f32.mrb[13].mxu1  ;;  %v1469_v16 = vmul.f32 0.25, %v2361_v48 }
 0xce9   :  { %v1468_v17 = vmul.f32 0.25, %v1459_v33 }
 0xcea   :  { %v1471_v20 = vadd.f32 %v1469_v16, %v2800_v54 }
 0xceb   :  { %v1470_v18 = vadd.f32 %v1468_v17, %v2805_v57 }
 0xcec   :  { %v1475_v21 = vsel %vm205_vm1, %v1471_v20, -inf }
 0xced   :  { %v1472_v19 = vsel %vm205_vm1, %v1470_v18, -inf }
 0xcee   :  { %1473 = vmax.xlane.f32.xlu0 %v1472_v19 }
 0xcf2   :  { %1476 = vmax.xlane.f32.xlu0 %v1475_v21 }
 0xd72   :  { %v1273_v22 = vpop.xlane.xlu1 %1272 }
 0xd73   :  { %v1275_v23 = vsub.f32 %v1267_v13, %v1273_v22  ;;  %v1270_v24 = vpop.xlane.xlu0 %1269  ;;  %v2126_v13 = vld [vmem:[%s3079_s7 + $0x1] ss:$0 sm:$0xff] }
 0xd74   :  { %v1274_v25 = vsub.f32 %v1266_v14, %v1270_v24 }
 0xd75   :  { %v1278_v26 = vmul.f32 1.442695, %v1275_v23 }
 0xd76   :  { %v1276_v27 = vmul.f32 1.442695, %v1274_v25 }
 0xd77   :  { %2614 = vpow2.f32 %v1278_v26 }
 0xd78   :  { %2616 = vpow2.f32 %v1276_v27 }
 0xd7b   :  { %v1474_v28 = vpop.xlane.xlu0 %1473 }
 0xd7c   :  { %v1478_v29 = vsub.f32 %v1470_v18, %v1474_v28  ;;  %v2132_v28 = vld [vmem:[%s3080_s10 + $0x28] sm:$0xff] }
 0xd7e   :  { %v1480_v30 = vmul.f32 1.442695, %v1478_v29 }
 0xd7f   :  { %v1477_v57 = vpop.xlane.xlu0 %1476 }
 0xd80   :  { %2618 = vpow2.f32 %v1480_v30  ;;  %v1479_v31 = vsub.f32 %v1471_v20, %v1477_v57  ;;  %v2133_v30 = vld [vmem:[%s3080_s10 + $0x30] sm:$0xff]  ;;  %v2134_v57 = vld [vmem:[%s3080_s10 + $0x38] sm:$0xff] }
 0xd81   :  { %v2615_v32 = vpop.eup %2614 }
 0xd82   :  { %v2617_v54 = vpop.eup %2616  ;;  %v1482_v34 = vmul.f32 1.442695, %v1479_v31  ;;  %v1283_v36 = vsel %vm205_vm1, %v2615_v32, 0.0  ;;  %v2513_v31 = vpack.c.bf16 %v2134_v57, %v2133_v30 }
 0xd83   :  { %1284 = vadd.xlane.f32.xlu1 %v1283_v36  ;;  %v1280_v37 = vsel %vm205_vm1, %v2617_v54, 0.0 }
 0xd84   :  { %2620 = vpow2.f32 %v1482_v34  ;;  %1281 = vadd.xlane.f32.xlu0 %v1280_v37 }
 0xd8a   :  { %v2619_v38 = vpop.eup %2618 }
 0xd8b   :  { %v1484_v39 = vsel %vm205_vm1, %v2619_v38, 0.0 }
 0xd8c   :  { %1485 = vadd.xlane.f32.xlu0 %v1484_v39 }
 0xd8e   :  { %v2621_v40 = vpop.eup %2620 }
 0xd8f   :  { %v1487_v42 = vsel %vm205_vm1, %v2621_v40, 0.0 }
 0xd90   :  { %1488 = vadd.xlane.f32.xlu1 %v1487_v42 }
 0xda1   :  { %2578 = vrot.lane.b32.xlu1 %v2938_v62, %s2645_s1 }
 0xda2   :  { %2573 = vrot.lane.b32.xlu0 %v2938_v62, %s2646_s30 }
 0xe10   :  { %v1285_v43 = vpop.xlane.xlu1 %1284 }
 0xe11   :  { %v1282_v41 = vpop.xlane.xlu0 %1281 }
 0xe12   :  { %2622 = vrcp.f32 %v1282_v41 }
 0xe13   :  { %2624 = vrcp.f32 %v1285_v43 }
 0xe19   :  { %v1486_v44 = vpop.xlane.xlu0 %1485 }
 0xe1a   :  { %2626 = vrcp.f32 %v1486_v44  ;;  %v2130_v44 = vld [vmem:[%s3082_s9 + $0x1] ss:$0 sm:$0xff] }
 0xe1c   :  { %v2623_v45 = vpop.eup %2622 }
 0xe1d   :  { %v1489_v46 = vpop.xlane.xlu1 %1488  ;;  %v2574_v47 = vpop.permute.xlu0 %2573  ;;  %v1288_v49 = vmul.f32 %v2623_v45, %v2617_v54 }
 0xe1e   :  { %2628 = vrcp.f32 %v1489_v46  ;;  %v2576_v50 = vunpack.i.h.bf16 %v2574_v47  ;;  %v2575_v51 = vunpack.i.l.bf16 %v2574_v47  ;;  %v2625_v56 = vpop.eup %2624 }
 0xe1f   :  { %2352 = vmatprep.mubr.msk.f32.mxu0 %vm205_vm1, %v1288_v49  ;;  %v1289_v62 = vmul.f32 %v2625_v56, %v2615_v32  ;;  %v2141_v56 = vld [vmem:[%s3083_s12 + $0x50] sm:$0xff] }
 0xe20   :  { %v2487_v52 = vpack.c.bf16 %v2576_v50, %v2575_v51  ;;  %v2139_v50 = vld [vmem:[%s3083_s12 + $0x40] sm:$0xff]  ;;  %v2140_v51 = vld [vmem:[%s3083_s12 + $0x48] sm:$0xff] }
 0xe21   :  { %v2579_v58 = vpop.permute.xlu1 %2578 }
 0xe22   :  { %v2581_v59 = vunpack.i.h.bf16 %v2579_v58  ;;  %v2580_v60 = vunpack.i.l.bf16 %v2579_v58  ;;  %2488 = vmatprep.subr.bf16.mxu0 %v2487_v52  ;;  %v2142_v58 = vld [vmem:[%s3083_s12 + $0x58] sm:$0xff] }
 0xe23   :  { %2490 = vmatpush3.bf16.msra.mxu0 %v2487_v52  ;;  %v2517_v52 = vpack.c.bf16 %v2140_v51, %v2139_v50  ;;  %v2154_v50 = vld [vmem:[%s3087_s15 + $0x1] ss:$0 sm:$0xff] }
 0xe24   :  { %v2627_v61 = vpop.eup %2626  ;;  %v2497_v63 = vpack.c.bf16 %v2581_v59, %v2580_v60  ;;  %v2521_v59 = vpack.c.bf16 %v2142_v58, %v2141_v56  ;;  %v2143_v60 = vld [vmem:[%s3083_s12 + $0x60] sm:$0xff] }
 0xe25   :  { %v1492_v0 = vmul.f32 %v2627_v61, %v2619_v38  ;;  %v2144_v61 = vld [vmem:[%s3083_s12 + $0x68] sm:$0xff] }
 0xe26   :  { %2353 = vmatmul.mubr.msk.f32.vlgmr.msra.gmra.mrb[8].mxu0 %vm205_vm1, %v1289_v62  ;;  %2498 = vmatprep.subr.bf16.mxu0 %v2497_v63  ;;  %v2525_v62 = vpack.c.bf16 %v2144_v61, %v2143_v60 }
 0xe27   :  { %2500 = vmatpush3.bf16.msra.mxu0 %v2497_v63  ;;  %2366 = vmatprep.mubr.msk.f32.mxu0 %vm205_vm1, %v1492_v0  ;;  %v2145_v63 = vld [vmem:[%s3083_s12 + $0x70] sm:$0xff]  ;;  %v2146_v0 = vld [vmem:[%s3083_s12 + $0x78] sm:$0xff] }
 0xe28   :  { %v2629_v1 = vpop.eup %2628  ;;  %2502 = vmatprep.subr.bf16.mxu0 %v2501_v5 }
 0xe29   :  { %v1493_v2 = vmul.f32 %v2629_v1, %v2621_v40  ;;  %v2129_v40 = vld [vmem:[%s3081_s8 + $0x1] ss:$0 sm:$0xff]  ;;  %v2529_v1 = vpack.c.bf16 %v2146_v0, %v2145_v63 }
 0xe2b   :  { %2367 = vmatmul.mubr.msk.f32.vlgmr.msra.gmra.mrb[10].mxu0 %vm205_vm1, %v1493_v2  ;;  %v2136_v2 = vld [vmem:[%s3084_s11 + $0x1] ss:$0 sm:$0xff] }
 0xe2c   :  { %2504 = vmatpush3.bf16.msra.mxu0 %v2501_v5 }
 0xe2d   :  { %2506 = vmatprep.subr.bf16.mxu0 %v2505_v8 }
 0xef9   :  { %v2354_v9 = vpop.f32.mrb[8].mxu0 }
 0xefa   :  { %v1368_v10 = vpop.f32.mrb[9].mxu0 }
 0xefe   :  { %v2368_v11 = vpop.f32.mrb[10].mxu0 }
 0xeff   :  { %v1572_v12 = vpop.f32.mrb[11].mxu0 }
 0xf00   :  { %2373 = vmatprep.mubr.msk.f32.mxu0 %vm205_vm1, %v1572_v12 }
 0xf01   :  { %2374 = vmatmul.mubr.msk.f32.vlgmr.msra.gmra.mrb[12].mxu0 %vm205_vm1, %v2368_v11 }
 0xf02   :  { %2508 = vmatpush3.bf16.msra.mxu0 %v2505_v8  ;;  %2380 = vmatprep.mubr.msk.f32.mxu0 %vm205_vm1, %v1368_v10 }
 0xf03   :  { %2518 = vmatprep.subr.bf16.mxu0 %v2517_v52 }
 0xf09   :  { %2381 = vmatmul.mubr.msk.f32.vlgmr.msra.gmra.mrb[12].mxu0 %vm205_vm1, %v2354_v9 }
 0xf0a   :  { %2520 = vmatpush3.bf16.msra.mxu0 %v2517_v52 }
 0xf0b   :  { %2522 = vmatprep.subr.bf16.mxu0 %v2521_v59 }
 0xf0e   :  { %2524 = vmatpush3.bf16.msra.mxu0 %v2521_v59 }
 0xf0f   :  { %2526 = vmatprep.subr.bf16.mxu0 %v2525_v62 }
 0xf12   :  { %2528 = vmatpush3.bf16.msra.mxu0 %v2525_v62 }
 0xf13   :  { %2530 = vmatprep.subr.bf16.mxu0 %v2529_v1 }
 0xf16   :  { %2532 = vmatpush3.bf16.msra.mxu0 %v2529_v1 }
 0xfdc   :  { %v2382_v14 = vpop.f32.mrb[12].mxu0 }
 0xfdd   :  { %v1752_v15 = vadd.f32 %v2382_v14, %v2126_v13  ;;  %v1734_v35 = vpop.f32.mrb[13].mxu0 }
 0xfde   :  { %v1751_v48 = vadd.f32 %v2126_v13, %v1734_v35 }
 0xfdf   :  { %v1754_v33 = vadd.f32 %v1752_v15, %v2928_v55 }
 0xfe0   :  { %v1753_v16 = vadd.f32 %v1751_v48, %v2926_v53  ;;  %v2131_v53 = vld [vmem:[%s3080_s10 + $0x20] sm:$0xff] }
 0xfe1   :  { %v1762_v17 = vsel %vm57_vm0, %v1754_v33, 0.0  ;;  %v2509_v29 = vpack.c.bf16 %v2132_v28, %v2131_v53 }
 0xfe2   :  { %1763 = vadd.xlane.f32.xlu0 %v1762_v17  ;;  %v1759_v18 = vsel %vm57_vm0, %v1753_v16, 0.0 }
 0xfe3   :  { %1760 = vadd.xlane.f32.xlu1 %v1759_v18  ;;  %2510 = vmatprep.subr.bf16.mxu1 %v2509_v29 }
 0xfe4   :  { %2512 = vmatpush3.bf16.msra.mxu1 %v2509_v29 }
 0xfe5   :  { %2514 = vmatprep.subr.bf16.mxu1 %v2513_v31 }
 0xfe8   :  { %2516 = vmatpush3.bf16.msra.mxu1 %v2513_v31 }
0x106f   :  { %v1764_v19 = vpop.xlane.xlu0 %1763 }
0x1070   :  { %v1766_v20 = vmul.f32 0.03125, %v1764_v19  ;;  %v1761_v21 = vpop.xlane.xlu1 %1760 }
0x1071   :  { %v1765_v22 = vmul.f32 0.03125, %v1761_v21 }
0x1072   :  { %v1768_v23 = vsub.f32 %v1754_v33, %v1766_v20 }
0x1073   :  { %v1767_v24 = vsub.f32 %v1753_v16, %v1765_v22  ;;  %v2148_v22 = vld [vmem:[%s3085_s13 + $0x1] ss:$0 sm:$0xff] }
0x1074   :  { %v1770_v25 = vmul.f32 %v1768_v23, %v1768_v23 }
0x1075   :  { %v1769_v26 = vmul.f32 %v1767_v24, %v1767_v24 }
0x1076   :  { %v1774_v27 = vsel %vm57_vm0, %v1770_v25, 0.0 }
0x1077   :  { %1775 = vadd.xlane.f32.xlu1 %v1774_v27  ;;  %v1771_v55 = vsel %vm57_vm0, %v1769_v26, 0.0 }
0x1078   :  { %1772 = vadd.xlane.f32.xlu0 %v1771_v55 }
0x1104   :  { %v1776_v32 = vpop.xlane.xlu1 %1775 }
0x1105   :  { %v1778_v54 = vmul.f32 0.03125, %v1776_v32  ;;  %v1773_v34 = vpop.xlane.xlu0 %1772 }
0x1106   :  { %v1777_v36 = vmul.f32 0.03125, %v1773_v34 }
0x1107   :  { %v1780_v37 = vadd.f32 1e-12, %v1778_v54 }
0x1108   :  { %v1779_v38 = vadd.f32 1e-12, %v1777_v36 }
0x1109   :  { %2630 = vrsqrt.f32 %v1780_v37 }
0x110a   :  { %2632 = vrsqrt.f32 %v1779_v38 }
0x1113   :  { %v2631_v39 = vpop.eup %2630 }
0x1114   :  { %v2633_v42 = vpop.eup %2632  ;;  %v1784_v41 = vmul.f32 %v2631_v39, %v1768_v23 }
0x1115   :  { %v1783_v43 = vmul.f32 %v2633_v42, %v1767_v24 }
0x1116   :  { %v1792_v45 = vmul.f32 %v2129_v40, %v1784_v41 }
0x1117   :  { %v1791_v46 = vmul.f32 %v2129_v40, %v1783_v43 }
0x1118   :  { %v1800_v49 = vadd.f32 %v2130_v44, %v1792_v45 }
0x1119   :  { %v1799_v47 = vadd.f32 %v2130_v44, %v1791_v46  ;;  %v2153_v46 = vld [vmem:[%s3086_s14 + $0x1] ss:$0 sm:$0xff] }
0x111b   :  { %2391 = vmatprep.mubr.msk.f32.mxu1 %vm57_vm0, %v1799_v47 }
0x111c   :  { %2392 = vmatmul.mubr.msk.f32.vlgmr.msra.gmra.mrb[14].mxu1 %vm57_vm0, %v1800_v49 }
0x11ef   :  { %v2393_v3 = vpop.f32.mrb[14].mxu1 }
0x11f0   :  { %v1892_v4 = vadd.f32 %v2393_v3, %v2136_v2  ;;  %v1886_v5 = vpop.f32.mrb[15].mxu1 }
0x11f1   :  { %v1887_v6 = vadd.f32 %v2136_v2, %v1886_v5 }
0x11f2   :  { %v1896_v7 = vmul.f32 %v1892_v4, %v1892_v4 }
0x11f3   :  { %v1895_v8 = vmul.f32 %v1887_v6, %v1887_v6 }
0x11f4   :  { %v1898_v9 = vmul.f32 %v1896_v7, %v1892_v4 }
0x11f5   :  { %v1897_v10 = vmul.f32 %v1895_v8, %v1887_v6 }
0x11f6   :  { %v1900_v11 = vmul.f32 0.044715, %v1898_v9 }
0x11f7   :  { %v1899_v12 = vmul.f32 0.044715, %v1897_v10 }
0x11f8   :  { %v1902_v13 = vadd.f32 %v1900_v11, %v1892_v4 }
0x11f9   :  { %v1901_v14 = vadd.f32 %v1899_v12, %v1887_v6 }
0x11fa   :  { %v1904_v15 = vmul.f32 0.7978846, %v1902_v13 }
0x11fb   :  { %v1903_v35 = vmul.f32 0.7978846, %v1901_v14 }
0x11fc   :  { %2634 = vtanh.f32 %v1904_v15 }
0x11fd   :  { %2636 = vtanh.f32 %v1903_v35 }
0x1206   :  { %v2635_v48 = vpop.eup %2634 }
0x1207   :  { %v2637_v33 = vpop.eup %2636  ;;  %v1908_v16 = vadd.f32 1.0, %v2635_v48 }
0x1208   :  { %v1907_v17 = vadd.f32 1.0, %v2637_v33 }
0x1209   :  { %v1910_v18 = vmul.f32 0.5, %v1908_v16 }
0x120a   :  { %v1909_v19 = vmul.f32 0.5, %v1907_v17 }
0x120b   :  { %v1912_v21 = vmul.f32 %v1910_v18, %v1892_v4 }
0x120c   :  { %v1911_v20 = vmul.f32 %v1909_v19, %v1887_v6 }
0x120e   :  { %2410 = vmatprep.mubr.msk.f32.mxu0 %vm948_vm3, %v1911_v20 }
0x120f   :  { %2411 = vmatmul.mubr.msk.f32.vlgmr.msra.gmra.mrb[14].mxu0 %vm948_vm3, %v1912_v21 }
0x12e2   :  { %v2412_v23 = vpop.f32.mrb[14].mxu0 }
0x12e3   :  { %v2008_v24 = vadd.f32 %v2412_v23, %v2148_v22  ;;  %v2002_v25 = vpop.f32.mrb[15].mxu0 }
0x12e4   :  { %v2003_v26 = vadd.f32 %v2148_v22, %v2002_v25 }
0x12e5   :  { %v2012_v27 = vadd.f32 %v2008_v24, %v1800_v49 }
0x12e6   :  { %v2011_v55 = vadd.f32 %v2003_v26, %v1799_v47 }
0x12e7   :  { %v2020_v53 = vsel %vm57_vm0, %v2012_v27, 0.0 }
0x12e8   :  { %2021 = vadd.xlane.f32.xlu1 %v2020_v53  ;;  %v2017_v28 = vsel %vm57_vm0, %v2011_v55, 0.0 }
0x12e9   :  { %2018 = vadd.xlane.f32.xlu0 %v2017_v28 }
0x1375   :  { %v2022_v29 = vpop.xlane.xlu1 %2021 }
0x1376   :  { %v2024_v30 = vmul.f32 0.03125, %v2022_v29  ;;  %v2019_v57 = vpop.xlane.xlu0 %2018 }
0x1377   :  { %v2023_v31 = vmul.f32 0.03125, %v2019_v57 }
0x1378   :  { %v2026_v32 = vsub.f32 %v2012_v27, %v2024_v30 }
0x1379   :  { %v2025_v54 = vsub.f32 %v2011_v55, %v2023_v31 }
0x137a   :  { %v2028_v34 = vmul.f32 %v2026_v32, %v2026_v32 }
0x137b   :  { %v2027_v36 = vmul.f32 %v2025_v54, %v2025_v54 }
0x137c   :  { %v2032_v37 = vsel %vm57_vm0, %v2028_v34, 0.0 }
0x137d   :  { %2033 = vadd.xlane.f32.xlu1 %v2032_v37  ;;  %v2029_v38 = vsel %vm57_vm0, %v2027_v36, 0.0 }
0x137e   :  { %2030 = vadd.xlane.f32.xlu0 %v2029_v38 }
0x140a   :  { %v2034_v39 = vpop.xlane.xlu1 %2033 }
0x140b   :  { %v2036_v40 = vmul.f32 0.03125, %v2034_v39  ;;  %v2031_v42 = vpop.xlane.xlu0 %2030 }
0x140c   :  { %v2035_v41 = vmul.f32 0.03125, %v2031_v42 }
0x140d   :  { %v2038_v43 = vadd.f32 1e-12, %v2036_v40 }
0x140e   :  { %v2037_v44 = vadd.f32 1e-12, %v2035_v41 }
0x140f   :  { %2638 = vrsqrt.f32 %v2038_v43 }
0x1410   :  { %2640 = vrsqrt.f32 %v2037_v44 }
0x1419   :  { %v2639_v45 = vpop.eup %2638 }
0x141a   :  { %v2641_v47 = vpop.eup %2640  ;;  %v2042_v49 = vmul.f32 %v2639_v45, %v2026_v32 }
0x141b   :  { %v2041_v51 = vmul.f32 %v2641_v47, %v2025_v54 }
0x141c   :  { %v2050_v52 = vmul.f32 %v2153_v46, %v2042_v49 }
0x141d   :  { %v2049_v56 = vmul.f32 %v2153_v46, %v2041_v51 }
0x141e   :  { %v2058_v58 = vadd.f32 %v2154_v50, %v2050_v52 }
0x141f   :  { %v2057_v59 = vadd.f32 %v2154_v50, %v2049_v56 }
0x1420   :  { %2060 = vst.msk [vmem:[%s3088_s16 + $0x8] sm:$0xff] %vm57_vm0, %v2058_v58 }
0x1421   :  { %2059 = vst.msk [vmem:[%s3088_s16] sm:$0xff] %vm57_vm0, %v2057_v59 }

// kernel: bert_lstm_forward.3
= control target key start
LH: loop header
LB: loop body
LE: loop exit
PB: predicated region body
PF: predicated region fallthrough
CT: control target
= control target key end

     0   :  { %vm54_vm0 = vcmask 261120   ;;  %v8273_v4 = vmov 0.0|0.0   ;;  %vm8274_vm1 = vmmov 0   ;;  %v8275_v13 = vmov 0.0   ;;  %s9472_s0 = inlined_call_operand.vmem [shape: f32[16,32], index: 0, kind: input, shape index: {}]   ;;  %s9473_s1 = inlined_call_operand.vmem [shape: f32[2,32,128], index: 1, kind: input, shape index: {}]   ;;  %s9474_s2 = inlined_call_operand.vmem [shape: f32[2,2,64,128], index: 2, kind: input, shape index: {}]   ;;  %s9475_s3 = inlined_call_operand.vmem [shape: f32[3,2,32,128], index: 3, kind: input, shape index: {}]   ;;  %s9476_s4 = inlined_call_operand.vmem [shape: f32[3,2,1,128], index: 4, kind: input, shape index: {}]   ;;  %s9477_s5 = inlined_call_operand.vmem [shape: f32[64,3], index: 5, kind: input, shape index: {}]   ;;  %s9478_s6 = inlined_call_operand.vmem [shape: f32[1,3], index: 6, kind: input, shape index: {}]   ;;  %s9479_s7 = inlined_call_operand.hbm [shape: f32[2,3], index: 7, kind: output, shape index: {}]  }
   0x1   :  { %v29_v0 = vld [vmem:[%s9473_s1] sm:$0xff]  ;;  %v30_v1 = vld [vmem:[%s9473_s1 + $0x8] sm:$0xff]  ;;  %7479 = vmatprep.subr.bf16.mxu1 %v8273_v4  ;;  %v31_v6 = vld [vmem:[%s9473_s1 + $0x10] sm:$0xff]  ;;  %6830 = vmatprep.mubr.msk.f32.mxu1 %vm8274_vm1, %v8275_v13 }
   0x2   :  { %v40_v2 = vld [vmem:[%s9475_s3] sm:$0xff]  ;;  %v7471_v3 = vpack.c.bf16 %v30_v1, %v29_v0  ;;  %v41_v5 = vld [vmem:[%s9475_s3 + $0x8] sm:$0xff]  ;;  %v32_v7 = vld [vmem:[%s9473_s1 + $0x18] sm:$0xff] }
   0x3   :  { %v8338_v8 = vpack.c.bf16 %v41_v5, %v40_v2  ;;  %v7475_v9 = vpack.c.bf16 %v32_v7, %v31_v6  ;;  %v8343_v10 = vld [vmem:[%s9472_s0] sm:$0xff]  ;;  %v42_v11 = vld [vmem:[%s9475_s3 + $0x10] sm:$0xff]  ;;  %v43_v12 = vld [vmem:[%s9475_s3 + $0x18] sm:$0xff] }
   0x4   :  { %7472 = vmatprep.subr.bf16.mxu0 %v7471_v3  ;;  %6819 = vmatprep.mubr.msk.f32.mxu0 %vm54_vm0, %v8343_v10 }
   0x5   :  { %12 = vsyncpa [#allocation5], 0  ;;  %7474 = vmatpush3.bf16.msra.mxu0 %v7471_v3  ;;  %7481 = vmatpush3.bf16.msra.mxu1 %v8338_v8  ;;  %v8356_v14 = vpack.c.bf16 %v43_v12, %v42_v11  ;;  %v8363_v15 = vld [vmem:[%s9472_s0 + $0x8] sm:$0xff]  ;;  %v6346_v16 = vld [vmem:[%s9476_s4] ss:$0 sm:$0xff]  ;;  %s8276_s22 = smov 64  }
   0x6   :  { %7476 = vmatprep.subr.bf16.mxu0 %v7475_v9  ;;  %7482 = vmatprep.subr.bf16.mxu1 %v8273_v4  ;;  %s8277_s23 = smov 32   ;;  %vm238_vm2 = vcmask 254976   ;;  %vm459_vm3 = vcmask 259076   ;;  %vm571_vm4 = vcmask 261126   ;;  %vm347_vm5 = vcmask 257026  }
   0x7   :  { %vm6326_vm6 = vcmask 17408  }
   0x9   :  { %7478 = vmatpush3.bf16.msra.mxu0 %v7475_v9  ;;  %7484 = vmatpush3.bf16.msra.mxu1 %v8356_v14 }
   0xa   :  { %7485 = vmatprep.subr.bf16.mxu0 %v8273_v4  ;;  %7491 = vmatprep.subr.bf16.mxu1 %v8273_v4 }
   0xc   :  { %6820 = vmatmul.mubr.msk.f32.vlgmr.msra.gmra.mrb[0].mxu0 %vm54_vm0, %v8363_v15  ;;  %6831 = vmatmul.mubr.f32.vlgmr.msra.gmra.mrb[0].mxu1 %v8275_v13 }
   0xd   :  { %7487 = vmatpush3.bf16.msra.mxu0 %v8338_v8  ;;  %6841 = vmatprep.mubr.msk.f32.mxu0 %vm8274_vm1, %v8275_v13 }
   0xe   :  { %7488 = vmatprep.subr.bf16.mxu0 %v8273_v4  ;;  %7493 = vmatpush3.bf16.msra.mxu1 %v8338_v8 }
   0xf   :  { %7494 = vmatprep.subr.bf16.mxu1 %v8273_v4  ;;  %6852 = vmatprep.mubr.msk.f32.mxu1 %vm8274_vm1, %v8275_v13 }
  0x11   :  { %7490 = vmatpush3.bf16.msra.mxu0 %v8356_v14 }
  0x12   :  { %7496 = vmatpush3.bf16.msra.mxu1 %v8356_v14  ;;  %7497 = vmatprep.subr.bf16.mxu0 %v8273_v4 }
  0x13   :  { %7503 = vmatprep.subr.bf16.mxu1 %v8273_v4 }
  0xdf   :  { %v6821_v17 = vpop.f32.mrb[0].mxu0  ;;  %v205_v18 = vpop.f32.mrb[0].mxu1 }
  0xe0   :  { %v8385_v19 = vadd.f32 %v6821_v17, %v6346_v16  ;;  %v127_v20 = vpop.f32.mrb[1].mxu0  ;;  %v6832_v21 = vpop.f32.mrb[1].mxu1 }
  0xe1   :  { %v8387_v22 = vadd.f32 %v6346_v16, %v127_v20 }
  0xe3   :  { %v209_v23 = vadd.f32 %v205_v18, %v8387_v22 }
  0xe5   :  { %7865 = vtanh.f32 %v209_v23  ;;  %v6349_v25 = vmul.f32 -1.442695, %v209_v23 }
  0xe7   :  { %7867 = vpow2.f32 %v6349_v25 }
  0xef   :  { %v7866_v24 = vpop.eup %7865 }
  0xf0   :  { %219 = vrot.lane.b32.xlu0 %v7866_v24, %s8276_s22 }
  0xf1   :  { %v7868_v26 = vpop.eup %7867 }
  0xf2   :  { %v213_v27 = vadd.f32 1.0, %v7868_v26 }
  0xf4   :  { %7869 = vrcp.f32 %v213_v27 }
  0xfe   :  { %v7870_v28 = vpop.eup %7869 }
  0xff   :  { %v217_v31 = vmul.f32 0.0, %v7870_v28 }
 0x162   :  { %v220_v29 = vpop.permute.xlu0 %219 }
 0x163   :  { %v222_v30 = vmul.f32 %v7870_v28, %v220_v29 }
 0x165   :  { %224 = vrot.lane.b32.xlu0 %v222_v30, %s8277_s23 }
 0x1d7   :  { %v225_v32 = vpop.permute.xlu0 %224 }
 0x1d8   :  { %v227_v33 = vadd.f32 %v225_v32, %v217_v31 }
 0x1da   :  { %7871 = vtanh.f32 %v227_v33  ;;  %v324_v49 = vrot.slane %v227_v33, 6 }
 0x1e4   :  { %v7872_v34 = vpop.eup %7871 }
 0x1e5   :  { %230 = vrot.lane.b32.xlu1 %v7872_v34, %s8276_s22 }
 0x257   :  { %v231_v35 = vpop.permute.xlu1 %230 }
 0x258   :  { %v233_v36 = vmul.f32 %v7870_v28, %v231_v35 }
 0x25a   :  { %235 = vrot.lane.b32.xlu1 %v233_v36, %s8277_s23 }
 0x2cc   :  { %v236_v37 = vpop.permute.xlu1 %235 }
 0x2cd   :  { %239 = vst.msk [vmem:[#allocation2] sm:$0x3] %vm238_vm2, %v236_v37  ;;  %6842 = vmatmul.mubr.msk.f32.vlgmr.msra.gmra.mrb[2].mxu0 %vm54_vm0, %v236_v37 }
 0x2ce   :  { %7499 = vmatpush3.bf16.msra.mxu0 %v8338_v8  ;;  %6863 = vmatprep.mubr.msk.f32.mxu0 %vm8274_vm1, %v8275_v13 }
 0x2cf   :  { %7500 = vmatprep.subr.bf16.mxu0 %v8273_v4 }
 0x2d2   :  { %7502 = vmatpush3.bf16.msra.mxu0 %v8356_v14 }
 0x2d3   :  { %7509 = vmatprep.subr.bf16.mxu0 %v8273_v4 }
 0x3a0   :  { %v308_v38 = vpop.f32.mrb[2].mxu0 }
 0x3a1   :  { %v313_v39 = vrot.slane %v308_v38, 6  ;;  %v6843_v40 = vpop.f32.mrb[3].mxu0 }
 0x3a3   :  { %v315_v41 = vadd.f32 %v313_v39, %v8387_v22 }
 0x3a5   :  { %7873 = vtanh.f32 %v315_v41  ;;  %v6351_v43 = vmul.f32 -1.442695, %v315_v41 }
 0x3a7   :  { %7875 = vpow2.f32 %v6351_v43 }
 0x3af   :  { %v7874_v42 = vpop.eup %7873 }
 0x3b0   :  { %328 = vrot.lane.b32.xlu0 %v7874_v42, %s8276_s22 }
 0x3b1   :  { %v7876_v44 = vpop.eup %7875 }
 0x3b2   :  { %v319_v45 = vadd.f32 1.0, %v7876_v44 }
 0x3b4   :  { %7877 = vrcp.f32 %v319_v45 }
 0x3be   :  { %v7878_v46 = vpop.eup %7877 }
 0x3bf   :  { %v326_v50 = vmul.f32 %v7878_v46, %v324_v49 }
 0x422   :  { %v329_v47 = vpop.permute.xlu0 %328 }
 0x423   :  { %v331_v48 = vmul.f32 %v7878_v46, %v329_v47 }
 0x425   :  { %333 = vrot.lane.b32.xlu1 %v331_v48, %s8277_s23 }
 0x497   :  { %v334_v51 = vpop.permute.xlu1 %333 }
 0x498   :  { %v336_v52 = vadd.f32 %v334_v51, %v326_v50 }
 0x49a   :  { %7879 = vtanh.f32 %v336_v52  ;;  %v436_v6 = vrot.slane %v336_v52, 6 }
 0x4a4   :  { %v7880_v53 = vpop.eup %7879 }
 0x4a5   :  { %339 = vrot.lane.b32.xlu0 %v7880_v53, %s8276_s22 }
 0x517   :  { %v340_v54 = vpop.permute.xlu0 %339 }
 0x518   :  { %v8406_v55 = vmul.f32 %v7878_v46, %v340_v54 }
 0x51a   :  { %v349_v56 = vrot.slane %v8406_v55, 2 }
 0x51c   :  { %350 = vrot.lane.b32.xlu1 %v349_v56, %s8277_s23 }
 0x58e   :  { %v351_v57 = vpop.permute.xlu1 %350 }
 0x58f   :  { %6853 = vmatmul.mubr.msk.f32.vlgmr.msra.gmra.mrb[2].mxu1 %vm54_vm0, %v351_v57 }
 0x590   :  { %7505 = vmatpush3.bf16.msra.mxu1 %v8338_v8  ;;  %6874 = vmatprep.mubr.msk.f32.mxu1 %vm8274_vm1, %v8275_v13 }
 0x591   :  { %7506 = vmatprep.subr.bf16.mxu1 %v8273_v4 }
 0x594   :  { %7508 = vmatpush3.bf16.msra.mxu1 %v8356_v14 }
 0x595   :  { %7515 = vmatprep.subr.bf16.mxu1 %v8273_v4 }
 0x662   :  { %v420_v58 = vpop.f32.mrb[2].mxu1 }
 0x663   :  { %v425_v59 = vrot.slane %v420_v58, 4  ;;  %v6854_v60 = vpop.f32.mrb[3].mxu1 }
 0x665   :  { %v427_v61 = vadd.f32 %v425_v59, %v8387_v22 }
 0x667   :  { %7881 = vtanh.f32 %v427_v61  ;;  %v6353_v63 = vmul.f32 -1.442695, %v427_v61 }
 0x669   :  { %7883 = vpow2.f32 %v6353_v63 }
 0x671   :  { %v7882_v62 = vpop.eup %7881 }
 0x672   :  { %440 = vrot.lane.b32.xlu0 %v7882_v62, %s8276_s22 }
 0x673   :  { %v7884_v0 = vpop.eup %7883 }
 0x674   :  { %v431_v1 = vadd.f32 1.0, %v7884_v0 }
 0x676   :  { %7885 = vrcp.f32 %v431_v1 }
 0x680   :  { %v7886_v2 = vpop.eup %7885 }
 0x681   :  { %v438_v7 = vmul.f32 %v7886_v2, %v436_v6 }
 0x6e4   :  { %v441_v3 = vpop.permute.xlu0 %440 }
 0x6e5   :  { %v443_v5 = vmul.f32 %v7886_v2, %v441_v3 }
 0x6e7   :  { %445 = vrot.lane.b32.xlu1 %v443_v5, %s8277_s23 }
 0x759   :  { %v446_v9 = vpop.permute.xlu1 %445 }
 0x75a   :  { %v448_v11 = vadd.f32 %v446_v9, %v438_v7 }
 0x75c   :  { %7887 = vtanh.f32 %v448_v11  ;;  %v548_v33 = vrot.slane %v448_v11, 6 }
 0x766   :  { %v7888_v12 = vpop.eup %7887 }
 0x767   :  { %451 = vrot.lane.b32.xlu0 %v7888_v12, %s8276_s22 }
 0x7d9   :  { %v452_v16 = vpop.permute.xlu0 %451 }
 0x7da   :  { %v8421_v17 = vmul.f32 %v7886_v2, %v452_v16 }
 0x7dc   :  { %v461_v18 = vrot.slane %v8421_v17, 4 }
 0x7de   :  { %462 = vrot.lane.b32.xlu1 %v461_v18, %s8277_s23 }
 0x850   :  { %v463_v20 = vpop.permute.xlu1 %462 }
 0x851   :  { %6864 = vmatmul.mubr.msk.f32.vlgmr.msra.gmra.mrb[4].mxu0 %vm54_vm0, %v463_v20 }
 0x852   :  { %7511 = vmatpush3.bf16.msra.mxu0 %v8338_v8  ;;  %6885 = vmatprep.mubr.msk.f32.mxu0 %vm8274_vm1, %v8275_v13 }
 0x853   :  { %7512 = vmatprep.subr.bf16.mxu0 %v8273_v4 }
 0x856   :  { %7514 = vmatpush3.bf16.msra.mxu0 %v8356_v14 }
 0x857   :  { %7521 = vmatprep.subr.bf16.mxu0 %v8273_v4 }
 0x924   :  { %v532_v21 = vpop.f32.mrb[4].mxu0 }
 0x925   :  { %v537_v23 = vrot.slane %v532_v21, 2  ;;  %v6865_v24 = vpop.f32.mrb[5].mxu0 }
 0x927   :  { %v539_v25 = vadd.f32 %v537_v23, %v8387_v22 }
 0x929   :  { %7889 = vtanh.f32 %v539_v25  ;;  %v6355_v27 = vmul.f32 -1.442695, %v539_v25 }
 0x92b   :  { %7891 = vpow2.f32 %v6355_v27 }
 0x933   :  { %v7890_v26 = vpop.eup %7889 }
 0x934   :  { %552 = vrot.lane.b32.xlu0 %v7890_v26, %s8276_s22 }
 0x935   :  { %v7892_v28 = vpop.eup %7891 }
 0x936   :  { %v543_v29 = vadd.f32 1.0, %v7892_v28 }
 0x938   :  { %7893 = vrcp.f32 %v543_v29 }
 0x942   :  { %v7894_v30 = vpop.eup %7893 }
 0x943   :  { %v550_v34 = vmul.f32 %v7894_v30, %v548_v33 }
 0x9a6   :  { %v553_v31 = vpop.permute.xlu0 %552 }
 0x9a7   :  { %v555_v32 = vmul.f32 %v7894_v30, %v553_v31 }
 0x9a9   :  { %557 = vrot.lane.b32.xlu1 %v555_v32, %s8277_s23 }
 0xa1b   :  { %v558_v35 = vpop.permute.xlu1 %557 }
 0xa1c   :  { %v560_v36 = vadd.f32 %v558_v35, %v550_v34 }
 0xa1e   :  { %7895 = vtanh.f32 %v560_v36  ;;  %v657_v51 = vrot.slane %v560_v36, 6 }
 0xa28   :  { %v7896_v22 = vpop.eup %7895 }
 0xa29   :  { %563 = vrot.lane.b32.xlu0 %v7896_v22, %s8276_s22  ;;  %v6342_v22 = vld [vmem:[%s9473_s1 + $0x20] sm:$0xff] }
 0xa9b   :  { %v564_v37 = vpop.permute.xlu0 %563 }
 0xa9c   :  { %v8436_v38 = vmul.f32 %v7894_v30, %v564_v37  ;;  %v6343_v37 = vld [vmem:[%s9473_s1 + $0x28] sm:$0xff] }
 0xa9e   :  { %v573_v39 = vrot.slane %v8436_v38, 6 }
 0xaa0   :  { %574 = vrot.lane.b32.xlu1 %v573_v39, %s8277_s23  ;;  %v7527_v39 = vpack.c.bf16 %v6343_v37, %v6342_v22 }
 0xb12   :  { %v575_v40 = vpop.permute.xlu1 %574 }
 0xb13   :  { %6875 = vmatmul.mubr.msk.f32.vlgmr.msra.gmra.mrb[4].mxu1 %vm54_vm0, %v575_v40 }
 0xb14   :  { %7517 = vmatpush3.bf16.msra.mxu1 %v8338_v8  ;;  %6896 = vmatprep.mubr.msk.f32.mxu1 %vm8274_vm1, %v8275_v13 }
 0xb15   :  { %7518 = vmatprep.subr.bf16.mxu1 %v8273_v4 }
 0xb18   :  { %7520 = vmatpush3.bf16.msra.mxu1 %v8356_v14 }
 0xb19   :  { %7528 = vmatprep.subr.bf16.mxu1 %v7527_v39 }
 0xbe6   :  { %v644_v41 = vpop.f32.mrb[4].mxu1 }
 0xbe7   :  { %v648_v42 = vadd.f32 %v644_v41, %v8385_v19  ;;  %v6876_v43 = vpop.f32.mrb[5].mxu1  ;;  %v6344_v41 = vld [vmem:[%s9473_s1 + $0x30] sm:$0xff] }
 0xbe9   :  { %7897 = vtanh.f32 %v648_v42  ;;  %v6357_v45 = vmul.f32 -1.442695, %v648_v42  ;;  %v6345_v42 = vld [vmem:[%s9473_s1 + $0x38] sm:$0xff] }
 0xbea   :  { %v7531_v43 = vpack.c.bf16 %v6345_v42, %v6344_v41 }
 0xbeb   :  { %7899 = vpow2.f32 %v6357_v45  ;;  %v45_v45 = vld [vmem:[%s9475_s3 + $0x28] sm:$0xff] }
 0xbf3   :  { %v7898_v44 = vpop.eup %7897 }
 0xbf4   :  { %661 = vrot.lane.b32.xlu0 %v7898_v44, %s8276_s22  ;;  %v44_v44 = vld [vmem:[%s9475_s3 + $0x20] sm:$0xff] }
 0xbf5   :  { %v7900_v46 = vpop.eup %7899 }
 0xbf6   :  { %v652_v47 = vadd.f32 1.0, %v7900_v46  ;;  %v8496_v46 = vpack.c.bf16 %v45_v45, %v44_v44 }
 0xbf8   :  { %7901 = vrcp.f32 %v652_v47  ;;  %v46_v47 = vld [vmem:[%s9475_s3 + $0x30] sm:$0xff] }
 0xc02   :  { %v7902_v48 = vpop.eup %7901 }
 0xc03   :  { %v659_v52 = vmul.f32 %v7902_v48, %v657_v51 }
 0xc66   :  { %v662_v49 = vpop.permute.xlu0 %661 }
 0xc67   :  { %v664_v50 = vmul.f32 %v7902_v48, %v662_v49 }
 0xc69   :  { %666 = vrot.lane.b32.xlu1 %v664_v50, %s8277_s23 }
 0xcdb   :  { %v667_v53 = vpop.permute.xlu1 %666 }
 0xcdc   :  { %v669_v54 = vadd.f32 %v667_v53, %v659_v52 }
 0xcde   :  { %7903 = vtanh.f32 %v669_v54 }
 0xce8   :  { %v7904_v56 = vpop.eup %7903 }
 0xce9   :  { %672 = vrot.lane.b32.xlu0 %v7904_v56, %s8276_s22 }
 0xd5b   :  { %v673_v57 = vpop.permute.xlu0 %672 }
 0xd5c   :  { %v675_v58 = vmul.f32 %v7902_v48, %v673_v57  ;;  %v47_v48 = vld [vmem:[%s9475_s3 + $0x38] sm:$0xff] }
 0xd5d   :  { %v8512_v51 = vpack.c.bf16 %v47_v48, %v46_v47 }
 0xd5e   :  { %677 = vrot.lane.b32.xlu1 %v675_v58, %s8277_s23 }
 0xdd0   :  { %v678_v59 = vpop.permute.xlu1 %677 }
 0xdd1   :  { %680 = vst.msk [vmem:[#allocation2 + $0x8] sm:$0x3] %vm238_vm2, %v678_v59  ;;  %6886 = vmatmul.mubr.msk.f32.vlgmr.msra.gmra.mrb[6].mxu0 %vm54_vm0, %v678_v59 }
 0xdd2   :  { %7523 = vmatpush3.bf16.msra.mxu0 %v8338_v8  ;;  %6907 = vmatprep.mubr.msk.f32.mxu0 %vm8274_vm1, %v8275_v13 }
 0xdd3   :  { %7524 = vmatprep.subr.bf16.mxu0 %v8273_v4 }
 0xdd6   :  { %7526 = vmatpush3.bf16.msra.mxu0 %v8356_v14  ;;  %v765_v14 = vrot.slane %v669_v54, 6  ;;  %v6364_v54 = vld [vmem:[%s9476_s4 + $0x1] ss:$0 sm:$0xff] }
 0xdd7   :  { %7535 = vmatprep.subr.bf16.mxu0 %v8273_v4 }
 0xea4   :  { %v749_v60 = vpop.f32.mrb[6].mxu0 }
 0xea5   :  { %v754_v61 = vrot.slane %v749_v60, 6  ;;  %v6887_v62 = vpop.f32.mrb[7].mxu0 }
 0xea7   :  { %v756_v63 = vadd.f32 %v754_v61, %v8385_v19 }
 0xea9   :  { %7905 = vtanh.f32 %v756_v63  ;;  %v6359_v1 = vmul.f32 -1.442695, %v756_v63 }
 0xeab   :  { %7907 = vpow2.f32 %v6359_v1 }
 0xeb3   :  { %v7906_v0 = vpop.eup %7905 }
 0xeb4   :  { %769 = vrot.lane.b32.xlu0 %v7906_v0, %s8276_s22 }
 0xeb5   :  { %v7908_v8 = vpop.eup %7907 }
 0xeb6   :  { %v760_v2 = vadd.f32 1.0, %v7908_v8 }
 0xeb8   :  { %7909 = vrcp.f32 %v760_v2 }
 0xec2   :  { %v7910_v3 = vpop.eup %7909 }
 0xec3   :  { %v767_v7 = vmul.f32 %v7910_v3, %v765_v14 }
 0xf26   :  { %v770_v5 = vpop.permute.xlu0 %769 }
 0xf27   :  { %v772_v6 = vmul.f32 %v7910_v3, %v770_v5 }
 0xf29   :  { %774 = vrot.lane.b32.xlu1 %v772_v6, %s8277_s23 }
 0xf9b   :  { %v775_v9 = vpop.permute.xlu1 %774 }
 0xf9c   :  { %v777_v11 = vadd.f32 %v775_v9, %v767_v7 }
 0xf9e   :  { %7911 = vtanh.f32 %v777_v11 }
 0xfa8   :  { %v7912_v12 = vpop.eup %7911 }
 0xfa9   :  { %780 = vrot.lane.b32.xlu0 %v7912_v12, %s8276_s22 }
0x101b   :  { %v781_v16 = vpop.permute.xlu0 %780 }
0x101c   :  { %v8463_v18 = vmul.f32 %v7910_v3, %v781_v16 }
0x101e   :  { %v789_v20 = vrot.slane %v8463_v18, 2 }
0x1020   :  { %790 = vrot.lane.b32.xlu1 %v789_v20, %s8277_s23 }
0x1092   :  { %v791_v21 = vpop.permute.xlu1 %790 }
0x1093   :  { %6897 = vmatmul.mubr.msk.f32.vlgmr.msra.gmra.mrb[6].mxu1 %vm54_vm0, %v791_v21 }
0x1094   :  { %6918 = vmatprep.mubr.msk.f32.mxu1 %vm54_vm0, %v8343_v10  ;;  %v876_v10 = vrot.slane %v777_v11, 6  ;;  %7530 = vmatpush3.bf16.msra.mxu1 %v7527_v39 }
0x1095   :  { %7532 = vmatprep.subr.bf16.mxu1 %v7531_v43 }
0x1098   :  { %7534 = vmatpush3.bf16.msra.mxu1 %v7531_v43 }
0x1099   :  { %7541 = vmatprep.subr.bf16.mxu1 %v8273_v4 }
0x109b   :  { %6919 = vmatmul.mubr.msk.f32.vlgmr.msra.gmra.mrb[8].mxu1 %vm54_vm0, %v8363_v15 }
0x109c   :  { %7543 = vmatpush3.bf16.msra.mxu1 %v8496_v46  ;;  %6940 = vmatprep.mubr.msk.f32.mxu1 %vm8274_vm1, %v8275_v13 }
0x109d   :  { %7544 = vmatprep.subr.bf16.mxu1 %v8273_v4 }
0x10a0   :  { %7546 = vmatpush3.bf16.msra.mxu1 %v8512_v51 }
0x10a1   :  { %7553 = vmatprep.subr.bf16.mxu1 %v8273_v4 }
0x1166   :  { %v860_v23 = vpop.f32.mrb[6].mxu1 }
0x1167   :  { %v865_v24 = vrot.slane %v860_v23, 4  ;;  %v6898_v25 = vpop.f32.mrb[7].mxu1 }
0x1169   :  { %v867_v26 = vadd.f32 %v865_v24, %v8385_v19 }
0x116b   :  { %7913 = vtanh.f32 %v867_v26  ;;  %v6361_v28 = vmul.f32 -1.442695, %v867_v26 }
0x116d   :  { %7915 = vpow2.f32 %v6361_v28 }
0x116e   :  { %v6920_v53 = vpop.f32.mrb[8].mxu1 }
0x116f   :  { %v1083_v56 = vpop.f32.mrb[9].mxu1  ;;  %v8539_v60 = vadd.f32 %v6920_v53, %v6364_v54 }
0x1170   :  { %v8535_v57 = vadd.f32 %v6364_v54, %v1083_v56 }
0x1175   :  { %v7914_v27 = vpop.eup %7913 }
0x1176   :  { %880 = vrot.lane.b32.xlu0 %v7914_v27, %s8276_s22 }
0x1177   :  { %v7916_v29 = vpop.eup %7915 }
0x1178   :  { %v871_v30 = vadd.f32 1.0, %v7916_v29 }
0x117a   :  { %7917 = vrcp.f32 %v871_v30 }
0x1184   :  { %v7918_v31 = vpop.eup %7917 }
0x1185   :  { %v878_v34 = vmul.f32 %v7918_v31, %v876_v10 }
0x11e8   :  { %v881_v32 = vpop.permute.xlu0 %880 }
0x11e9   :  { %v883_v33 = vmul.f32 %v7918_v31, %v881_v32 }
0x11eb   :  { %885 = vrot.lane.b32.xlu1 %v883_v33, %s8277_s23 }
0x125d   :  { %v886_v35 = vpop.permute.xlu1 %885 }
0x125e   :  { %v8473_v36 = vadd.f32 %v886_v35, %v878_v34 }
0x1260   :  { %7919 = vtanh.f32 %v8473_v36 }
0x126a   :  { %v7920_v40 = vpop.eup %7919 }
0x126b   :  { %891 = vrot.lane.b32.xlu0 %v7920_v40, %s8276_s22 }
0x12dd   :  { %v892_v49 = vpop.permute.xlu0 %891 }
0x12de   :  { %v8509_v50 = vmul.f32 %v7918_v31, %v892_v49 }
0x12e0   :  { %v900_v52 = vrot.slane %v8509_v50, 4 }
0x12e2   :  { %901 = vrot.lane.b32.xlu1 %v900_v52, %s8277_s23 }
0x1354   :  { %v902_v15 = vpop.permute.xlu1 %901 }
0x1355   :  { %6908 = vmatmul.mubr.msk.f32.vlgmr.msra.gmra.mrb[8].mxu0 %vm54_vm0, %v902_v15 }
0x1356   :  { %7537 = vmatpush3.bf16.msra.mxu0 %v8496_v46  ;;  %6929 = vmatprep.mubr.msk.f32.mxu0 %vm8274_vm1, %v8275_v13 }
0x1357   :  { %7538 = vmatprep.subr.bf16.mxu0 %v8273_v4 }
0x135a   :  { %7540 = vmatpush3.bf16.msra.mxu0 %v8512_v51 }
0x135b   :  { %7547 = vmatprep.subr.bf16.mxu0 %v8273_v4 }
0x135d   :  { %6930 = vmatmul.mubr.f32.vlgmr.msra.gmra.mrb[10].mxu0 %v8275_v13 }
0x135e   :  { %7549 = vmatpush3.bf16.msra.mxu0 %v8496_v46  ;;  %6951 = vmatprep.mubr.msk.f32.mxu0 %vm8274_vm1, %v8275_v13 }
0x135f   :  { %7550 = vmatprep.subr.bf16.mxu0 %v8273_v4 }
0x1362   :  { %7552 = vmatpush3.bf16.msra.mxu0 %v8512_v51 }
0x1363   :  { %7559 = vmatprep.subr.bf16.mxu0 %v8273_v4 }
0x1428   :  { %v8537_v58 = vpop.f32.mrb[8].mxu0 }
0x1429   :  { %v6909_v59 = vpop.f32.mrb[9].mxu0 }
0x1430   :  { %v1158_v61 = vpop.f32.mrb[10].mxu0 }
0x1431   :  { %v1163_v62 = vrot.slane %v1158_v61, 2  ;;  %v6931_v63 = vpop.f32.mrb[11].mxu0 }
0x1433   :  { %v1165_v0 = vadd.f32 %v1163_v62, %v8539_v60 }
0x1435   :  { %7921 = vtanh.f32 %v1165_v0  ;;  %v6367_v8 = vmul.f32 -1.442695, %v1165_v0 }
0x1437   :  { %7923 = vpow2.f32 %v6367_v8 }
0x143f   :  { %v7922_v1 = vpop.eup %7921 }
0x1440   :  { %1175 = vrot.lane.b32.xlu0 %v7922_v1, %s8276_s22 }
0x1441   :  { %v7924_v2 = vpop.eup %7923 }
0x1442   :  { %v1169_v3 = vadd.f32 1.0, %v7924_v2 }
0x1444   :  { %7925 = vrcp.f32 %v1169_v3 }
0x144e   :  { %v7926_v5 = vpop.eup %7925 }
0x144f   :  { %v1173_v7 = vmul.f32 0.0, %v7926_v5 }
0x14b2   :  { %v1176_v6 = vpop.permute.xlu0 %1175 }
0x14b3   :  { %v1178_v14 = vmul.f32 %v7926_v5, %v1176_v6 }
0x14b5   :  { %1180 = vrot.lane.b32.xlu1 %v1178_v14, %s8277_s23 }
0x1527   :  { %v1181_v9 = vpop.permute.xlu1 %1180 }
0x1528   :  { %v1183_v11 = vadd.f32 %v1181_v9, %v1173_v7 }
0x152a   :  { %7927 = vtanh.f32 %v1183_v11  ;;  %v1282_v34 = vrot.slane %v1183_v11, 2 }
0x1534   :  { %v7928_v12 = vpop.eup %7927 }
0x1535   :  { %1186 = vrot.lane.b32.xlu0 %v7928_v12, %s8276_s22 }
0x15a7   :  { %v1187_v16 = vpop.permute.xlu0 %1186 }
0x15a8   :  { %v8545_v20 = vmul.f32 %v7926_v5, %v1187_v16 }
0x15aa   :  { %v1195_v21 = vrot.slane %v8545_v20, 6 }
0x15ac   :  { %1196 = vrot.lane.b32.xlu1 %v1195_v21, %s8277_s23 }
0x161e   :  { %v1197_v23 = vpop.permute.xlu1 %1196 }
0x161f   :  { %6941 = vmatmul.mubr.msk.f32.vlgmr.msra.gmra.mrb[10].mxu1 %vm54_vm0, %v1197_v23 }
0x1620   :  { %7555 = vmatpush3.bf16.msra.mxu1 %v8496_v46  ;;  %6962 = vmatprep.mubr.msk.f32.mxu1 %vm8274_vm1, %v8275_v13 }
0x1621   :  { %7556 = vmatprep.subr.bf16.mxu1 %v8273_v4 }
0x1624   :  { %7558 = vmatpush3.bf16.msra.mxu1 %v8512_v51 }
0x1625   :  { %7565 = vmatprep.subr.bf16.mxu1 %v8273_v4 }
0x16f2   :  { %v1266_v24 = vpop.f32.mrb[10].mxu1 }
0x16f3   :  { %v1271_v25 = vrot.slane %v1266_v24, 4  ;;  %v6942_v26 = vpop.f32.mrb[11].mxu1 }
0x16f5   :  { %v1273_v27 = vadd.f32 %v1271_v25, %v8539_v60 }
0x16f7   :  { %7929 = vtanh.f32 %v1273_v27  ;;  %v6369_v29 = vmul.f32 -1.442695, %v1273_v27 }
0x16f9   :  { %7931 = vpow2.f32 %v6369_v29 }
0x1701   :  { %v7930_v28 = vpop.eup %7929 }
0x1702   :  { %1286 = vrot.lane.b32.xlu0 %v7930_v28, %s8276_s22 }
0x1703   :  { %v7932_v30 = vpop.eup %7931 }
0x1704   :  { %v1277_v31 = vadd.f32 1.0, %v7932_v30 }
0x1706   :  { %7933 = vrcp.f32 %v1277_v31 }
0x1710   :  { %v7934_v32 = vpop.eup %7933 }
0x1711   :  { %v1284_v35 = vmul.f32 %v7934_v32, %v1282_v34 }
0x1774   :  { %v1287_v33 = vpop.permute.xlu0 %1286 }
0x1775   :  { %v1289_v10 = vmul.f32 %v7934_v32, %v1287_v33 }
0x1777   :  { %1291 = vrot.lane.b32.xlu1 %v1289_v10, %s8277_s23 }
0x17e9   :  { %v1292_v22 = vpop.permute.xlu1 %1291 }
0x17ea   :  { %v1294_v37 = vadd.f32 %v1292_v22, %v1284_v35 }
0x17ec   :  { %7935 = vtanh.f32 %v1294_v37  ;;  %v1393_v61 = vrot.slane %v1294_v37, 2 }
0x17f6   :  { %v7936_v39 = vpop.eup %7935 }
0x17f7   :  { %1297 = vrot.lane.b32.xlu0 %v7936_v39, %s8276_s22 }
0x1869   :  { %v1298_v40 = vpop.permute.xlu0 %1297 }
0x186a   :  { %v8560_v41 = vmul.f32 %v7934_v32, %v1298_v40 }
0x186c   :  { %v1306_v42 = vrot.slane %v8560_v41, 4 }
0x186e   :  { %1307 = vrot.lane.b32.xlu1 %v1306_v42, %s8277_s23 }
0x18e0   :  { %v1308_v43 = vpop.permute.xlu1 %1307 }
0x18e1   :  { %6952 = vmatmul.mubr.msk.f32.vlgmr.msra.gmra.mrb[12].mxu0 %vm54_vm0, %v1308_v43 }
0x18e2   :  { %7561 = vmatpush3.bf16.msra.mxu0 %v8496_v46  ;;  %6973 = vmatprep.mubr.msk.f32.mxu0 %vm8274_vm1, %v8275_v13 }
0x18e3   :  { %7562 = vmatprep.subr.bf16.mxu0 %v8273_v4 }
0x18e6   :  { %7564 = vmatpush3.bf16.msra.mxu0 %v8512_v51 }
0x18e7   :  { %7571 = vmatprep.subr.bf16.mxu0 %v8273_v4 }
0x19b4   :  { %v1377_v44 = vpop.f32.mrb[12].mxu0 }
0x19b5   :  { %v1382_v45 = vrot.slane %v1377_v44, 6  ;;  %v6953_v47 = vpop.f32.mrb[13].mxu0 }
0x19b7   :  { %v1384_v48 = vadd.f32 %v1382_v45, %v8539_v60 }
0x19b9   :  { %7937 = vtanh.f32 %v1384_v48  ;;  %v6371_v52 = vmul.f32 -1.442695, %v1384_v48 }
0x19bb   :  { %7939 = vpow2.f32 %v6371_v52 }
0x19c3   :  { %v7938_v49 = vpop.eup %7937 }
0x19c4   :  { %1397 = vrot.lane.b32.xlu0 %v7938_v49, %s8276_s22 }
0x19c5   :  { %v7940_v15 = vpop.eup %7939 }
0x19c6   :  { %v1388_v53 = vadd.f32 1.0, %v7940_v15 }
0x19c8   :  { %7941 = vrcp.f32 %v1388_v53 }
0x19d2   :  { %v7942_v54 = vpop.eup %7941 }
0x19d3   :  { %v1395_v62 = vmul.f32 %v7942_v54, %v1393_v61 }
0x1a36   :  { %v1398_v56 = vpop.permute.xlu0 %1397 }
0x1a37   :  { %v1400_v59 = vmul.f32 %v7942_v54, %v1398_v56 }
0x1a39   :  { %1402 = vrot.lane.b32.xlu1 %v1400_v59, %s8277_s23 }
0x1aab   :  { %v1403_v63 = vpop.permute.xlu1 %1402 }
0x1aac   :  { %v1405_v0 = vadd.f32 %v1403_v63, %v1395_v62 }
0x1aae   :  { %7943 = vtanh.f32 %v1405_v0  ;;  %v1501_v25 = vrot.slane %v1405_v0, 2 }
0x1ab8   :  { %v7944_v1 = vpop.eup %7943 }
0x1ab9   :  { %1408 = vrot.lane.b32.xlu0 %v7944_v1, %s8276_s22 }
0x1b2b   :  { %v1409_v8 = vpop.permute.xlu0 %1408 }
0x1b2c   :  { %v8575_v2 = vmul.f32 %v7942_v54, %v1409_v8 }
0x1b2e   :  { %v1417_v3 = vrot.slane %v8575_v2, 2 }
0x1b30   :  { %1418 = vrot.lane.b32.xlu1 %v1417_v3, %s8277_s23 }
0x1ba2   :  { %v1419_v5 = vpop.permute.xlu1 %1418 }
0x1ba3   :  { %6963 = vmatmul.mubr.msk.f32.vlgmr.msra.gmra.mrb[12].mxu1 %vm54_vm0, %v1419_v5 }
0x1ba4   :  { %7567 = vmatpush3.bf16.msra.mxu1 %v8496_v46  ;;  %6984 = vmatprep.mubr.msk.f32.mxu1 %vm8274_vm1, %v8275_v13 }
0x1ba5   :  { %7568 = vmatprep.subr.bf16.mxu1 %v8273_v4 }
0x1ba8   :  { %7570 = vmatpush3.bf16.msra.mxu1 %v8512_v51 }
0x1ba9   :  { %7577 = vmatprep.subr.bf16.mxu1 %v8273_v4 }
0x1c76   :  { %v1488_v6 = vpop.f32.mrb[12].mxu1 }
0x1c77   :  { %v1492_v14 = vadd.f32 %v1488_v6, %v8539_v60  ;;  %v6964_v7 = vpop.f32.mrb[13].mxu1 }
0x1c79   :  { %7945 = vtanh.f32 %v1492_v14  ;;  %v6373_v11 = vmul.f32 -1.442695, %v1492_v14 }
0x1c7b   :  { %7947 = vpow2.f32 %v6373_v11 }
0x1c83   :  { %v7946_v9 = vpop.eup %7945 }
0x1c84   :  { %1505 = vrot.lane.b32.xlu0 %v7946_v9, %s8276_s22 }
0x1c85   :  { %v7948_v12 = vpop.eup %7947 }
0x1c86   :  { %v1496_v16 = vadd.f32 1.0, %v7948_v12 }
0x1c88   :  { %7949 = vrcp.f32 %v1496_v16 }
0x1c92   :  { %v7950_v21 = vpop.eup %7949 }
0x1c93   :  { %v1503_v26 = vmul.f32 %v7950_v21, %v1501_v25 }
0x1cf6   :  { %v1506_v23 = vpop.permute.xlu0 %1505 }
0x1cf7   :  { %v1508_v24 = vmul.f32 %v7950_v21, %v1506_v23 }
0x1cf9   :  { %1510 = vrot.lane.b32.xlu1 %v1508_v24, %s8277_s23 }
0x1d6b   :  { %v1511_v27 = vpop.permute.xlu1 %1510 }
0x1d6c   :  { %v1513_v28 = vadd.f32 %v1511_v27, %v1503_v26 }
0x1d6e   :  { %7951 = vtanh.f32 %v1513_v28  ;;  %v1609_v44 = vrot.slane %v1513_v28, 2 }
0x1d78   :  { %v7952_v60 = vpop.eup %7951 }
0x1d79   :  { %1516 = vrot.lane.b32.xlu0 %v7952_v60, %s8276_s22 }
0x1deb   :  { %v1517_v29 = vpop.permute.xlu0 %1516 }
0x1dec   :  { %v1519_v30 = vmul.f32 %v7950_v21, %v1517_v29 }
0x1dee   :  { %1521 = vrot.lane.b32.xlu1 %v1519_v30, %s8277_s23 }
0x1e60   :  { %v1522_v31 = vpop.permute.xlu1 %1521 }
0x1e61   :  { %1524 = vst.msk [vmem:[#allocation3 + $0x8] sm:$0x3] %vm238_vm2, %v1522_v31  ;;  %6974 = vmatmul.mubr.msk.f32.vlgmr.msra.gmra.mrb[14].mxu0 %vm54_vm0, %v1522_v31 }
0x1e62   :  { %7573 = vmatpush3.bf16.msra.mxu0 %v8496_v46  ;;  %6995 = vmatprep.mubr.msk.f32.mxu0 %vm8274_vm1, %v8275_v13 }
0x1e63   :  { %7574 = vmatprep.subr.bf16.mxu0 %v8273_v4 }
0x1e66   :  { %7576 = vmatpush3.bf16.msra.mxu0 %v8512_v51 }
0x1f34   :  { %v1593_v32 = vpop.f32.mrb[14].mxu0 }
0x1f35   :  { %v1598_v33 = vrot.slane %v1593_v32, 2  ;;  %v6975_v10 = vpop.f32.mrb[15].mxu0 }
0x1f37   :  { %v1600_v34 = vadd.f32 %v1598_v33, %v8535_v57 }
0x1f39   :  { %7953 = vtanh.f32 %v1600_v34  ;;  %v6375_v22 = vmul.f32 -1.442695, %v1600_v34 }
0x1f3b   :  { %7955 = vpow2.f32 %v6375_v22 }
0x1f43   :  { %v7954_v35 = vpop.eup %7953 }
0x1f44   :  { %1613 = vrot.lane.b32.xlu0 %v7954_v35, %s8276_s22 }
0x1f45   :  { %v7956_v37 = vpop.eup %7955 }
0x1f46   :  { %v1604_v39 = vadd.f32 1.0, %v7956_v37  ;;  %v976_v37 = vrot.slane %v8537_v58, 2 }
0x1f48   :  { %7957 = vrcp.f32 %v1604_v39  ;;  %v978_v39 = vadd.f32 %v976_v37, %v8385_v19 }
0x1f52   :  { %v7958_v40 = vpop.eup %7957 }
0x1f53   :  { %v1611_v45 = vmul.f32 %v7958_v40, %v1609_v44 }
0x1fb6   :  { %v1614_v42 = vpop.permute.xlu0 %1613 }
0x1fb7   :  { %v1616_v43 = vmul.f32 %v7958_v40, %v1614_v42 }
0x1fb9   :  { %1618 = vrot.lane.b32.xlu1 %v1616_v43, %s8277_s23 }
0x202b   :  { %v1619_v47 = vpop.permute.xlu1 %1618 }
0x202c   :  { %v1621_v48 = vadd.f32 %v1619_v47, %v1611_v45  ;;  %v6363_v45 = vmul.f32 -1.442695, %v978_v39 }
0x202e   :  { %7959 = vtanh.f32 %v1621_v48 }
0x2038   :  { %v7960_v49 = vpop.eup %7959 }
0x2039   :  { %1624 = vrot.lane.b32.xlu0 %v7960_v49, %s8276_s22 }
0x20ab   :  { %v1625_v52 = vpop.permute.xlu0 %1624 }
0x20ac   :  { %v8602_v15 = vmul.f32 %v7958_v40, %v1625_v52 }
0x20ae   :  { %v1633_v53 = vrot.slane %v8602_v15, 6 }
0x20b0   :  { %1634 = vrot.lane.b32.xlu1 %v1633_v53, %s8277_s23  ;;  %v987_v53 = vrot.slane %v8473_v36, 6 }
0x2122   :  { %v1635_v54 = vpop.permute.xlu1 %1634 }
0x2123   :  { %6985 = vmatmul.mubr.msk.f32.vlgmr.msra.gmra.mrb[14].mxu1 %vm54_vm0, %v1635_v54 }
0x2124   :  { %7579 = vmatpush3.bf16.msra.mxu1 %v8496_v46  ;;  %7006 = vmatprep.mubr.msk.f32.mxu1 %vm8274_vm1, %v8275_v13 }
0x2125   :  { %7580 = vmatprep.subr.bf16.mxu1 %v8273_v4 }
0x2128   :  { %7582 = vmatpush3.bf16.msra.mxu1 %v8512_v51  ;;  %v1720_v51 = vrot.slane %v1621_v48, 2 }
0x21f6   :  { %v1704_v56 = vpop.f32.mrb[14].mxu1 }
0x21f7   :  { %v1709_v59 = vrot.slane %v1704_v56, 4  ;;  %v6986_v61 = vpop.f32.mrb[15].mxu1 }
0x21f9   :  { %v1711_v62 = vadd.f32 %v1709_v59, %v8535_v57 }
0x21fb   :  { %7961 = vtanh.f32 %v1711_v62  ;;  %v6377_v0 = vmul.f32 -1.442695, %v1711_v62 }
0x21fd   :  { %7963 = vpow2.f32 %v6377_v0 }
0x2205   :  { %v7962_v63 = vpop.eup %7961 }
0x2206   :  { %1724 = vrot.lane.b32.xlu0 %v7962_v63, %s8276_s22 }
0x2207   :  { %v7964_v1 = vpop.eup %7963 }
0x2208   :  { %v1715_v46 = vadd.f32 1.0, %v7964_v1 }
0x220a   :  { %7965 = vrcp.f32 %v1715_v46 }
0x2214   :  { %v7966_v8 = vpop.eup %7965 }
0x2215   :  { %v1722_v6 = vmul.f32 %v7966_v8, %v1720_v51 }
0x2278   :  { %v1725_v3 = vpop.permute.xlu0 %1724 }
0x2279   :  { %v1727_v5 = vmul.f32 %v7966_v8, %v1725_v3 }
0x227b   :  { %1729 = vrot.lane.b32.xlu1 %v1727_v5, %s8277_s23 }
0x22ed   :  { %v1730_v14 = vpop.permute.xlu1 %1729 }
0x22ee   :  { %v1732_v7 = vadd.f32 %v1730_v14, %v1722_v6 }
0x22f0   :  { %7967 = vtanh.f32 %v1732_v7  ;;  %v1831_v33 = vrot.slane %v1732_v7, 2 }
0x22fa   :  { %v7968_v9 = vpop.eup %7967 }
0x22fb   :  { %1735 = vrot.lane.b32.xlu0 %v7968_v9, %s8276_s22 }
0x236d   :  { %v1736_v11 = vpop.permute.xlu0 %1735 }
0x236e   :  { %v1738_v12 = vmul.f32 %v7966_v8, %v1736_v11 }
0x2370   :  { %v1744_v16 = vrot.slane %v1738_v12, 4 }
0x2372   :  { %1745 = vrot.lane.b32.xlu1 %v1744_v16, %s8277_s23 }
0x23e4   :  { %v1746_v21 = vpop.permute.xlu1 %1745 }
0x23e5   :  { %6996 = vmatmul.mubr.msk.f32.vlgmr.msra.gmra.mrb[16].mxu0 %vm54_vm0, %v1746_v21 }
0x24b8   :  { %v1815_v23 = vpop.f32.mrb[16].mxu0 }
0x24b9   :  { %v1820_v24 = vrot.slane %v1815_v23, 6  ;;  %v6997_v25 = vpop.f32.mrb[17].mxu0  ;;  %v1973_v23 = vld [vmem:[%s9474_s2 + $0x30] sm:$0xff] }
0x24ba   :  { %v1981_v25 = vld [vmem:[%s9474_s2 + $0x70] sm:$0xff] }
0x24bb   :  { %v1822_v26 = vadd.f32 %v1820_v24, %v8535_v57  ;;  %v1974_v24 = vld [vmem:[%s9474_s2 + $0x38] sm:$0xff] }
0x24bd   :  { %7969 = vtanh.f32 %v1822_v26  ;;  %v6379_v28 = vmul.f32 -1.442695, %v1822_v26  ;;  %v7587_v26 = vpack.c.bf16 %v1974_v24, %v1973_v23 }
0x24bf   :  { %7971 = vpow2.f32 %v6379_v28 }
0x24c7   :  { %v7970_v27 = vpop.eup %7969 }
0x24c8   :  { %1835 = vrot.lane.b32.xlu0 %v7970_v27, %s8276_s22  ;;  %v1982_v27 = vld [vmem:[%s9474_s2 + $0x78] sm:$0xff] }
0x24c9   :  { %v7972_v60 = vpop.eup %7971  ;;  %v7603_v28 = vpack.c.bf16 %v1982_v27, %v1981_v25 }
0x24ca   :  { %v1826_v29 = vadd.f32 1.0, %v7972_v60  ;;  %v1967_v60 = vld [vmem:[%s9474_s2] sm:$0xff] }
0x24cc   :  { %7973 = vrcp.f32 %v1826_v29  ;;  %v1968_v29 = vld [vmem:[%s9474_s2 + $0x8] sm:$0xff] }
0x24d6   :  { %v7974_v30 = vpop.eup %7973 }
0x24d7   :  { %v1833_v10 = vmul.f32 %v7974_v30, %v1831_v33 }
0x253a   :  { %v1836_v31 = vpop.permute.xlu0 %1835 }
0x253b   :  { %v1838_v32 = vmul.f32 %v7974_v30, %v1836_v31  ;;  %v1975_v31 = vld [vmem:[%s9474_s2 + $0x40] sm:$0xff] }
0x253d   :  { %1840 = vrot.lane.b32.xlu1 %v1838_v32, %s8277_s23  ;;  %v1976_v32 = vld [vmem:[%s9474_s2 + $0x48] sm:$0xff] }
0x25af   :  { %v1841_v34 = vpop.permute.xlu1 %1840 }
0x25b0   :  { %v1843_v35 = vadd.f32 %v1841_v34, %v1833_v10  ;;  %v7607_v10 = vpack.c.bf16 %v1976_v32, %v1975_v31 }
0x25b2   :  { %7975 = vtanh.f32 %v1843_v35  ;;  %v1939_v14 = vrot.slane %v1843_v35, 2 }
0x25b3   :  { %7977 = vtanh.f32 %v978_v39 }
0x25b4   :  { %7979 = vpow2.f32 %v6363_v45  ;;  %v1977_v45 = vld [vmem:[%s9474_s2 + $0x50] sm:$0xff] }
0x25bc   :  { %v7976_v22 = vpop.eup %7975 }
0x25bd   :  { %1846 = vrot.lane.b32.xlu0 %v7976_v22, %s8276_s22  ;;  %v7978_v44 = vpop.eup %7977 }
0x25be   :  { %v7980_v47 = vpop.eup %7979 }
0x25bf   :  { %v982_v48 = vadd.f32 1.0, %v7980_v47  ;;  %v1978_v47 = vld [vmem:[%s9474_s2 + $0x58] sm:$0xff] }
0x25c1   :  { %7981 = vrcp.f32 %v982_v48 }
0x25cb   :  { %v7982_v58 = vpop.eup %7981 }
0x25cc   :  { %v989_v54 = vmul.f32 %v7982_v58, %v987_v53 }
0x262f   :  { %v1847_v40 = vpop.permute.xlu0 %1846 }
0x2630   :  { %v1849_v42 = vmul.f32 %v7974_v30, %v1847_v40  ;;  %v7591_v30 = vpack.c.bf16 %v1968_v29, %v1967_v60 }
0x2632   :  { %v1855_v43 = vrot.slane %v1849_v42, 2 }
0x2634   :  { %1856 = vrot.lane.b32.xlu1 %v1855_v43, %s8277_s23 }
0x2638   :  { %991 = vrot.lane.b32.xlu1 %v7978_v44, %s8276_s22  ;;  %v1970_v44 = vld [vmem:[%s9474_s2 + $0x18] sm:$0xff] }
0x26a6   :  { %v1857_v49 = vpop.permute.xlu1 %1856 }
0x26a7   :  { %7007 = vmatmul.mubr.msk.f32.vlgmr.msra.gmra.mrb[16].mxu1 %vm54_vm0, %v1857_v49 }
0x26aa   :  { %v992_v52 = vpop.permute.xlu1 %991 }
0x26ab   :  { %v994_v19 = vmul.f32 %v7982_v58, %v992_v52  ;;  %v7611_v52 = vpack.c.bf16 %v1978_v47, %v1977_v45 }
0x26ad   :  { %996 = vrot.lane.b32.xlu1 %v994_v19, %s8277_s23 }
0x271f   :  { %v997_v56 = vpop.permute.xlu1 %996 }
0x2720   :  { %v999_v59 = vadd.f32 %v997_v56, %v989_v54  ;;  %v6392_v54 = vld [vmem:[%s9475_s3 + $0x40] sm:$0xff]  ;;  %v6393_v56 = vld [vmem:[%s9475_s3 + $0x48] sm:$0xff] }
0x2722   :  { %7983 = vtanh.f32 %v999_v59 }
0x272c   :  { %v7984_v61 = vpop.eup %7983 }
0x272d   :  { %1002 = vrot.lane.b32.xlu1 %v7984_v61, %s8276_s22  ;;  %v8731_v61 = vpack.c.bf16 %v6393_v56, %v6392_v54 }
0x2731   :  { %1740 = vrot.lane.b32.xlu1 %v1738_v12, %s8277_s23 }
0x2735   :  { %1302 = vrot.lane.b32.xlu1 %v8560_v41, %s8277_s23 }
0x277a   :  { %v1926_v62 = vpop.f32.mrb[16].mxu1 }
0x277b   :  { %v1930_v63 = vadd.f32 %v1926_v62, %v8535_v57  ;;  %v7008_v0 = vpop.f32.mrb[17].mxu1  ;;  %v6394_v62 = vld [vmem:[%s9475_s3 + $0x50] sm:$0xff] }
0x277d   :  { %7985 = vtanh.f32 %v1930_v63  ;;  %v6381_v3 = vmul.f32 -1.442695, %v1930_v63  ;;  %v6395_v63 = vld [vmem:[%s9475_s3 + $0x58] sm:$0xff] }
0x277f   :  { %7987 = vpow2.f32 %v6381_v3 }
0x2787   :  { %v7986_v1 = vpop.eup %7985 }
0x2788   :  { %1943 = vrot.lane.b32.xlu0 %v7986_v1, %s8276_s22  ;;  %v8742_v1 = vpack.c.bf16 %v6395_v63, %v6394_v62 }
0x2789   :  { %v7988_v5 = vpop.eup %7987 }
0x278a   :  { %v1934_v41 = vadd.f32 1.0, %v7988_v5 }
0x278c   :  { %7989 = vrcp.f32 %v1934_v41 }
0x2796   :  { %v7990_v51 = vpop.eup %7989 }
0x2797   :  { %v1941_v7 = vmul.f32 %v7990_v51, %v1939_v14 }
0x279f   :  { %v1003_v36 = vpop.permute.xlu1 %1002 }
0x27a0   :  { %v1005_v16 = vmul.f32 %v7982_v58, %v1003_v36  ;;  %v6400_v36 = vld [vmem:[%s9476_s4 + $0x2] ss:$0 sm:$0xff] }
0x27a3   :  { %v1741_v46 = vpop.permute.xlu1 %1740 }
0x27a4   :  { %1743 = vst.msk [vmem:[#allocation3] sm:$0x30] %vm459_vm3, %v1741_v46  ;;  %v8768_v46 = vld [vmem:[%s9476_s4 + $0x3] ss:$0 sm:$0xff] }
0x27a7   :  { %v1303_v8 = vpop.permute.xlu1 %1302 }
0x27a8   :  { %1305 = vst.msk [vmem:[#allocation3 + $0x8] sm:$0x30] %vm459_vm3, %v1303_v8 }
0x27fa   :  { %v1944_v57 = vpop.permute.xlu0 %1943 }
0x27fb   :  { %v1946_v6 = vmul.f32 %v7990_v51, %v1944_v57 }
0x27fd   :  { %1948 = vrot.lane.b32.xlu0 %v1946_v6, %s8277_s23 }
0x286f   :  { %v1949_v9 = vpop.permute.xlu0 %1948 }
0x2870   :  { %v1951_v11 = vadd.f32 %v1949_v9, %v1941_v7 }
0x2872   :  { %7991 = vtanh.f32 %v1951_v11 }
0x287c   :  { %v7992_v12 = vpop.eup %7991 }
0x287d   :  { %1954 = vrot.lane.b32.xlu0 %v7992_v12, %s8276_s22 }
0x2881   :  { %1629 = vrot.lane.b32.xlu0 %v8602_v15, %s8277_s23  ;;  %v1971_v15 = vld [vmem:[%s9474_s2 + $0x20] sm:$0xff] }
0x2885   :  { %1851 = vrot.lane.b32.xlu0 %v1849_v42, %s8277_s23 }
0x2889   :  { %1191 = vrot.lane.b32.xlu0 %v8545_v20, %s8277_s23  ;;  %v1972_v20 = vld [vmem:[%s9474_s2 + $0x28] sm:$0xff] }
0x288a   :  { %v7583_v21 = vpack.c.bf16 %v1972_v20, %v1971_v15 }
0x288c   :  { %7584 = vmatprep.subr.bf16.mxu0 %v7583_v21 }
0x288d   :  { %1413 = vrot.lane.b32.xlu0 %v8575_v2, %s8277_s23  ;;  %v1979_v2 = vld [vmem:[%s9474_s2 + $0x60] sm:$0xff]  ;;  %7586 = vmatpush3.bf16.msra.mxu0 %v7583_v21 }
0x288e   :  { %7588 = vmatprep.subr.bf16.mxu0 %v7587_v26 }
0x2891   :  { %456 = vrot.lane.b32.xlu0 %v8421_v17, %s8277_s23  ;;  %v1980_v17 = vld [vmem:[%s9474_s2 + $0x68] sm:$0xff]  ;;  %7590 = vmatpush3.bf16.msra.mxu0 %v7587_v26 }
0x2892   :  { %7592 = vmatprep.subr.bf16.mxu0 %v7591_v30 }
0x2895   :  { %785 = vrot.lane.b32.xlu0 %v8463_v18, %s8277_s23  ;;  %v7599_v18 = vpack.c.bf16 %v1980_v17, %v1979_v2 }
0x2897   :  { %7600 = vmatprep.subr.bf16.mxu1 %v7599_v18 }
0x2898   :  { %7602 = vmatpush3.bf16.msra.mxu1 %v7599_v18 }
0x2899   :  { %1007 = vrot.lane.b32.xlu0 %v1005_v16, %s8277_s23  ;;  %7604 = vmatprep.subr.bf16.mxu1 %v7603_v28 }
0x289c   :  { %7606 = vmatpush3.bf16.msra.mxu1 %v7603_v28 }
0x289d   :  { %7608 = vmatprep.subr.bf16.mxu1 %v7607_v10 }
0x28ef   :  { %v1955_v33 = vpop.permute.xlu0 %1954 }
0x28f0   :  { %v1957_v34 = vmul.f32 %v7990_v51, %v1955_v33 }
0x28f2   :  { %1959 = vrot.lane.b32.xlu1 %v1957_v34, %s8277_s23 }
0x28f3   :  { %v1630_v35 = vpop.permute.xlu0 %1629 }
0x28f4   :  { %1632 = vst.msk [vmem:[#allocation3] sm:$0xc0] %vm571_vm4, %v1630_v35 }
0x28f6   :  { %344 = vrot.lane.b32.xlu1 %v8406_v55, %s8277_s23 }
0x28f7   :  { %v1852_v22 = vpop.permute.xlu0 %1851 }
0x28f8   :  { %1854 = vst.msk [vmem:[#allocation3] sm:$0xc] %vm347_vm5, %v1852_v22 }
0x28fa   :  { %568 = vrot.lane.b32.xlu1 %v8436_v38, %s8277_s23 }
0x28fb   :  { %v1192_v37 = vpop.permute.xlu0 %1191 }
0x28fc   :  { %1194 = vst.msk [vmem:[#allocation3 + $0x8] sm:$0xc0] %vm571_vm4, %v1192_v37 }
0x28fe   :  { %896 = vrot.lane.b32.xlu1 %v8509_v50, %s8277_s23  ;;  %v1969_v50 = vld [vmem:[%s9474_s2 + $0x10] sm:$0xff] }
0x28ff   :  { %v1414_v39 = vpop.permute.xlu0 %1413  ;;  %v7595_v58 = vpack.c.bf16 %v1970_v44, %v1969_v50 }
0x2900   :  { %1416 = vst.msk [vmem:[#allocation3 + $0x8] sm:$0xc] %vm347_vm5, %v1414_v39 }
0x2903   :  { %v457_v40 = vpop.permute.xlu0 %456 }
0x2904   :  { %460 = vst.msk [vmem:[#allocation2] sm:$0x30] %vm459_vm3, %v457_v40 }
0x2907   :  { %v786_v42 = vpop.permute.xlu0 %785  ;;  %v1966_v19 = vld [vmem:[#allocation3 + $0x8] sm:$0xff] }
0x2908   :  { %788 = vst.msk [vmem:[#allocation2 + $0x8] sm:$0xc] %vm347_vm5, %v786_v42 }
0x290b   :  { %v1008_v55 = vpop.permute.xlu0 %1007 }
0x290c   :  { %1010 = vst.msk [vmem:[#allocation2 + $0x8] sm:$0xc0] %vm571_vm4, %v1008_v55 }
0x2964   :  { %v1960_v43 = vpop.permute.xlu1 %1959 }
0x2965   :  { %1962 = vst.msk [vmem:[#allocation3] sm:$0x3] %vm238_vm2, %v1960_v43 }
0x2968   :  { %v345_v38 = vpop.permute.xlu1 %344 }
0x2969   :  { %348 = vst.msk [vmem:[#allocation2] sm:$0xc] %vm347_vm5, %v345_v38 }
0x296c   :  { %v569_v48 = vpop.permute.xlu1 %568  ;;  %v1965_v49 = vld [vmem:[#allocation3] sm:$0xff] }
0x296d   :  { %572 = vst.msk [vmem:[#allocation2] sm:$0xc0] %vm571_vm4, %v569_v48  ;;  %7017 = vmatprep.mubr.msk.f32.mxu0 %vm54_vm0, %v1965_v49  ;;  %7039 = vmatprep.mubr.msk.f32.mxu1 %vm54_vm0, %v1965_v49 }
0x296e   :  { %7018 = vmatmul.mubr.msk.f32.vlgmr.msra.gmra.mrb[18].mxu0 %vm54_vm0, %v1966_v19  ;;  %7040 = vmatmul.mubr.msk.f32.vlgmr.msra.gmra.mrb[18].mxu1 %vm54_vm0, %v1966_v19 }
0x296f   :  { %7594 = vmatpush3.bf16.msra.mxu0 %v7591_v30  ;;  %7610 = vmatpush3.bf16.msra.mxu1 %v7607_v10 }
0x2970   :  { %v897_v53 = vpop.permute.xlu1 %896  ;;  %7596 = vmatprep.subr.bf16.mxu0 %v7595_v58  ;;  %7612 = vmatprep.subr.bf16.mxu1 %v7611_v52 }
0x2971   :  { %899 = vst.msk [vmem:[#allocation2 + $0x8] sm:$0x30] %vm459_vm3, %v897_v53 }
0x2973   :  { %7598 = vmatpush3.bf16.msra.mxu0 %v7595_v58  ;;  %7614 = vmatpush3.bf16.msra.mxu1 %v7611_v52 }
0x2974   :  { %v1963_v59 = vld [vmem:[#allocation2] sm:$0xff]  ;;  %7615 = vmatprep.subr.bf16.mxu0 %v8273_v4  ;;  %7621 = vmatprep.subr.bf16.mxu1 %v8273_v4 }
0x2975   :  { %7028 = vmatprep.mubr.msk.f32.mxu0 %vm54_vm0, %v1963_v59  ;;  %7050 = vmatprep.mubr.msk.f32.mxu1 %vm54_vm0, %v1963_v59 }
0x2978   :  { %v1964_v0 = vld [vmem:[#allocation2 + $0x8] sm:$0xff] }
0x2979   :  { %7029 = vmatmul.mubr.msk.f32.vlgmr.msra.gmra.mrb[18].mxu0 %vm54_vm0, %v1964_v0  ;;  %7051 = vmatmul.mubr.msk.f32.vlgmr.msra.gmra.mrb[18].mxu1 %vm54_vm0, %v1964_v0 }
0x297a   :  { %7617 = vmatpush3.bf16.msra.mxu0 %v8731_v61  ;;  %7061 = vmatprep.mubr.msk.f32.mxu0 %vm8274_vm1, %v8275_v13 }
0x297b   :  { %7618 = vmatprep.subr.bf16.mxu0 %v8273_v4  ;;  %7623 = vmatpush3.bf16.msra.mxu1 %v8731_v61 }
0x297c   :  { %7624 = vmatprep.subr.bf16.mxu1 %v8273_v4  ;;  %7072 = vmatprep.mubr.msk.f32.mxu1 %vm8274_vm1, %v8275_v13 }
0x297e   :  { %7620 = vmatpush3.bf16.msra.mxu0 %v8742_v1 }
0x297f   :  { %7626 = vmatpush3.bf16.msra.mxu1 %v8742_v1  ;;  %7627 = vmatprep.subr.bf16.mxu0 %v8273_v4 }
0x2980   :  { %7633 = vmatprep.subr.bf16.mxu1 %v8273_v4 }
0x2981   :  { %7062 = vmatmul.mubr.f32.vlgmr.msra.gmra.mrb[20].mxu0 %v8275_v13 }
0x2982   :  { %7629 = vmatpush3.bf16.msra.mxu0 %v8731_v61  ;;  %7083 = vmatprep.mubr.msk.f32.mxu0 %vm8274_vm1, %v8275_v13 }
0x2983   :  { %7630 = vmatprep.subr.bf16.mxu0 %v8273_v4 }
0x2986   :  { %7632 = vmatpush3.bf16.msra.mxu0 %v8742_v1 }
0x2987   :  { %7639 = vmatprep.subr.bf16.mxu0 %v8273_v4 }
0x2a4c   :  { %v7030_v8 = vpop.f32.mrb[18].mxu0  ;;  %v8770_v3 = vpop.f32.mrb[18].mxu1 }
0x2a4d   :  { %v8772_v5 = vadd.f32 %v7030_v8, %v6400_v36  ;;  %v2136_v41 = vpop.f32.mrb[19].mxu0  ;;  %v2286_v51 = vpop.f32.mrb[19].mxu1 }
0x2a4e   :  { %v8775_v57 = vadd.f32 %v8768_v46, %v2286_v51  ;;  %v8777_v6 = vadd.f32 %v6400_v36, %v2136_v41 }
0x2a54   :  { %v2381_v14 = vpop.f32.mrb[20].mxu0 }
0x2a55   :  { %v2385_v7 = vadd.f32 %v2381_v14, %v8777_v6  ;;  %v7063_v9 = vpop.f32.mrb[21].mxu0 }
0x2a57   :  { %7993 = vtanh.f32 %v2385_v7  ;;  %v6401_v12 = vmul.f32 -1.442695, %v2385_v7 }
0x2a59   :  { %7995 = vpow2.f32 %v6401_v12 }
0x2a61   :  { %v7994_v11 = vpop.eup %7993 }
0x2a62   :  { %2395 = vrot.lane.b32.xlu1 %v7994_v11, %s8276_s22 }
0x2a63   :  { %v7996_v16 = vpop.eup %7995 }
0x2a64   :  { %v2389_v15 = vadd.f32 1.0, %v7996_v16 }
0x2a66   :  { %7997 = vrcp.f32 %v2389_v15 }
0x2a70   :  { %v7998_v20 = vpop.eup %7997 }
0x2a71   :  { %v2393_v17 = vmul.f32 0.0, %v7998_v20 }
0x2ad4   :  { %v2396_v2 = vpop.permute.xlu1 %2395 }
0x2ad5   :  { %v2398_v21 = vmul.f32 %v7998_v20, %v2396_v2 }
0x2ad7   :  { %2400 = vrot.lane.b32.xlu0 %v2398_v21, %s8277_s23 }
0x2b49   :  { %v2401_v18 = vpop.permute.xlu0 %2400 }
0x2b4a   :  { %v2403_v23 = vadd.f32 %v2401_v18, %v2393_v17 }
0x2b4c   :  { %7999 = vtanh.f32 %v2403_v23  ;;  %v2499_v37 = vrot.slane %v2403_v23, 6 }
0x2b56   :  { %v8000_v24 = vpop.eup %7999 }
0x2b57   :  { %2406 = vrot.lane.b32.xlu1 %v8000_v24, %s8276_s22 }
0x2bc9   :  { %v2407_v25 = vpop.permute.xlu1 %2406 }
0x2bca   :  { %v2409_v26 = vmul.f32 %v7998_v20, %v2407_v25 }
0x2bcc   :  { %2411 = vrot.lane.b32.xlu0 %v2409_v26, %s8277_s23 }
0x2c3e   :  { %v2412_v27 = vpop.permute.xlu0 %2411 }
0x2c3f   :  { %2414 = vst.msk [vmem:[#allocation2] sm:$0x3] %vm238_vm2, %v2412_v27  ;;  %7073 = vmatmul.mubr.msk.f32.vlgmr.msra.gmra.mrb[20].mxu1 %vm54_vm0, %v2412_v27 }
0x2c40   :  { %7635 = vmatpush3.bf16.msra.mxu1 %v8731_v61  ;;  %7094 = vmatprep.mubr.msk.f32.mxu1 %vm8274_vm1, %v8275_v13 }
0x2c41   :  { %7636 = vmatprep.subr.bf16.mxu1 %v8273_v4 }
0x2c44   :  { %7638 = vmatpush3.bf16.msra.mxu1 %v8742_v1 }
0x2c45   :  { %7645 = vmatprep.subr.bf16.mxu1 %v8273_v4 }
0x2d12   :  { %v2483_v28 = vpop.f32.mrb[20].mxu1 }
0x2d13   :  { %v2488_v60 = vrot.slane %v2483_v28, 6  ;;  %v7074_v29 = vpop.f32.mrb[21].mxu1 }
0x2d15   :  { %v2490_v30 = vadd.f32 %v2488_v60, %v8777_v6 }
0x2d17   :  { %8001 = vtanh.f32 %v2490_v30  ;;  %v6403_v32 = vmul.f32 -1.442695, %v2490_v30 }
0x2d19   :  { %8003 = vpow2.f32 %v6403_v32 }
0x2d21   :  { %v8002_v31 = vpop.eup %8001 }
0x2d22   :  { %2503 = vrot.lane.b32.xlu1 %v8002_v31, %s8276_s22 }
0x2d23   :  { %v8004_v33 = vpop.eup %8003 }
0x2d24   :  { %v2494_v10 = vadd.f32 1.0, %v8004_v33 }
0x2d26   :  { %8005 = vrcp.f32 %v2494_v10 }
0x2d30   :  { %v8006_v34 = vpop.eup %8005 }
0x2d31   :  { %v2501_v39 = vmul.f32 %v8006_v34, %v2499_v37 }
0x2d94   :  { %v2504_v35 = vpop.permute.xlu1 %2503 }
0x2d95   :  { %v2506_v22 = vmul.f32 %v8006_v34, %v2504_v35 }
0x2d97   :  { %2508 = vrot.lane.b32.xlu0 %v2506_v22, %s8277_s23 }
0x2e09   :  { %v2509_v40 = vpop.permute.xlu0 %2508 }
0x2e0a   :  { %v2511_v42 = vadd.f32 %v2509_v40, %v2501_v39 }
0x2e0c   :  { %8007 = vtanh.f32 %v2511_v42  ;;  %v2610_v62 = vrot.slane %v2511_v42, 6 }
0x2e16   :  { %v8008_v55 = vpop.eup %8007 }
0x2e17   :  { %2514 = vrot.lane.b32.xlu1 %v8008_v55, %s8276_s22 }
0x2e89   :  { %v2515_v43 = vpop.permute.xlu1 %2514 }
0x2e8a   :  { %v8796_v38 = vmul.f32 %v8006_v34, %v2515_v43 }
0x2e8c   :  { %v2523_v50 = vrot.slane %v8796_v38, 2 }
0x2e8e   :  { %2524 = vrot.lane.b32.xlu0 %v2523_v50, %s8277_s23 }
0x2f00   :  { %v2525_v44 = vpop.permute.xlu0 %2524 }
0x2f01   :  { %7084 = vmatmul.mubr.msk.f32.vlgmr.msra.gmra.mrb[22].mxu0 %vm54_vm0, %v2525_v44 }
0x2f02   :  { %7641 = vmatpush3.bf16.msra.mxu0 %v8731_v61  ;;  %7105 = vmatprep.mubr.msk.f32.mxu0 %vm8274_vm1, %v8275_v13 }
0x2f03   :  { %7642 = vmatprep.subr.bf16.mxu0 %v8273_v4 }
0x2f06   :  { %7644 = vmatpush3.bf16.msra.mxu0 %v8742_v1 }
0x2f07   :  { %7651 = vmatprep.subr.bf16.mxu0 %v8273_v4 }
0x2fd4   :  { %v2594_v45 = vpop.f32.mrb[22].mxu0 }
0x2fd5   :  { %v2599_v47 = vrot.slane %v2594_v45, 4  ;;  %v7085_v48 = vpop.f32.mrb[23].mxu0 }
0x2fd7   :  { %v2601_v49 = vadd.f32 %v2599_v47, %v8777_v6 }
0x2fd9   :  { %8009 = vtanh.f32 %v2601_v49  ;;  %v6405_v52 = vmul.f32 -1.442695, %v2601_v49 }
0x2fdb   :  { %8011 = vpow2.f32 %v6405_v52 }
0x2fe3   :  { %v8010_v58 = vpop.eup %8009 }
0x2fe4   :  { %2614 = vrot.lane.b32.xlu1 %v8010_v58, %s8276_s22 }
0x2fe5   :  { %v8012_v19 = vpop.eup %8011 }
0x2fe6   :  { %v2605_v53 = vadd.f32 1.0, %v8012_v19 }
0x2fe8   :  { %8013 = vrcp.f32 %v2605_v53 }
0x2ff2   :  { %v8014_v54 = vpop.eup %8013 }
0x2ff3   :  { %v2612_v63 = vmul.f32 %v8014_v54, %v2610_v62 }
0x3056   :  { %v2615_v56 = vpop.permute.xlu1 %2614 }
0x3057   :  { %v2617_v59 = vmul.f32 %v8014_v54, %v2615_v56 }
0x3059   :  { %2619 = vrot.lane.b32.xlu0 %v2617_v59, %s8277_s23 }
0x30cb   :  { %v2620_v0 = vpop.permute.xlu0 %2619 }
0x30cc   :  { %v2622_v36 = vadd.f32 %v2620_v0, %v2612_v63 }
0x30ce   :  { %8015 = vtanh.f32 %v2622_v36  ;;  %v2721_v24 = vrot.slane %v2622_v36, 6 }
0x30d8   :  { %v8016_v8 = vpop.eup %8015 }
0x30d9   :  { %2625 = vrot.lane.b32.xlu1 %v8016_v8, %s8276_s22 }
0x314b   :  { %v2626_v41 = vpop.permute.xlu1 %2625 }
0x314c   :  { %v8811_v51 = vmul.f32 %v8014_v54, %v2626_v41 }
0x314e   :  { %v2634_v14 = vrot.slane %v8811_v51, 4 }
0x3150   :  { %2635 = vrot.lane.b32.xlu0 %v2634_v14, %s8277_s23 }
0x31c2   :  { %v2636_v7 = vpop.permute.xlu0 %2635 }
0x31c3   :  { %7095 = vmatmul.mubr.msk.f32.vlgmr.msra.gmra.mrb[22].mxu1 %vm54_vm0, %v2636_v7 }
0x31c4   :  { %7647 = vmatpush3.bf16.msra.mxu1 %v8731_v61  ;;  %7116 = vmatprep.mubr.msk.f32.mxu1 %vm8274_vm1, %v8275_v13 }
0x31c5   :  { %7648 = vmatprep.subr.bf16.mxu1 %v8273_v4 }
0x31c8   :  { %7650 = vmatpush3.bf16.msra.mxu1 %v8742_v1 }
0x31c9   :  { %7657 = vmatprep.subr.bf16.mxu1 %v8273_v4 }
0x3296   :  { %v2705_v9 = vpop.f32.mrb[22].mxu1 }
0x3297   :  { %v2710_v11 = vrot.slane %v2705_v9, 2  ;;  %v7096_v12 = vpop.f32.mrb[23].mxu1 }
0x3298   :  { %v6397_v12 = vld [vmem:[%s9475_s3 + $0x68] sm:$0xff] }
0x3299   :  { %v2712_v16 = vadd.f32 %v2710_v11, %v8777_v6  ;;  %v6396_v11 = vld [vmem:[%s9475_s3 + $0x60] sm:$0xff] }
0x329b   :  { %8017 = vtanh.f32 %v2712_v16  ;;  %v6407_v20 = vmul.f32 -1.442695, %v2712_v16  ;;  %v8864_v16 = vpack.c.bf16 %v6397_v12, %v6396_v11 }
0x329d   :  { %8019 = vpow2.f32 %v6407_v20  ;;  %v6399_v20 = vld [vmem:[%s9475_s3 + $0x78] sm:$0xff] }
0x32a5   :  { %v8018_v15 = vpop.eup %8017 }
0x32a6   :  { %2725 = vrot.lane.b32.xlu1 %v8018_v15, %s8276_s22  ;;  %v6398_v15 = vld [vmem:[%s9475_s3 + $0x70] sm:$0xff] }
0x32a7   :  { %v8020_v2 = vpop.eup %8019 }
0x32a8   :  { %v2716_v21 = vadd.f32 1.0, %v8020_v2 }
0x32aa   :  { %8021 = vrcp.f32 %v2716_v21  ;;  %v8874_v21 = vpack.c.bf16 %v6399_v20, %v6398_v15 }
0x32b4   :  { %v8022_v17 = vpop.eup %8021 }
0x32b5   :  { %v2723_v25 = vmul.f32 %v8022_v17, %v2721_v24 }
0x3318   :  { %v2726_v18 = vpop.permute.xlu1 %2725 }
0x3319   :  { %v2728_v23 = vmul.f32 %v8022_v17, %v2726_v18 }
0x331b   :  { %2730 = vrot.lane.b32.xlu0 %v2728_v23, %s8277_s23 }
0x338d   :  { %v2731_v26 = vpop.permute.xlu0 %2730 }
0x338e   :  { %v2733_v27 = vadd.f32 %v2731_v26, %v2723_v25  ;;  %v8891_v26 = vadd.f32 %v8770_v3, %v8768_v46 }
0x3390   :  { %8023 = vtanh.f32 %v2733_v27  ;;  %v2829_v42 = vrot.slane %v2733_v27, 6 }
0x339a   :  { %v8024_v6 = vpop.eup %8023 }
0x339b   :  { %2736 = vrot.lane.b32.xlu1 %v8024_v6, %s8276_s22 }
0x340d   :  { %v2737_v28 = vpop.permute.xlu1 %2736 }
0x340e   :  { %v8826_v60 = vmul.f32 %v8022_v17, %v2737_v28 }
0x3410   :  { %v2745_v29 = vrot.slane %v8826_v60, 6 }
0x3412   :  { %2746 = vrot.lane.b32.xlu0 %v2745_v29, %s8277_s23 }
0x3484   :  { %v2747_v30 = vpop.permute.xlu0 %2746 }
0x3485   :  { %7106 = vmatmul.mubr.msk.f32.vlgmr.msra.gmra.mrb[24].mxu0 %vm54_vm0, %v2747_v30 }
0x3486   :  { %7653 = vmatpush3.bf16.msra.mxu0 %v8731_v61  ;;  %7127 = vmatprep.mubr.msk.f32.mxu0 %vm8274_vm1, %v8275_v13 }
0x3487   :  { %7654 = vmatprep.subr.bf16.mxu0 %v8273_v4 }
0x348a   :  { %7656 = vmatpush3.bf16.msra.mxu0 %v8742_v1 }
0x348b   :  { %7663 = vmatprep.subr.bf16.mxu0 %v8273_v4 }
0x3558   :  { %v2816_v31 = vpop.f32.mrb[24].mxu0 }
0x3559   :  { %v2820_v32 = vadd.f32 %v2816_v31, %v8772_v5  ;;  %v7107_v33 = vpop.f32.mrb[25].mxu0 }
0x355b   :  { %8025 = vtanh.f32 %v2820_v32  ;;  %v6409_v34 = vmul.f32 -1.442695, %v2820_v32 }
0x355d   :  { %8027 = vpow2.f32 %v6409_v34 }
0x3565   :  { %v8026_v10 = vpop.eup %8025 }
0x3566   :  { %2833 = vrot.lane.b32.xlu1 %v8026_v10, %s8276_s22 }
0x3567   :  { %v8028_v35 = vpop.eup %8027 }
0x3568   :  { %v2824_v22 = vadd.f32 1.0, %v8028_v35 }
0x356a   :  { %8029 = vrcp.f32 %v2824_v22 }
0x3574   :  { %v8030_v37 = vpop.eup %8029 }
0x3575   :  { %v2831_v55 = vmul.f32 %v8030_v37, %v2829_v42 }
0x35d8   :  { %v2834_v39 = vpop.permute.xlu1 %2833 }
0x35d9   :  { %v2836_v40 = vmul.f32 %v8030_v37, %v2834_v39 }
0x35db   :  { %2838 = vrot.lane.b32.xlu0 %v2836_v40, %s8277_s23 }
0x364d   :  { %v2839_v43 = vpop.permute.xlu0 %2838 }
0x364e   :  { %v2841_v50 = vadd.f32 %v2839_v43, %v2831_v55 }
0x3650   :  { %8031 = vtanh.f32 %v2841_v50 }
0x365a   :  { %v8032_v44 = vpop.eup %8031 }
0x365b   :  { %2844 = vrot.lane.b32.xlu1 %v8032_v44, %s8276_s22 }
0x36cd   :  { %v2845_v45 = vpop.permute.xlu1 %2844 }
0x36ce   :  { %v2847_v47 = vmul.f32 %v8030_v37, %v2845_v45 }
0x36d0   :  { %2849 = vrot.lane.b32.xlu0 %v2847_v47, %s8277_s23 }
0x3742   :  { %v2850_v48 = vpop.permute.xlu0 %2849 }
0x3743   :  { %2852 = vst.msk [vmem:[#allocation2 + $0x8] sm:$0x3] %vm238_vm2, %v2850_v48  ;;  %7117 = vmatmul.mubr.msk.f32.vlgmr.msra.gmra.mrb[24].mxu1 %vm54_vm0, %v2850_v48 }
0x3744   :  { %7659 = vmatpush3.bf16.msra.mxu1 %v8731_v61  ;;  %7138 = vmatprep.mubr.msk.f32.mxu1 %vm8274_vm1, %v8275_v13 }
0x3745   :  { %7660 = vmatprep.subr.bf16.mxu1 %v8273_v4 }
0x3748   :  { %7662 = vmatpush3.bf16.msra.mxu1 %v8742_v1  ;;  %v2937_v1 = vrot.slane %v2841_v50, 6 }
0x3749   :  { %7669 = vmatprep.subr.bf16.mxu1 %v8273_v4 }
0x3816   :  { %v2921_v49 = vpop.f32.mrb[24].mxu1 }
0x3817   :  { %v2926_v58 = vrot.slane %v2921_v49, 6  ;;  %v7118_v52 = vpop.f32.mrb[25].mxu1 }
0x3819   :  { %v2928_v19 = vadd.f32 %v2926_v58, %v8772_v5 }
0x381b   :  { %8033 = vtanh.f32 %v2928_v19  ;;  %v6411_v54 = vmul.f32 -1.442695, %v2928_v19 }
0x381d   :  { %8035 = vpow2.f32 %v6411_v54 }
0x3825   :  { %v8034_v53 = vpop.eup %8033 }
0x3826   :  { %2941 = vrot.lane.b32.xlu1 %v8034_v53, %s8276_s22 }
0x3827   :  { %v8036_v61 = vpop.eup %8035 }
0x3828   :  { %v2932_v56 = vadd.f32 1.0, %v8036_v61 }
0x382a   :  { %8037 = vrcp.f32 %v2932_v56 }
0x3834   :  { %v8038_v59 = vpop.eup %8037 }
0x3835   :  { %v2939_v0 = vmul.f32 %v8038_v59, %v2937_v1 }
0x3898   :  { %v2942_v62 = vpop.permute.xlu1 %2941 }
0x3899   :  { %v2944_v63 = vmul.f32 %v8038_v59, %v2942_v62 }
0x389b   :  { %2946 = vrot.lane.b32.xlu0 %v2944_v63, %s8277_s23 }
0x390d   :  { %v2947_v36 = vpop.permute.xlu0 %2946 }
0x390e   :  { %v2949_v8 = vadd.f32 %v2947_v36, %v2939_v0 }
0x3910   :  { %8039 = vtanh.f32 %v2949_v8  ;;  %v3048_v42 = vrot.slane %v2949_v8, 6 }
0x391a   :  { %v8040_v41 = vpop.eup %8039 }
0x391b   :  { %2952 = vrot.lane.b32.xlu1 %v8040_v41, %s8276_s22 }
0x398d   :  { %v2953_v14 = vpop.permute.xlu1 %2952 }
0x398e   :  { %v8854_v7 = vmul.f32 %v8038_v59, %v2953_v14 }
0x3990   :  { %v2961_v9 = vrot.slane %v8854_v7, 2 }
0x3992   :  { %2962 = vrot.lane.b32.xlu0 %v2961_v9, %s8277_s23 }
0x3a04   :  { %v2963_v2 = vpop.permute.xlu0 %2962 }
0x3a05   :  { %7128 = vmatmul.mubr.msk.f32.vlgmr.msra.gmra.mrb[26].mxu0 %vm54_vm0, %v2963_v2 }
0x3a06   :  { %7665 = vmatpush3.bf16.msra.mxu0 %v8864_v16  ;;  %7149 = vmatprep.mubr.msk.f32.mxu0 %vm8274_vm1, %v8275_v13 }
0x3a07   :  { %7666 = vmatprep.subr.bf16.mxu0 %v8273_v4 }
0x3a0a   :  { %7668 = vmatpush3.bf16.msra.mxu0 %v8874_v21 }
0x3a0b   :  { %7675 = vmatprep.subr.bf16.mxu0 %v8273_v4 }
0x3a0d   :  { %7150 = vmatmul.mubr.f32.vlgmr.msra.gmra.mrb[28].mxu0 %v8275_v13 }
0x3a0e   :  { %7677 = vmatpush3.bf16.msra.mxu0 %v8864_v16  ;;  %7171 = vmatprep.mubr.msk.f32.mxu0 %vm8274_vm1, %v8275_v13 }
0x3a0f   :  { %7678 = vmatprep.subr.bf16.mxu0 %v8273_v4 }
0x3a12   :  { %7680 = vmatpush3.bf16.msra.mxu0 %v8874_v21 }
0x3a13   :  { %7687 = vmatprep.subr.bf16.mxu0 %v8273_v4 }
0x3ad8   :  { %v3032_v17 = vpop.f32.mrb[26].mxu0 }
0x3ad9   :  { %v3037_v18 = vrot.slane %v3032_v17, 4  ;;  %v7129_v23 = vpop.f32.mrb[27].mxu0 }
0x3adb   :  { %v3039_v24 = vadd.f32 %v3037_v18, %v8772_v5 }
0x3add   :  { %8041 = vtanh.f32 %v3039_v24  ;;  %v6413_v31 = vmul.f32 -1.442695, %v3039_v24 }
0x3ae0   :  { %v3257_v25 = vpop.f32.mrb[28].mxu0 }
0x3ae1   :  { %v3262_v27 = vrot.slane %v3257_v25, 2  ;;  %v7151_v6 = vpop.f32.mrb[29].mxu0 }
0x3ae3   :  { %v3264_v28 = vadd.f32 %v3262_v27, %v8891_v26 }
0x3ae5   :  { %8043 = vtanh.f32 %v3264_v28  ;;  %v6417_v32 = vmul.f32 -1.442695, %v3264_v28 }
0x3ae6   :  { %8045 = vpow2.f32 %v6413_v31 }
0x3ae7   :  { %v8042_v29 = vpop.eup %8041  ;;  %8047 = vpow2.f32 %v6417_v32 }
0x3ae8   :  { %3052 = vrot.lane.b32.xlu1 %v8042_v29, %s8276_s22 }
0x3aef   :  { %v8044_v30 = vpop.eup %8043 }
0x3af0   :  { %3274 = vrot.lane.b32.xlu0 %v8044_v30, %s8276_s22  ;;  %v8046_v33 = vpop.eup %8045 }
0x3af1   :  { %v3043_v10 = vadd.f32 1.0, %v8046_v33  ;;  %v8048_v46 = vpop.eup %8047 }
0x3af2   :  { %v3268_v3 = vadd.f32 1.0, %v8048_v46 }
0x3af3   :  { %8049 = vrcp.f32 %v3043_v10 }
0x3af4   :  { %8051 = vrcp.f32 %v3268_v3 }
0x3afd   :  { %v8050_v34 = vpop.eup %8049 }
0x3afe   :  { %v8052_v37 = vpop.eup %8051  ;;  %v3050_v55 = vmul.f32 %v8050_v34, %v3048_v42 }
0x3aff   :  { %v3272_v44 = vmul.f32 0.0, %v8052_v37 }
0x3b5a   :  { %v3053_v35 = vpop.permute.xlu1 %3052 }
0x3b5b   :  { %v3055_v22 = vmul.f32 %v8050_v34, %v3053_v35 }
0x3b5d   :  { %3057 = vrot.lane.b32.xlu1 %v3055_v22, %s8277_s23 }
0x3b62   :  { %v3275_v39 = vpop.permute.xlu0 %3274 }
0x3b63   :  { %v3277_v40 = vmul.f32 %v8052_v37, %v3275_v39 }
0x3b65   :  { %3279 = vrot.lane.b32.xlu0 %v3277_v40, %s8277_s23 }
0x3bcf   :  { %v3058_v43 = vpop.permute.xlu1 %3057 }
0x3bd0   :  { %v8898_v50 = vadd.f32 %v3058_v43, %v3050_v55 }
0x3bd2   :  { %8053 = vtanh.f32 %v8898_v50 }
0x3bd7   :  { %v3280_v45 = vpop.permute.xlu0 %3279 }
0x3bd8   :  { %v3282_v47 = vadd.f32 %v3280_v45, %v3272_v44 }
0x3bda   :  { %8055 = vtanh.f32 %v3282_v47  ;;  %v3381_v2 = vrot.slane %v3282_v47, 2 }
0x3bdc   :  { %v8054_v48 = vpop.eup %8053 }
0x3bdd   :  { %3063 = vrot.lane.b32.xlu1 %v8054_v48, %s8276_s22 }
0x3be4   :  { %v8056_v49 = vpop.eup %8055 }
0x3be5   :  { %3285 = vrot.lane.b32.xlu0 %v8056_v49, %s8276_s22 }
0x3c4f   :  { %v3064_v58 = vpop.permute.xlu1 %3063 }
0x3c50   :  { %v8903_v52 = vmul.f32 %v8050_v34, %v3064_v58 }
0x3c52   :  { %v3072_v19 = vrot.slane %v8903_v52, 4 }
0x3c54   :  { %3073 = vrot.lane.b32.xlu1 %v3072_v19, %s8277_s23 }
0x3c57   :  { %v3286_v53 = vpop.permute.xlu0 %3285 }
0x3c58   :  { %v8907_v54 = vmul.f32 %v8052_v37, %v3286_v53 }
0x3c5a   :  { %v3294_v61 = vrot.slane %v8907_v54, 6 }
0x3c5c   :  { %3295 = vrot.lane.b32.xlu0 %v3294_v61, %s8277_s23 }
0x3cc6   :  { %v3074_v56 = vpop.permute.xlu1 %3073 }
0x3cc7   :  { %7139 = vmatmul.mubr.msk.f32.vlgmr.msra.gmra.mrb[26].mxu1 %vm54_vm0, %v3074_v56 }
0x3cc8   :  { %7671 = vmatpush3.bf16.msra.mxu1 %v8864_v16  ;;  %7160 = vmatprep.mubr.msk.f32.mxu1 %vm8274_vm1, %v8275_v13 }
0x3cc9   :  { %7672 = vmatprep.subr.bf16.mxu1 %v8273_v4 }
0x3ccc   :  { %7674 = vmatpush3.bf16.msra.mxu1 %v8874_v21 }
0x3ccd   :  { %7681 = vmatprep.subr.bf16.mxu1 %v8273_v4 }
0x3cce   :  { %v3296_v59 = vpop.permute.xlu0 %3295 }
0x3ccf   :  { %7161 = vmatmul.mubr.msk.f32.vlgmr.msra.gmra.mrb[28].mxu1 %vm54_vm0, %v3296_v59 }
0x3cd0   :  { %7683 = vmatpush3.bf16.msra.mxu1 %v8864_v16  ;;  %7182 = vmatprep.mubr.msk.f32.mxu1 %vm8274_vm1, %v8275_v13 }
0x3cd1   :  { %7684 = vmatprep.subr.bf16.mxu1 %v8273_v4 }
0x3cd4   :  { %7686 = vmatpush3.bf16.msra.mxu1 %v8874_v21 }
0x3cd5   :  { %7693 = vmatprep.subr.bf16.mxu1 %v8273_v4 }
0x3d9a   :  { %v8925_v62 = vpop.f32.mrb[26].mxu1 }
0x3d9b   :  { %v7140_v63 = vpop.f32.mrb[27].mxu1 }
0x3da2   :  { %v3365_v1 = vpop.f32.mrb[28].mxu1 }
0x3da3   :  { %v3370_v0 = vrot.slane %v3365_v1, 4  ;;  %v7162_v36 = vpop.f32.mrb[29].mxu1 }
0x3da5   :  { %v3372_v8 = vadd.f32 %v3370_v0, %v8891_v26 }
0x3da7   :  { %8057 = vtanh.f32 %v3372_v8  ;;  %v6419_v14 = vmul.f32 -1.442695, %v3372_v8 }
0x3da9   :  { %8059 = vpow2.f32 %v6419_v14 }
0x3db1   :  { %v8058_v41 = vpop.eup %8057 }
0x3db2   :  { %3385 = vrot.lane.b32.xlu1 %v8058_v41, %s8276_s22 }
0x3db3   :  { %v8060_v9 = vpop.eup %8059 }
0x3db4   :  { %v3376_v11 = vadd.f32 1.0, %v8060_v9 }
0x3db6   :  { %8061 = vrcp.f32 %v3376_v11 }
0x3dc0   :  { %v8062_v12 = vpop.eup %8061 }
0x3dc1   :  { %v3383_v17 = vmul.f32 %v8062_v12, %v3381_v2 }
0x3e24   :  { %v3386_v15 = vpop.permute.xlu1 %3385 }
0x3e25   :  { %v3388_v20 = vmul.f32 %v8062_v12, %v3386_v15 }
0x3e27   :  { %3390 = vrot.lane.b32.xlu0 %v3388_v20, %s8277_s23 }
0x3e99   :  { %v3391_v18 = vpop.permute.xlu0 %3390 }
0x3e9a   :  { %v3393_v23 = vadd.f32 %v3391_v18, %v3383_v17 }
0x3e9c   :  { %8063 = vtanh.f32 %v3393_v23  ;;  %v3492_v37 = vrot.slane %v3393_v23, 2 }
0x3ea6   :  { %v8064_v24 = vpop.eup %8063 }
0x3ea7   :  { %3396 = vrot.lane.b32.xlu1 %v8064_v24, %s8276_s22 }
0x3f19   :  { %v3397_v25 = vpop.permute.xlu1 %3396 }
0x3f1a   :  { %v8931_v27 = vmul.f32 %v8062_v12, %v3397_v25 }
0x3f1c   :  { %v3405_v6 = vrot.slane %v8931_v27, 4 }
0x3f1e   :  { %3406 = vrot.lane.b32.xlu0 %v3405_v6, %s8277_s23 }
0x3f90   :  { %v3407_v28 = vpop.permute.xlu0 %3406 }
0x3f91   :  { %7172 = vmatmul.mubr.msk.f32.vlgmr.msra.gmra.mrb[30].mxu0 %vm54_vm0, %v3407_v28 }
0x3f92   :  { %7689 = vmatpush3.bf16.msra.mxu0 %v8864_v16  ;;  %7193 = vmatprep.mubr.msk.f32.mxu0 %vm8274_vm1, %v8275_v13 }
0x3f93   :  { %7690 = vmatprep.subr.bf16.mxu0 %v8273_v4 }
0x3f96   :  { %7692 = vmatpush3.bf16.msra.mxu0 %v8874_v21 }
0x3f97   :  { %7699 = vmatprep.subr.bf16.mxu0 %v8273_v4 }
0x4064   :  { %v3476_v29 = vpop.f32.mrb[30].mxu0 }
0x4065   :  { %v3481_v30 = vrot.slane %v3476_v29, 6  ;;  %v7173_v31 = vpop.f32.mrb[31].mxu0 }
0x4067   :  { %v3483_v32 = vadd.f32 %v3481_v30, %v8891_v26 }
0x4069   :  { %8065 = vtanh.f32 %v3483_v32  ;;  %v6421_v10 = vmul.f32 -1.442695, %v3483_v32 }
0x406b   :  { %8067 = vpow2.f32 %v6421_v10 }
0x4073   :  { %v8066_v33 = vpop.eup %8065 }
0x4074   :  { %3496 = vrot.lane.b32.xlu1 %v8066_v33, %s8276_s22 }
0x4075   :  { %v8068_v46 = vpop.eup %8067 }
0x4076   :  { %v3487_v3 = vadd.f32 1.0, %v8068_v46 }
0x4078   :  { %8069 = vrcp.f32 %v3487_v3 }
0x4082   :  { %v8070_v34 = vpop.eup %8069 }
0x4083   :  { %v3494_v39 = vmul.f32 %v8070_v34, %v3492_v37 }
0x40e6   :  { %v3497_v35 = vpop.permute.xlu1 %3496 }
0x40e7   :  { %v3499_v22 = vmul.f32 %v8070_v34, %v3497_v35 }
0x40e9   :  { %3501 = vrot.lane.b32.xlu0 %v3499_v22, %s8277_s23 }
0x415b   :  { %v3502_v40 = vpop.permute.xlu0 %3501 }
0x415c   :  { %v3504_v42 = vadd.f32 %v3502_v40, %v3494_v39 }
0x415e   :  { %8071 = vtanh.f32 %v3504_v42  ;;  %v3600_v0 = vrot.slane %v3504_v42, 2 }
0x4168   :  { %v8072_v55 = vpop.eup %8071 }
0x4169   :  { %3507 = vrot.lane.b32.xlu1 %v8072_v55, %s8276_s22 }
0x41db   :  { %v3508_v43 = vpop.permute.xlu1 %3507 }
0x41dc   :  { %v8946_v44 = vmul.f32 %v8070_v34, %v3508_v43 }
0x41de   :  { %v3516_v45 = vrot.slane %v8946_v44, 2 }
0x41e0   :  { %3517 = vrot.lane.b32.xlu0 %v3516_v45, %s8277_s23 }
0x4252   :  { %v3518_v47 = vpop.permute.xlu0 %3517 }
0x4253   :  { %7183 = vmatmul.mubr.msk.f32.vlgmr.msra.gmra.mrb[30].mxu1 %vm54_vm0, %v3518_v47 }
0x4254   :  { %7695 = vmatpush3.bf16.msra.mxu1 %v8864_v16  ;;  %7204 = vmatprep.mubr.msk.f32.mxu1 %vm8274_vm1, %v8275_v13 }
0x4255   :  { %7696 = vmatprep.subr.bf16.mxu1 %v8273_v4 }
0x4258   :  { %7698 = vmatpush3.bf16.msra.mxu1 %v8874_v21 }
0x4259   :  { %7705 = vmatprep.subr.bf16.mxu1 %v8273_v4 }
0x4326   :  { %v3587_v48 = vpop.f32.mrb[30].mxu1 }
0x4327   :  { %v3591_v49 = vadd.f32 %v3587_v48, %v8891_v26  ;;  %v7184_v58 = vpop.f32.mrb[31].mxu1 }
0x4329   :  { %8073 = vtanh.f32 %v3591_v49  ;;  %v6423_v53 = vmul.f32 -1.442695, %v3591_v49 }
0x432b   :  { %8075 = vpow2.f32 %v6423_v53 }
0x4333   :  { %v8074_v19 = vpop.eup %8073 }
0x4334   :  { %3604 = vrot.lane.b32.xlu1 %v8074_v19, %s8276_s22 }
0x4335   :  { %v8076_v61 = vpop.eup %8075 }
0x4336   :  { %v3595_v56 = vadd.f32 1.0, %v8076_v61 }
0x4338   :  { %8077 = vrcp.f32 %v3595_v56 }
0x4342   :  { %v8078_v59 = vpop.eup %8077 }
0x4343   :  { %v3602_v36 = vmul.f32 %v8078_v59, %v3600_v0 }
0x43a6   :  { %v3605_v63 = vpop.permute.xlu1 %3604 }
0x43a7   :  { %v3607_v1 = vmul.f32 %v8078_v59, %v3605_v63 }
0x43a9   :  { %3609 = vrot.lane.b32.xlu0 %v3607_v1, %s8277_s23 }
0x441b   :  { %v3610_v8 = vpop.permute.xlu0 %3609 }
0x441c   :  { %v3612_v41 = vadd.f32 %v3610_v8, %v3602_v36 }
0x441e   :  { %8079 = vtanh.f32 %v3612_v41  ;;  %v3708_v29 = vrot.slane %v3612_v41, 2 }
0x4428   :  { %v8080_v26 = vpop.eup %8079 }
0x4429   :  { %3615 = vrot.lane.b32.xlu1 %v8080_v26, %s8276_s22 }
0x449b   :  { %v3616_v14 = vpop.permute.xlu1 %3615 }
0x449c   :  { %v3618_v9 = vmul.f32 %v8078_v59, %v3616_v14 }
0x449e   :  { %3620 = vrot.lane.b32.xlu0 %v3618_v9, %s8277_s23 }
0x4510   :  { %v3621_v11 = vpop.permute.xlu0 %3620 }
0x4511   :  { %3623 = vst.msk [vmem:[#allocation3 + $0x8] sm:$0x3] %vm238_vm2, %v3621_v11  ;;  %7194 = vmatmul.mubr.msk.f32.vlgmr.msra.gmra.mrb[32].mxu0 %vm54_vm0, %v3621_v11 }
0x4512   :  { %7701 = vmatpush3.bf16.msra.mxu0 %v8864_v16  ;;  %7215 = vmatprep.mubr.msk.f32.mxu0 %vm8274_vm1, %v8275_v13 }
0x4513   :  { %7702 = vmatprep.subr.bf16.mxu0 %v8273_v4 }
0x4516   :  { %7704 = vmatpush3.bf16.msra.mxu0 %v8874_v21 }
0x45e4   :  { %v3692_v12 = vpop.f32.mrb[32].mxu0 }
0x45e5   :  { %v3697_v15 = vrot.slane %v3692_v12, 2  ;;  %v7195_v20 = vpop.f32.mrb[33].mxu0 }
0x45e7   :  { %v3699_v2 = vadd.f32 %v3697_v15, %v8775_v57 }
0x45e9   :  { %8081 = vtanh.f32 %v3699_v2  ;;  %v6425_v18 = vmul.f32 -1.442695, %v3699_v2 }
0x45eb   :  { %8083 = vpow2.f32 %v6425_v18 }
0x45f3   :  { %v8082_v17 = vpop.eup %8081 }
0x45f4   :  { %3712 = vrot.lane.b32.xlu1 %v8082_v17, %s8276_s22 }
0x45f5   :  { %v8084_v23 = vpop.eup %8083 }
0x45f6   :  { %v3703_v24 = vadd.f32 1.0, %v8084_v23  ;;  %v3148_v23 = vrot.slane %v8925_v62, 2 }
0x45f8   :  { %8085 = vrcp.f32 %v3703_v24  ;;  %v3150_v24 = vadd.f32 %v3148_v23, %v8772_v5 }
0x4602   :  { %v8086_v25 = vpop.eup %8085 }
0x4603   :  { %v3710_v30 = vmul.f32 %v8086_v25, %v3708_v29 }
0x4666   :  { %v3713_v6 = vpop.permute.xlu1 %3712 }
0x4667   :  { %v3715_v28 = vmul.f32 %v8086_v25, %v3713_v6 }
0x4669   :  { %3717 = vrot.lane.b32.xlu0 %v3715_v28, %s8277_s23 }
0x46db   :  { %v3718_v31 = vpop.permute.xlu0 %3717 }
0x46dc   :  { %v3720_v32 = vadd.f32 %v3718_v31, %v3710_v30  ;;  %v6415_v30 = vmul.f32 -1.442695, %v3150_v24 }
0x46de   :  { %8087 = vtanh.f32 %v3720_v32 }
0x46e8   :  { %v8088_v33 = vpop.eup %8087 }
0x46e9   :  { %3723 = vrot.lane.b32.xlu1 %v8088_v33, %s8276_s22 }
0x475b   :  { %v3724_v10 = vpop.permute.xlu1 %3723 }
0x475c   :  { %v8973_v46 = vmul.f32 %v8086_v25, %v3724_v10 }
0x475e   :  { %v3732_v3 = vrot.slane %v8973_v46, 6 }
0x4760   :  { %3733 = vrot.lane.b32.xlu0 %v3732_v3, %s8277_s23  ;;  %v3159_v3 = vrot.slane %v8898_v50, 6 }
0x47d2   :  { %v3734_v34 = vpop.permute.xlu0 %3733 }
0x47d3   :  { %7205 = vmatmul.mubr.msk.f32.vlgmr.msra.gmra.mrb[32].mxu1 %vm54_vm0, %v3734_v34 }
0x47d4   :  { %7707 = vmatpush3.bf16.msra.mxu1 %v8864_v16  ;;  %7226 = vmatprep.mubr.msk.f32.mxu1 %vm8274_vm1, %v8275_v13 }
0x47d5   :  { %7708 = vmatprep.subr.bf16.mxu1 %v8273_v4 }
0x47d8   :  { %7710 = vmatpush3.bf16.msra.mxu1 %v8874_v21  ;;  %v3819_v21 = vrot.slane %v3720_v32, 2 }
0x48a6   :  { %v3803_v35 = vpop.f32.mrb[32].mxu1 }
0x48a7   :  { %v3808_v22 = vrot.slane %v3803_v35, 4  ;;  %v7206_v37 = vpop.f32.mrb[33].mxu1 }
0x48a9   :  { %v3810_v39 = vadd.f32 %v3808_v22, %v8775_v57 }
0x48ab   :  { %8089 = vtanh.f32 %v3810_v39  ;;  %v6427_v42 = vmul.f32 -1.442695, %v3810_v39 }
0x48ad   :  { %8091 = vpow2.f32 %v6427_v42 }
0x48b5   :  { %v8090_v40 = vpop.eup %8089 }
0x48b6   :  { %3823 = vrot.lane.b32.xlu1 %v8090_v40, %s8276_s22 }
0x48b7   :  { %v8092_v55 = vpop.eup %8091 }
0x48b8   :  { %v3814_v16 = vadd.f32 1.0, %v8092_v55 }
0x48ba   :  { %8093 = vrcp.f32 %v3814_v16 }
0x48c4   :  { %v8094_v43 = vpop.eup %8093 }
0x48c5   :  { %v3821_v48 = vmul.f32 %v8094_v43, %v3819_v21 }
0x4928   :  { %v3824_v45 = vpop.permute.xlu1 %3823 }
0x4929   :  { %v3826_v47 = vmul.f32 %v8094_v43, %v3824_v45 }
0x492b   :  { %3828 = vrot.lane.b32.xlu0 %v3826_v47, %s8277_s23 }
0x499d   :  { %v3829_v49 = vpop.permute.xlu0 %3828 }
0x499e   :  { %v3831_v58 = vadd.f32 %v3829_v49, %v3821_v48 }
0x49a0   :  { %8095 = vtanh.f32 %v3831_v58  ;;  %v3930_v15 = vrot.slane %v3831_v58, 2 }
0x49aa   :  { %v8096_v19 = vpop.eup %8095 }
0x49ab   :  { %3834 = vrot.lane.b32.xlu1 %v8096_v19, %s8276_s22 }
0x4a1d   :  { %v3835_v53 = vpop.permute.xlu1 %3834 }
0x4a1e   :  { %v3837_v61 = vmul.f32 %v8094_v43, %v3835_v53 }
0x4a20   :  { %v3843_v56 = vrot.slane %v3837_v61, 4 }
0x4a22   :  { %3844 = vrot.lane.b32.xlu0 %v3843_v56, %s8277_s23 }
0x4a94   :  { %v3845_v59 = vpop.permute.xlu0 %3844 }
0x4a95   :  { %7216 = vmatmul.mubr.msk.f32.vlgmr.msra.gmra.mrb[34].mxu0 %vm54_vm0, %v3845_v59 }
0x4b68   :  { %v3914_v63 = vpop.f32.mrb[34].mxu0 }
0x4b69   :  { %v3919_v1 = vrot.slane %v3914_v63, 6  ;;  %v7217_v0 = vpop.f32.mrb[35].mxu0  ;;  %v6438_v63 = vld [vmem:[%s9474_s2 + $0xb0] sm:$0xff] }
0x4b6a   :  { %v6446_v0 = vld [vmem:[%s9474_s2 + $0xf0] sm:$0xff] }
0x4b6b   :  { %v3921_v36 = vadd.f32 %v3919_v1, %v8775_v57  ;;  %v6439_v1 = vld [vmem:[%s9474_s2 + $0xb8] sm:$0xff] }
0x4b6d   :  { %8097 = vtanh.f32 %v3921_v36  ;;  %v6429_v41 = vmul.f32 -1.442695, %v3921_v36  ;;  %v7715_v36 = vpack.c.bf16 %v6439_v1, %v6438_v63 }
0x4b6f   :  { %8099 = vpow2.f32 %v6429_v41 }
0x4b77   :  { %v8098_v8 = vpop.eup %8097 }
0x4b78   :  { %3934 = vrot.lane.b32.xlu1 %v8098_v8, %s8276_s22  ;;  %v6447_v8 = vld [vmem:[%s9474_s2 + $0xf8] sm:$0xff] }
0x4b79   :  { %v8100_v26 = vpop.eup %8099  ;;  %v7731_v41 = vpack.c.bf16 %v6447_v8, %v6446_v0 }
0x4b7a   :  { %v3925_v14 = vadd.f32 1.0, %v8100_v26  ;;  %v6432_v26 = vld [vmem:[%s9474_s2 + $0x80] sm:$0xff] }
0x4b7c   :  { %8101 = vrcp.f32 %v3925_v14  ;;  %v6433_v14 = vld [vmem:[%s9474_s2 + $0x88] sm:$0xff] }
0x4b86   :  { %v8102_v9 = vpop.eup %8101 }
0x4b87   :  { %v3932_v20 = vmul.f32 %v8102_v9, %v3930_v15 }
0x4bea   :  { %v3935_v11 = vpop.permute.xlu1 %3934 }
0x4beb   :  { %v3937_v12 = vmul.f32 %v8102_v9, %v3935_v11  ;;  %v6440_v11 = vld [vmem:[%s9474_s2 + $0xc0] sm:$0xff] }
0x4bed   :  { %3939 = vrot.lane.b32.xlu0 %v3937_v12, %s8277_s23  ;;  %v6441_v12 = vld [vmem:[%s9474_s2 + $0xc8] sm:$0xff] }
0x4c5f   :  { %v3940_v2 = vpop.permute.xlu0 %3939 }
0x4c60   :  { %v3942_v17 = vadd.f32 %v3940_v2, %v3932_v20  ;;  %v7735_v20 = vpack.c.bf16 %v6441_v12, %v6440_v11 }
0x4c62   :  { %8103 = vtanh.f32 %v3942_v17  ;;  %v4038_v49 = vrot.slane %v3942_v17, 2 }
0x4c63   :  { %8105 = vtanh.f32 %v3150_v24 }
0x4c64   :  { %8107 = vpow2.f32 %v6415_v30  ;;  %v6442_v30 = vld [vmem:[%s9474_s2 + $0xd0] sm:$0xff] }
0x4c6c   :  { %v8104_v18 = vpop.eup %8103 }
0x4c6d   :  { %3945 = vrot.lane.b32.xlu1 %v8104_v18, %s8276_s22  ;;  %v8106_v29 = vpop.eup %8105 }
0x4c6e   :  { %v8108_v31 = vpop.eup %8107 }
0x4c6f   :  { %v3154_v32 = vadd.f32 1.0, %v8108_v31  ;;  %v6443_v31 = vld [vmem:[%s9474_s2 + $0xd8] sm:$0xff] }
0x4c71   :  { %8109 = vrcp.f32 %v3154_v32 }
0x4c7b   :  { %v8110_v62 = vpop.eup %8109 }
0x4c7c   :  { %v3161_v34 = vmul.f32 %v8110_v62, %v3159_v3 }
0x4cdf   :  { %v3946_v25 = vpop.permute.xlu1 %3945 }
0x4ce0   :  { %v3948_v6 = vmul.f32 %v8102_v9, %v3946_v25  ;;  %v7719_v9 = vpack.c.bf16 %v6433_v14, %v6432_v26 }
0x4ce2   :  { %v3954_v28 = vrot.slane %v3948_v6, 2 }
0x4ce4   :  { %3955 = vrot.lane.b32.xlu0 %v3954_v28, %s8277_s23 }
0x4ce8   :  { %3163 = vrot.lane.b32.xlu0 %v8106_v29, %s8276_s22  ;;  %v6435_v29 = vld [vmem:[%s9474_s2 + $0x98] sm:$0xff] }
0x4d56   :  { %v3956_v33 = vpop.permute.xlu0 %3955 }
0x4d57   :  { %7227 = vmatmul.mubr.msk.f32.vlgmr.msra.gmra.mrb[34].mxu1 %vm54_vm0, %v3956_v33 }
0x4d5a   :  { %v3164_v10 = vpop.permute.xlu0 %3163 }
0x4d5b   :  { %v3166_v5 = vmul.f32 %v8110_v62, %v3164_v10  ;;  %v7739_v10 = vpack.c.bf16 %v6443_v31, %v6442_v30 }
0x4d5d   :  { %3168 = vrot.lane.b32.xlu0 %v3166_v5, %s8277_s23 }
0x4dcf   :  { %v3169_v35 = vpop.permute.xlu0 %3168 }
0x4dd0   :  { %v3171_v22 = vadd.f32 %v3169_v35, %v3161_v34  ;;  %v6458_v34 = vld [vmem:[%s9475_s3 + $0x80] sm:$0xff]  ;;  %v6459_v35 = vld [vmem:[%s9475_s3 + $0x88] sm:$0xff] }
0x4dd2   :  { %8111 = vtanh.f32 %v3171_v22 }
0x4ddc   :  { %v8112_v37 = vpop.eup %8111 }
0x4ddd   :  { %3174 = vrot.lane.b32.xlu0 %v8112_v37, %s8276_s22  ;;  %v9102_v37 = vpack.c.bf16 %v6459_v35, %v6458_v34 }
0x4de1   :  { %3839 = vrot.lane.b32.xlu0 %v3837_v61, %s8277_s23 }
0x4de5   :  { %3401 = vrot.lane.b32.xlu0 %v8931_v27, %s8277_s23 }
0x4e2a   :  { %v4025_v39 = vpop.f32.mrb[34].mxu1 }
0x4e2b   :  { %v4029_v40 = vadd.f32 %v4025_v39, %v8775_v57  ;;  %v7228_v42 = vpop.f32.mrb[35].mxu1  ;;  %v6460_v39 = vld [vmem:[%s9475_s3 + $0x90] sm:$0xff] }
0x4e2d   :  { %8113 = vtanh.f32 %v4029_v40  ;;  %v6431_v45 = vmul.f32 -1.442695, %v4029_v40  ;;  %v6461_v40 = vld [vmem:[%s9475_s3 + $0x98] sm:$0xff] }
0x4e2f   :  { %8115 = vpow2.f32 %v6431_v45 }
0x4e37   :  { %v8114_v55 = vpop.eup %8113 }
0x4e38   :  { %4042 = vrot.lane.b32.xlu1 %v8114_v55, %s8276_s22  ;;  %v9113_v55 = vpack.c.bf16 %v6461_v40, %v6460_v39 }
0x4e39   :  { %v8116_v47 = vpop.eup %8115 }
0x4e3a   :  { %v4033_v21 = vadd.f32 1.0, %v8116_v47 }
0x4e3c   :  { %8117 = vrcp.f32 %v4033_v21 }
0x4e46   :  { %v8118_v27 = vpop.eup %8117 }
0x4e47   :  { %v4040_v58 = vmul.f32 %v8118_v27, %v4038_v49 }
0x4e4f   :  { %v3175_v50 = vpop.permute.xlu0 %3174 }
0x4e50   :  { %v3177_v56 = vmul.f32 %v8110_v62, %v3175_v50  ;;  %v6466_v50 = vld [vmem:[%s9476_s4 + $0x4] ss:$0 sm:$0xff] }
0x4e53   :  { %v3840_v16 = vpop.permute.xlu0 %3839 }
0x4e54   :  { %3842 = vst.msk [vmem:[#allocation3] sm:$0x30] %vm459_vm3, %v3840_v16  ;;  %v9139_v16 = vld [vmem:[%s9476_s4 + $0x5] ss:$0 sm:$0xff] }
0x4e57   :  { %v3402_v43 = vpop.permute.xlu0 %3401 }
0x4e58   :  { %3404 = vst.msk [vmem:[#allocation3 + $0x8] sm:$0x30] %vm459_vm3, %v3402_v43 }
0x4eaa   :  { %v4043_v48 = vpop.permute.xlu1 %4042 }
0x4eab   :  { %v4045_v57 = vmul.f32 %v8118_v27, %v4043_v48 }
0x4ead   :  { %4047 = vrot.lane.b32.xlu1 %v4045_v57, %s8277_s23 }
0x4f1f   :  { %v4048_v19 = vpop.permute.xlu1 %4047 }
0x4f20   :  { %v4050_v53 = vadd.f32 %v4048_v19, %v4040_v58 }
0x4f22   :  { %8119 = vtanh.f32 %v4050_v53 }
0x4f2c   :  { %v8120_v61 = vpop.eup %8119 }
0x4f2d   :  { %4053 = vrot.lane.b32.xlu1 %v8120_v61, %s8276_s22 }
0x4f31   :  { %3728 = vrot.lane.b32.xlu1 %v8973_v46, %s8277_s23  ;;  %v6436_v46 = vld [vmem:[%s9474_s2 + $0xa0] sm:$0xff] }
0x4f35   :  { %3950 = vrot.lane.b32.xlu1 %v3948_v6, %s8277_s23 }
0x4f39   :  { %3290 = vrot.lane.b32.xlu1 %v8907_v54, %s8277_s23  ;;  %v6437_v54 = vld [vmem:[%s9474_s2 + $0xa8] sm:$0xff] }
0x4f3a   :  { %v7711_v59 = vpack.c.bf16 %v6437_v54, %v6436_v46 }
0x4f3c   :  { %7712 = vmatprep.subr.bf16.mxu0 %v7711_v59 }
0x4f3d   :  { %3512 = vrot.lane.b32.xlu1 %v8946_v44, %s8277_s23  ;;  %v6444_v44 = vld [vmem:[%s9474_s2 + $0xe0] sm:$0xff]  ;;  %7714 = vmatpush3.bf16.msra.mxu0 %v7711_v59 }
0x4f3e   :  { %7716 = vmatprep.subr.bf16.mxu0 %v7715_v36 }
0x4f41   :  { %2630 = vrot.lane.b32.xlu1 %v8811_v51, %s8277_s23  ;;  %v6445_v51 = vld [vmem:[%s9474_s2 + $0xe8] sm:$0xff]  ;;  %7718 = vmatpush3.bf16.msra.mxu0 %v7715_v36 }
0x4f42   :  { %7720 = vmatprep.subr.bf16.mxu0 %v7719_v9 }
0x4f45   :  { %2957 = vrot.lane.b32.xlu1 %v8854_v7, %s8277_s23  ;;  %v7727_v7 = vpack.c.bf16 %v6445_v51, %v6444_v44 }
0x4f47   :  { %7728 = vmatprep.subr.bf16.mxu1 %v7727_v7 }
0x4f48   :  { %7730 = vmatpush3.bf16.msra.mxu1 %v7727_v7 }
0x4f49   :  { %3179 = vrot.lane.b32.xlu1 %v3177_v56, %s8277_s23  ;;  %7732 = vmatprep.subr.bf16.mxu1 %v7731_v41 }
0x4f4c   :  { %7734 = vmatpush3.bf16.msra.mxu1 %v7731_v41 }
0x4f4d   :  { %7736 = vmatprep.subr.bf16.mxu1 %v7735_v20 }
0x4f9f   :  { %v4054_v15 = vpop.permute.xlu1 %4053 }
0x4fa0   :  { %v4056_v2 = vmul.f32 %v8118_v27, %v4054_v15 }
0x4fa2   :  { %4058 = vrot.lane.b32.xlu0 %v4056_v2, %s8277_s23 }
0x4fa3   :  { %v3729_v17 = vpop.permute.xlu1 %3728 }
0x4fa4   :  { %3731 = vst.msk [vmem:[#allocation3] sm:$0xc0] %vm571_vm4, %v3729_v17 }
0x4fa6   :  { %2519 = vrot.lane.b32.xlu0 %v8796_v38, %s8277_s23 }
0x4fa7   :  { %v3951_v18 = vpop.permute.xlu1 %3950 }
0x4fa8   :  { %3953 = vst.msk [vmem:[#allocation3] sm:$0xc] %vm347_vm5, %v3951_v18 }
0x4faa   :  { %2741 = vrot.lane.b32.xlu0 %v8826_v60, %s8277_s23 }
0x4fab   :  { %v3291_v23 = vpop.permute.xlu1 %3290 }
0x4fac   :  { %3293 = vst.msk [vmem:[#allocation3 + $0x8] sm:$0xc0] %vm571_vm4, %v3291_v23 }
0x4fae   :  { %3068 = vrot.lane.b32.xlu0 %v8903_v52, %s8277_s23  ;;  %v6434_v52 = vld [vmem:[%s9474_s2 + $0x90] sm:$0xff] }
0x4faf   :  { %v3513_v24 = vpop.permute.xlu1 %3512  ;;  %v7723_v62 = vpack.c.bf16 %v6435_v29, %v6434_v52 }
0x4fb0   :  { %3515 = vst.msk [vmem:[#allocation3 + $0x8] sm:$0xc] %vm347_vm5, %v3513_v24 }
0x4fb3   :  { %v2631_v25 = vpop.permute.xlu1 %2630 }
0x4fb4   :  { %2633 = vst.msk [vmem:[#allocation2] sm:$0x30] %vm459_vm3, %v2631_v25 }
0x4fb7   :  { %v2958_v6 = vpop.permute.xlu1 %2957  ;;  %v4065_v5 = vld [vmem:[#allocation3 + $0x8] sm:$0xff] }
0x4fb8   :  { %2960 = vst.msk [vmem:[#allocation2 + $0x8] sm:$0xc] %vm347_vm5, %v2958_v6 }
0x4fbb   :  { %v3180_v38 = vpop.permute.xlu1 %3179 }
0x4fbc   :  { %3182 = vst.msk [vmem:[#allocation2 + $0x8] sm:$0xc0] %vm571_vm4, %v3180_v38 }
0x5014   :  { %v4059_v28 = vpop.permute.xlu0 %4058 }
0x5015   :  { %4061 = vst.msk [vmem:[#allocation3] sm:$0x3] %vm238_vm2, %v4059_v28 }
0x5018   :  { %v2520_v60 = vpop.permute.xlu0 %2519 }
0x5019   :  { %2522 = vst.msk [vmem:[#allocation2] sm:$0xc] %vm347_vm5, %v2520_v60 }
0x501c   :  { %v2742_v32 = vpop.permute.xlu0 %2741  ;;  %v4064_v33 = vld [vmem:[#allocation3] sm:$0xff] }
0x501d   :  { %2744 = vst.msk [vmem:[#allocation2] sm:$0xc0] %vm571_vm4, %v2742_v32  ;;  %7237 = vmatprep.mubr.msk.f32.mxu0 %vm54_vm0, %v4064_v33  ;;  %7259 = vmatprep.mubr.msk.f32.mxu1 %vm54_vm0, %v4064_v33 }
0x501e   :  { %7238 = vmatmul.mubr.msk.f32.vlgmr.msra.gmra.mrb[36].mxu0 %vm54_vm0, %v4065_v5  ;;  %7260 = vmatmul.mubr.msk.f32.vlgmr.msra.gmra.mrb[36].mxu1 %vm54_vm0, %v4065_v5 }
0x501f   :  { %7722 = vmatpush3.bf16.msra.mxu0 %v7719_v9  ;;  %7738 = vmatpush3.bf16.msra.mxu1 %v7735_v20 }
0x5020   :  { %v3069_v3 = vpop.permute.xlu0 %3068  ;;  %7724 = vmatprep.subr.bf16.mxu0 %v7723_v62  ;;  %7740 = vmatprep.subr.bf16.mxu1 %v7739_v10 }
0x5021   :  { %3071 = vst.msk [vmem:[#allocation2 + $0x8] sm:$0x30] %vm459_vm3, %v3069_v3 }
0x5023   :  { %7726 = vmatpush3.bf16.msra.mxu0 %v7723_v62  ;;  %7742 = vmatpush3.bf16.msra.mxu1 %v7739_v10 }
0x5024   :  { %v4062_v22 = vld [vmem:[#allocation2] sm:$0xff]  ;;  %7743 = vmatprep.subr.bf16.mxu0 %v8273_v4  ;;  %7749 = vmatprep.subr.bf16.mxu1 %v8273_v4 }
0x5025   :  { %7248 = vmatprep.mubr.msk.f32.mxu0 %vm54_vm0, %v4062_v22  ;;  %7270 = vmatprep.mubr.msk.f32.mxu1 %vm54_vm0, %v4062_v22 }
0x5028   :  { %v4063_v42 = vld [vmem:[#allocation2 + $0x8] sm:$0xff] }
0x5029   :  { %7249 = vmatmul.mubr.msk.f32.vlgmr.msra.gmra.mrb[36].mxu0 %vm54_vm0, %v4063_v42  ;;  %7271 = vmatmul.mubr.msk.f32.vlgmr.msra.gmra.mrb[36].mxu1 %vm54_vm0, %v4063_v42 }
0x502a   :  { %7745 = vmatpush3.bf16.msra.mxu0 %v9102_v37  ;;  %7281 = vmatprep.mubr.msk.f32.mxu0 %vm8274_vm1, %v8275_v13 }
0x502b   :  { %7746 = vmatprep.subr.bf16.mxu0 %v8273_v4  ;;  %7751 = vmatpush3.bf16.msra.mxu1 %v9102_v37 }
0x502c   :  { %7752 = vmatprep.subr.bf16.mxu1 %v8273_v4  ;;  %7292 = vmatprep.mubr.msk.f32.mxu1 %vm8274_vm1, %v8275_v13 }
0x502e   :  { %7748 = vmatpush3.bf16.msra.mxu0 %v9113_v55 }
0x502f   :  { %7754 = vmatpush3.bf16.msra.mxu1 %v9113_v55  ;;  %7755 = vmatprep.subr.bf16.mxu0 %v8273_v4 }
0x5030   :  { %7761 = vmatprep.subr.bf16.mxu1 %v8273_v4 }
0x5031   :  { %7282 = vmatmul.mubr.f32.vlgmr.msra.gmra.mrb[38].mxu0 %v8275_v13 }
0x5032   :  { %7757 = vmatpush3.bf16.msra.mxu0 %v9102_v37  ;;  %7303 = vmatprep.mubr.msk.f32.mxu0 %vm8274_vm1, %v8275_v13 }
0x5033   :  { %7758 = vmatprep.subr.bf16.mxu0 %v8273_v4 }
0x5036   :  { %7760 = vmatpush3.bf16.msra.mxu0 %v9113_v55 }
0x5037   :  { %7767 = vmatprep.subr.bf16.mxu0 %v8273_v4 }
0x50fc   :  { %v7250_v43 = vpop.f32.mrb[36].mxu0  ;;  %v9141_v45 = vpop.f32.mrb[36].mxu1 }
0x50fd   :  { %v9143_v47 = vadd.f32 %v7250_v43, %v6466_v50  ;;  %v4236_v21 = vpop.f32.mrb[37].mxu0  ;;  %v4386_v27 = vpop.f32.mrb[37].mxu1 }
0x50fe   :  { %v9146_v48 = vadd.f32 %v9139_v16, %v4386_v27  ;;  %v9148_v57 = vadd.f32 %v6466_v50, %v4236_v21 }
0x5104   :  { %v4481_v49 = vpop.f32.mrb[38].mxu0 }
0x5105   :  { %v4485_v58 = vadd.f32 %v4481_v49, %v9148_v57  ;;  %v7283_v19 = vpop.f32.mrb[39].mxu0 }
0x5107   :  { %8121 = vtanh.f32 %v4485_v58  ;;  %v6467_v61 = vmul.f32 -1.442695, %v4485_v58 }
0x5109   :  { %8123 = vpow2.f32 %v6467_v61 }
0x5111   :  { %v8122_v53 = vpop.eup %8121 }
0x5112   :  { %4495 = vrot.lane.b32.xlu0 %v8122_v53, %s8276_s22 }
0x5113   :  { %v8124_v56 = vpop.eup %8123 }
0x5114   :  { %v4489_v46 = vadd.f32 1.0, %v8124_v56 }
0x5116   :  { %8125 = vrcp.f32 %v4489_v46 }
0x5120   :  { %v8126_v54 = vpop.eup %8125 }
0x5121   :  { %v4493_v51 = vmul.f32 0.0, %v8126_v54 }
0x5184   :  { %v4496_v44 = vpop.permute.xlu0 %4495 }
0x5185   :  { %v4498_v59 = vmul.f32 %v8126_v54, %v4496_v44 }
0x5187   :  { %4500 = vrot.lane.b32.xlu1 %v4498_v59, %s8277_s23 }
0x51f9   :  { %v4501_v7 = vpop.permute.xlu1 %4500 }
0x51fa   :  { %v4503_v63 = vadd.f32 %v4501_v7, %v4493_v51 }
0x51fc   :  { %8127 = vtanh.f32 %v4503_v63  ;;  %v4599_v23 = vrot.slane %v4503_v63, 6 }
0x5206   :  { %v8128_v1 = vpop.eup %8127 }
0x5207   :  { %4506 = vrot.lane.b32.xlu0 %v8128_v1, %s8276_s22 }
0x5279   :  { %v4507_v0 = vpop.permute.xlu0 %4506 }
0x527a   :  { %v4509_v36 = vmul.f32 %v8126_v54, %v4507_v0 }
0x527c   :  { %4511 = vrot.lane.b32.xlu1 %v4509_v36, %s8277_s23 }
0x52ee   :  { %v4512_v8 = vpop.permute.xlu1 %4511 }
0x52ef   :  { %4514 = vst.msk [vmem:[#allocation2] sm:$0x3] %vm238_vm2, %v4512_v8  ;;  %7293 = vmatmul.mubr.msk.f32.vlgmr.msra.gmra.mrb[38].mxu1 %vm54_vm0, %v4512_v8 }
0x52f0   :  { %7763 = vmatpush3.bf16.msra.mxu1 %v9102_v37  ;;  %7314 = vmatprep.mubr.msk.f32.mxu1 %vm8274_vm1, %v8275_v13 }
0x52f1   :  { %7764 = vmatprep.subr.bf16.mxu1 %v8273_v4 }
0x52f4   :  { %7766 = vmatpush3.bf16.msra.mxu1 %v9113_v55 }
0x52f5   :  { %7773 = vmatprep.subr.bf16.mxu1 %v8273_v4 }
0x53c2   :  { %v4583_v41 = vpop.f32.mrb[38].mxu1 }
0x53c3   :  { %v4588_v26 = vrot.slane %v4583_v41, 6  ;;  %v7294_v14 = vpop.f32.mrb[39].mxu1 }
0x53c5   :  { %v4590_v9 = vadd.f32 %v4588_v26, %v9148_v57 }
0x53c7   :  { %8129 = vtanh.f32 %v4590_v9  ;;  %v6469_v12 = vmul.f32 -1.442695, %v4590_v9 }
0x53c9   :  { %8131 = vpow2.f32 %v6469_v12 }
0x53d1   :  { %v8130_v11 = vpop.eup %8129 }
0x53d2   :  { %4603 = vrot.lane.b32.xlu0 %v8130_v11, %s8276_s22 }
0x53d3   :  { %v8132_v15 = vpop.eup %8131 }
0x53d4   :  { %v4594_v20 = vadd.f32 1.0, %v8132_v15 }
0x53d6   :  { %8133 = vrcp.f32 %v4594_v20 }
0x53e0   :  { %v8134_v2 = vpop.eup %8133 }
0x53e1   :  { %v4601_v24 = vmul.f32 %v8134_v2, %v4599_v23 }
0x5444   :  { %v4604_v17 = vpop.permute.xlu0 %4603 }
0x5445   :  { %v4606_v18 = vmul.f32 %v8134_v2, %v4604_v17 }
0x5447   :  { %4608 = vrot.lane.b32.xlu1 %v4606_v18, %s8277_s23 }
0x54b9   :  { %v4609_v25 = vpop.permute.xlu1 %4608 }
0x54ba   :  { %v4611_v6 = vadd.f32 %v4609_v25, %v4601_v24 }
0x54bc   :  { %8135 = vtanh.f32 %v4611_v6  ;;  %v4710_v39 = vrot.slane %v4611_v6, 6 }
0x54c6   :  { %v8136_v38 = vpop.eup %8135 }
0x54c7   :  { %4614 = vrot.lane.b32.xlu0 %v8136_v38, %s8276_s22 }
0x5539   :  { %v4615_v28 = vpop.permute.xlu0 %4614 }
0x553a   :  { %v9167_v60 = vmul.f32 %v8134_v2, %v4615_v28 }
0x553c   :  { %v4623_v52 = vrot.slane %v9167_v60, 2 }
0x553e   :  { %4624 = vrot.lane.b32.xlu1 %v4623_v52, %s8277_s23 }
0x55b0   :  { %v4625_v29 = vpop.permute.xlu1 %4624 }
0x55b1   :  { %7304 = vmatmul.mubr.msk.f32.vlgmr.msra.gmra.mrb[40].mxu0 %vm54_vm0, %v4625_v29 }
0x55b2   :  { %7769 = vmatpush3.bf16.msra.mxu0 %v9102_v37  ;;  %7325 = vmatprep.mubr.msk.f32.mxu0 %vm8274_vm1, %v8275_v13 }
0x55b3   :  { %7770 = vmatprep.subr.bf16.mxu0 %v8273_v4 }
0x55b6   :  { %7772 = vmatpush3.bf16.msra.mxu0 %v9113_v55 }
0x55b7   :  { %7779 = vmatprep.subr.bf16.mxu0 %v8273_v4 }
0x5684   :  { %v4694_v30 = vpop.f32.mrb[40].mxu0 }
0x5685   :  { %v4699_v31 = vrot.slane %v4694_v30, 4  ;;  %v7305_v32 = vpop.f32.mrb[41].mxu0 }
0x5687   :  { %v4701_v33 = vadd.f32 %v4699_v31, %v9148_v57 }
0x5689   :  { %8137 = vtanh.f32 %v4701_v33  ;;  %v6471_v10 = vmul.f32 -1.442695, %v4701_v33 }
0x568b   :  { %8139 = vpow2.f32 %v6471_v10 }
0x5693   :  { %v8138_v62 = vpop.eup %8137 }
0x5694   :  { %4714 = vrot.lane.b32.xlu0 %v8138_v62, %s8276_s22 }
0x5695   :  { %v8140_v5 = vpop.eup %8139 }
0x5696   :  { %v4705_v3 = vadd.f32 1.0, %v8140_v5 }
0x5698   :  { %8141 = vrcp.f32 %v4705_v3 }
0x56a2   :  { %v8142_v34 = vpop.eup %8141 }
0x56a3   :  { %v4712_v40 = vmul.f32 %v8142_v34, %v4710_v39 }
0x5706   :  { %v4715_v35 = vpop.permute.xlu0 %4714 }
0x5707   :  { %v4717_v22 = vmul.f32 %v8142_v34, %v4715_v35 }
0x5709   :  { %4719 = vrot.lane.b32.xlu1 %v4717_v22, %s8277_s23 }
0x577b   :  { %v4720_v42 = vpop.permute.xlu1 %4719 }
0x577c   :  { %v4722_v50 = vadd.f32 %v4720_v42, %v4712_v40 }
0x577e   :  { %8143 = vtanh.f32 %v4722_v50  ;;  %v4821_v1 = vrot.slane %v4722_v50, 6 }
0x5788   :  { %v8144_v43 = vpop.eup %8143 }
0x5789   :  { %4725 = vrot.lane.b32.xlu0 %v8144_v43, %s8276_s22 }
0x57fb   :  { %v4726_v21 = vpop.permute.xlu0 %4725 }
0x57fc   :  { %v9182_v27 = vmul.f32 %v8142_v34, %v4726_v21 }
0x57fe   :  { %v4734_v49 = vrot.slane %v9182_v27, 4 }
0x5800   :  { %4735 = vrot.lane.b32.xlu1 %v4734_v49, %s8277_s23 }
0x5872   :  { %v4736_v58 = vpop.permute.xlu1 %4735 }
0x5873   :  { %7315 = vmatmul.mubr.msk.f32.vlgmr.msra.gmra.mrb[40].mxu1 %vm54_vm0, %v4736_v58 }
0x5874   :  { %7775 = vmatpush3.bf16.msra.mxu1 %v9102_v37  ;;  %7336 = vmatprep.mubr.msk.f32.mxu1 %vm8274_vm1, %v8275_v13 }
0x5875   :  { %7776 = vmatprep.subr.bf16.mxu1 %v8273_v4 }
0x5878   :  { %7778 = vmatpush3.bf16.msra.mxu1 %v9113_v55 }
0x5879   :  { %7785 = vmatprep.subr.bf16.mxu1 %v8273_v4 }
0x5946   :  { %v4805_v19 = vpop.f32.mrb[40].mxu1 }
0x5947   :  { %v4810_v53 = vrot.slane %v4805_v19, 2  ;;  %v7316_v61 = vpop.f32.mrb[41].mxu1 }
0x5948   :  { %v6463_v61 = vld [vmem:[%s9475_s3 + $0xa8] sm:$0xff] }
0x5949   :  { %v4812_v56 = vadd.f32 %v4810_v53, %v9148_v57  ;;  %v6462_v53 = vld [vmem:[%s9475_s3 + $0xa0] sm:$0xff] }
0x594b   :  { %8145 = vtanh.f32 %v4812_v56  ;;  %v6473_v54 = vmul.f32 -1.442695, %v4812_v56  ;;  %v9235_v56 = vpack.c.bf16 %v6463_v61, %v6462_v53 }
0x594d   :  { %8147 = vpow2.f32 %v6473_v54  ;;  %v6465_v54 = vld [vmem:[%s9475_s3 + $0xb8] sm:$0xff] }
0x5955   :  { %v8146_v46 = vpop.eup %8145 }
0x5956   :  { %4825 = vrot.lane.b32.xlu0 %v8146_v46, %s8276_s22  ;;  %v6464_v46 = vld [vmem:[%s9475_s3 + $0xb0] sm:$0xff] }
0x5957   :  { %v8148_v44 = vpop.eup %8147 }
0x5958   :  { %v4816_v59 = vadd.f32 1.0, %v8148_v44 }
0x595a   :  { %8149 = vrcp.f32 %v4816_v59  ;;  %v9245_v59 = vpack.c.bf16 %v6465_v54, %v6464_v46 }
0x5964   :  { %v8150_v51 = vpop.eup %8149 }
0x5965   :  { %v4823_v0 = vmul.f32 %v8150_v51, %v4821_v1 }
0x59c8   :  { %v4826_v7 = vpop.permute.xlu0 %4825 }
0x59c9   :  { %v4828_v63 = vmul.f32 %v8150_v51, %v4826_v7 }
0x59cb   :  { %4830 = vrot.lane.b32.xlu1 %v4828_v63, %s8277_s23 }
0x5a3d   :  { %v4831_v36 = vpop.permute.xlu1 %4830 }
0x5a3e   :  { %v4833_v8 = vadd.f32 %v4831_v36, %v4823_v0  ;;  %v9262_v36 = vadd.f32 %v9141_v45, %v9139_v16 }
0x5a40   :  { %8151 = vtanh.f32 %v4833_v8  ;;  %v4929_v6 = vrot.slane %v4833_v8, 6 }
0x5a4a   :  { %v8152_v57 = vpop.eup %8151 }
0x5a4b   :  { %4836 = vrot.lane.b32.xlu0 %v8152_v57, %s8276_s22 }
0x5abd   :  { %v4837_v41 = vpop.permute.xlu0 %4836 }
0x5abe   :  { %v9197_v26 = vmul.f32 %v8150_v51, %v4837_v41 }
0x5ac0   :  { %v4845_v14 = vrot.slane %v9197_v26, 6 }
0x5ac2   :  { %4846 = vrot.lane.b32.xlu1 %v4845_v14, %s8277_s23 }
0x5b34   :  { %v4847_v9 = vpop.permute.xlu1 %4846 }
0x5b35   :  { %7326 = vmatmul.mubr.msk.f32.vlgmr.msra.gmra.mrb[42].mxu0 %vm54_vm0, %v4847_v9 }
0x5b36   :  { %7781 = vmatpush3.bf16.msra.mxu0 %v9102_v37  ;;  %7347 = vmatprep.mubr.msk.f32.mxu0 %vm8274_vm1, %v8275_v13 }
0x5b37   :  { %7782 = vmatprep.subr.bf16.mxu0 %v8273_v4 }
0x5b3a   :  { %7784 = vmatpush3.bf16.msra.mxu0 %v9113_v55 }
0x5b3b   :  { %7791 = vmatprep.subr.bf16.mxu0 %v8273_v4 }
0x5c08   :  { %v4916_v11 = vpop.f32.mrb[42].mxu0 }
0x5c09   :  { %v4920_v12 = vadd.f32 %v4916_v11, %v9143_v47  ;;  %v7327_v15 = vpop.f32.mrb[43].mxu0 }
0x5c0b   :  { %8153 = vtanh.f32 %v4920_v12  ;;  %v6475_v2 = vmul.f32 -1.442695, %v4920_v12 }
0x5c0d   :  { %8155 = vpow2.f32 %v6475_v2 }
0x5c15   :  { %v8154_v20 = vpop.eup %8153 }
0x5c16   :  { %4933 = vrot.lane.b32.xlu0 %v8154_v20, %s8276_s22 }
0x5c17   :  { %v8156_v17 = vpop.eup %8155 }
0x5c18   :  { %v4924_v18 = vadd.f32 1.0, %v8156_v17 }
0x5c1a   :  { %8157 = vrcp.f32 %v4924_v18 }
0x5c24   :  { %v8158_v23 = vpop.eup %8157 }
0x5c25   :  { %v4931_v38 = vmul.f32 %v8158_v23, %v4929_v6 }
0x5c88   :  { %v4934_v24 = vpop.permute.xlu0 %4933 }
0x5c89   :  { %v4936_v25 = vmul.f32 %v8158_v23, %v4934_v24 }
0x5c8b   :  { %4938 = vrot.lane.b32.xlu1 %v4936_v25, %s8277_s23 }
0x5cfd   :  { %v4939_v28 = vpop.permute.xlu1 %4938 }
0x5cfe   :  { %v4941_v52 = vadd.f32 %v4939_v28, %v4931_v38 }
0x5d00   :  { %8159 = vtanh.f32 %v4941_v52 }
0x5d0a   :  { %v8160_v29 = vpop.eup %8159 }
0x5d0b   :  { %4944 = vrot.lane.b32.xlu0 %v8160_v29, %s8276_s22 }
0x5d7d   :  { %v4945_v30 = vpop.permute.xlu0 %4944 }
0x5d7e   :  { %v4947_v31 = vmul.f32 %v8158_v23, %v4945_v30 }
0x5d80   :  { %4949 = vrot.lane.b32.xlu1 %v4947_v31, %s8277_s23 }
0x5df2   :  { %v4950_v32 = vpop.permute.xlu1 %4949 }
0x5df3   :  { %4952 = vst.msk [vmem:[#allocation2 + $0x8] sm:$0x3] %vm238_vm2, %v4950_v32  ;;  %7337 = vmatmul.mubr.msk.f32.vlgmr.msra.gmra.mrb[42].mxu1 %vm54_vm0, %v4950_v32 }
0x5df4   :  { %7787 = vmatpush3.bf16.msra.mxu1 %v9102_v37  ;;  %7358 = vmatprep.mubr.msk.f32.mxu1 %vm8274_vm1, %v8275_v13 }
0x5df5   :  { %7788 = vmatprep.subr.bf16.mxu1 %v8273_v4 }
0x5df8   :  { %7790 = vmatpush3.bf16.msra.mxu1 %v9113_v55  ;;  %v5037_v55 = vrot.slane %v4941_v52, 6 }
0x5df9   :  { %7797 = vmatprep.subr.bf16.mxu1 %v8273_v4 }
0x5ec6   :  { %v5021_v33 = vpop.f32.mrb[42].mxu1 }
0x5ec7   :  { %v5026_v62 = vrot.slane %v5021_v33, 6  ;;  %v7338_v10 = vpop.f32.mrb[43].mxu1 }
0x5ec9   :  { %v5028_v5 = vadd.f32 %v5026_v62, %v9143_v47 }
0x5ecb   :  { %8161 = vtanh.f32 %v5028_v5  ;;  %v6477_v34 = vmul.f32 -1.442695, %v5028_v5 }
0x5ecd   :  { %8163 = vpow2.f32 %v6477_v34 }
0x5ed5   :  { %v8162_v3 = vpop.eup %8161 }
0x5ed6   :  { %5041 = vrot.lane.b32.xlu0 %v8162_v3, %s8276_s22 }
0x5ed7   :  { %v8164_v37 = vpop.eup %8163 }
0x5ed8   :  { %v5032_v35 = vadd.f32 1.0, %v8164_v37 }
0x5eda   :  { %8165 = vrcp.f32 %v5032_v35 }
0x5ee4   :  { %v8166_v22 = vpop.eup %8165 }
0x5ee5   :  { %v5039_v42 = vmul.f32 %v8166_v22, %v5037_v55 }
0x5f48   :  { %v5042_v39 = vpop.permute.xlu0 %5041 }
0x5f49   :  { %v5044_v40 = vmul.f32 %v8166_v22, %v5042_v39 }
0x5f4b   :  { %5046 = vrot.lane.b32.xlu1 %v5044_v40, %s8277_s23 }
0x5fbd   :  { %v5047_v50 = vpop.permute.xlu1 %5046 }
0x5fbe   :  { %v5049_v43 = vadd.f32 %v5047_v50, %v5039_v42 }
0x5fc0   :  { %8167 = vtanh.f32 %v5049_v43  ;;  %v5148_v6 = vrot.slane %v5049_v43, 6 }
0x5fca   :  { %v8168_v21 = vpop.eup %8167 }
0x5fcb   :  { %5052 = vrot.lane.b32.xlu0 %v8168_v21, %s8276_s22 }
0x603d   :  { %v5053_v49 = vpop.permute.xlu0 %5052 }
0x603e   :  { %v9225_v58 = vmul.f32 %v8166_v22, %v5053_v49 }
0x6040   :  { %v5061_v19 = vrot.slane %v9225_v58, 2 }
0x6042   :  { %5062 = vrot.lane.b32.xlu1 %v5061_v19, %s8277_s23 }
0x60b4   :  { %v5063_v44 = vpop.permute.xlu1 %5062 }
0x60b5   :  { %7348 = vmatmul.mubr.msk.f32.vlgmr.msra.gmra.mrb[44].mxu0 %vm54_vm0, %v5063_v44 }
0x60b6   :  { %7793 = vmatpush3.bf16.msra.mxu0 %v9235_v56  ;;  %7369 = vmatprep.mubr.msk.f32.mxu0 %vm8274_vm1, %v8275_v13 }
0x60b7   :  { %7794 = vmatprep.subr.bf16.mxu0 %v8273_v4 }
0x60ba   :  { %7796 = vmatpush3.bf16.msra.mxu0 %v9245_v59 }
0x60bb   :  { %7803 = vmatprep.subr.bf16.mxu0 %v8273_v4 }
0x60bd   :  { %7370 = vmatmul.mubr.f32.vlgmr.msra.gmra.mrb[46].mxu0 %v8275_v13 }
0x60be   :  { %7805 = vmatpush3.bf16.msra.mxu0 %v9235_v56  ;;  %7391 = vmatprep.mubr.msk.f32.mxu0 %vm8274_vm1, %v8275_v13 }
0x60bf   :  { %7806 = vmatprep.subr.bf16.mxu0 %v8273_v4 }
0x60c2   :  { %7808 = vmatpush3.bf16.msra.mxu0 %v9245_v59 }
0x60c3   :  { %7815 = vmatprep.subr.bf16.mxu0 %v8273_v4 }
0x6188   :  { %v5132_v51 = vpop.f32.mrb[44].mxu0 }
0x6189   :  { %v5137_v7 = vrot.slane %v5132_v51, 4  ;;  %v7349_v63 = vpop.f32.mrb[45].mxu0 }
0x618b   :  { %v5139_v1 = vadd.f32 %v5137_v7, %v9143_v47 }
0x618d   :  { %8169 = vtanh.f32 %v5139_v1  ;;  %v6479_v11 = vmul.f32 -1.442695, %v5139_v1 }
0x6190   :  { %v5357_v0 = vpop.f32.mrb[46].mxu0 }
0x6191   :  { %v5362_v8 = vrot.slane %v5357_v0, 2  ;;  %v7371_v57 = vpop.f32.mrb[47].mxu0 }
0x6193   :  { %v5364_v41 = vadd.f32 %v5362_v8, %v9262_v36 }
0x6195   :  { %8171 = vtanh.f32 %v5364_v41  ;;  %v6483_v12 = vmul.f32 -1.442695, %v5364_v41 }
0x6196   :  { %8173 = vpow2.f32 %v6479_v11 }
0x6197   :  { %v8170_v14 = vpop.eup %8169  ;;  %8175 = vpow2.f32 %v6483_v12 }
0x6198   :  { %5152 = vrot.lane.b32.xlu0 %v8170_v14, %s8276_s22 }
0x619f   :  { %v8172_v9 = vpop.eup %8171 }
0x61a0   :  { %5374 = vrot.lane.b32.xlu1 %v8172_v9, %s8276_s22  ;;  %v8174_v15 = vpop.eup %8173 }
0x61a1   :  { %v5143_v20 = vadd.f32 1.0, %v8174_v15  ;;  %v8176_v16 = vpop.eup %8175 }
0x61a2   :  { %v5368_v45 = vadd.f32 1.0, %v8176_v16 }
0x61a3   :  { %8177 = vrcp.f32 %v5143_v20 }
0x61a4   :  { %8179 = vrcp.f32 %v5368_v45 }
0x61ad   :  { %v8178_v2 = vpop.eup %8177 }
0x61ae   :  { %v8180_v23 = vpop.eup %8179  ;;  %v5150_v38 = vmul.f32 %v8178_v2, %v5148_v6 }
0x61af   :  { %v5372_v29 = vmul.f32 0.0, %v8180_v23 }
0x620a   :  { %v5153_v17 = vpop.permute.xlu0 %5152 }
0x620b   :  { %v5155_v18 = vmul.f32 %v8178_v2, %v5153_v17 }
0x620d   :  { %5157 = vrot.lane.b32.xlu0 %v5155_v18, %s8277_s23 }
0x6212   :  { %v5375_v24 = vpop.permute.xlu1 %5374 }
0x6213   :  { %v5377_v25 = vmul.f32 %v8180_v23, %v5375_v24 }
0x6215   :  { %5379 = vrot.lane.b32.xlu1 %v5377_v25, %s8277_s23 }
0x627f   :  { %v5158_v28 = vpop.permute.xlu0 %5157 }
0x6280   :  { %v9269_v52 = vadd.f32 %v5158_v28, %v5150_v38 }
0x6282   :  { %8181 = vtanh.f32 %v9269_v52 }
0x6287   :  { %v5380_v30 = vpop.permute.xlu1 %5379 }
0x6288   :  { %v5382_v31 = vadd.f32 %v5380_v30, %v5372_v29 }
0x628a   :  { %8183 = vtanh.f32 %v5382_v31  ;;  %v5481_v44 = vrot.slane %v5382_v31, 2 }
0x628c   :  { %v8182_v32 = vpop.eup %8181 }
0x628d   :  { %5163 = vrot.lane.b32.xlu0 %v8182_v32, %s8276_s22 }
0x6294   :  { %v8184_v33 = vpop.eup %8183 }
0x6295   :  { %5385 = vrot.lane.b32.xlu1 %v8184_v33, %s8276_s22 }
0x62ff   :  { %v5164_v62 = vpop.permute.xlu0 %5163 }
0x6300   :  { %v9274_v10 = vmul.f32 %v8178_v2, %v5164_v62 }
0x6302   :  { %v5172_v5 = vrot.slane %v9274_v10, 4 }
0x6304   :  { %5173 = vrot.lane.b32.xlu0 %v5172_v5, %s8277_s23 }
0x6307   :  { %v5386_v3 = vpop.permute.xlu1 %5385 }
0x6308   :  { %v9278_v34 = vmul.f32 %v8180_v23, %v5386_v3 }
0x630a   :  { %v5394_v37 = vrot.slane %v9278_v34, 6 }
0x630c   :  { %5395 = vrot.lane.b32.xlu1 %v5394_v37, %s8277_s23 }
0x6376   :  { %v5174_v35 = vpop.permute.xlu0 %5173 }
0x6377   :  { %7359 = vmatmul.mubr.msk.f32.vlgmr.msra.gmra.mrb[44].mxu1 %vm54_vm0, %v5174_v35 }
0x6378   :  { %7799 = vmatpush3.bf16.msra.mxu1 %v9235_v56  ;;  %7380 = vmatprep.mubr.msk.f32.mxu1 %vm8274_vm1, %v8275_v13 }
0x6379   :  { %7800 = vmatprep.subr.bf16.mxu1 %v8273_v4 }
0x637c   :  { %7802 = vmatpush3.bf16.msra.mxu1 %v9245_v59 }
0x637d   :  { %7809 = vmatprep.subr.bf16.mxu1 %v8273_v4 }
0x637e   :  { %v5396_v22 = vpop.permute.xlu1 %5395 }
0x637f   :  { %7381 = vmatmul.mubr.msk.f32.vlgmr.msra.gmra.mrb[46].mxu1 %vm54_vm0, %v5396_v22 }
0x6380   :  { %7811 = vmatpush3.bf16.msra.mxu1 %v9235_v56  ;;  %7402 = vmatprep.mubr.msk.f32.mxu1 %vm8274_vm1, %v8275_v13 }
0x6381   :  { %7812 = vmatprep.subr.bf16.mxu1 %v8273_v4 }
0x6384   :  { %7814 = vmatpush3.bf16.msra.mxu1 %v9245_v59 }
0x6385   :  { %7821 = vmatprep.subr.bf16.mxu1 %v8273_v4 }
0x644a   :  { %v9296_v39 = vpop.f32.mrb[44].mxu1 }
0x644b   :  { %v7360_v40 = vpop.f32.mrb[45].mxu1 }
0x6452   :  { %v5465_v55 = vpop.f32.mrb[46].mxu1 }
0x6453   :  { %v5470_v42 = vrot.slane %v5465_v55, 4  ;;  %v7382_v50 = vpop.f32.mrb[47].mxu1 }
0x6455   :  { %v5472_v43 = vadd.f32 %v5470_v42, %v9262_v36 }
0x6457   :  { %8185 = vtanh.f32 %v5472_v43  ;;  %v6485_v49 = vmul.f32 -1.442695, %v5472_v43 }
0x6459   :  { %8187 = vpow2.f32 %v6485_v49 }
0x6461   :  { %v8186_v21 = vpop.eup %8185 }
0x6462   :  { %5485 = vrot.lane.b32.xlu0 %v8186_v21, %s8276_s22 }
0x6463   :  { %v8188_v19 = vpop.eup %8187 }
0x6464   :  { %v5476_v53 = vadd.f32 1.0, %v8188_v19 }
0x6466   :  { %8189 = vrcp.f32 %v5476_v53 }
0x6470   :  { %v8190_v61 = vpop.eup %8189 }
0x6471   :  { %v5483_v51 = vmul.f32 %v8190_v61, %v5481_v44 }
0x64d4   :  { %v5486_v46 = vpop.permute.xlu0 %5485 }
0x64d5   :  { %v5488_v54 = vmul.f32 %v8190_v61, %v5486_v46 }
0x64d7   :  { %5490 = vrot.lane.b32.xlu1 %v5488_v54, %s8277_s23 }
0x6549   :  { %v5491_v7 = vpop.permute.xlu1 %5490 }
0x654a   :  { %v5493_v63 = vadd.f32 %v5491_v7, %v5483_v51 }
0x654c   :  { %8191 = vtanh.f32 %v5493_v63  ;;  %v5592_v23 = vrot.slane %v5493_v63, 2 }
0x6556   :  { %v8192_v1 = vpop.eup %8191 }
0x6557   :  { %5496 = vrot.lane.b32.xlu0 %v8192_v1, %s8276_s22 }
0x65c9   :  { %v5497_v0 = vpop.permute.xlu0 %5496 }
0x65ca   :  { %v9302_v8 = vmul.f32 %v8190_v61, %v5497_v0 }
0x65cc   :  { %v5505_v57 = vrot.slane %v9302_v8, 4 }
0x65ce   :  { %5506 = vrot.lane.b32.xlu1 %v5505_v57, %s8277_s23 }
0x6640   :  { %v5507_v41 = vpop.permute.xlu1 %5506 }
0x6641   :  { %7392 = vmatmul.mubr.msk.f32.vlgmr.msra.gmra.mrb[48].mxu0 %vm54_vm0, %v5507_v41 }
0x6642   :  { %7817 = vmatpush3.bf16.msra.mxu0 %v9235_v56  ;;  %7413 = vmatprep.mubr.msk.f32.mxu0 %vm8274_vm1, %v8275_v13 }
0x6643   :  { %7818 = vmatprep.subr.bf16.mxu0 %v8273_v4 }
0x6646   :  { %7820 = vmatpush3.bf16.msra.mxu0 %v9245_v59 }
0x6647   :  { %7827 = vmatprep.subr.bf16.mxu0 %v8273_v4 }
0x6714   :  { %v5576_v14 = vpop.f32.mrb[48].mxu0 }
0x6715   :  { %v5581_v9 = vrot.slane %v5576_v14, 6  ;;  %v7393_v11 = vpop.f32.mrb[49].mxu0 }
0x6717   :  { %v5583_v12 = vadd.f32 %v5581_v9, %v9262_v36 }
0x6719   :  { %8193 = vtanh.f32 %v5583_v12  ;;  %v6487_v20 = vmul.f32 -1.442695, %v5583_v12 }
0x671b   :  { %8195 = vpow2.f32 %v6487_v20 }
0x6723   :  { %v8194_v15 = vpop.eup %8193 }
0x6724   :  { %5596 = vrot.lane.b32.xlu0 %v8194_v15, %s8276_s22 }
0x6725   :  { %v8196_v16 = vpop.eup %8195 }
0x6726   :  { %v5587_v45 = vadd.f32 1.0, %v8196_v16 }
0x6728   :  { %8197 = vrcp.f32 %v5587_v45 }
0x6732   :  { %v8198_v2 = vpop.eup %8197 }
0x6733   :  { %v5594_v24 = vmul.f32 %v8198_v2, %v5592_v23 }
0x6796   :  { %v5597_v17 = vpop.permute.xlu0 %5596 }
0x6797   :  { %v5599_v18 = vmul.f32 %v8198_v2, %v5597_v17 }
0x6799   :  { %5601 = vrot.lane.b32.xlu1 %v5599_v18, %s8277_s23 }
0x680b   :  { %v5602_v25 = vpop.permute.xlu1 %5601 }
0x680c   :  { %v5604_v6 = vadd.f32 %v5602_v25, %v5594_v24 }
0x680e   :  { %8199 = vtanh.f32 %v5604_v6  ;;  %v5700_v42 = vrot.slane %v5604_v6, 2 }
0x6818   :  { %v8200_v38 = vpop.eup %8199 }
0x6819   :  { %5607 = vrot.lane.b32.xlu0 %v8200_v38, %s8276_s22 }
0x688b   :  { %v5608_v28 = vpop.permute.xlu0 %5607 }
0x688c   :  { %v9317_v29 = vmul.f32 %v8198_v2, %v5608_v28 }
0x688e   :  { %v5616_v30 = vrot.slane %v9317_v29, 2 }
0x6890   :  { %5617 = vrot.lane.b32.xlu1 %v5616_v30, %s8277_s23 }
0x6902   :  { %v5618_v31 = vpop.permute.xlu1 %5617 }
0x6903   :  { %7403 = vmatmul.mubr.msk.f32.vlgmr.msra.gmra.mrb[48].mxu1 %vm54_vm0, %v5618_v31 }
0x6904   :  { %7823 = vmatpush3.bf16.msra.mxu1 %v9235_v56  ;;  %7424 = vmatprep.mubr.msk.f32.mxu1 %vm8274_vm1, %v8275_v13 }
0x6905   :  { %7824 = vmatprep.subr.bf16.mxu1 %v8273_v4 }
0x6908   :  { %7826 = vmatpush3.bf16.msra.mxu1 %v9245_v59 }
0x6909   :  { %7833 = vmatprep.subr.bf16.mxu1 %v8273_v4 }
0x69d6   :  { %v5687_v32 = vpop.f32.mrb[48].mxu1 }
0x69d7   :  { %v5691_v33 = vadd.f32 %v5687_v32, %v9262_v36  ;;  %v7404_v62 = vpop.f32.mrb[49].mxu1 }
0x69d9   :  { %8201 = vtanh.f32 %v5691_v33  ;;  %v6489_v3 = vmul.f32 -1.442695, %v5691_v33 }
0x69db   :  { %8203 = vpow2.f32 %v6489_v3 }
0x69e3   :  { %v8202_v5 = vpop.eup %8201 }
0x69e4   :  { %5704 = vrot.lane.b32.xlu0 %v8202_v5, %s8276_s22 }
0x69e5   :  { %v8204_v37 = vpop.eup %8203 }
0x69e6   :  { %v5695_v35 = vadd.f32 1.0, %v8204_v37 }
0x69e8   :  { %8205 = vrcp.f32 %v5695_v35 }
0x69f2   :  { %v8206_v22 = vpop.eup %8205 }
0x69f3   :  { %v5702_v50 = vmul.f32 %v8206_v22, %v5700_v42 }
0x6a56   :  { %v5705_v40 = vpop.permute.xlu0 %5704 }
0x6a57   :  { %v5707_v55 = vmul.f32 %v8206_v22, %v5705_v40 }
0x6a59   :  { %5709 = vrot.lane.b32.xlu1 %v5707_v55, %s8277_s23 }
0x6acb   :  { %v5710_v43 = vpop.permute.xlu1 %5709 }
0x6acc   :  { %v5712_v21 = vadd.f32 %v5710_v43, %v5702_v50 }
0x6ace   :  { %8207 = vtanh.f32 %v5712_v21  ;;  %v5808_v14 = vrot.slane %v5712_v21, 2 }
0x6ad8   :  { %v8208_v36 = vpop.eup %8207 }
0x6ad9   :  { %5715 = vrot.lane.b32.xlu0 %v8208_v36, %s8276_s22 }
0x6b4b   :  { %v5716_v49 = vpop.permute.xlu0 %5715 }
0x6b4c   :  { %v5718_v19 = vmul.f32 %v8206_v22, %v5716_v49 }
0x6b4e   :  { %5720 = vrot.lane.b32.xlu1 %v5718_v19, %s8277_s23 }
0x6bc0   :  { %v5721_v53 = vpop.permute.xlu1 %5720 }
0x6bc1   :  { %5723 = vst.msk [vmem:[#allocation3 + $0x8] sm:$0x3] %vm238_vm2, %v5721_v53  ;;  %7414 = vmatmul.mubr.msk.f32.vlgmr.msra.gmra.mrb[50].mxu0 %vm54_vm0, %v5721_v53 }
0x6bc2   :  { %7829 = vmatpush3.bf16.msra.mxu0 %v9235_v56  ;;  %7435 = vmatprep.mubr.msk.f32.mxu0 %vm8274_vm1, %v8275_v13 }
0x6bc3   :  { %7830 = vmatprep.subr.bf16.mxu0 %v8273_v4 }
0x6bc6   :  { %7832 = vmatpush3.bf16.msra.mxu0 %v9245_v59 }
0x6bc7   :  { %7839 = vmatprep.subr.bf16.mxu0 %v8273_v4 }
0x6c94   :  { %v5792_v61 = vpop.f32.mrb[50].mxu0 }
0x6c95   :  { %v5797_v46 = vrot.slane %v5792_v61, 2  ;;  %v7415_v54 = vpop.f32.mrb[51].mxu0 }
0x6c96   :  { %v5248_v54 = vrot.slane %v9296_v39, 2 }
0x6c97   :  { %v5799_v44 = vadd.f32 %v5797_v46, %v9146_v48 }
0x6c99   :  { %8209 = vtanh.f32 %v5799_v44  ;;  %v6491_v7 = vmul.f32 -1.442695, %v5799_v44 }
0x6c9b   :  { %8211 = vpow2.f32 %v6491_v7 }
0x6ca3   :  { %v8210_v51 = vpop.eup %8209 }
0x6ca4   :  { %5812 = vrot.lane.b32.xlu0 %v8210_v51, %s8276_s22 }
0x6ca5   :  { %v8212_v63 = vpop.eup %8211 }
0x6ca6   :  { %v5803_v1 = vadd.f32 1.0, %v8212_v63  ;;  %v5250_v63 = vadd.f32 %v5248_v54, %v9143_v47 }
0x6ca8   :  { %8213 = vrcp.f32 %v5803_v1 }
0x6cb2   :  { %v8214_v0 = vpop.eup %8213 }
0x6cb3   :  { %v5810_v9 = vmul.f32 %v8214_v0, %v5808_v14 }
0x6d16   :  { %v5813_v57 = vpop.permute.xlu0 %5812 }
0x6d17   :  { %v5815_v41 = vmul.f32 %v8214_v0, %v5813_v57  ;;  %v6481_v57 = vmul.f32 -1.442695, %v5250_v63 }
0x6d19   :  { %5817 = vrot.lane.b32.xlu1 %v5815_v41, %s8277_s23 }
0x6d8b   :  { %v5818_v11 = vpop.permute.xlu1 %5817 }
0x6d8c   :  { %v5820_v12 = vadd.f32 %v5818_v11, %v5810_v9 }
0x6d8e   :  { %8215 = vtanh.f32 %v5820_v12 }
0x6d98   :  { %v8216_v15 = vpop.eup %8215 }
0x6d99   :  { %5823 = vrot.lane.b32.xlu0 %v8216_v15, %s8276_s22 }
0x6e0b   :  { %v5824_v20 = vpop.permute.xlu0 %5823 }
0x6e0c   :  { %v9345_v16 = vmul.f32 %v8214_v0, %v5824_v20 }
0x6e0e   :  { %v5832_v45 = vrot.slane %v9345_v16, 6 }
0x6e10   :  { %5833 = vrot.lane.b32.xlu1 %v5832_v45, %s8277_s23  ;;  %v5259_v45 = vrot.slane %v9269_v52, 6  ;;  %v6170_v52 = vld [vmem:[%s9477_s5 + $0x30] sm:$0xff] }
0x6e82   :  { %v5834_v2 = vpop.permute.xlu1 %5833 }
0x6e83   :  { %7425 = vmatmul.mubr.msk.f32.vlgmr.msra.gmra.mrb[50].mxu1 %vm54_vm0, %v5834_v2 }
0x6e84   :  { %7835 = vmatpush3.bf16.msra.mxu1 %v9235_v56  ;;  %7446 = vmatprep.mubr.msk.f32.mxu1 %vm8274_vm1, %v8275_v13 }
0x6e85   :  { %7836 = vmatprep.subr.bf16.mxu1 %v8273_v4 }
0x6e88   :  { %7838 = vmatpush3.bf16.msra.mxu1 %v9245_v59  ;;  %v5919_v59 = vrot.slane %v5820_v12, 2 }
0x6e89   :  { %7845 = vmatprep.subr.bf16.mxu1 %v8273_v4 }
0x6f56   :  { %v5903_v17 = vpop.f32.mrb[50].mxu1 }
0x6f57   :  { %v5908_v18 = vrot.slane %v5903_v17, 4  ;;  %v7426_v23 = vpop.f32.mrb[51].mxu1 }
0x6f58   :  { %v6168_v23 = vld [vmem:[%s9477_s5 + $0x20] sm:$0xff] }
0x6f59   :  { %v5910_v24 = vadd.f32 %v5908_v18, %v9146_v48 }
0x6f5b   :  { %8217 = vtanh.f32 %v5910_v24  ;;  %v6493_v6 = vmul.f32 -1.442695, %v5910_v24  ;;  %v6169_v24 = vld [vmem:[%s9477_s5 + $0x28] sm:$0xff] }
0x6f5d   :  { %8219 = vpow2.f32 %v6493_v6 }
0x6f65   :  { %v8218_v25 = vpop.eup %8217 }
0x6f66   :  { %5923 = vrot.lane.b32.xlu0 %v8218_v25, %s8276_s22  ;;  %v7840_v25 = vpack.c.bf16 %v6169_v24, %v6168_v23 }
0x6f67   :  { %v8220_v56 = vpop.eup %8219 }
0x6f68   :  { %v5914_v38 = vadd.f32 1.0, %v8220_v56 }
0x6f6a   :  { %8221 = vrcp.f32 %v5914_v38  ;;  %v6164_v38 = vld [vmem:[%s9477_s5] sm:$0xff] }
0x6f74   :  { %v8222_v28 = vpop.eup %8221 }
0x6f75   :  { %v5921_v32 = vmul.f32 %v8222_v28, %v5919_v59  ;;  %v6167_v59 = vld [vmem:[%s9477_s5 + $0x18] sm:$0xff] }
0x6fd8   :  { %v5924_v30 = vpop.permute.xlu0 %5923 }
0x6fd9   :  { %v5926_v31 = vmul.f32 %v8222_v28, %v5924_v30 }
0x6fdb   :  { %5928 = vrot.lane.b32.xlu1 %v5926_v31, %s8277_s23  ;;  %v6166_v31 = vld [vmem:[%s9477_s5 + $0x10] sm:$0xff] }
0x704d   :  { %v5929_v33 = vpop.permute.xlu1 %5928 }
0x704e   :  { %v5931_v62 = vadd.f32 %v5929_v33, %v5921_v32  ;;  %v7849_v32 = vpack.c.bf16 %v6167_v59, %v6166_v31 }
0x7050   :  { %8223 = vtanh.f32 %v5931_v62  ;;  %v6030_v46 = vrot.slane %v5931_v62, 2 }
0x705a   :  { %v8224_v5 = vpop.eup %8223 }
0x705b   :  { %5934 = vrot.lane.b32.xlu0 %v8224_v5, %s8276_s22 }
0x70cd   :  { %v5935_v3 = vpop.permute.xlu0 %5934 }
0x70ce   :  { %v9360_v37 = vmul.f32 %v8222_v28, %v5935_v3  ;;  %v6165_v28 = vld [vmem:[%s9477_s5 + $0x8] sm:$0xff] }
0x70cf   :  { %v7846_v30 = vpack.c.bf16 %v6165_v28, %v6164_v38 }
0x70d0   :  { %v5943_v35 = vrot.slane %v9360_v37, 4 }
0x70d2   :  { %5944 = vrot.lane.b32.xlu1 %v5943_v35, %s8277_s23 }
0x7144   :  { %v5945_v22 = vpop.permute.xlu1 %5944 }
0x7145   :  { %7436 = vmatmul.mubr.msk.f32.vlgmr.msra.gmra.mrb[52].mxu0 %vm54_vm0, %v5945_v22 }
0x7146   :  { %7457 = vmatprep.mubr.msk.f32.mxu0 %vm8274_vm1, %v8275_v13  ;;  %7841 = vmatpush3.bf16.msra.mxu0 %v7840_v25 }
0x7147   :  { %7842 = vmatprep.subr.bf16.mxu0 %v8273_v4 }
0x7218   :  { %v6014_v40 = vpop.f32.mrb[52].mxu0 }
0x7219   :  { %v6019_v55 = vrot.slane %v6014_v40, 6  ;;  %v7437_v42 = vpop.f32.mrb[53].mxu0 }
0x721b   :  { %v6021_v50 = vadd.f32 %v6019_v55, %v9146_v48 }
0x721d   :  { %8225 = vtanh.f32 %v6021_v50  ;;  %v6495_v21 = vmul.f32 -1.442695, %v6021_v50 }
0x721f   :  { %8227 = vpow2.f32 %v6495_v21 }
0x7227   :  { %v8226_v43 = vpop.eup %8225 }
0x7228   :  { %6034 = vrot.lane.b32.xlu0 %v8226_v43, %s8276_s22 }
0x7229   :  { %v8228_v36 = vpop.eup %8227 }
0x722a   :  { %v6025_v49 = vadd.f32 1.0, %v8228_v36 }
0x722c   :  { %8229 = vrcp.f32 %v6025_v49 }
0x7236   :  { %v8230_v19 = vpop.eup %8229 }
0x7237   :  { %v6032_v44 = vmul.f32 %v8230_v19, %v6030_v46 }
0x729a   :  { %v6035_v53 = vpop.permute.xlu0 %6034 }
0x729b   :  { %v6037_v61 = vmul.f32 %v8230_v19, %v6035_v53 }
0x729d   :  { %6039 = vrot.lane.b32.xlu1 %v6037_v61, %s8277_s23 }
0x730f   :  { %v6040_v51 = vpop.permute.xlu1 %6039 }
0x7310   :  { %v9371_v7 = vadd.f32 %v6040_v51, %v6032_v44 }
0x7312   :  { %8231 = vtanh.f32 %v9371_v7  ;;  %v6138_v53 = vrot.slane %v9371_v7, 2 }
0x7313   :  { %8233 = vtanh.f32 %v5250_v63 }
0x7314   :  { %8235 = vpow2.f32 %v6481_v57 }
0x731c   :  { %v8232_v1 = vpop.eup %8231 }
0x731d   :  { %6045 = vrot.lane.b32.xlu0 %v8232_v1, %s8276_s22  ;;  %v8234_v0 = vpop.eup %8233 }
0x731e   :  { %v8236_v41 = vpop.eup %8235 }
0x731f   :  { %v5254_v14 = vadd.f32 1.0, %v8236_v41 }
0x7321   :  { %5263 = vrot.lane.b32.xlu0 %v8234_v0, %s8276_s22  ;;  %8237 = vrcp.f32 %v5254_v14 }
0x732b   :  { %v8238_v12 = vpop.eup %8237 }
0x732c   :  { %v5261_v2 = vmul.f32 %v8238_v12, %v5259_v45 }
0x738f   :  { %v6046_v39 = vpop.permute.xlu0 %6045 }
0x7390   :  { %v9377_v9 = vmul.f32 %v8230_v19, %v6046_v39 }
0x7392   :  { %v6054_v11 = vrot.slane %v9377_v9, 2 }
0x7393   :  { %v5264_v47 = vpop.permute.xlu0 %5263 }
0x7394   :  { %6055 = vrot.lane.b32.xlu1 %v6054_v11, %s8277_s23  ;;  %v5266_v15 = vmul.f32 %v8238_v12, %v5264_v47 }
0x7398   :  { %5268 = vrot.lane.b32.xlu1 %v5266_v15, %s8277_s23 }
0x7406   :  { %v6056_v20 = vpop.permute.xlu1 %6055 }
0x7407   :  { %7447 = vmatmul.mubr.msk.f32.vlgmr.msra.gmra.mrb[52].mxu1 %vm54_vm0, %v6056_v20 }
0x7408   :  { %7468 = vmatprep.mubr.msk.f32.mxu1 %vm8274_vm1, %v8275_v13  ;;  %v6171_v13 = vld [vmem:[%s9477_s5 + $0x38] sm:$0xff]  ;;  %7847 = vmatpush3.bf16.msra.mxu1 %v7846_v30 }
0x7409   :  { %v7843_v6 = vpack.c.bf16 %v6171_v13, %v6170_v52  ;;  %7848 = vmatprep.subr.bf16.mxu1 %v8273_v4 }
0x740a   :  { %v5269_v17 = vpop.permute.xlu1 %5268 }
0x740b   :  { %v5271_v18 = vadd.f32 %v5269_v17, %v5261_v2  ;;  %7844 = vmatpush3.bf16.msra.mxu0 %v7843_v6 }
0x740c   :  { %7850 = vmatpush3.bf16.msra.mxu1 %v7849_v32 }
0x740d   :  { %8239 = vtanh.f32 %v5271_v18 }
0x7417   :  { %v8240_v56 = vpop.eup %8239 }
0x7418   :  { %5274 = vrot.lane.b32.xlu0 %v8240_v56, %s8276_s22 }
0x741c   :  { %5390 = vrot.lane.b32.xlu0 %v9278_v34, %s8277_s23 }
0x748a   :  { %v5275_v34 = vpop.permute.xlu0 %5274 }
0x748b   :  { %v5277_v33 = vmul.f32 %v8238_v12, %v5275_v34 }
0x748d   :  { %5279 = vrot.lane.b32.xlu1 %v5277_v33, %s8277_s23 }
0x748e   :  { %v5391_v62 = vpop.permute.xlu0 %5390 }
0x748f   :  { %5393 = vst.msk [vmem:[#allocation3 + $0x8] sm:$0xc0] %vm571_vm4, %v5391_v62 }
0x7496   :  { %v6163_v5 = vld [vmem:[#allocation3 + $0xe] sm:$0x3] }
0x7497   :  { %7458 = vmatmul.mubr.msk.f32.vlgmr.msra.gmra.mrb[54].mxu0 %vm54_vm0, %v6163_v5 }
0x74da   :  { %v6125_v3 = vpop.f32.mrb[52].mxu1 }
0x74db   :  { %v6129_v35 = vadd.f32 %v6125_v3, %v9146_v48  ;;  %v7448_v22 = vpop.f32.mrb[53].mxu1 }
0x74dd   :  { %8241 = vtanh.f32 %v6129_v35  ;;  %v6497_v42 = vmul.f32 -1.442695, %v6129_v35 }
0x74df   :  { %8243 = vpow2.f32 %v6497_v42 }
0x74e7   :  { %v8242_v40 = vpop.eup %8241 }
0x74e8   :  { %6142 = vrot.lane.b32.xlu1 %v8242_v40, %s8276_s22 }
0x74e9   :  { %v8244_v50 = vpop.eup %8243 }
0x74ea   :  { %v6133_v43 = vadd.f32 1.0, %v8244_v50 }
0x74ec   :  { %8245 = vrcp.f32 %v6133_v43 }
0x74f6   :  { %v8246_v21 = vpop.eup %8245 }
0x74f7   :  { %v6140_v61 = vmul.f32 %v8246_v21, %v6138_v53 }
0x74ff   :  { %v5280_v4 = vpop.permute.xlu1 %5279 }
0x7500   :  { %5282 = vst.msk [vmem:[#allocation2 + $0x8] sm:$0xc0] %vm571_vm4, %v5280_v4 }
0x7507   :  { %v6162_v55 = vld [vmem:[#allocation2 + $0xe] sm:$0x3] }
0x7508   :  { %7469 = vmatmul.mubr.msk.f32.vlgmr.msra.gmra.mrb[54].mxu1 %vm54_vm0, %v6162_v55 }
0x755a   :  { %v6143_v36 = vpop.permute.xlu1 %6142 }
0x755b   :  { %v6145_v49 = vmul.f32 %v8246_v21, %v6143_v36 }
0x755d   :  { %6147 = vrot.lane.b32.xlu0 %v6145_v49, %s8277_s23 }
0x7561   :  { %4619 = vrot.lane.b32.xlu0 %v9167_v60, %s8277_s23 }
0x7565   :  { %4841 = vrot.lane.b32.xlu0 %v9197_v26, %s8277_s23 }
0x7569   :  { %5168 = vrot.lane.b32.xlu0 %v9274_v10, %s8277_s23 }
0x756a   :  { %v6241_v48 = vpop.f32.mrb[54].mxu0 }
0x756b   :  { %v7459_v19 = vpop.f32.mrb[55].mxu0 }
0x756d   :  { %5612 = vrot.lane.b32.xlu0 %v9317_v29, %s8277_s23  ;;  %v6500_v29 = vld [vmem:[%s9478_s6] ss:$0 sm:$0xff]  ;;  %s8278_s6 = smov [#allocation4]  }
0x7571   :  { %5939 = vrot.lane.b32.xlu0 %v9360_v37, %s8277_s23 }
0x75cf   :  { %v6148_v46 = vpop.permute.xlu0 %6147 }
0x75d0   :  { %v6150_v54 = vadd.f32 %v6148_v46, %v6140_v61 }
0x75d2   :  { %8247 = vtanh.f32 %v6150_v54 }
0x75d3   :  { %v4620_v60 = vpop.permute.xlu0 %4619 }
0x75d4   :  { %4622 = vst.msk [vmem:[#allocation2] sm:$0xc] %vm347_vm5, %v4620_v60 }
0x75d7   :  { %v4842_v26 = vpop.permute.xlu0 %4841 }
0x75d8   :  { %4844 = vst.msk [vmem:[#allocation2] sm:$0xc0] %vm571_vm4, %v4842_v26 }
0x75db   :  { %v5169_v10 = vpop.permute.xlu0 %5168  ;;  %v6314_v44 = vpop.f32.mrb[54].mxu1 }
0x75dc   :  { %v8248_v51 = vpop.eup %8247  ;;  %5171 = vst.msk [vmem:[#allocation2 + $0x8] sm:$0x30] %vm459_vm3, %v5169_v10  ;;  %v6315_v37 = vadd.f32 %v6314_v44, %v6241_v48  ;;  %v7470_v7 = vpop.f32.mrb[55].mxu1 }
0x75dd   :  { %6153 = vrot.lane.b32.xlu1 %v8248_v51, %s8276_s22  ;;  %s6334_s22 = sshll.u32 %s8278_s6, 4  ;;  %s6335_s22 = int_to_ptr.vmem [resolvable:$true] %s6334_s22 }
0x75de   :  { %v6325_v63 = vadd.f32 %v6500_v29, %v6315_v37  ;;  %s8249_s20 = scalar_lea.vmem %s6335_s22, 32  ;;  %p8254_p1 = scmp.lt.s32.totalorder %s6335_s22, %s6335_s22 }
0x75df   :  { %v5613_v1 = vpop.permute.xlu0 %5612  ;;  %p8250_p0 = scmp.ne.s32.totalorder %s6335_s22, %s8249_s20  ;;  %p8255_p2 = scmp.lt.s32.totalorder %s8249_s20, %s8249_s20 }
0x75e0   :  { %5615 = vst.msk [vmem:[#allocation3 + $0x8] sm:$0xc] %vm347_vm5, %v5613_v1 }
0x75e1   :  { %6327 = vst.msk [vmem:[#allocation4] sm:$0x3] %vm6326_vm6, %v6325_v63  ;;  %4730 = vrot.lane.b32.xlu1 %v9182_v27, %s8277_s23  ;;  %p8256_p3 = por %p8255_p2, %p8254_p1 }
0x75e3   :  { %v5940_v0 = vpop.permute.xlu0 %5939  ;;  %p8257_p4 = pnand %p8256_p3, %p8250_p0 }
0x75e4   :  { %5942 = vst.msk [vmem:[#allocation3] sm:$0x30] %vm459_vm3, %v5940_v0 }
0x75e5   :  { %5057 = vrot.lane.b32.xlu1 %v9225_v58, %s8277_s23 }
0x75e9   :  { %5501 = vrot.lane.b32.xlu1 %v9302_v8, %s8277_s23 }
0x75ed   :  { %5828 = vrot.lane.b32.xlu1 %v9345_v16, %s8277_s23 }
0x75f1   :  { %6050 = vrot.lane.b32.xlu1 %v9377_v9, %s8277_s23 }
0x75f2   :  { %8260 = shalt.err (!%p8257_p4)
}
0x75f3   :  { %s8261_s21 = scalar_lea.hbm %s9479_s7, 32 }
0x75f4   :  { %p8262_p5 = scmp.ne.s32.totalorder %s9479_s7, %s8261_s21  ;;  %p8265_p6 = scmp.lt.u32.totalorder %s8261_s21, %s9479_s7 }
0x75f6   :  { %p8267_p7 = pnand %p8265_p6, %p8262_p5 }
0x75f8   :  { %8270 = shalt.err (!%p8267_p7)
}
0x75f9   :  { %6337 = dma.vmem_to_hbm [thread:$0]  %s6335_s22, 32, %s9479_s7, [#allocation5]  }
0x764f   :  { %v6154_v27 = vpop.permute.xlu1 %6153 }
0x7650   :  { %v6156_v58 = vmul.f32 %v8246_v21, %v6154_v27 }
0x7652   :  { %6158 = vrot.lane.b32.xlu0 %v6156_v58, %s8277_s23 }
0x7653   :  { %v4731_v8 = vpop.permute.xlu1 %4730 }
0x7654   :  { %4733 = vst.msk [vmem:[#allocation2] sm:$0x30] %vm459_vm3, %v4731_v8 }
0x7657   :  { %v5058_v16 = vpop.permute.xlu1 %5057 }
0x7658   :  { %5060 = vst.msk [vmem:[#allocation2 + $0x8] sm:$0xc] %vm347_vm5, %v5058_v16 }
0x765b   :  { %v5502_v57 = vpop.permute.xlu1 %5501 }
0x765c   :  { %5504 = vst.msk [vmem:[#allocation3 + $0x8] sm:$0x30] %vm459_vm3, %v5502_v57 }
0x765f   :  { %v5829_v41 = vpop.permute.xlu1 %5828 }
0x7660   :  { %5831 = vst.msk [vmem:[#allocation3] sm:$0xc0] %vm571_vm4, %v5829_v41 }
0x7663   :  { %v6051_v14 = vpop.permute.xlu1 %6050 }
0x7664   :  { %6053 = vst.msk [vmem:[#allocation3] sm:$0xc] %vm347_vm5, %v6051_v14 }
0x76c4   :  { %v6159_v39 = vpop.permute.xlu0 %6158 }
0x76c5   :  { %6161 = vst.msk [vmem:[#allocation3] sm:$0x3] %vm238_vm2, %v6159_v39 }
0x76c6   :  { %8271 = dma.done.wait [#allocation5], 32  }
0x76c7   :  { %8272 = vsyncadd [#allocation5], 4294967264 }
0x76c8   :  { %6341 = vsyncpa [#allocation5], 1 }

</bundles_post_ra>
